<compile_context>
chip_gen: v7x
topology: tpu7x:2x2x1
jax: 0.10.0
libtpu: 0.0.40
codegen_flags: <defaults>
</compile_context>

<pallas_src>
import jax
import jax.numpy as jnp
from jax import lax
from jax.experimental import pallas as pl
from jax.experimental.pallas import tpu as pltpu


def _round_up(x, m):
    return ((x + m - 1) // m) * m


# ---------------------------------------------------------------------------
# Fused Semi3D kernel.
#   grid = (batch tiles, K tiles over flattened image pixels)   ("parallel", "arbitrary")
# ---------------------------------------------------------------------------
def _make_semi3d_kernel(V):
    n_weights = 22  # img_w1 (tiled) + 21 constant weight blocks

    def kernel(*refs):
        pt_ref, mesh_ref = refs[0], refs[1]
        view_refs = refs[2:2 + V]
        (img_w1_ref, img_b1_ref, img_w2_ref, img_b2_ref,
         pt_w1_ref, pt_b1_ref, pt_w2_ref, pt_b2_ref,
         mesh_w1_ref, mesh_b1_ref, mesh_w2_ref, mesh_b2_ref,
         fus_w1_ref, fus_b1_ref, fus_w2_ref, fus_b2_ref,
         hf_w_ref, hf_b_ref, hg_w_ref, hg_b_ref,
         hp_w_ref, hp_b_ref) = refs[2 + V:2 + V + n_weights]
        (pt_o_ref, mesh_o_ref, img_o_ref, fused_o_ref,
         preds_o_ref, feats_o_ref, gfeats_o_ref) = refs[2 + V + n_weights:
                                                        2 + V + n_weights + 7]
        img_acc_ref = refs[2 + V + n_weights + 7]

        k = pl.program_id(1)
        nk = pl.num_programs(1)
        f32 = jnp.float32

        # ---- image branch, layer 1: K-tiled accumulation over flattened pixels ----
        @pl.when(k == 0)
        def _init_acc():
            img_acc_ref[...] = jnp.zeros_like(img_acc_ref)

        w1_k = img_w1_ref[...]                                        # (tk, H)
        for v in range(V):
            img_acc_ref[v] = img_acc_ref[v] + jnp.dot(
                view_refs[v][...], w1_k, preferred_element_type=f32)  # (Bt, H)

        # ---- everything else only on the last K tile (accumulator finalize) ----
        @pl.when(k == nk - 1)
        def _finalize():
            # image branch: layer 2 + max over views (elementwise running max)
            img_b1 = img_b1_ref[...]
            img_w2 = img_w2_ref[...]
            img_b2 = img_b2_ref[...]
            img_b = None
            for v in range(V):
                hv = jnp.maximum(img_acc_ref[v] + img_b1, 0.0)
                fv = jnp.maximum(
                    jnp.dot(hv, img_w2, preferred_element_type=f32) + img_b2, 0.0)
                img_b = fv if img_b is None else jnp.maximum(img_b, fv)
            img_o_ref[...] = img_b

            # point-cloud / mesh branches: channels-first (lane-dense along N / F) blocks.
            # Layer 1 is a per-sample transposed dot (tiny K = 3 / 18); layer 2 is one
            # batched GEMM with M = Bt * elements (better MXU row fill); the element
            # max-pool writes one lane-dense (1, D) row per sample into the output block.
            def small_branch(x_ref, w1, b1, w2, b2, o_ref):
                bt = x_ref.shape[0]
                nel = x_ref.shape[2]
                hs = [lax.dot_general(x_ref[i], w1, (((0,), (0,)), ((), ())),
                                      preferred_element_type=f32)
                      for i in range(bt)]                             # each (nel, H)
                h = hs[0] if bt == 1 else jnp.concatenate(hs, axis=0)  # (bt*nel, H)
                h = jnp.maximum(h + b1, 0.0)
                f = jnp.maximum(jnp.dot(h, w2, preferred_element_type=f32) + b2, 0.0)
                for i in range(bt):                                   # max-pool over elems
                    o_ref[pl.ds(i, 1)] = jnp.max(f[i * nel:(i + 1) * nel],
                                                 axis=0, keepdims=True)
                return o_ref[...]                                     # (bt, D)

            pt_b = small_branch(pt_ref, pt_w1_ref[...], pt_b1_ref[...],
                                pt_w2_ref[...], pt_b2_ref[...], pt_o_ref)
            mesh_b = small_branch(mesh_ref, mesh_w1_ref[...], mesh_b1_ref[...],
                                  mesh_w2_ref[...], mesh_b2_ref[...], mesh_o_ref)

            # fusion_net: concat(pt, mesh, img) @ W1 as three partial GEMMs (no concat)
            fh = (jnp.dot(pt_b, fus_w1_ref[0], preferred_element_type=f32)
                  + jnp.dot(mesh_b, fus_w1_ref[1], preferred_element_type=f32)
                  + jnp.dot(img_b, fus_w1_ref[2], preferred_element_type=f32)
                  + fus_b1_ref[...])
            fh = jnp.maximum(fh, 0.0)
            fused_o_ref[...] = (jnp.dot(fh, fus_w2_ref[...], preferred_element_type=f32)
                                + fus_b2_ref[...])                    # lane-padded to 128

            # fusion_head: per modality (img, pt, mesh); all outputs lane-padded to 128
            for m, base in enumerate((img_b, pt_b, mesh_b)):
                feat = jnp.maximum(
                    jnp.dot(base, hf_w_ref[m], preferred_element_type=f32) + hf_b_ref[m],
                    0.0)
                gfeat = jnp.maximum(
                    jnp.dot(feat, hg_w_ref[m], preferred_element_type=f32) + hg_b_ref[m],
                    0.0)
                pred = (jnp.dot(gfeat, hp_w_ref[m], preferred_element_type=f32)
                        + hp_b_ref[m])
                feats_o_ref[m] = feat
                gfeats_o_ref[m] = gfeat
                preds_o_ref[m] = pred

    return kernel


# ---------------------------------------------------------------------------
# Wrapper: glue (gather / flatten / weight stacking+padding) + the pallas_call
# ---------------------------------------------------------------------------
def semi3d_pallas(p, pt, centers, corners, normals, neighbor_index, views,
                  *, img_k_tile=8192):
    f32 = jnp.float32
    B = pt.shape[0]
    N = pt.shape[2]
    F = centers.shape[2]
    V = len(views)

    # channels-first modality features (lane-dense along N / F)
    pt_cf = pt.astype(f32)                                     # (B, 3, N)
    c = centers.astype(f32)
    kc = corners.astype(f32)
    nz = normals.astype(f32)
    # MeshNet-style neighbor aggregation: data-dependent gather stays in XLA glue.
    nbr = jax.vmap(lambda cf, idx: cf[:, idx].mean(axis=-1))(c, neighbor_index)  # (B,3,F)
    mesh_cf = jnp.concatenate([c, kc, nz, nbr], axis=1)        # (B, 18, F)
    # 12 views as 12 separate flattened inputs (reshape only, no (B,V,P) stack copy).
    views2d = [v.reshape(B, -1).astype(f32) for v in views]    # V x (B, P)
    P = views2d[0].shape[1]

    Dd = p["pt_w2"].shape[1]            # feature dim (128)
    Hd = p["pt_w1"].shape[1]            # hidden dim (== Dd here)
    C = p["fus_w2"].shape[1]            # num classes
    G = p["img_hg_w"].shape[1]          # gfeat dim
    Cp = _round_up(max(C, 1), 128)      # lane-padded widths
    Gp = _round_up(max(G, 1), 128)

    # batch tile (keeps the (8,128) block constraint legal)
    if B <= 8:
        Bt = B
    elif B % 8 == 0:
        Bt = 8
    else:
        Bt = B
    nb = B // Bt

    # K tiling of the flattened image pixels (v7x: img_w1 must not be one VMEM block)
    if P <= img_k_tile:
        tk, Pp = P, P
    else:
        tk = _round_up(img_k_tile, 128)
        Pp = _round_up(P, tk)
    nk = Pp // tk
    if Pp != P:
        views2d = [jnp.pad(v, ((0, 0), (0, Pp - P))) for v in views2d]
        img_w1 = jnp.pad(p["img_w1"], ((0, Pp - P), (0, 0)))
    else:
        img_w1 = p["img_w1"]

    # weight stacking / lane padding (done once, outside the kernel)
    def pad_to(a, shape):
        return jnp.pad(a, [(0, t - s) for s, t in zip(a.shape, shape)])

    order = ("img", "pt", "mesh")
    fus_w1 = p["fus_w1"].reshape(3, Dd, Hd)                    # row blocks: (pt, mesh, img)
    fus_w2p = pad_to(p["fus_w2"], (Hd, Cp))
    fus_b2p = pad_to(p["fus_b2"], (1, Cp))
    hf_w = jnp.stack([p[f"{m}_hf_w"] for m in order])          # (3, D, D)
    hf_b = jnp.stack([p[f"{m}_hf_b"] for m in order])          # (3, 1, D)
    hg_wp = jnp.stack([pad_to(p[f"{m}_hg_w"], (Dd, Gp)) for m in order])
    hg_bp = jnp.stack([pad_to(p[f"{m}_hg_b"], (1, Gp)) for m in order])
    hp_wp = jnp.stack([pad_to(p[f"{m}_hp_w"], (Gp, Cp)) for m in order])
    hp_bp = jnp.stack([pad_to(p[f"{m}_hp_b"], (1, Cp)) for m in order])

    const_weights = [p["img_b1"], p["img_w2"], p["img_b2"],
                     p["pt_w1"], p["pt_b1"], p["pt_w2"], p["pt_b2"],
                     p["mesh_w1"], p["mesh_b1"], p["mesh_w2"], p["mesh_b2"],
                     fus_w1, p["fus_b1"], fus_w2p, fus_b2p,
                     hf_w, hf_b, hg_wp, hg_bp, hp_wp, hp_bp]

    # TODO(synk): single-buffer these constant blocks (pipeline_mode=pl.Buffered(1));
    # after K-tiling img_w1 they total only ~1.5 MB so double-buffering is harmless here.
    def cspec(arr):
        nd = arr.ndim
        return pl.BlockSpec(arr.shape, lambda b, k, _nd=nd: (0,) * _nd)

    in_specs = (
        [pl.BlockSpec((Bt, 3, N), lambda b, k: (b, 0, 0)),
         pl.BlockSpec((Bt, 18, F), lambda b, k: (b, 0, 0))]
        + [pl.BlockSpec((Bt, tk), lambda b, k: (b, k)) for _ in range(V)]
        + [pl.BlockSpec((tk, Hd), lambda b, k: (k, 0))]
        + [cspec(w) for w in const_weights]
    )
    out_specs = (
        pl.BlockSpec((Bt, Dd), lambda b, k: (b, 0)),
        pl.BlockSpec((Bt, Dd), lambda b, k: (b, 0)),
        pl.BlockSpec((Bt, Dd), lambda b, k: (b, 0)),
        pl.BlockSpec((Bt, Cp), lambda b, k: (b, 0)),
        pl.BlockSpec((3, Bt, Cp), lambda b, k: (0, b, 0)),
        pl.BlockSpec((3, Bt, Dd), lambda b, k: (0, b, 0)),
        pl.BlockSpec((3, Bt, Gp), lambda b, k: (0, b, 0)),
    )
    out_shape = (
        jax.ShapeDtypeStruct((B, Dd), f32),      # pt_base
        jax.ShapeDtypeStruct((B, Dd), f32),      # mesh_base
        jax.ShapeDtypeStruct((B, Dd), f32),      # img_base
        jax.ShapeDtypeStruct((B, Cp), f32),      # fused_pred (lane padded)
        jax.ShapeDtypeStruct((3, B, Cp), f32),   # preds (img, pt, mesh), lane padded
        jax.ShapeDtypeStruct((3, B, Dd), f32),   # feats (img, pt, mesh)
        jax.ShapeDtypeStruct((3, B, Gp), f32),   # gfeats (img, pt, mesh), lane padded
    )

    # explicit scoped-VMEM budget sized from the chosen tiles (+ headroom)
    const_elems = sum(int(w.size) for w in const_weights)
    tiled_in_elems = Bt * 3 * N + Bt * 18 * F + V * Bt * tk + tk * Hd
    out_block_elems = Bt * (3 * Dd + Cp) + 3 * Bt * (Cp + Dd + Gp)
    scratch_elems = V * max(Bt, 8) * Hd
    demand_bytes = 4 * (2 * tiled_in_elems + 2 * const_elems
                        + 2 * out_block_elems + scratch_elems)
    vmem_limit = int(min(100 * 2**20, max(32 * 2**20, 2 * demand_bytes + 8 * 2**20)))

    flops = 2 * B * (V * Pp * Hd + V * Hd * Dd
                     + 3 * N * Hd + N * Hd * Dd
                     + 18 * F * Hd + F * Hd * Dd
                     + 3 * Dd * Hd + Hd * Cp
                     + 3 * (Dd * Dd + Dd * Gp + Gp * Cp))
    bytes_accessed = 4 * (B * 3 * N + B * 18 * F + V * B * Pp
                          + nb * Pp * Hd + const_elems
                          + B * (3 * Dd + Cp) + 3 * B * (Cp + Dd + Gp))

    outs = pl.pallas_call(
        _make_semi3d_kernel(V),
        out_shape=out_shape,
        grid=(nb, nk),
        in_specs=in_specs,
        out_specs=out_specs,
        scratch_shapes=[pltpu.VMEM((V, Bt, Hd), f32)],
        compiler_params=pltpu.CompilerParams(
            dimension_semantics=("parallel", "arbitrary"),
            vmem_limit_bytes=vmem_limit),
        cost_estimate=pl.CostEstimate(flops=int(flops), transcendentals=0,
                                      bytes_accessed=int(bytes_accessed)),
    )(pt_cf, mesh_cf, *views2d, img_w1, *const_weights)

    pt_base, mesh_base, img_base, fused_pad, preds_pad, feats, gfeats_pad = outs
    fused_pred = fused_pad[:, :C]
    img_pred, pt_pred, mesh_pred = (preds_pad[0, :, :C], preds_pad[1, :, :C],
                                    preds_pad[2, :, :C])
    img_feat, pt_feat, mesh_feat = feats[0], feats[1], feats[2]
    img_gfeat, pt_gfeat, mesh_gfeat = (gfeats_pad[0, :, :G], gfeats_pad[1, :, :G],
                                       gfeats_pad[2, :, :G])
    return (fused_pred, img_pred, pt_pred, mesh_pred,
            img_feat, pt_feat, mesh_feat,
            img_gfeat, pt_gfeat, mesh_gfeat,
            pt_base, mesh_base, img_base)


# ---------------------------------------------------------------------------
# Parameter init (deterministic, synthetic backbones matching the forward structure)
# ---------------------------------------------------------------------------
def _init_linear(key, cin, cout):
    kw, kb = jax.random.split(key)
    scale = 1.0 / jnp.sqrt(jnp.float32(cin))
    w = jax.random.normal(kw, (cin, cout), jnp.float32) * scale
    b = jax.random.normal(kb, (1, cout), jnp.float32) * 0.01
    return w, b


def init_params(key, *, img_pix, feat_dim=128, gfeat_dim=64, num_classes=16):
    keys = jax.random.split(key, 17)
    p = {}
    # cloud_net: 3 -> 128 -> 128, max-pool over points
    p["pt_w1"], p["pt_b1"] = _init_linear(keys[0], 3, feat_dim)
    p["pt_w2"], p["pt_b2"] = _init_linear(keys[1], feat_dim, feat_dim)
    # meshnet: 18 -> 128 -> 128, max-pool over faces (18 = centers+corners+normals+nbr-agg)
    p["mesh_w1"], p["mesh_b1"] = _init_linear(keys[2], 18, feat_dim)
    p["mesh_w2"], p["mesh_b2"] = _init_linear(keys[3], feat_dim, feat_dim)
    # img_net: per-view C*H*W -> 128 -> 128, max-pool over the 12 views
    p["img_w1"], p["img_b1"] = _init_linear(keys[4], img_pix, feat_dim)
    p["img_w2"], p["img_b2"] = _init_linear(keys[5], feat_dim, feat_dim)
    # fusion_net: concat(pt, mesh, img) = 3*128 -> 128 -> num_classes
    p["fus_w1"], p["fus_b1"] = _init_linear(keys[6], 3 * feat_dim, feat_dim)
    p["fus_w2"], p["fus_b2"] = _init_linear(keys[7], feat_dim, num_classes)
    # fusion_head: per modality feat -> gfeat -> pred
    for i, m in enumerate(("img", "pt", "mesh")):
        p[f"{m}_hf_w"], p[f"{m}_hf_b"] = _init_linear(keys[8 + i], feat_dim, feat_dim)
        p[f"{m}_hg_w"], p[f"{m}_hg_b"] = _init_linear(keys[11 + i], feat_dim, gfeat_dim)
        p[f"{m}_hp_w"], p[f"{m}_hp_b"] = _init_linear(keys[14 + i], gfeat_dim, num_classes)
    return p


# ---------------------------------------------------------------------------
# Semi3D forward (mirrors the PyTorch module's forward signature / return order)
# ---------------------------------------------------------------------------
def semi3d_forward(p, pt, img, imgV, img1V3, img1V4, img1V5, img1V6, img1V7,
                   img1V8, img1V9, img1V10, img1V11, img1V12,
                   centers, corners, normals, neighbor_index, *, img_k_tile=8192):
    views = (img, imgV, img1V3, img1V4, img1V5, img1V6, img1V7,
             img1V8, img1V9, img1V10, img1V11, img1V12)
    (fused_pred, img_pred, pt_pred, mesh_pred,
     img_feat, pt_feat, mesh_feat,
     img_gfeat, pt_gfeat, mesh_gfeat,
     pt_base, mesh_base, img_base) = semi3d_pallas(
        p, pt, centers, corners, normals, neighbor_index, views,
        img_k_tile=img_k_tile)
    return (pt_pred, mesh_pred, img_pred, fused_pred,
            pt_feat, mesh_feat, img_feat,
            pt_base, mesh_base, img_base,
            pt_gfeat, mesh_gfeat, img_gfeat)


if __name__ == "__main__":
    B, Cimg, Himg, Wimg = 2, 3, 16, 16
    Npts, Fmesh = 128, 64
    NUM_VIEWS = 12

    key = jax.random.PRNGKey(0)
    k_param, k_pt, k_img, k_c, k_k, k_n, k_idx = jax.random.split(key, 7)

    params = init_params(k_param, img_pix=Cimg * Himg * Wimg)

    pt = jax.random.normal(k_pt, (B, 3, Npts), jnp.float32)
    view_keys = jax.random.split(k_img, NUM_VIEWS)
    views = [jax.random.normal(vk, (B, Cimg, Himg, Wimg), jnp.float32) for vk in view_keys]
    centers = jax.random.normal(k_c, (B, 3, Fmesh), jnp.float32)
    corners = jax.random.normal(k_k, (B, 9, Fmesh), jnp.float32)
    normals = jax.random.normal(k_n, (B, 3, Fmesh), jnp.float32)
    neighbor_index = jax.random.randint(k_idx, (B, Fmesh, 3), 0, Fmesh, jnp.int32)

    # img_k_tile=256 -> 3 K tiles over the 768 flattened pixels, exercising the
    # K-tiled accumulation path (realistic sizes would use the 8192 default).
    outs = semi3d_forward(params, pt, *views, centers, corners, normals, neighbor_index,
                          img_k_tile=256)
    outs = jax.block_until_ready(outs)
    assert len(outs) == 13
    assert outs[3].shape == (B, 16)      # fused_pred
    assert outs[7].shape == (B, 128)     # pt_base
    assert outs[10].shape == (B, 64)     # pt_gfeat
    print("KERNEL_OK")
</pallas_src>

<mosaic_0001>
module attributes {stable_mosaic.version = 11 : i64} {
  func.func @kernel(%arg0: i32, %arg1: i32, %arg2: memref<2x3x128xf32, #tpu.memory_space<vmem>>, %arg3: memref<2x18x64xf32, #tpu.memory_space<vmem>>, %arg4: memref<2x256xf32, #tpu.memory_space<vmem>>, %arg5: memref<2x256xf32, #tpu.memory_space<vmem>>, %arg6: memref<2x256xf32, #tpu.memory_space<vmem>>, %arg7: memref<2x256xf32, #tpu.memory_space<vmem>>, %arg8: memref<2x256xf32, #tpu.memory_space<vmem>>, %arg9: memref<2x256xf32, #tpu.memory_space<vmem>>, %arg10: memref<2x256xf32, #tpu.memory_space<vmem>>, %arg11: memref<2x256xf32, #tpu.memory_space<vmem>>, %arg12: memref<2x256xf32, #tpu.memory_space<vmem>>, %arg13: memref<2x256xf32, #tpu.memory_space<vmem>>, %arg14: memref<2x256xf32, #tpu.memory_space<vmem>>, %arg15: memref<2x256xf32, #tpu.memory_space<vmem>>, %arg16: memref<256x128xf32, #tpu.memory_space<vmem>>, %arg17: memref<1x128xf32, #tpu.memory_space<vmem>>, %arg18: memref<128x128xf32, #tpu.memory_space<vmem>>, %arg19: memref<1x128xf32, #tpu.memory_space<vmem>>, %arg20: memref<3x128xf32, #tpu.memory_space<vmem>>, %arg21: memref<1x128xf32, #tpu.memory_space<vmem>>, %arg22: memref<128x128xf32, #tpu.memory_space<vmem>>, %arg23: memref<1x128xf32, #tpu.memory_space<vmem>>, %arg24: memref<18x128xf32, #tpu.memory_space<vmem>>, %arg25: memref<1x128xf32, #tpu.memory_space<vmem>>, %arg26: memref<128x128xf32, #tpu.memory_space<vmem>>, %arg27: memref<1x128xf32, #tpu.memory_space<vmem>>, %arg28: memref<3x128x128xf32, #tpu.memory_space<vmem>>, %arg29: memref<1x128xf32, #tpu.memory_space<vmem>>, %arg30: memref<128x128xf32, #tpu.memory_space<vmem>>, %arg31: memref<1x128xf32, #tpu.memory_space<vmem>>, %arg32: memref<3x128x128xf32, #tpu.memory_space<vmem>>, %arg33: memref<3x1x128xf32, #tpu.memory_space<vmem>>, %arg34: memref<3x128x128xf32, #tpu.memory_space<vmem>>, %arg35: memref<3x1x128xf32, #tpu.memory_space<vmem>>, %arg36: memref<3x128x128xf32, #tpu.memory_space<vmem>>, %arg37: memref<3x1x128xf32, #tpu.memory_space<vmem>>, %arg38: memref<2x128xf32, #tpu.memory_space<vmem>>, %arg39: memref<2x128xf32, #tpu.memory_space<vmem>>, %arg40: memref<2x128xf32, #tpu.memory_space<vmem>>, %arg41: memref<2x128xf32, #tpu.memory_space<vmem>>, %arg42: memref<3x2x128xf32, #tpu.memory_space<vmem>>, %arg43: memref<3x2x128xf32, #tpu.memory_space<vmem>>, %arg44: memref<3x2x128xf32, #tpu.memory_space<vmem>>, %arg45: memref<12x2x128xf32, #tpu.memory_space<vmem>>) attributes {dimension_semantics = [#tpu.dimension_semantics<parallel>, #tpu.dimension_semantics<arbitrary>], iteration_bounds = array<i64: 1, 3>, scalar_prefetch = 0 : i64, scratch_operands = 1 : i64, tpu.core_type = #tpu.core_type<tc>, window_params = [{transform_indices = @transform_0, window_bounds = array<i64: 2, 3, 128>}, {transform_indices = @transform_1, window_bounds = array<i64: 2, 18, 64>}, {transform_indices = @transform_2, window_bounds = array<i64: 2, 256>}, {transform_indices = @transform_3, window_bounds = array<i64: 2, 256>}, {transform_indices = @transform_4, window_bounds = array<i64: 2, 256>}, {transform_indices = @transform_5, window_bounds = array<i64: 2, 256>}, {transform_indices = @transform_6, window_bounds = array<i64: 2, 256>}, {transform_indices = @transform_7, window_bounds = array<i64: 2, 256>}, {transform_indices = @transform_8, window_bounds = array<i64: 2, 256>}, {transform_indices = @transform_9, window_bounds = array<i64: 2, 256>}, {transform_indices = @transform_10, window_bounds = array<i64: 2, 256>}, {transform_indices = @transform_11, window_bounds = array<i64: 2, 256>}, {transform_indices = @transform_12, window_bounds = array<i64: 2, 256>}, {transform_indices = @transform_13, window_bounds = array<i64: 2, 256>}, {transform_indices = @transform_14, window_bounds = array<i64: 256, 128>}, {pipeline_mode = #tpu.pipeline_mode<synchronous>, transform_indices = @transform_15, window_bounds = array<i64: 1, 128>}, {pipeline_mode = #tpu.pipeline_mode<synchronous>, transform_indices = @transform_16, window_bounds = array<i64: 128, 128>}, {pipeline_mode = #tpu.pipeline_mode<synchronous>, transform_indices = @transform_17, window_bounds = array<i64: 1, 128>}, {pipeline_mode = #tpu.pipeline_mode<synchronous>, transform_indices = @transform_18, window_bounds = array<i64: 3, 128>}, {pipeline_mode = #tpu.pipeline_mode<synchronous>, transform_indices = @transform_19, window_bounds = array<i64: 1, 128>}, {pipeline_mode = #tpu.pipeline_mode<synchronous>, transform_indices = @transform_20, window_bounds = array<i64: 128, 128>}, {pipeline_mode = #tpu.pipeline_mode<synchronous>, transform_indices = @transform_21, window_bounds = array<i64: 1, 128>}, {pipeline_mode = #tpu.pipeline_mode<synchronous>, transform_indices = @transform_22, window_bounds = array<i64: 18, 128>}, {pipeline_mode = #tpu.pipeline_mode<synchronous>, transform_indices = @transform_23, window_bounds = array<i64: 1, 128>}, {pipeline_mode = #tpu.pipeline_mode<synchronous>, transform_indices = @transform_24, window_bounds = array<i64: 128, 128>}, {pipeline_mode = #tpu.pipeline_mode<synchronous>, transform_indices = @transform_25, window_bounds = array<i64: 1, 128>}, {pipeline_mode = #tpu.pipeline_mode<synchronous>, transform_indices = @transform_26, window_bounds = array<i64: 3, 128, 128>}, {pipeline_mode = #tpu.pipeline_mode<synchronous>, transform_indices = @transform_27, window_bounds = array<i64: 1, 128>}, {pipeline_mode = #tpu.pipeline_mode<synchronous>, transform_indices = @transform_28, window_bounds = array<i64: 128, 128>}, {pipeline_mode = #tpu.pipeline_mode<synchronous>, transform_indices = @transform_29, window_bounds = array<i64: 1, 128>}, {pipeline_mode = #tpu.pipeline_mode<synchronous>, transform_indices = @transform_30, window_bounds = array<i64: 3, 128, 128>}, {pipeline_mode = #tpu.pipeline_mode<synchronous>, transform_indices = @transform_31, window_bounds = array<i64: 3, 1, 128>}, {pipeline_mode = #tpu.pipeline_mode<synchronous>, transform_indices = @transform_32, window_bounds = array<i64: 3, 128, 128>}, {pipeline_mode = #tpu.pipeline_mode<synchronous>, transform_indices = @transform_33, window_bounds = array<i64: 3, 1, 128>}, {pipeline_mode = #tpu.pipeline_mode<synchronous>, transform_indices = @transform_34, window_bounds = array<i64: 3, 128, 128>}, {pipeline_mode = #tpu.pipeline_mode<synchronous>, transform_indices = @transform_35, window_bounds = array<i64: 3, 1, 128>}, {transform_indices = @transform_36, window_bounds = array<i64: 2, 128>}, {transform_indices = @transform_37, window_bounds = array<i64: 2, 128>}, {transform_indices = @transform_38, window_bounds = array<i64: 2, 128>}, {transform_indices = @transform_39, window_bounds = array<i64: 2, 128>}, {transform_indices = @transform_40, window_bounds = array<i64: 3, 2, 128>}, {transform_indices = @transform_41, window_bounds = array<i64: 3, 2, 128>}, {transform_indices = @transform_42, window_bounds = array<i64: 3, 2, 128>}]} {
    %c0_i32 = arith.constant 0 : i32
    %0 = arith.cmpi eq, %arg1, %c0_i32 : i32
    %1 = arith.extui %0 : i1 to i32
    %c0_i32_0 = arith.constant 0 : i32
    %2 = arith.cmpi ne, %1, %c0_i32_0 : i32
    scf.if %2 {
      %cst_99 = arith.constant 0.000000e+00 : f32
      %103 = vector.broadcast %cst_99 : f32 to vector<12x2x128xf32>
      %c0_100 = arith.constant 0 : index
      %c0_101 = arith.constant 0 : index
      %c0_102 = arith.constant 0 : index
      %104 = vector.load %arg45[%c0_100, %c0_101, %c0_102] : memref<12x2x128xf32, #tpu.memory_space<vmem>>, vector<12x2x128xf32>
      tpu.vector_store %arg45[%c0_100, %c0_101, %c0_102], %103 {strides = array<i32>} : memref<12x2x128xf32, #tpu.memory_space<vmem>>, vector<12x2x128xf32>,
    } else {
    }
    %c0 = arith.constant 0 : index
    %c0_1 = arith.constant 0 : index
    %3 = vector.load %arg16[%c0, %c0_1] : memref<256x128xf32, #tpu.memory_space<vmem>>, vector<256x128xf32>
    %c0_2 = arith.constant 0 : index
    %c0_3 = arith.constant 0 : index
    %c0_4 = arith.constant 0 : index
    %4 = vector.load %arg45[%c0_2, %c0_3, %c0_4] : memref<12x2x128xf32, #tpu.memory_space<vmem>>, vector<1x2x128xf32>
    %5 = vector.shape_cast %4 : vector<1x2x128xf32> to vector<2x128xf32>
    %c0_5 = arith.constant 0 : index
    %c0_6 = arith.constant 0 : index
    %6 = vector.load %arg4[%c0_5, %c0_6] : memref<2x256xf32, #tpu.memory_space<vmem>>, vector<2x256xf32>
    %cst = arith.constant dense<0.000000e+00> : vector<2x128xf32>
    %7 = tpu.matmul %6, %3, %cst {dimension_numbers = #tpu.dot_dimension_numbers<[1], [0], [0], [1], [0, 0, 1, 1], [], []>} : vector<2x256xf32>, vector<256x128xf32>, vector<2x128xf32> -> vector<2x128xf32>
    %8 = arith.addf %5, %7 : vector<2x128xf32>
    %c0_7 = arith.constant 0 : index
    %c0_8 = arith.constant 0 : index
    %c0_9 = arith.constant 0 : index
    %9 = vector.load %arg45[%c0_7, %c0_8, %c0_9] : memref<12x2x128xf32, #tpu.memory_space<vmem>>, vector<1x2x128xf32>
    %10 = vector.shape_cast %9 : vector<1x2x128xf32> to vector<2x128xf32>
    %11 = vector.shape_cast %8 : vector<2x128xf32> to vector<1x2x128xf32>
    tpu.vector_store %arg45[%c0_7, %c0_8, %c0_9], %11 {strides = array<i32>} : memref<12x2x128xf32, #tpu.memory_space<vmem>>, vector<1x2x128xf32>,
    %c1 = arith.constant 1 : index
    %c0_10 = arith.constant 0 : index
    %c0_11 = arith.constant 0 : index
    %12 = vector.load %arg45[%c1, %c0_10, %c0_11] : memref<12x2x128xf32, #tpu.memory_space<vmem>>, vector<1x2x128xf32>
    %13 = vector.shape_cast %12 : vector<1x2x128xf32> to vector<2x128xf32>
    %c0_12 = arith.constant 0 : index
    %c0_13 = arith.constant 0 : index
    %14 = vector.load %arg5[%c0_12, %c0_13] : memref<2x256xf32, #tpu.memory_space<vmem>>, vector<2x256xf32>
    %cst_14 = arith.constant dense<0.000000e+00> : vector<2x128xf32>
    %15 = tpu.matmul %14, %3, %cst_14 {dimension_numbers = #tpu.dot_dimension_numbers<[1], [0], [0], [1], [0, 0, 1, 1], [], []>} : vector<2x256xf32>, vector<256x128xf32>, vector<2x128xf32> -> vector<2x128xf32>
    %16 = arith.addf %13, %15 : vector<2x128xf32>
    %c1_15 = arith.constant 1 : index
    %c0_16 = arith.constant 0 : index
    %c0_17 = arith.constant 0 : index
    %17 = vector.load %arg45[%c1_15, %c0_16, %c0_17] : memref<12x2x128xf32, #tpu.memory_space<vmem>>, vector<1x2x128xf32>
    %18 = vector.shape_cast %17 : vector<1x2x128xf32> to vector<2x128xf32>
    %19 = vector.shape_cast %16 : vector<2x128xf32> to vector<1x2x128xf32>
    tpu.vector_store %arg45[%c1_15, %c0_16, %c0_17], %19 {strides = array<i32>} : memref<12x2x128xf32, #tpu.memory_space<vmem>>, vector<1x2x128xf32>,
    %c2 = arith.constant 2 : index
    %c0_18 = arith.constant 0 : index
    %c0_19 = arith.constant 0 : index
    %20 = vector.load %arg45[%c2, %c0_18, %c0_19] : memref<12x2x128xf32, #tpu.memory_space<vmem>>, vector<1x2x128xf32>
    %21 = vector.shape_cast %20 : vector<1x2x128xf32> to vector<2x128xf32>
    %c0_20 = arith.constant 0 : index
    %c0_21 = arith.constant 0 : index
    %22 = vector.load %arg6[%c0_20, %c0_21] : memref<2x256xf32, #tpu.memory_space<vmem>>, vector<2x256xf32>
    %cst_22 = arith.constant dense<0.000000e+00> : vector<2x128xf32>
    %23 = tpu.matmul %22, %3, %cst_22 {dimension_numbers = #tpu.dot_dimension_numbers<[1], [0], [0], [1], [0, 0, 1, 1], [], []>} : vector<2x256xf32>, vector<256x128xf32>, vector<2x128xf32> -> vector<2x128xf32>
    %24 = arith.addf %21, %23 : vector<2x128xf32>
    %c2_23 = arith.constant 2 : index
    %c0_24 = arith.constant 0 : index
    %c0_25 = arith.constant 0 : index
    %25 = vector.load %arg45[%c2_23, %c0_24, %c0_25] : memref<12x2x128xf32, #tpu.memory_space<vmem>>, vector<1x2x128xf32>
    %26 = vector.shape_cast %25 : vector<1x2x128xf32> to vector<2x128xf32>
    %27 = vector.shape_cast %24 : vector<2x128xf32> to vector<1x2x128xf32>
    tpu.vector_store %arg45[%c2_23, %c0_24, %c0_25], %27 {strides = array<i32>} : memref<12x2x128xf32, #tpu.memory_space<vmem>>, vector<1x2x128xf32>,
    %c3 = arith.constant 3 : index
    %c0_26 = arith.constant 0 : index
    %c0_27 = arith.constant 0 : index
    %28 = vector.load %arg45[%c3, %c0_26, %c0_27] : memref<12x2x128xf32, #tpu.memory_space<vmem>>, vector<1x2x128xf32>
    %29 = vector.shape_cast %28 : vector<1x2x128xf32> to vector<2x128xf32>
    %c0_28 = arith.constant 0 : index
    %c0_29 = arith.constant 0 : index
    %30 = vector.load %arg7[%c0_28, %c0_29] : memref<2x256xf32, #tpu.memory_space<vmem>>, vector<2x256xf32>
    %cst_30 = arith.constant dense<0.000000e+00> : vector<2x128xf32>
    %31 = tpu.matmul %30, %3, %cst_30 {dimension_numbers = #tpu.dot_dimension_numbers<[1], [0], [0], [1], [0, 0, 1, 1], [], []>} : vector<2x256xf32>, vector<256x128xf32>, vector<2x128xf32> -> vector<2x128xf32>
    %32 = arith.addf %29, %31 : vector<2x128xf32>
    %c3_31 = arith.constant 3 : index
    %c0_32 = arith.constant 0 : index
    %c0_33 = arith.constant 0 : index
    %33 = vector.load %arg45[%c3_31, %c0_32, %c0_33] : memref<12x2x128xf32, #tpu.memory_space<vmem>>, vector<1x2x128xf32>
    %34 = vector.shape_cast %33 : vector<1x2x128xf32> to vector<2x128xf32>
    %35 = vector.shape_cast %32 : vector<2x128xf32> to vector<1x2x128xf32>
    tpu.vector_store %arg45[%c3_31, %c0_32, %c0_33], %35 {strides = array<i32>} : memref<12x2x128xf32, #tpu.memory_space<vmem>>, vector<1x2x128xf32>,
    %c4 = arith.constant 4 : index
    %c0_34 = arith.constant 0 : index
    %c0_35 = arith.constant 0 : index
    %36 = vector.load %arg45[%c4, %c0_34, %c0_35] : memref<12x2x128xf32, #tpu.memory_space<vmem>>, vector<1x2x128xf32>
    %37 = vector.shape_cast %36 : vector<1x2x128xf32> to vector<2x128xf32>
    %c0_36 = arith.constant 0 : index
    %c0_37 = arith.constant 0 : index
    %38 = vector.load %arg8[%c0_36, %c0_37] : memref<2x256xf32, #tpu.memory_space<vmem>>, vector<2x256xf32>
    %cst_38 = arith.constant dense<0.000000e+00> : vector<2x128xf32>
    %39 = tpu.matmul %38, %3, %cst_38 {dimension_numbers = #tpu.dot_dimension_numbers<[1], [0], [0], [1], [0, 0, 1, 1], [], []>} : vector<2x256xf32>, vector<256x128xf32>, vector<2x128xf32> -> vector<2x128xf32>
    %40 = arith.addf %37, %39 : vector<2x128xf32>
    %c4_39 = arith.constant 4 : index
    %c0_40 = arith.constant 0 : index
    %c0_41 = arith.constant 0 : index
    %41 = vector.load %arg45[%c4_39, %c0_40, %c0_41] : memref<12x2x128xf32, #tpu.memory_space<vmem>>, vector<1x2x128xf32>
    %42 = vector.shape_cast %41 : vector<1x2x128xf32> to vector<2x128xf32>
    %43 = vector.shape_cast %40 : vector<2x128xf32> to vector<1x2x128xf32>
    tpu.vector_store %arg45[%c4_39, %c0_40, %c0_41], %43 {strides = array<i32>} : memref<12x2x128xf32, #tpu.memory_space<vmem>>, vector<1x2x128xf32>,
    %c5 = arith.constant 5 : index
    %c0_42 = arith.constant 0 : index
    %c0_43 = arith.constant 0 : index
    %44 = vector.load %arg45[%c5, %c0_42, %c0_43] : memref<12x2x128xf32, #tpu.memory_space<vmem>>, vector<1x2x128xf32>
    %45 = vector.shape_cast %44 : vector<1x2x128xf32> to vector<2x128xf32>
    %c0_44 = arith.constant 0 : index
    %c0_45 = arith.constant 0 : index
    %46 = vector.load %arg9[%c0_44, %c0_45] : memref<2x256xf32, #tpu.memory_space<vmem>>, vector<2x256xf32>
    %cst_46 = arith.constant dense<0.000000e+00> : vector<2x128xf32>
    %47 = tpu.matmul %46, %3, %cst_46 {dimension_numbers = #tpu.dot_dimension_numbers<[1], [0], [0], [1], [0, 0, 1, 1], [], []>} : vector<2x256xf32>, vector<256x128xf32>, vector<2x128xf32> -> vector<2x128xf32>
    %48 = arith.addf %45, %47 : vector<2x128xf32>
    %c5_47 = arith.constant 5 : index
    %c0_48 = arith.constant 0 : index
    %c0_49 = arith.constant 0 : index
    %49 = vector.load %arg45[%c5_47, %c0_48, %c0_49] : memref<12x2x128xf32, #tpu.memory_space<vmem>>, vector<1x2x128xf32>
    %50 = vector.shape_cast %49 : vector<1x2x128xf32> to vector<2x128xf32>
    %51 = vector.shape_cast %48 : vector<2x128xf32> to vector<1x2x128xf32>
    tpu.vector_store %arg45[%c5_47, %c0_48, %c0_49], %51 {strides = array<i32>} : memref<12x2x128xf32, #tpu.memory_space<vmem>>, vector<1x2x128xf32>,
    %c6 = arith.constant 6 : index
    %c0_50 = arith.constant 0 : index
    %c0_51 = arith.constant 0 : index
    %52 = vector.load %arg45[%c6, %c0_50, %c0_51] : memref<12x2x128xf32, #tpu.memory_space<vmem>>, vector<1x2x128xf32>
    %53 = vector.shape_cast %52 : vector<1x2x128xf32> to vector<2x128xf32>
    %c0_52 = arith.constant 0 : index
    %c0_53 = arith.constant 0 : index
    %54 = vector.load %arg10[%c0_52, %c0_53] : memref<2x256xf32, #tpu.memory_space<vmem>>, vector<2x256xf32>
    %cst_54 = arith.constant dense<0.000000e+00> : vector<2x128xf32>
    %55 = tpu.matmul %54, %3, %cst_54 {dimension_numbers = #tpu.dot_dimension_numbers<[1], [0], [0], [1], [0, 0, 1, 1], [], []>} : vector<2x256xf32>, vector<256x128xf32>, vector<2x128xf32> -> vector<2x128xf32>
    %56 = arith.addf %53, %55 : vector<2x128xf32>
    %c6_55 = arith.constant 6 : index
    %c0_56 = arith.constant 0 : index
    %c0_57 = arith.constant 0 : index
    %57 = vector.load %arg45[%c6_55, %c0_56, %c0_57] : memref<12x2x128xf32, #tpu.memory_space<vmem>>, vector<1x2x128xf32>
    %58 = vector.shape_cast %57 : vector<1x2x128xf32> to vector<2x128xf32>
    %59 = vector.shape_cast %56 : vector<2x128xf32> to vector<1x2x128xf32>
    tpu.vector_store %arg45[%c6_55, %c0_56, %c0_57], %59 {strides = array<i32>} : memref<12x2x128xf32, #tpu.memory_space<vmem>>, vector<1x2x128xf32>,
    %c7 = arith.constant 7 : index
    %c0_58 = arith.constant 0 : index
    %c0_59 = arith.constant 0 : index
    %60 = vector.load %arg45[%c7, %c0_58, %c0_59] : memref<12x2x128xf32, #tpu.memory_space<vmem>>, vector<1x2x128xf32>
    %61 = vector.shape_cast %60 : vector<1x2x128xf32> to vector<2x128xf32>
    %c0_60 = arith.constant 0 : index
    %c0_61 = arith.constant 0 : index
    %62 = vector.load %arg11[%c0_60, %c0_61] : memref<2x256xf32, #tpu.memory_space<vmem>>, vector<2x256xf32>
    %cst_62 = arith.constant dense<0.000000e+00> : vector<2x128xf32>
    %63 = tpu.matmul %62, %3, %cst_62 {dimension_numbers = #tpu.dot_dimension_numbers<[1], [0], [0], [1], [0, 0, 1, 1], [], []>} : vector<2x256xf32>, vector<256x128xf32>, vector<2x128xf32> -> vector<2x128xf32>
    %64 = arith.addf %61, %63 : vector<2x128xf32>
    %c7_63 = arith.constant 7 : index
    %c0_64 = arith.constant 0 : index
    %c0_65 = arith.constant 0 : index
    %65 = vector.load %arg45[%c7_63, %c0_64, %c0_65] : memref<12x2x128xf32, #tpu.memory_space<vmem>>, vector<1x2x128xf32>
    %66 = vector.shape_cast %65 : vector<1x2x128xf32> to vector<2x128xf32>
    %67 = vector.shape_cast %64 : vector<2x128xf32> to vector<1x2x128xf32>
    tpu.vector_store %arg45[%c7_63, %c0_64, %c0_65], %67 {strides = array<i32>} : memref<12x2x128xf32, #tpu.memory_space<vmem>>, vector<1x2x128xf32>,
    %c8 = arith.constant 8 : index
    %c0_66 = arith.constant 0 : index
    %c0_67 = arith.constant 0 : index
    %68 = vector.load %arg45[%c8, %c0_66, %c0_67] : memref<12x2x128xf32, #tpu.memory_space<vmem>>, vector<1x2x128xf32>
    %69 = vector.shape_cast %68 : vector<1x2x128xf32> to vector<2x128xf32>
    %c0_68 = arith.constant 0 : index
    %c0_69 = arith.constant 0 : index
    %70 = vector.load %arg12[%c0_68, %c0_69] : memref<2x256xf32, #tpu.memory_space<vmem>>, vector<2x256xf32>
    %cst_70 = arith.constant dense<0.000000e+00> : vector<2x128xf32>
    %71 = tpu.matmul %70, %3, %cst_70 {dimension_numbers = #tpu.dot_dimension_numbers<[1], [0], [0], [1], [0, 0, 1, 1], [], []>} : vector<2x256xf32>, vector<256x128xf32>, vector<2x128xf32> -> vector<2x128xf32>
    %72 = arith.addf %69, %71 : vector<2x128xf32>
    %c8_71 = arith.constant 8 : index
    %c0_72 = arith.constant 0 : index
    %c0_73 = arith.constant 0 : index
    %73 = vector.load %arg45[%c8_71, %c0_72, %c0_73] : memref<12x2x128xf32, #tpu.memory_space<vmem>>, vector<1x2x128xf32>
    %74 = vector.shape_cast %73 : vector<1x2x128xf32> to vector<2x128xf32>
    %75 = vector.shape_cast %72 : vector<2x128xf32> to vector<1x2x128xf32>
    tpu.vector_store %arg45[%c8_71, %c0_72, %c0_73], %75 {strides = array<i32>} : memref<12x2x128xf32, #tpu.memory_space<vmem>>, vector<1x2x128xf32>,
    %c9 = arith.constant 9 : index
    %c0_74 = arith.constant 0 : index
    %c0_75 = arith.constant 0 : index
    %76 = vector.load %arg45[%c9, %c0_74, %c0_75] : memref<12x2x128xf32, #tpu.memory_space<vmem>>, vector<1x2x128xf32>
    %77 = vector.shape_cast %76 : vector<1x2x128xf32> to vector<2x128xf32>
    %c0_76 = arith.constant 0 : index
    %c0_77 = arith.constant 0 : index
    %78 = vector.load %arg13[%c0_76, %c0_77] : memref<2x256xf32, #tpu.memory_space<vmem>>, vector<2x256xf32>
    %cst_78 = arith.constant dense<0.000000e+00> : vector<2x128xf32>
    %79 = tpu.matmul %78, %3, %cst_78 {dimension_numbers = #tpu.dot_dimension_numbers<[1], [0], [0], [1], [0, 0, 1, 1], [], []>} : vector<2x256xf32>, vector<256x128xf32>, vector<2x128xf32> -> vector<2x128xf32>
    %80 = arith.addf %77, %79 : vector<2x128xf32>
    %c9_79 = arith.constant 9 : index
    %c0_80 = arith.constant 0 : index
    %c0_81 = arith.constant 0 : index
    %81 = vector.load %arg45[%c9_79, %c0_80, %c0_81] : memref<12x2x128xf32, #tpu.memory_space<vmem>>, vector<1x2x128xf32>
    %82 = vector.shape_cast %81 : vector<1x2x128xf32> to vector<2x128xf32>
    %83 = vector.shape_cast %80 : vector<2x128xf32> to vector<1x2x128xf32>
    tpu.vector_store %arg45[%c9_79, %c0_80, %c0_81], %83 {strides = array<i32>} : memref<12x2x128xf32, #tpu.memory_space<vmem>>, vector<1x2x128xf32>,
    %c10 = arith.constant 10 : index
    %c0_82 = arith.constant 0 : index
    %c0_83 = arith.constant 0 : index
    %84 = vector.load %arg45[%c10, %c0_82, %c0_83] : memref<12x2x128xf32, #tpu.memory_space<vmem>>, vector<1x2x128xf32>
    %85 = vector.shape_cast %84 : vector<1x2x128xf32> to vector<2x128xf32>
    %c0_84 = arith.constant 0 : index
    %c0_85 = arith.constant 0 : index
    %86 = vector.load %arg14[%c0_84, %c0_85] : memref<2x256xf32, #tpu.memory_space<vmem>>, vector<2x256xf32>
    %cst_86 = arith.constant dense<0.000000e+00> : vector<2x128xf32>
    %87 = tpu.matmul %86, %3, %cst_86 {dimension_numbers = #tpu.dot_dimension_numbers<[1], [0], [0], [1], [0, 0, 1, 1], [], []>} : vector<2x256xf32>, vector<256x128xf32>, vector<2x128xf32> -> vector<2x128xf32>
    %88 = arith.addf %85, %87 : vector<2x128xf32>
    %c10_87 = arith.constant 10 : index
    %c0_88 = arith.constant 0 : index
    %c0_89 = arith.constant 0 : index
    %89 = vector.load %arg45[%c10_87, %c0_88, %c0_89] : memref<12x2x128xf32, #tpu.memory_space<vmem>>, vector<1x2x128xf32>
    %90 = vector.shape_cast %89 : vector<1x2x128xf32> to vector<2x128xf32>
    %91 = vector.shape_cast %88 : vector<2x128xf32> to vector<1x2x128xf32>
    tpu.vector_store %arg45[%c10_87, %c0_88, %c0_89], %91 {strides = array<i32>} : memref<12x2x128xf32, #tpu.memory_space<vmem>>, vector<1x2x128xf32>,
    %c11 = arith.constant 11 : index
    %c0_90 = arith.constant 0 : index
    %c0_91 = arith.constant 0 : index
    %92 = vector.load %arg45[%c11, %c0_90, %c0_91] : memref<12x2x128xf32, #tpu.memory_space<vmem>>, vector<1x2x128xf32>
    %93 = vector.shape_cast %92 : vector<1x2x128xf32> to vector<2x128xf32>
    %c0_92 = arith.constant 0 : index
    %c0_93 = arith.constant 0 : index
    %94 = vector.load %arg15[%c0_92, %c0_93] : memref<2x256xf32, #tpu.memory_space<vmem>>, vector<2x256xf32>
    %cst_94 = arith.constant dense<0.000000e+00> : vector<2x128xf32>
    %95 = tpu.matmul %94, %3, %cst_94 {dimension_numbers = #tpu.dot_dimension_numbers<[1], [0], [0], [1], [0, 0, 1, 1], [], []>} : vector<2x256xf32>, vector<256x128xf32>, vector<2x128xf32> -> vector<2x128xf32>
    %96 = arith.addf %93, %95 : vector<2x128xf32>
    %c11_95 = arith.constant 11 : index
    %c0_96 = arith.constant 0 : index
    %c0_97 = arith.constant 0 : index
    %97 = vector.load %arg45[%c11_95, %c0_96, %c0_97] : memref<12x2x128xf32, #tpu.memory_space<vmem>>, vector<1x2x128xf32>
    %98 = vector.shape_cast %97 : vector<1x2x128xf32> to vector<2x128xf32>
    %99 = vector.shape_cast %96 : vector<2x128xf32> to vector<1x2x128xf32>
    tpu.vector_store %arg45[%c11_95, %c0_96, %c0_97], %99 {strides = array<i32>} : memref<12x2x128xf32, #tpu.memory_space<vmem>>, vector<1x2x128xf32>,
    %c2_i32 = arith.constant 2 : i32
    %100 = arith.cmpi eq, %arg1, %c2_i32 : i32
    %101 = arith.extui %100 : i1 to i32
    %c0_i32_98 = arith.constant 0 : i32
    %102 = arith.cmpi ne, %101, %c0_i32_98 : i32
    scf.if %102 {
      %c0_99 = arith.constant 0 : index
      %c0_100 = arith.constant 0 : index
      %103 = vector.load %arg17[%c0_99, %c0_100] : memref<1x128xf32, #tpu.memory_space<vmem>>, vector<1x128xf32>
      %c0_101 = arith.constant 0 : index
      %c0_102 = arith.constant 0 : index
      %104 = vector.load %arg18[%c0_101, %c0_102] : memref<128x128xf32, #tpu.memory_space<vmem>>, vector<128x128xf32>
      %c0_103 = arith.constant 0 : index
      %c0_104 = arith.constant 0 : index
      %105 = vector.load %arg19[%c0_103, %c0_104] : memref<1x128xf32, #tpu.memory_space<vmem>>, vector<1x128xf32>
      %c0_105 = arith.constant 0 : index
      %c0_106 = arith.constant 0 : index
      %c0_107 = arith.constant 0 : index
      %106 = vector.load %arg45[%c0_105, %c0_106, %c0_107] : memref<12x2x128xf32, #tpu.memory_space<vmem>>, vector<1x2x128xf32>
      %107 = vector.shape_cast %106 : vector<1x2x128xf32> to vector<2x128xf32>
      %108 = vector.broadcast %103 : vector<1x128xf32> to vector<2x128xf32>
      %109 = arith.addf %107, %108 : vector<2x128xf32>
      %cst_108 = arith.constant 0.000000e+00 : f32
      %110 = vector.broadcast %cst_108 : f32 to vector<2x128xf32>
      %111 = arith.maximumf %109, %110 : vector<2x128xf32>
      %cst_109 = arith.constant dense<0.000000e+00> : vector<2x128xf32>
      %112 = tpu.matmul %111, %104, %cst_109 {dimension_numbers = #tpu.dot_dimension_numbers<[1], [0], [0], [1], [0, 0, 1, 1], [], []>} : vector<2x128xf32>, vector<128x128xf32>, vector<2x128xf32> -> vector<2x128xf32>
      %113 = vector.broadcast %105 : vector<1x128xf32> to vector<2x128xf32>
      %114 = arith.addf %112, %113 : vector<2x128xf32>
      %cst_110 = arith.constant 0.000000e+00 : f32
      %115 = vector.broadcast %cst_110 : f32 to vector<2x128xf32>
      %116 = arith.maximumf %114, %115 : vector<2x128xf32>
      %c1_111 = arith.constant 1 : index
      %c0_112 = arith.constant 0 : index
      %c0_113 = arith.constant 0 : index
      %117 = vector.load %arg45[%c1_111, %c0_112, %c0_113] : memref<12x2x128xf32, #tpu.memory_space<vmem>>, vector<1x2x128xf32>
      %118 = vector.shape_cast %117 : vector<1x2x128xf32> to vector<2x128xf32>
      %119 = vector.broadcast %103 : vector<1x128xf32> to vector<2x128xf32>
      %120 = arith.addf %118, %119 : vector<2x128xf32>
      %cst_114 = arith.constant 0.000000e+00 : f32
      %121 = vector.broadcast %cst_114 : f32 to vector<2x128xf32>
      %122 = arith.maximumf %120, %121 : vector<2x128xf32>
      %cst_115 = arith.constant dense<0.000000e+00> : vector<2x128xf32>
      %123 = tpu.matmul %122, %104, %cst_115 {dimension_numbers = #tpu.dot_dimension_numbers<[1], [0], [0], [1], [0, 0, 1, 1], [], []>} : vector<2x128xf32>, vector<128x128xf32>, vector<2x128xf32> -> vector<2x128xf32>
      %124 = vector.broadcast %105 : vector<1x128xf32> to vector<2x128xf32>
      %125 = arith.addf %123, %124 : vector<2x128xf32>
      %cst_116 = arith.constant 0.000000e+00 : f32
      %126 = vector.broadcast %cst_116 : f32 to vector<2x128xf32>
      %127 = arith.maximumf %125, %126 : vector<2x128xf32>
      %128 = arith.maximumf %116, %127 : vector<2x128xf32>
      %c2_117 = arith.constant 2 : index
      %c0_118 = arith.constant 0 : index
      %c0_119 = arith.constant 0 : index
      %129 = vector.load %arg45[%c2_117, %c0_118, %c0_119] : memref<12x2x128xf32, #tpu.memory_space<vmem>>, vector<1x2x128xf32>
      %130 = vector.shape_cast %129 : vector<1x2x128xf32> to vector<2x128xf32>
      %131 = vector.broadcast %103 : vector<1x128xf32> to vector<2x128xf32>
      %132 = arith.addf %130, %131 : vector<2x128xf32>
      %cst_120 = arith.constant 0.000000e+00 : f32
      %133 = vector.broadcast %cst_120 : f32 to vector<2x128xf32>
      %134 = arith.maximumf %132, %133 : vector<2x128xf32>
      %cst_121 = arith.constant dense<0.000000e+00> : vector<2x128xf32>
      %135 = tpu.matmul %134, %104, %cst_121 {dimension_numbers = #tpu.dot_dimension_numbers<[1], [0], [0], [1], [0, 0, 1, 1], [], []>} : vector<2x128xf32>, vector<128x128xf32>, vector<2x128xf32> -> vector<2x128xf32>
      %136 = vector.broadcast %105 : vector<1x128xf32> to vector<2x128xf32>
      %137 = arith.addf %135, %136 : vector<2x128xf32>
      %cst_122 = arith.constant 0.000000e+00 : f32
      %138 = vector.broadcast %cst_122 : f32 to vector<2x128xf32>
      %139 = arith.maximumf %137, %138 : vector<2x128xf32>
      %140 = arith.maximumf %128, %139 : vector<2x128xf32>
      %c3_123 = arith.constant 3 : index
      %c0_124 = arith.constant 0 : index
      %c0_125 = arith.constant 0 : index
      %141 = vector.load %arg45[%c3_123, %c0_124, %c0_125] : memref<12x2x128xf32, #tpu.memory_space<vmem>>, vector<1x2x128xf32>
      %142 = vector.shape_cast %141 : vector<1x2x128xf32> to vector<2x128xf32>
      %143 = vector.broadcast %103 : vector<1x128xf32> to vector<2x128xf32>
      %144 = arith.addf %142, %143 : vector<2x128xf32>
      %cst_126 = arith.constant 0.000000e+00 : f32
      %145 = vector.broadcast %cst_126 : f32 to vector<2x128xf32>
      %146 = arith.maximumf %144, %145 : vector<2x128xf32>
      %cst_127 = arith.constant dense<0.000000e+00> : vector<2x128xf32>
      %147 = tpu.matmul %146, %104, %cst_127 {dimension_numbers = #tpu.dot_dimension_numbers<[1], [0], [0], [1], [0, 0, 1, 1], [], []>} : vector<2x128xf32>, vector<128x128xf32>, vector<2x128xf32> -> vector<2x128xf32>
      %148 = vector.broadcast %105 : vector<1x128xf32> to vector<2x128xf32>
      %149 = arith.addf %147, %148 : vector<2x128xf32>
      %cst_128 = arith.constant 0.000000e+00 : f32
      %150 = vector.broadcast %cst_128 : f32 to vector<2x128xf32>
      %151 = arith.maximumf %149, %150 : vector<2x128xf32>
      %152 = arith.maximumf %140, %151 : vector<2x128xf32>
      %c4_129 = arith.constant 4 : index
      %c0_130 = arith.constant 0 : index
      %c0_131 = arith.constant 0 : index
      %153 = vector.load %arg45[%c4_129, %c0_130, %c0_131] : memref<12x2x128xf32, #tpu.memory_space<vmem>>, vector<1x2x128xf32>
      %154 = vector.shape_cast %153 : vector<1x2x128xf32> to vector<2x128xf32>
      %155 = vector.broadcast %103 : vector<1x128xf32> to vector<2x128xf32>
      %156 = arith.addf %154, %155 : vector<2x128xf32>
      %cst_132 = arith.constant 0.000000e+00 : f32
      %157 = vector.broadcast %cst_132 : f32 to vector<2x128xf32>
      %158 = arith.maximumf %156, %157 : vector<2x128xf32>
      %cst_133 = arith.constant dense<0.000000e+00> : vector<2x128xf32>
      %159 = tpu.matmul %158, %104, %cst_133 {dimension_numbers = #tpu.dot_dimension_numbers<[1], [0], [0], [1], [0, 0, 1, 1], [], []>} : vector<2x128xf32>, vector<128x128xf32>, vector<2x128xf32> -> vector<2x128xf32>
      %160 = vector.broadcast %105 : vector<1x128xf32> to vector<2x128xf32>
      %161 = arith.addf %159, %160 : vector<2x128xf32>
      %cst_134 = arith.constant 0.000000e+00 : f32
      %162 = vector.broadcast %cst_134 : f32 to vector<2x128xf32>
      %163 = arith.maximumf %161, %162 : vector<2x128xf32>
      %164 = arith.maximumf %152, %163 : vector<2x128xf32>
      %c5_135 = arith.constant 5 : index
      %c0_136 = arith.constant 0 : index
      %c0_137 = arith.constant 0 : index
      %165 = vector.load %arg45[%c5_135, %c0_136, %c0_137] : memref<12x2x128xf32, #tpu.memory_space<vmem>>, vector<1x2x128xf32>
      %166 = vector.shape_cast %165 : vector<1x2x128xf32> to vector<2x128xf32>
      %167 = vector.broadcast %103 : vector<1x128xf32> to vector<2x128xf32>
      %168 = arith.addf %166, %167 : vector<2x128xf32>
      %cst_138 = arith.constant 0.000000e+00 : f32
      %169 = vector.broadcast %cst_138 : f32 to vector<2x128xf32>
      %170 = arith.maximumf %168, %169 : vector<2x128xf32>
      %cst_139 = arith.constant dense<0.000000e+00> : vector<2x128xf32>
      %171 = tpu.matmul %170, %104, %cst_139 {dimension_numbers = #tpu.dot_dimension_numbers<[1], [0], [0], [1], [0, 0, 1, 1], [], []>} : vector<2x128xf32>, vector<128x128xf32>, vector<2x128xf32> -> vector<2x128xf32>
      %172 = vector.broadcast %105 : vector<1x128xf32> to vector<2x128xf32>
      %173 = arith.addf %171, %172 : vector<2x128xf32>
      %cst_140 = arith.constant 0.000000e+00 : f32
      %174 = vector.broadcast %cst_140 : f32 to vector<2x128xf32>
      %175 = arith.maximumf %173, %174 : vector<2x128xf32>
      %176 = arith.maximumf %164, %175 : vector<2x128xf32>
      %c6_141 = arith.constant 6 : index
      %c0_142 = arith.constant 0 : index
      %c0_143 = arith.constant 0 : index
      %177 = vector.load %arg45[%c6_141, %c0_142, %c0_143] : memref<12x2x128xf32, #tpu.memory_space<vmem>>, vector<1x2x128xf32>
      %178 = vector.shape_cast %177 : vector<1x2x128xf32> to vector<2x128xf32>
      %179 = vector.broadcast %103 : vector<1x128xf32> to vector<2x128xf32>
      %180 = arith.addf %178, %179 : vector<2x128xf32>
      %cst_144 = arith.constant 0.000000e+00 : f32
      %181 = vector.broadcast %cst_144 : f32 to vector<2x128xf32>
      %182 = arith.maximumf %180, %181 : vector<2x128xf32>
      %cst_145 = arith.constant dense<0.000000e+00> : vector<2x128xf32>
      %183 = tpu.matmul %182, %104, %cst_145 {dimension_numbers = #tpu.dot_dimension_numbers<[1], [0], [0], [1], [0, 0, 1, 1], [], []>} : vector<2x128xf32>, vector<128x128xf32>, vector<2x128xf32> -> vector<2x128xf32>
      %184 = vector.broadcast %105 : vector<1x128xf32> to vector<2x128xf32>
      %185 = arith.addf %183, %184 : vector<2x128xf32>
      %cst_146 = arith.constant 0.000000e+00 : f32
      %186 = vector.broadcast %cst_146 : f32 to vector<2x128xf32>
      %187 = arith.maximumf %185, %186 : vector<2x128xf32>
      %188 = arith.maximumf %176, %187 : vector<2x128xf32>
      %c7_147 = arith.constant 7 : index
      %c0_148 = arith.constant 0 : index
      %c0_149 = arith.constant 0 : index
      %189 = vector.load %arg45[%c7_147, %c0_148, %c0_149] : memref<12x2x128xf32, #tpu.memory_space<vmem>>, vector<1x2x128xf32>
      %190 = vector.shape_cast %189 : vector<1x2x128xf32> to vector<2x128xf32>
      %191 = vector.broadcast %103 : vector<1x128xf32> to vector<2x128xf32>
      %192 = arith.addf %190, %191 : vector<2x128xf32>
      %cst_150 = arith.constant 0.000000e+00 : f32
      %193 = vector.broadcast %cst_150 : f32 to vector<2x128xf32>
      %194 = arith.maximumf %192, %193 : vector<2x128xf32>
      %cst_151 = arith.constant dense<0.000000e+00> : vector<2x128xf32>
      %195 = tpu.matmul %194, %104, %cst_151 {dimension_numbers = #tpu.dot_dimension_numbers<[1], [0], [0], [1], [0, 0, 1, 1], [], []>} : vector<2x128xf32>, vector<128x128xf32>, vector<2x128xf32> -> vector<2x128xf32>
      %196 = vector.broadcast %105 : vector<1x128xf32> to vector<2x128xf32>
      %197 = arith.addf %195, %196 : vector<2x128xf32>
      %cst_152 = arith.constant 0.000000e+00 : f32
      %198 = vector.broadcast %cst_152 : f32 to vector<2x128xf32>
      %199 = arith.maximumf %197, %198 : vector<2x128xf32>
      %200 = arith.maximumf %188, %199 : vector<2x128xf32>
      %c8_153 = arith.constant 8 : index
      %c0_154 = arith.constant 0 : index
      %c0_155 = arith.constant 0 : index
      %201 = vector.load %arg45[%c8_153, %c0_154, %c0_155] : memref<12x2x128xf32, #tpu.memory_space<vmem>>, vector<1x2x128xf32>
      %202 = vector.shape_cast %201 : vector<1x2x128xf32> to vector<2x128xf32>
      %203 = vector.broadcast %103 : vector<1x128xf32> to vector<2x128xf32>
      %204 = arith.addf %202, %203 : vector<2x128xf32>
      %cst_156 = arith.constant 0.000000e+00 : f32
      %205 = vector.broadcast %cst_156 : f32 to vector<2x128xf32>
      %206 = arith.maximumf %204, %205 : vector<2x128xf32>
      %cst_157 = arith.constant dense<0.000000e+00> : vector<2x128xf32>
      %207 = tpu.matmul %206, %104, %cst_157 {dimension_numbers = #tpu.dot_dimension_numbers<[1], [0], [0], [1], [0, 0, 1, 1], [], []>} : vector<2x128xf32>, vector<128x128xf32>, vector<2x128xf32> -> vector<2x128xf32>
      %208 = vector.broadcast %105 : vector<1x128xf32> to vector<2x128xf32>
      %209 = arith.addf %207, %208 : vector<2x128xf32>
      %cst_158 = arith.constant 0.000000e+00 : f32
      %210 = vector.broadcast %cst_158 : f32 to vector<2x128xf32>
      %211 = arith.maximumf %209, %210 : vector<2x128xf32>
      %212 = arith.maximumf %200, %211 : vector<2x128xf32>
      %c9_159 = arith.constant 9 : index
      %c0_160 = arith.constant 0 : index
      %c0_161 = arith.constant 0 : index
      %213 = vector.load %arg45[%c9_159, %c0_160, %c0_161] : memref<12x2x128xf32, #tpu.memory_space<vmem>>, vector<1x2x128xf32>
      %214 = vector.shape_cast %213 : vector<1x2x128xf32> to vector<2x128xf32>
      %215 = vector.broadcast %103 : vector<1x128xf32> to vector<2x128xf32>
      %216 = arith.addf %214, %215 : vector<2x128xf32>
      %cst_162 = arith.constant 0.000000e+00 : f32
      %217 = vector.broadcast %cst_162 : f32 to vector<2x128xf32>
      %218 = arith.maximumf %216, %217 : vector<2x128xf32>
      %cst_163 = arith.constant dense<0.000000e+00> : vector<2x128xf32>
      %219 = tpu.matmul %218, %104, %cst_163 {dimension_numbers = #tpu.dot_dimension_numbers<[1], [0], [0], [1], [0, 0, 1, 1], [], []>} : vector<2x128xf32>, vector<128x128xf32>, vector<2x128xf32> -> vector<2x128xf32>
      %220 = vector.broadcast %105 : vector<1x128xf32> to vector<2x128xf32>
      %221 = arith.addf %219, %220 : vector<2x128xf32>
      %cst_164 = arith.constant 0.000000e+00 : f32
      %222 = vector.broadcast %cst_164 : f32 to vector<2x128xf32>
      %223 = arith.maximumf %221, %222 : vector<2x128xf32>
      %224 = arith.maximumf %212, %223 : vector<2x128xf32>
      %c10_165 = arith.constant 10 : index
      %c0_166 = arith.constant 0 : index
      %c0_167 = arith.constant 0 : index
      %225 = vector.load %arg45[%c10_165, %c0_166, %c0_167] : memref<12x2x128xf32, #tpu.memory_space<vmem>>, vector<1x2x128xf32>
      %226 = vector.shape_cast %225 : vector<1x2x128xf32> to vector<2x128xf32>
      %227 = vector.broadcast %103 : vector<1x128xf32> to vector<2x128xf32>
      %228 = arith.addf %226, %227 : vector<2x128xf32>
      %cst_168 = arith.constant 0.000000e+00 : f32
      %229 = vector.broadcast %cst_168 : f32 to vector<2x128xf32>
      %230 = arith.maximumf %228, %229 : vector<2x128xf32>
      %cst_169 = arith.constant dense<0.000000e+00> : vector<2x128xf32>
      %231 = tpu.matmul %230, %104, %cst_169 {dimension_numbers = #tpu.dot_dimension_numbers<[1], [0], [0], [1], [0, 0, 1, 1], [], []>} : vector<2x128xf32>, vector<128x128xf32>, vector<2x128xf32> -> vector<2x128xf32>
      %232 = vector.broadcast %105 : vector<1x128xf32> to vector<2x128xf32>
      %233 = arith.addf %231, %232 : vector<2x128xf32>
      %cst_170 = arith.constant 0.000000e+00 : f32
      %234 = vector.broadcast %cst_170 : f32 to vector<2x128xf32>
      %235 = arith.maximumf %233, %234 : vector<2x128xf32>
      %236 = arith.maximumf %224, %235 : vector<2x128xf32>
      %c11_171 = arith.constant 11 : index
      %c0_172 = arith.constant 0 : index
      %c0_173 = arith.constant 0 : index
      %237 = vector.load %arg45[%c11_171, %c0_172, %c0_173] : memref<12x2x128xf32, #tpu.memory_space<vmem>>, vector<1x2x128xf32>
      %238 = vector.shape_cast %237 : vector<1x2x128xf32> to vector<2x128xf32>
      %239 = vector.broadcast %103 : vector<1x128xf32> to vector<2x128xf32>
      %240 = arith.addf %238, %239 : vector<2x128xf32>
      %cst_174 = arith.constant 0.000000e+00 : f32
      %241 = vector.broadcast %cst_174 : f32 to vector<2x128xf32>
      %242 = arith.maximumf %240, %241 : vector<2x128xf32>
      %cst_175 = arith.constant dense<0.000000e+00> : vector<2x128xf32>
      %243 = tpu.matmul %242, %104, %cst_175 {dimension_numbers = #tpu.dot_dimension_numbers<[1], [0], [0], [1], [0, 0, 1, 1], [], []>} : vector<2x128xf32>, vector<128x128xf32>, vector<2x128xf32> -> vector<2x128xf32>
      %244 = vector.broadcast %105 : vector<1x128xf32> to vector<2x128xf32>
      %245 = arith.addf %243, %244 : vector<2x128xf32>
      %cst_176 = arith.constant 0.000000e+00 : f32
      %246 = vector.broadcast %cst_176 : f32 to vector<2x128xf32>
      %247 = arith.maximumf %245, %246 : vector<2x128xf32>
      %248 = arith.maximumf %236, %247 : vector<2x128xf32>
      %c0_177 = arith.constant 0 : index
      %c0_178 = arith.constant 0 : index
      %249 = vector.load %arg40[%c0_177, %c0_178] : memref<2x128xf32, #tpu.memory_space<vmem>>, vector<2x128xf32>
      tpu.vector_store %arg40[%c0_177, %c0_178], %248 {strides = array<i32>} : memref<2x128xf32, #tpu.memory_space<vmem>>, vector<2x128xf32>,
      %c0_179 = arith.constant 0 : index
      %c0_180 = arith.constant 0 : index
      %250 = vector.load %arg20[%c0_179, %c0_180] : memref<3x128xf32, #tpu.memory_space<vmem>>, vector<3x128xf32>
      %c0_181 = arith.constant 0 : index
      %c0_182 = arith.constant 0 : index
      %251 = vector.load %arg21[%c0_181, %c0_182] : memref<1x128xf32, #tpu.memory_space<vmem>>, vector<1x128xf32>
      %c0_183 = arith.constant 0 : index
      %c0_184 = arith.constant 0 : index
      %252 = vector.load %arg22[%c0_183, %c0_184] : memref<128x128xf32, #tpu.memory_space<vmem>>, vector<128x128xf32>
      %c0_185 = arith.constant 0 : index
      %c0_186 = arith.constant 0 : index
      %253 = vector.load %arg23[%c0_185, %c0_186] : memref<1x128xf32, #tpu.memory_space<vmem>>, vector<1x128xf32>
      %c0_187 = arith.constant 0 : index
      %c0_188 = arith.constant 0 : index
      %c0_189 = arith.constant 0 : index
      %254 = vector.load %arg2[%c0_187, %c0_188, %c0_189] : memref<2x3x128xf32, #tpu.memory_space<vmem>>, vector<1x3x128xf32>
      %255 = vector.shape_cast %254 : vector<1x3x128xf32> to vector<3x128xf32>
      %cst_190 = arith.constant dense<0.000000e+00> : vector<128x128xf32>
      %256 = tpu.matmul %255, %250, %cst_190 {dimension_numbers = #tpu.dot_dimension_numbers<[0], [0], [1], [1], [0, 1, 1, 1], [], []>} : vector<3x128xf32>, vector<3x128xf32>, vector<128x128xf32> -> vector<128x128xf32>
      %c1_191 = arith.constant 1 : index
      %c0_192 = arith.constant 0 : index
      %c0_193 = arith.constant 0 : index
      %257 = vector.load %arg2[%c1_191, %c0_192, %c0_193] : memref<2x3x128xf32, #tpu.memory_space<vmem>>, vector<1x3x128xf32>
      %258 = vector.shape_cast %257 : vector<1x3x128xf32> to vector<3x128xf32>
      %cst_194 = arith.constant dense<0.000000e+00> : vector<128x128xf32>
      %259 = tpu.matmul %258, %250, %cst_194 {dimension_numbers = #tpu.dot_dimension_numbers<[0], [0], [1], [1], [0, 1, 1, 1], [], []>} : vector<3x128xf32>, vector<3x128xf32>, vector<128x128xf32> -> vector<128x128xf32>
      %260 = tpu.concatenate %256, %259 in 0 : vector<128x128xf32>, vector<128x128xf32> -> vector<256x128xf32>
      %261 = vector.broadcast %251 : vector<1x128xf32> to vector<256x128xf32>
      %262 = arith.addf %260, %261 : vector<256x128xf32>
      %cst_195 = arith.constant 0.000000e+00 : f32
      %263 = vector.broadcast %cst_195 : f32 to vector<256x128xf32>
      %264 = arith.maximumf %262, %263 : vector<256x128xf32>
      %cst_196 = arith.constant dense<0.000000e+00> : vector<256x128xf32>
      %265 = tpu.matmul %264, %252, %cst_196 {dimension_numbers = #tpu.dot_dimension_numbers<[1], [0], [0], [1], [0, 0, 1, 1], [], []>} : vector<256x128xf32>, vector<128x128xf32>, vector<256x128xf32> -> vector<256x128xf32>
      %266 = vector.broadcast %253 : vector<1x128xf32> to vector<256x128xf32>
      %267 = arith.addf %265, %266 : vector<256x128xf32>
      %cst_197 = arith.constant 0.000000e+00 : f32
      %268 = vector.broadcast %cst_197 : f32 to vector<256x128xf32>
      %269 = arith.maximumf %267, %268 : vector<256x128xf32>
      %270 = vector.extract_strided_slice %269 {offsets = [0, 0], sizes = [128, 128], strides = [1, 1]} : vector<256x128xf32> to vector<128x128xf32>
      %cst_198 = arith.constant dense<0xFF800000> : vector<128xf32>
      %271 = vector.multi_reduction <maximumf>, %270, %cst_198 [0] : vector<128x128xf32> to vector<128xf32>
      %272 = vector.shape_cast %271 : vector<128xf32> to vector<1x128xf32>
      %c0_199 = arith.constant 0 : index
      %c0_200 = arith.constant 0 : index
      %273 = vector.load %arg38[%c0_199, %c0_200] : memref<2x128xf32, #tpu.memory_space<vmem>>, vector<1x128xf32>
      tpu.vector_store %arg38[%c0_199, %c0_200], %272 {strides = array<i32>} : memref<2x128xf32, #tpu.memory_space<vmem>>, vector<1x128xf32>,
      %274 = vector.extract_strided_slice %269 {offsets = [128, 0], sizes = [128, 128], strides = [1, 1]} : vector<256x128xf32> to vector<128x128xf32>
      %cst_201 = arith.constant dense<0xFF800000> : vector<128xf32>
      %275 = vector.multi_reduction <maximumf>, %274, %cst_201 [0] : vector<128x128xf32> to vector<128xf32>
      %276 = vector.shape_cast %275 : vector<128xf32> to vector<1x128xf32>
      %c1_202 = arith.constant 1 : index
      %c0_203 = arith.constant 0 : index
      %277 = vector.load %arg38[%c1_202, %c0_203] : memref<2x128xf32, #tpu.memory_space<vmem>>, vector<1x128xf32>
      tpu.vector_store %arg38[%c1_202, %c0_203], %276 {strides = array<i32>} : memref<2x128xf32, #tpu.memory_space<vmem>>, vector<1x128xf32>,
      %c0_204 = arith.constant 0 : index
      %c0_205 = arith.constant 0 : index
      %278 = vector.load %arg38[%c0_204, %c0_205] : memref<2x128xf32, #tpu.memory_space<vmem>>, vector<2x128xf32>
      %c0_206 = arith.constant 0 : index
      %c0_207 = arith.constant 0 : index
      %279 = vector.load %arg24[%c0_206, %c0_207] : memref<18x128xf32, #tpu.memory_space<vmem>>, vector<18x128xf32>
      %c0_208 = arith.constant 0 : index
      %c0_209 = arith.constant 0 : index
      %280 = vector.load %arg25[%c0_208, %c0_209] : memref<1x128xf32, #tpu.memory_space<vmem>>, vector<1x128xf32>
      %c0_210 = arith.constant 0 : index
      %c0_211 = arith.constant 0 : index
      %281 = vector.load %arg26[%c0_210, %c0_211] : memref<128x128xf32, #tpu.memory_space<vmem>>, vector<128x128xf32>
      %c0_212 = arith.constant 0 : index
      %c0_213 = arith.constant 0 : index
      %282 = vector.load %arg27[%c0_212, %c0_213] : memref<1x128xf32, #tpu.memory_space<vmem>>, vector<1x128xf32>
      %c0_214 = arith.constant 0 : index
      %c0_215 = arith.constant 0 : index
      %c0_216 = arith.constant 0 : index
      %283 = vector.load %arg3[%c0_214, %c0_215, %c0_216] : memref<2x18x64xf32, #tpu.memory_space<vmem>>, vector<1x18x64xf32>
      %284 = vector.shape_cast %283 : vector<1x18x64xf32> to vector<18x64xf32>
      %cst_217 = arith.constant dense<0.000000e+00> : vector<64x128xf32>
      %285 = tpu.matmul %284, %279, %cst_217 {dimension_numbers = #tpu.dot_dimension_numbers<[0], [0], [1], [1], [0, 1, 1, 1], [], []>} : vector<18x64xf32>, vector<18x128xf32>, vector<64x128xf32> -> vector<64x128xf32>
      %c1_218 = arith.constant 1 : index
      %c0_219 = arith.constant 0 : index
      %c0_220 = arith.constant 0 : index
      %286 = vector.load %arg3[%c1_218, %c0_219, %c0_220] : memref<2x18x64xf32, #tpu.memory_space<vmem>>, vector<1x18x64xf32>
      %287 = vector.shape_cast %286 : vector<1x18x64xf32> to vector<18x64xf32>
      %cst_221 = arith.constant dense<0.000000e+00> : vector<64x128xf32>
      %288 = tpu.matmul %287, %279, %cst_221 {dimension_numbers = #tpu.dot_dimension_numbers<[0], [0], [1], [1], [0, 1, 1, 1], [], []>} : vector<18x64xf32>, vector<18x128xf32>, vector<64x128xf32> -> vector<64x128xf32>
      %289 = tpu.concatenate %285, %288 in 0 : vector<64x128xf32>, vector<64x128xf32> -> vector<128x128xf32>
      %290 = vector.broadcast %280 : vector<1x128xf32> to vector<128x128xf32>
      %291 = arith.addf %289, %290 : vector<128x128xf32>
      %cst_222 = arith.constant 0.000000e+00 : f32
      %292 = vector.broadcast %cst_222 : f32 to vector<128x128xf32>
      %293 = arith.maximumf %291, %292 : vector<128x128xf32>
      %cst_223 = arith.constant dense<0.000000e+00> : vector<128x128xf32>
      %294 = tpu.matmul %293, %281, %cst_223 {dimension_numbers = #tpu.dot_dimension_numbers<[1], [0], [0], [1], [0, 0, 1, 1], [], []>} : vector<128x128xf32>, vector<128x128xf32>, vector<128x128xf32> -> vector<128x128xf32>
      %295 = vector.broadcast %282 : vector<1x128xf32> to vector<128x128xf32>
      %296 = arith.addf %294, %295 : vector<128x128xf32>
      %cst_224 = arith.constant 0.000000e+00 : f32
      %297 = vector.broadcast %cst_224 : f32 to vector<128x128xf32>
      %298 = arith.maximumf %296, %297 : vector<128x128xf32>
      %299 = vector.extract_strided_slice %298 {offsets = [0, 0], sizes = [64, 128], strides = [1, 1]} : vector<128x128xf32> to vector<64x128xf32>
      %cst_225 = arith.constant dense<0xFF800000> : vector<128xf32>
      %300 = vector.multi_reduction <maximumf>, %299, %cst_225 [0] : vector<64x128xf32> to vector<128xf32>
      %301 = vector.shape_cast %300 : vector<128xf32> to vector<1x128xf32>
      %c0_226 = arith.constant 0 : index
      %c0_227 = arith.constant 0 : index
      %302 = vector.load %arg39[%c0_226, %c0_227] : memref<2x128xf32, #tpu.memory_space<vmem>>, vector<1x128xf32>
      tpu.vector_store %arg39[%c0_226, %c0_227], %301 {strides = array<i32>} : memref<2x128xf32, #tpu.memory_space<vmem>>, vector<1x128xf32>,
      %303 = vector.extract_strided_slice %298 {offsets = [64, 0], sizes = [64, 128], strides = [1, 1]} : vector<128x128xf32> to vector<64x128xf32>
      %cst_228 = arith.constant dense<0xFF800000> : vector<128xf32>
      %304 = vector.multi_reduction <maximumf>, %303, %cst_228 [0] : vector<64x128xf32> to vector<128xf32>
      %305 = vector.shape_cast %304 : vector<128xf32> to vector<1x128xf32>
      %c1_229 = arith.constant 1 : index
      %c0_230 = arith.constant 0 : index
      %306 = vector.load %arg39[%c1_229, %c0_230] : memref<2x128xf32, #tpu.memory_space<vmem>>, vector<1x128xf32>
      tpu.vector_store %arg39[%c1_229, %c0_230], %305 {strides = array<i32>} : memref<2x128xf32, #tpu.memory_space<vmem>>, vector<1x128xf32>,
      %c0_231 = arith.constant 0 : index
      %c0_232 = arith.constant 0 : index
      %307 = vector.load %arg39[%c0_231, %c0_232] : memref<2x128xf32, #tpu.memory_space<vmem>>, vector<2x128xf32>
      %c0_233 = arith.constant 0 : index
      %c0_234 = arith.constant 0 : index
      %c0_235 = arith.constant 0 : index
      %308 = vector.load %arg28[%c0_233, %c0_234, %c0_235] : memref<3x128x128xf32, #tpu.memory_space<vmem>>, vector<1x128x128xf32>
      %309 = vector.shape_cast %308 : vector<1x128x128xf32> to vector<128x128xf32>
      %cst_236 = arith.constant dense<0.000000e+00> : vector<2x128xf32>
      %310 = tpu.matmul %278, %309, %cst_236 {dimension_numbers = #tpu.dot_dimension_numbers<[1], [0], [0], [1], [0, 0, 1, 1], [], []>} : vector<2x128xf32>, vector<128x128xf32>, vector<2x128xf32> -> vector<2x128xf32>
      %c1_237 = arith.constant 1 : index
      %c0_238 = arith.constant 0 : index
      %c0_239 = arith.constant 0 : index
      %311 = vector.load %arg28[%c1_237, %c0_238, %c0_239] : memref<3x128x128xf32, #tpu.memory_space<vmem>>, vector<1x128x128xf32>
      %312 = vector.shape_cast %311 : vector<1x128x128xf32> to vector<128x128xf32>
      %cst_240 = arith.constant dense<0.000000e+00> : vector<2x128xf32>
      %313 = tpu.matmul %307, %312, %cst_240 {dimension_numbers = #tpu.dot_dimension_numbers<[1], [0], [0], [1], [0, 0, 1, 1], [], []>} : vector<2x128xf32>, vector<128x128xf32>, vector<2x128xf32> -> vector<2x128xf32>
      %314 = arith.addf %310, %313 : vector<2x128xf32>
      %c2_241 = arith.constant 2 : index
      %c0_242 = arith.constant 0 : index
      %c0_243 = arith.constant 0 : index
      %315 = vector.load %arg28[%c2_241, %c0_242, %c0_243] : memref<3x128x128xf32, #tpu.memory_space<vmem>>, vector<1x128x128xf32>
      %316 = vector.shape_cast %315 : vector<1x128x128xf32> to vector<128x128xf32>
      %cst_244 = arith.constant dense<0.000000e+00> : vector<2x128xf32>
      %317 = tpu.matmul %248, %316, %cst_244 {dimension_numbers = #tpu.dot_dimension_numbers<[1], [0], [0], [1], [0, 0, 1, 1], [], []>} : vector<2x128xf32>, vector<128x128xf32>, vector<2x128xf32> -> vector<2x128xf32>
      %318 = arith.addf %314, %317 : vector<2x128xf32>
      %c0_245 = arith.constant 0 : index
      %c0_246 = arith.constant 0 : index
      %319 = vector.load %arg29[%c0_245, %c0_246] : memref<1x128xf32, #tpu.memory_space<vmem>>, vector<1x128xf32>
      %320 = vector.broadcast %319 : vector<1x128xf32> to vector<2x128xf32>
      %321 = arith.addf %318, %320 : vector<2x128xf32>
      %cst_247 = arith.constant 0.000000e+00 : f32
      %322 = vector.broadcast %cst_247 : f32 to vector<2x128xf32>
      %323 = arith.maximumf %321, %322 : vector<2x128xf32>
      %c0_248 = arith.constant 0 : index
      %c0_249 = arith.constant 0 : index
      %324 = vector.load %arg30[%c0_248, %c0_249] : memref<128x128xf32, #tpu.memory_space<vmem>>, vector<128x128xf32>
      %cst_250 = arith.constant dense<0.000000e+00> : vector<2x128xf32>
      %325 = tpu.matmul %323, %324, %cst_250 {dimension_numbers = #tpu.dot_dimension_numbers<[1], [0], [0], [1], [0, 0, 1, 1], [], []>} : vector<2x128xf32>, vector<128x128xf32>, vector<2x128xf32> -> vector<2x128xf32>
      %c0_251 = arith.constant 0 : index
      %c0_252 = arith.constant 0 : index
      %326 = vector.load %arg31[%c0_251, %c0_252] : memref<1x128xf32, #tpu.memory_space<vmem>>, vector<1x128xf32>
      %327 = vector.broadcast %326 : vector<1x128xf32> to vector<2x128xf32>
      %328 = arith.addf %325, %327 : vector<2x128xf32>
      %c0_253 = arith.constant 0 : index
      %c0_254 = arith.constant 0 : index
      %329 = vector.load %arg41[%c0_253, %c0_254] : memref<2x128xf32, #tpu.memory_space<vmem>>, vector<2x128xf32>
      tpu.vector_store %arg41[%c0_253, %c0_254], %328 {strides = array<i32>} : memref<2x128xf32, #tpu.memory_space<vmem>>, vector<2x128xf32>,
      %c0_255 = arith.constant 0 : index
      %c0_256 = arith.constant 0 : index
      %c0_257 = arith.constant 0 : index
      %330 = vector.load %arg32[%c0_255, %c0_256, %c0_257] : memref<3x128x128xf32, #tpu.memory_space<vmem>>, vector<1x128x128xf32>
      %331 = vector.shape_cast %330 : vector<1x128x128xf32> to vector<128x128xf32>
      %cst_258 = arith.constant dense<0.000000e+00> : vector<2x128xf32>
      %332 = tpu.matmul %248, %331, %cst_258 {dimension_numbers = #tpu.dot_dimension_numbers<[1], [0], [0], [1], [0, 0, 1, 1], [], []>} : vector<2x128xf32>, vector<128x128xf32>, vector<2x128xf32> -> vector<2x128xf32>
      %c0_259 = arith.constant 0 : index
      %c0_260 = arith.constant 0 : index
      %c0_261 = arith.constant 0 : index
      %333 = vector.load %arg33[%c0_259, %c0_260, %c0_261] : memref<3x1x128xf32, #tpu.memory_space<vmem>>, vector<1x1x128xf32>
      %334 = vector.shape_cast %333 : vector<1x1x128xf32> to vector<1x128xf32>
      %335 = vector.broadcast %334 : vector<1x128xf32> to vector<2x128xf32>
      %336 = arith.addf %332, %335 : vector<2x128xf32>
      %cst_262 = arith.constant 0.000000e+00 : f32
      %337 = vector.broadcast %cst_262 : f32 to vector<2x128xf32>
      %338 = arith.maximumf %336, %337 : vector<2x128xf32>
      %c0_263 = arith.constant 0 : index
      %c0_264 = arith.constant 0 : index
      %c0_265 = arith.constant 0 : index
      %339 = vector.load %arg34[%c0_263, %c0_264, %c0_265] : memref<3x128x128xf32, #tpu.memory_space<vmem>>, vector<1x128x128xf32>
      %340 = vector.shape_cast %339 : vector<1x128x128xf32> to vector<128x128xf32>
      %cst_266 = arith.constant dense<0.000000e+00> : vector<2x128xf32>
      %341 = tpu.matmul %338, %340, %cst_266 {dimension_numbers = #tpu.dot_dimension_numbers<[1], [0], [0], [1], [0, 0, 1, 1], [], []>} : vector<2x128xf32>, vector<128x128xf32>, vector<2x128xf32> -> vector<2x128xf32>
      %c0_267 = arith.constant 0 : index
      %c0_268 = arith.constant 0 : index
      %c0_269 = arith.constant 0 : index
      %342 = vector.load %arg35[%c0_267, %c0_268, %c0_269] : memref<3x1x128xf32, #tpu.memory_space<vmem>>, vector<1x1x128xf32>
      %343 = vector.shape_cast %342 : vector<1x1x128xf32> to vector<1x128xf32>
      %344 = vector.broadcast %343 : vector<1x128xf32> to vector<2x128xf32>
      %345 = arith.addf %341, %344 : vector<2x128xf32>
      %cst_270 = arith.constant 0.000000e+00 : f32
      %346 = vector.broadcast %cst_270 : f32 to vector<2x128xf32>
      %347 = arith.maximumf %345, %346 : vector<2x128xf32>
      %c0_271 = arith.constant 0 : index
      %c0_272 = arith.constant 0 : index
      %c0_273 = arith.constant 0 : index
      %348 = vector.load %arg36[%c0_271, %c0_272, %c0_273] : memref<3x128x128xf32, #tpu.memory_space<vmem>>, vector<1x128x128xf32>
      %349 = vector.shape_cast %348 : vector<1x128x128xf32> to vector<128x128xf32>
      %cst_274 = arith.constant dense<0.000000e+00> : vector<2x128xf32>
      %350 = tpu.matmul %347, %349, %cst_274 {dimension_numbers = #tpu.dot_dimension_numbers<[1], [0], [0], [1], [0, 0, 1, 1], [], []>} : vector<2x128xf32>, vector<128x128xf32>, vector<2x128xf32> -> vector<2x128xf32>
      %c0_275 = arith.constant 0 : index
      %c0_276 = arith.constant 0 : index
      %c0_277 = arith.constant 0 : index
      %351 = vector.load %arg37[%c0_275, %c0_276, %c0_277] : memref<3x1x128xf32, #tpu.memory_space<vmem>>, vector<1x1x128xf32>
      %352 = vector.shape_cast %351 : vector<1x1x128xf32> to vector<1x128xf32>
      %353 = vector.broadcast %352 : vector<1x128xf32> to vector<2x128xf32>
      %354 = arith.addf %350, %353 : vector<2x128xf32>
      %c0_278 = arith.constant 0 : index
      %c0_279 = arith.constant 0 : index
      %c0_280 = arith.constant 0 : index
      %355 = vector.load %arg43[%c0_278, %c0_279, %c0_280] : memref<3x2x128xf32, #tpu.memory_space<vmem>>, vector<1x2x128xf32>
      %356 = vector.shape_cast %355 : vector<1x2x128xf32> to vector<2x128xf32>
      %357 = vector.shape_cast %338 : vector<2x128xf32> to vector<1x2x128xf32>
      tpu.vector_store %arg43[%c0_278, %c0_279, %c0_280], %357 {strides = array<i32>} : memref<3x2x128xf32, #tpu.memory_space<vmem>>, vector<1x2x128xf32>,
      %c0_281 = arith.constant 0 : index
      %c0_282 = arith.constant 0 : index
      %c0_283 = arith.constant 0 : index
      %358 = vector.load %arg44[%c0_281, %c0_282, %c0_283] : memref<3x2x128xf32, #tpu.memory_space<vmem>>, vector<1x2x128xf32>
      %359 = vector.shape_cast %358 : vector<1x2x128xf32> to vector<2x128xf32>
      %360 = vector.shape_cast %347 : vector<2x128xf32> to vector<1x2x128xf32>
      tpu.vector_store %arg44[%c0_281, %c0_282, %c0_283], %360 {strides = array<i32>} : memref<3x2x128xf32, #tpu.memory_space<vmem>>, vector<1x2x128xf32>,
      %c0_284 = arith.constant 0 : index
      %c0_285 = arith.constant 0 : index
      %c0_286 = arith.constant 0 : index
      %361 = vector.load %arg42[%c0_284, %c0_285, %c0_286] : memref<3x2x128xf32, #tpu.memory_space<vmem>>, vector<1x2x128xf32>
      %362 = vector.shape_cast %361 : vector<1x2x128xf32> to vector<2x128xf32>
      %363 = vector.shape_cast %354 : vector<2x128xf32> to vector<1x2x128xf32>
      tpu.vector_store %arg42[%c0_284, %c0_285, %c0_286], %363 {strides = array<i32>} : memref<3x2x128xf32, #tpu.memory_space<vmem>>, vector<1x2x128xf32>,
      %c1_287 = arith.constant 1 : index
      %c0_288 = arith.constant 0 : index
      %c0_289 = arith.constant 0 : index
      %364 = vector.load %arg32[%c1_287, %c0_288, %c0_289] : memref<3x128x128xf32, #tpu.memory_space<vmem>>, vector<1x128x128xf32>
      %365 = vector.shape_cast %364 : vector<1x128x128xf32> to vector<128x128xf32>
      %cst_290 = arith.constant dense<0.000000e+00> : vector<2x128xf32>
      %366 = tpu.matmul %278, %365, %cst_290 {dimension_numbers = #tpu.dot_dimension_numbers<[1], [0], [0], [1], [0, 0, 1, 1], [], []>} : vector<2x128xf32>, vector<128x128xf32>, vector<2x128xf32> -> vector<2x128xf32>
      %c1_291 = arith.constant 1 : index
      %c0_292 = arith.constant 0 : index
      %c0_293 = arith.constant 0 : index
      %367 = vector.load %arg33[%c1_291, %c0_292, %c0_293] : memref<3x1x128xf32, #tpu.memory_space<vmem>>, vector<1x1x128xf32>
      %368 = vector.shape_cast %367 : vector<1x1x128xf32> to vector<1x128xf32>
      %369 = vector.broadcast %368 : vector<1x128xf32> to vector<2x128xf32>
      %370 = arith.addf %366, %369 : vector<2x128xf32>
      %cst_294 = arith.constant 0.000000e+00 : f32
      %371 = vector.broadcast %cst_294 : f32 to vector<2x128xf32>
      %372 = arith.maximumf %370, %371 : vector<2x128xf32>
      %c1_295 = arith.constant 1 : index
      %c0_296 = arith.constant 0 : index
      %c0_297 = arith.constant 0 : index
      %373 = vector.load %arg34[%c1_295, %c0_296, %c0_297] : memref<3x128x128xf32, #tpu.memory_space<vmem>>, vector<1x128x128xf32>
      %374 = vector.shape_cast %373 : vector<1x128x128xf32> to vector<128x128xf32>
      %cst_298 = arith.constant dense<0.000000e+00> : vector<2x128xf32>
      %375 = tpu.matmul %372, %374, %cst_298 {dimension_numbers = #tpu.dot_dimension_numbers<[1], [0], [0], [1], [0, 0, 1, 1], [], []>} : vector<2x128xf32>, vector<128x128xf32>, vector<2x128xf32> -> vector<2x128xf32>
      %c1_299 = arith.constant 1 : index
      %c0_300 = arith.constant 0 : index
      %c0_301 = arith.constant 0 : index
      %376 = vector.load %arg35[%c1_299, %c0_300, %c0_301] : memref<3x1x128xf32, #tpu.memory_space<vmem>>, vector<1x1x128xf32>
      %377 = vector.shape_cast %376 : vector<1x1x128xf32> to vector<1x128xf32>
      %378 = vector.broadcast %377 : vector<1x128xf32> to vector<2x128xf32>
      %379 = arith.addf %375, %378 : vector<2x128xf32>
      %cst_302 = arith.constant 0.000000e+00 : f32
      %380 = vector.broadcast %cst_302 : f32 to vector<2x128xf32>
      %381 = arith.maximumf %379, %380 : vector<2x128xf32>
      %c1_303 = arith.constant 1 : index
      %c0_304 = arith.constant 0 : index
      %c0_305 = arith.constant 0 : index
      %382 = vector.load %arg36[%c1_303, %c0_304, %c0_305] : memref<3x128x128xf32, #tpu.memory_space<vmem>>, vector<1x128x128xf32>
      %383 = vector.shape_cast %382 : vector<1x128x128xf32> to vector<128x128xf32>
      %cst_306 = arith.constant dense<0.000000e+00> : vector<2x128xf32>
      %384 = tpu.matmul %381, %383, %cst_306 {dimension_numbers = #tpu.dot_dimension_numbers<[1], [0], [0], [1], [0, 0, 1, 1], [], []>} : vector<2x128xf32>, vector<128x128xf32>, vector<2x128xf32> -> vector<2x128xf32>
      %c1_307 = arith.constant 1 : index
      %c0_308 = arith.constant 0 : index
      %c0_309 = arith.constant 0 : index
      %385 = vector.load %arg37[%c1_307, %c0_308, %c0_309] : memref<3x1x128xf32, #tpu.memory_space<vmem>>, vector<1x1x128xf32>
      %386 = vector.shape_cast %385 : vector<1x1x128xf32> to vector<1x128xf32>
      %387 = vector.broadcast %386 : vector<1x128xf32> to vector<2x128xf32>
      %388 = arith.addf %384, %387 : vector<2x128xf32>
      %c1_310 = arith.constant 1 : index
      %c0_311 = arith.constant 0 : index
      %c0_312 = arith.constant 0 : index
      %389 = vector.load %arg43[%c1_310, %c0_311, %c0_312] : memref<3x2x128xf32, #tpu.memory_space<vmem>>, vector<1x2x128xf32>
      %390 = vector.shape_cast %389 : vector<1x2x128xf32> to vector<2x128xf32>
      %391 = vector.shape_cast %372 : vector<2x128xf32> to vector<1x2x128xf32>
      tpu.vector_store %arg43[%c1_310, %c0_311, %c0_312], %391 {strides = array<i32>} : memref<3x2x128xf32, #tpu.memory_space<vmem>>, vector<1x2x128xf32>,
      %c1_313 = arith.constant 1 : index
      %c0_314 = arith.constant 0 : index
      %c0_315 = arith.constant 0 : index
      %392 = vector.load %arg44[%c1_313, %c0_314, %c0_315] : memref<3x2x128xf32, #tpu.memory_space<vmem>>, vector<1x2x128xf32>
      %393 = vector.shape_cast %392 : vector<1x2x128xf32> to vector<2x128xf32>
      %394 = vector.shape_cast %381 : vector<2x128xf32> to vector<1x2x128xf32>
      tpu.vector_store %arg44[%c1_313, %c0_314, %c0_315], %394 {strides = array<i32>} : memref<3x2x128xf32, #tpu.memory_space<vmem>>, vector<1x2x128xf32>,
      %c1_316 = arith.constant 1 : index
      %c0_317 = arith.constant 0 : index
      %c0_318 = arith.constant 0 : index
      %395 = vector.load %arg42[%c1_316, %c0_317, %c0_318] : memref<3x2x128xf32, #tpu.memory_space<vmem>>, vector<1x2x128xf32>
      %396 = vector.shape_cast %395 : vector<1x2x128xf32> to vector<2x128xf32>
      %397 = vector.shape_cast %388 : vector<2x128xf32> to vector<1x2x128xf32>
      tpu.vector_store %arg42[%c1_316, %c0_317, %c0_318], %397 {strides = array<i32>} : memref<3x2x128xf32, #tpu.memory_space<vmem>>, vector<1x2x128xf32>,
      %c2_319 = arith.constant 2 : index
      %c0_320 = arith.constant 0 : index
      %c0_321 = arith.constant 0 : index
      %398 = vector.load %arg32[%c2_319, %c0_320, %c0_321] : memref<3x128x128xf32, #tpu.memory_space<vmem>>, vector<1x128x128xf32>
      %399 = vector.shape_cast %398 : vector<1x128x128xf32> to vector<128x128xf32>
      %cst_322 = arith.constant dense<0.000000e+00> : vector<2x128xf32>
      %400 = tpu.matmul %307, %399, %cst_322 {dimension_numbers = #tpu.dot_dimension_numbers<[1], [0], [0], [1], [0, 0, 1, 1], [], []>} : vector<2x128xf32>, vector<128x128xf32>, vector<2x128xf32> -> vector<2x128xf32>
      %c2_323 = arith.constant 2 : index
      %c0_324 = arith.constant 0 : index
      %c0_325 = arith.constant 0 : index
      %401 = vector.load %arg33[%c2_323, %c0_324, %c0_325] : memref<3x1x128xf32, #tpu.memory_space<vmem>>, vector<1x1x128xf32>
      %402 = vector.shape_cast %401 : vector<1x1x128xf32> to vector<1x128xf32>
      %403 = vector.broadcast %402 : vector<1x128xf32> to vector<2x128xf32>
      %404 = arith.addf %400, %403 : vector<2x128xf32>
      %cst_326 = arith.constant 0.000000e+00 : f32
      %405 = vector.broadcast %cst_326 : f32 to vector<2x128xf32>
      %406 = arith.maximumf %404, %405 : vector<2x128xf32>
      %c2_327 = arith.constant 2 : index
      %c0_328 = arith.constant 0 : index
      %c0_329 = arith.constant 0 : index
      %407 = vector.load %arg34[%c2_327, %c0_328, %c0_329] : memref<3x128x128xf32, #tpu.memory_space<vmem>>, vector<1x128x128xf32>
      %408 = vector.shape_cast %407 : vector<1x128x128xf32> to vector<128x128xf32>
      %cst_330 = arith.constant dense<0.000000e+00> : vector<2x128xf32>
      %409 = tpu.matmul %406, %408, %cst_330 {dimension_numbers = #tpu.dot_dimension_numbers<[1], [0], [0], [1], [0, 0, 1, 1], [], []>} : vector<2x128xf32>, vector<128x128xf32>, vector<2x128xf32> -> vector<2x128xf32>
      %c2_331 = arith.constant 2 : index
      %c0_332 = arith.constant 0 : index
      %c0_333 = arith.constant 0 : index
      %410 = vector.load %arg35[%c2_331, %c0_332, %c0_333] : memref<3x1x128xf32, #tpu.memory_space<vmem>>, vector<1x1x128xf32>
      %411 = vector.shape_cast %410 : vector<1x1x128xf32> to vector<1x128xf32>
      %412 = vector.broadcast %411 : vector<1x128xf32> to vector<2x128xf32>
      %413 = arith.addf %409, %412 : vector<2x128xf32>
      %cst_334 = arith.constant 0.000000e+00 : f32
      %414 = vector.broadcast %cst_334 : f32 to vector<2x128xf32>
      %415 = arith.maximumf %413, %414 : vector<2x128xf32>
      %c2_335 = arith.constant 2 : index
      %c0_336 = arith.constant 0 : index
      %c0_337 = arith.constant 0 : index
      %416 = vector.load %arg36[%c2_335, %c0_336, %c0_337] : memref<3x128x128xf32, #tpu.memory_space<vmem>>, vector<1x128x128xf32>
      %417 = vector.shape_cast %416 : vector<1x128x128xf32> to vector<128x128xf32>
      %cst_338 = arith.constant dense<0.000000e+00> : vector<2x128xf32>
      %418 = tpu.matmul %415, %417, %cst_338 {dimension_numbers = #tpu.dot_dimension_numbers<[1], [0], [0], [1], [0, 0, 1, 1], [], []>} : vector<2x128xf32>, vector<128x128xf32>, vector<2x128xf32> -> vector<2x128xf32>
      %c2_339 = arith.constant 2 : index
      %c0_340 = arith.constant 0 : index
      %c0_341 = arith.constant 0 : index
      %419 = vector.load %arg37[%c2_339, %c0_340, %c0_341] : memref<3x1x128xf32, #tpu.memory_space<vmem>>, vector<1x1x128xf32>
      %420 = vector.shape_cast %419 : vector<1x1x128xf32> to vector<1x128xf32>
      %421 = vector.broadcast %420 : vector<1x128xf32> to vector<2x128xf32>
      %422 = arith.addf %418, %421 : vector<2x128xf32>
      %c2_342 = arith.constant 2 : index
      %c0_343 = arith.constant 0 : index
      %c0_344 = arith.constant 0 : index
      %423 = vector.load %arg43[%c2_342, %c0_343, %c0_344] : memref<3x2x128xf32, #tpu.memory_space<vmem>>, vector<1x2x128xf32>
      %424 = vector.shape_cast %423 : vector<1x2x128xf32> to vector<2x128xf32>
      %425 = vector.shape_cast %406 : vector<2x128xf32> to vector<1x2x128xf32>
      tpu.vector_store %arg43[%c2_342, %c0_343, %c0_344], %425 {strides = array<i32>} : memref<3x2x128xf32, #tpu.memory_space<vmem>>, vector<1x2x128xf32>,
      %c2_345 = arith.constant 2 : index
      %c0_346 = arith.constant 0 : index
      %c0_347 = arith.constant 0 : index
      %426 = vector.load %arg44[%c2_345, %c0_346, %c0_347] : memref<3x2x128xf32, #tpu.memory_space<vmem>>, vector<1x2x128xf32>
      %427 = vector.shape_cast %426 : vector<1x2x128xf32> to vector<2x128xf32>
      %428 = vector.shape_cast %415 : vector<2x128xf32> to vector<1x2x128xf32>
      tpu.vector_store %arg44[%c2_345, %c0_346, %c0_347], %428 {strides = array<i32>} : memref<3x2x128xf32, #tpu.memory_space<vmem>>, vector<1x2x128xf32>,
      %c2_348 = arith.constant 2 : index
      %c0_349 = arith.constant 0 : index
      %c0_350 = arith.constant 0 : index
      %429 = vector.load %arg42[%c2_348, %c0_349, %c0_350] : memref<3x2x128xf32, #tpu.memory_space<vmem>>, vector<1x2x128xf32>
      %430 = vector.shape_cast %429 : vector<1x2x128xf32> to vector<2x128xf32>
      %431 = vector.shape_cast %422 : vector<2x128xf32> to vector<1x2x128xf32>
      tpu.vector_store %arg42[%c2_348, %c0_349, %c0_350], %431 {strides = array<i32>} : memref<3x2x128xf32, #tpu.memory_space<vmem>>, vector<1x2x128xf32>,
    } else {
    }
    return
  }
  func.func @transform_0(%arg0: i32, %arg1: i32) -> (i32, i32, i32) {
    %c0_i32 = arith.constant 0 : i32
    %c0_i32_0 = arith.constant 0 : i32
    %c0_i32_1 = arith.constant 0 : i32
    return %arg0, %c0_i32, %c0_i32_0 : i32, i32, i32
  }
  func.func @transform_1(%arg0: i32, %arg1: i32) -> (i32, i32, i32) {
    %c0_i32 = arith.constant 0 : i32
    %c0_i32_0 = arith.constant 0 : i32
    %c0_i32_1 = arith.constant 0 : i32
    return %arg0, %c0_i32, %c0_i32_0 : i32, i32, i32
  }
  func.func @transform_2(%arg0: i32, %arg1: i32) -> (i32, i32) {
    %c0_i32 = arith.constant 0 : i32
    return %arg0, %arg1 : i32, i32
  }
  func.func @transform_3(%arg0: i32, %arg1: i32) -> (i32, i32) {
    %c0_i32 = arith.constant 0 : i32
    return %arg0, %arg1 : i32, i32
  }
  func.func @transform_4(%arg0: i32, %arg1: i32) -> (i32, i32) {
    %c0_i32 = arith.constant 0 : i32
    return %arg0, %arg1 : i32, i32
  }
  func.func @transform_5(%arg0: i32, %arg1: i32) -> (i32, i32) {
    %c0_i32 = arith.constant 0 : i32
    return %arg0, %arg1 : i32, i32
  }
  func.func @transform_6(%arg0: i32, %arg1: i32) -> (i32, i32) {
    %c0_i32 = arith.constant 0 : i32
    return %arg0, %arg1 : i32, i32
  }
  func.func @transform_7(%arg0: i32, %arg1: i32) -> (i32, i32) {
    %c0_i32 = arith.constant 0 : i32
    return %arg0, %arg1 : i32, i32
  }
  func.func @transform_8(%arg0: i32, %arg1: i32) -> (i32, i32) {
    %c0_i32 = arith.constant 0 : i32
    return %arg0, %arg1 : i32, i32
  }
  func.func @transform_9(%arg0: i32, %arg1: i32) -> (i32, i32) {
    %c0_i32 = arith.constant 0 : i32
    return %arg0, %arg1 : i32, i32
  }
  func.func @transform_10(%arg0: i32, %arg1: i32) -> (i32, i32) {
    %c0_i32 = arith.constant 0 : i32
    return %arg0, %arg1 : i32, i32
  }
  func.func @transform_11(%arg0: i32, %arg1: i32) -> (i32, i32) {
    %c0_i32 = arith.constant 0 : i32
    return %arg0, %arg1 : i32, i32
  }
  func.func @transform_12(%arg0: i32, %arg1: i32) -> (i32, i32) {
    %c0_i32 = arith.constant 0 : i32
    return %arg0, %arg1 : i32, i32
  }
  func.func @transform_13(%arg0: i32, %arg1: i32) -> (i32, i32) {
    %c0_i32 = arith.constant 0 : i32
    return %arg0, %arg1 : i32, i32
  }
  func.func @transform_14(%arg0: i32, %arg1: i32) -> (i32, i32) {
    %c0_i32 = arith.constant 0 : i32
    %c0_i32_0 = arith.constant 0 : i32
    return %arg1, %c0_i32 : i32, i32
  }
  func.func @transform_15(%arg0: i32, %arg1: i32) -> (i32, i32) {
    %c0_i32 = arith.constant 0 : i32
    %c0_i32_0 = arith.constant 0 : i32
    %c0_i32_1 = arith.constant 0 : i32
    return %c0_i32, %c0_i32_0 : i32, i32
  }
  func.func @transform_16(%arg0: i32, %arg1: i32) -> (i32, i32) {
    %c0_i32 = arith.constant 0 : i32
    %c0_i32_0 = arith.constant 0 : i32
    %c0_i32_1 = arith.constant 0 : i32
    return %c0_i32, %c0_i32_0 : i32, i32
  }
  func.func @transform_17(%arg0: i32, %arg1: i32) -> (i32, i32) {
    %c0_i32 = arith.constant 0 : i32
    %c0_i32_0 = arith.constant 0 : i32
    %c0_i32_1 = arith.constant 0 : i32
    return %c0_i32, %c0_i32_0 : i32, i32
  }
  func.func @transform_18(%arg0: i32, %arg1: i32) -> (i32, i32) {
    %c0_i32 = arith.constant 0 : i32
    %c0_i32_0 = arith.constant 0 : i32
    %c0_i32_1 = arith.constant 0 : i32
    return %c0_i32, %c0_i32_0 : i32, i32
  }
  func.func @transform_19(%arg0: i32, %arg1: i32) -> (i32, i32) {
    %c0_i32 = arith.constant 0 : i32
    %c0_i32_0 = arith.constant 0 : i32
    %c0_i32_1 = arith.constant 0 : i32
    return %c0_i32, %c0_i32_0 : i32, i32
  }
  func.func @transform_20(%arg0: i32, %arg1: i32) -> (i32, i32) {
    %c0_i32 = arith.constant 0 : i32
    %c0_i32_0 = arith.constant 0 : i32
    %c0_i32_1 = arith.constant 0 : i32
    return %c0_i32, %c0_i32_0 : i32, i32
  }
  func.func @transform_21(%arg0: i32, %arg1: i32) -> (i32, i32) {
    %c0_i32 = arith.constant 0 : i32
    %c0_i32_0 = arith.constant 0 : i32
    %c0_i32_1 = arith.constant 0 : i32
    return %c0_i32, %c0_i32_0 : i32, i32
  }
  func.func @transform_22(%arg0: i32, %arg1: i32) -> (i32, i32) {
    %c0_i32 = arith.constant 0 : i32
    %c0_i32_0 = arith.constant 0 : i32
    %c0_i32_1 = arith.constant 0 : i32
    return %c0_i32, %c0_i32_0 : i32, i32
  }
  func.func @transform_23(%arg0: i32, %arg1: i32) -> (i32, i32) {
    %c0_i32 = arith.constant 0 : i32
    %c0_i32_0 = arith.constant 0 : i32
    %c0_i32_1 = arith.constant 0 : i32
    return %c0_i32, %c0_i32_0 : i32, i32
  }
  func.func @transform_24(%arg0: i32, %arg1: i32) -> (i32, i32) {
    %c0_i32 = arith.constant 0 : i32
    %c0_i32_0 = arith.constant 0 : i32
    %c0_i32_1 = arith.constant 0 : i32
    return %c0_i32, %c0_i32_0 : i32, i32
  }
  func.func @transform_25(%arg0: i32, %arg1: i32) -> (i32, i32) {
    %c0_i32 = arith.constant 0 : i32
    %c0_i32_0 = arith.constant 0 : i32
    %c0_i32_1 = arith.constant 0 : i32
    return %c0_i32, %c0_i32_0 : i32, i32
  }
  func.func @transform_26(%arg0: i32, %arg1: i32) -> (i32, i32, i32) {
    %c0_i32 = arith.constant 0 : i32
    %c0_i32_0 = arith.constant 0 : i32
    %c0_i32_1 = arith.constant 0 : i32
    %c0_i32_2 = arith.constant 0 : i32
    return %c0_i32, %c0_i32_0, %c0_i32_1 : i32, i32, i32
  }
  func.func @transform_27(%arg0: i32, %arg1: i32) -> (i32, i32) {
    %c0_i32 = arith.constant 0 : i32
    %c0_i32_0 = arith.constant 0 : i32
    %c0_i32_1 = arith.constant 0 : i32
    return %c0_i32, %c0_i32_0 : i32, i32
  }
  func.func @transform_28(%arg0: i32, %arg1: i32) -> (i32, i32) {
    %c0_i32 = arith.constant 0 : i32
    %c0_i32_0 = arith.constant 0 : i32
    %c0_i32_1 = arith.constant 0 : i32
    return %c0_i32, %c0_i32_0 : i32, i32
  }
  func.func @transform_29(%arg0: i32, %arg1: i32) -> (i32, i32) {
    %c0_i32 = arith.constant 0 : i32
    %c0_i32_0 = arith.constant 0 : i32
    %c0_i32_1 = arith.constant 0 : i32
    return %c0_i32, %c0_i32_0 : i32, i32
  }
  func.func @transform_30(%arg0: i32, %arg1: i32) -> (i32, i32, i32) {
    %c0_i32 = arith.constant 0 : i32
    %c0_i32_0 = arith.constant 0 : i32
    %c0_i32_1 = arith.constant 0 : i32
    %c0_i32_2 = arith.constant 0 : i32
    return %c0_i32, %c0_i32_0, %c0_i32_1 : i32, i32, i32
  }
  func.func @transform_31(%arg0: i32, %arg1: i32) -> (i32, i32, i32) {
    %c0_i32 = arith.constant 0 : i32
    %c0_i32_0 = arith.constant 0 : i32
    %c0_i32_1 = arith.constant 0 : i32
    %c0_i32_2 = arith.constant 0 : i32
    return %c0_i32, %c0_i32_0, %c0_i32_1 : i32, i32, i32
  }
  func.func @transform_32(%arg0: i32, %arg1: i32) -> (i32, i32, i32) {
    %c0_i32 = arith.constant 0 : i32
    %c0_i32_0 = arith.constant 0 : i32
    %c0_i32_1 = arith.constant 0 : i32
    %c0_i32_2 = arith.constant 0 : i32
    return %c0_i32, %c0_i32_0, %c0_i32_1 : i32, i32, i32
  }
  func.func @transform_33(%arg0: i32, %arg1: i32) -> (i32, i32, i32) {
    %c0_i32 = arith.constant 0 : i32
    %c0_i32_0 = arith.constant 0 : i32
    %c0_i32_1 = arith.constant 0 : i32
    %c0_i32_2 = arith.constant 0 : i32
    return %c0_i32, %c0_i32_0, %c0_i32_1 : i32, i32, i32
  }
  func.func @transform_34(%arg0: i32, %arg1: i32) -> (i32, i32, i32) {
    %c0_i32 = arith.constant 0 : i32
    %c0_i32_0 = arith.constant 0 : i32
    %c0_i32_1 = arith.constant 0 : i32
    %c0_i32_2 = arith.constant 0 : i32
    return %c0_i32, %c0_i32_0, %c0_i32_1 : i32, i32, i32
  }
  func.func @transform_35(%arg0: i32, %arg1: i32) -> (i32, i32, i32) {
    %c0_i32 = arith.constant 0 : i32
    %c0_i32_0 = arith.constant 0 : i32
    %c0_i32_1 = arith.constant 0 : i32
    %c0_i32_2 = arith.constant 0 : i32
    return %c0_i32, %c0_i32_0, %c0_i32_1 : i32, i32, i32
  }
  func.func @transform_36(%arg0: i32, %arg1: i32) -> (i32, i32) {
    %c0_i32 = arith.constant 0 : i32
    %c0_i32_0 = arith.constant 0 : i32
    return %arg0, %c0_i32 : i32, i32
  }
  func.func @transform_37(%arg0: i32, %arg1: i32) -> (i32, i32) {
    %c0_i32 = arith.constant 0 : i32
    %c0_i32_0 = arith.constant 0 : i32
    return %arg0, %c0_i32 : i32, i32
  }
  func.func @transform_38(%arg0: i32, %arg1: i32) -> (i32, i32) {
    %c0_i32 = arith.constant 0 : i32
    %c0_i32_0 = arith.constant 0 : i32
    return %arg0, %c0_i32 : i32, i32
  }
  func.func @transform_39(%arg0: i32, %arg1: i32) -> (i32, i32) {
    %c0_i32 = arith.constant 0 : i32
    %c0_i32_0 = arith.constant 0 : i32
    return %arg0, %c0_i32 : i32, i32
  }
  func.func @transform_40(%arg0: i32, %arg1: i32) -> (i32, i32, i32) {
    %c0_i32 = arith.constant 0 : i32
    %c0_i32_0 = arith.constant 0 : i32
    %c0_i32_1 = arith.constant 0 : i32
    return %c0_i32, %arg0, %c0_i32_0 : i32, i32, i32
  }
  func.func @transform_41(%arg0: i32, %arg1: i32) -> (i32, i32, i32) {
    %c0_i32 = arith.constant 0 : i32
    %c0_i32_0 = arith.constant 0 : i32
    %c0_i32_1 = arith.constant 0 : i32
    return %c0_i32, %arg0, %c0_i32_0 : i32, i32, i32
  }
  func.func @transform_42(%arg0: i32, %arg1: i32) -> (i32, i32, i32) {
    %c0_i32 = arith.constant 0 : i32
    %c0_i32_0 = arith.constant 0 : i32
    %c0_i32_1 = arith.constant 0 : i32
    return %c0_i32, %arg0, %c0_i32_0 : i32, i32, i32
  }
}

</mosaic_0001>

<bundles_post_ra>
// kernel: tpu_custom_call.1
= control target key start
LH: loop header
LB: loop body
LE: loop exit
PB: predicated region body
PF: predicated region fallthrough
CT: control target
= control target key end

     0   :  { %s11877_s6 = smov 1   ;;  %s11878_s10 = smov 2   ;;  %s13854_s0 = inlined_call_operand.smem [shape: u32[43], index: -1, kind: input, shape index: {}] }
   0x1   :  { %s11966_s5 = sld [smem:[%s13854_s0]]   ;;  %s11879_s14 = smov 3  }
   0x2   :  { %s11971_s9 = sld [smem:[%s13854_s0 + %s11877_s6]]   ;;  %s11880_s18 = smov 4  }
   0x3   :  { %s11976_s13 = sld [smem:[%s13854_s0 + %s11878_s10]]   ;;  %s11881_s22 = smov 5  }
   0x4   :  { %s11981_s17 = sld [smem:[%s13854_s0 + %s11879_s14]]   ;;  %s11882_s26 = smov 6  }
   0x5   :  { %s11986_s21 = sld [smem:[%s13854_s0 + %s11880_s18]]   ;;  %s11883_s30 = smov 7  }
   0x6   :  { %s11991_s25 = sld [smem:[%s13854_s0 + %s11881_s22]]   ;;  %s11884_s4 = smov 8  }
   0x7   :  { %13911 = sst [smem:[#allocation64_spill]] %s11966_s5  ;;  %s11885_s10 = smov 9  }
   0x8   :  { %13912 = sst [smem:[#allocation65_spill]] %s11971_s9  ;;  %s11886_s15 = smov 10  }
   0x9   :  { %13913 = sst [smem:[#allocation66_spill]] %s11976_s13  ;;  %s11887_s20 = smov 11  }
   0xa   :  { %s11996_s29 = sld [smem:[%s13854_s0 + %s11882_s26]]   ;;  %s11888_s26 = smov 12  }
   0xb   :  { %13914 = sst [smem:[#allocation67_spill]] %s11986_s21  ;;  %s11889_s1 = smov 13  }
   0xc   :  { %s12001_s3 = sld [smem:[%s13854_s0 + %s11883_s30]]   ;;  %s11890_s7 = smov 14  }
   0xd   :  { %s12006_s8 = sld [smem:[%s13854_s0 + %s11884_s4]]   ;;  %s11892_s22 = smov 16  }
   0xe   :  { %s12011_s14 = sld [smem:[%s13854_s0 + %s11885_s10]]   ;;  %s11893_s28 = smov 17  }
   0xf   :  { %s12016_s19 = sld [smem:[%s13854_s0 + %s11886_s15]]   ;;  %s11891_s15 = smov 15  }
  0x10   :  { %13915 = sst [smem:[#allocation68_spill]] %s11996_s29 }
  0x11   :  { %s12021_s24 = sld [smem:[%s13854_s0 + %s11887_s20]]  }
  0x12   :  { %13916 = sst [smem:[#allocation69_spill]] %s12001_s3 }
  0x13   :  { %13917 = sst [smem:[#allocation70_spill]] %s12006_s8 }
  0x14   :  { %s12026_s30 = sld [smem:[%s13854_s0 + %s11888_s26]]  }
  0x15   :  { %13918 = sst [smem:[#allocation71_spill]] %s12016_s19 }
  0x16   :  { %s12031_s6 = sld [smem:[%s13854_s0 + %s11889_s1]]  }
  0x17   :  { %s12036_s12 = sld [smem:[%s13854_s0 + %s11890_s7]]   ;;  %s11894_s7 = smov 18  }
  0x18   :  { %s12041_s20 = sld [smem:[%s13854_s0 + %s11891_s15]]   ;;  %s11895_s15 = smov 19  }
  0x19   :  { %s12046_s27 = sld [smem:[%s13854_s0 + %s11892_s22]]   ;;  %s11896_s22 = smov 20  }
  0x1a   :  { %13919 = sst [smem:[#allocation72_spill]] %s12026_s30 }
  0x1b   :  { %s12051_s4 = sld [smem:[%s13854_s0 + %s11893_s28]]   ;;  %s11897_s28 = smov 21  }
  0x1c   :  { %13920 = sst [smem:[#allocation73_spill]] %s12031_s6 }
  0x1d   :  { %13921 = sst [smem:[#allocation74_spill]] %s12036_s12 }
  0x1e   :  { %13922 = sst [smem:[#allocation75_spill]] %s12041_s20 }
  0x1f   :  { %13923 = sst [smem:[#allocation76_spill]] %s12046_s27 }
  0x20   :  { %s12056_s9 = sld [smem:[%s13854_s0 + %s11894_s7]]   ;;  %s11898_s7 = smov 22  }
  0x21   :  { %13924 = sst [smem:[#allocation77_spill]] %s12051_s4 }
  0x22   :  { %s12061_s5 = sld [smem:[%s13854_s0 + %s11895_s15]]   ;;  %s11899_s15 = smov 23  }
  0x23   :  { %s12066_s27 = sld [smem:[%s13854_s0 + %s11896_s22]]   ;;  %s11900_s22 = smov 24  }
  0x24   :  { %s12071_s12 = sld [smem:[%s13854_s0 + %s11897_s28]]   ;;  %s11901_s28 = smov 25  }
  0x25   :  { %s12086_s30 = sld [smem:[%s13854_s0 + %s11900_s22]]   ;;  %s11904_s22 = smov 28  }
  0x26   :  { %13925 = sst [smem:[#allocation78_spill]] %s12056_s9 }
  0x27   :  { %s12076_s9 = sld [smem:[%s13854_s0 + %s11898_s7]]   ;;  %s11902_s7 = smov 26  }
  0x28   :  { %13926 = sst [smem:[#allocation79_spill]] %s12061_s5 }
  0x29   :  { %s12081_s5 = sld [smem:[%s13854_s0 + %s11899_s15]]   ;;  %s11903_s15 = smov 27  }
  0x2a   :  { %13927 = sst [smem:[#allocation80_spill]] %s12071_s12 }
  0x2b   :  { %s12091_s12 = sld [smem:[%s13854_s0 + %s11901_s28]]   ;;  %s11905_s28 = smov 29  }
  0x2c   :  { %s12106_s19 = sld [smem:[%s13854_s0 + %s11904_s22]]   ;;  %s11908_s22 = smov 32  }
  0x2d   :  { %13928 = sst [smem:[#allocation81_spill]] %s12076_s9 }
  0x2e   :  { %s12096_s9 = sld [smem:[%s13854_s0 + %s11902_s7]]   ;;  %s11906_s7 = smov 30  }
  0x2f   :  { %13929 = sst [smem:[#allocation82_spill]] %s12081_s5 }
  0x30   :  { %s12101_s5 = sld [smem:[%s13854_s0 + %s11903_s15]]   ;;  %s11907_s15 = smov 31  }
  0x31   :  { %13930 = sst [smem:[#allocation83_spill]] %s12091_s12 }
  0x32   :  { %s12111_s12 = sld [smem:[%s13854_s0 + %s11905_s28]]   ;;  %s11909_s28 = smov 33  }
  0x33   :  { %s12116_s8 = sld [smem:[%s13854_s0 + %s11906_s7]]   ;;  %s11910_s7 = smov 34  }
  0x34   :  { %13931 = sst [smem:[#allocation84_spill]] %s12096_s9 }
  0x35   :  { %s12126_s29 = sld [smem:[%s13854_s0 + %s11908_s22]]   ;;  %s11912_s22 = smov 36  }
  0x36   :  { %13932 = sst [smem:[#allocation85_spill]] %s12101_s5 }
  0x37   :  { %s12121_s5 = sld [smem:[%s13854_s0 + %s11907_s15]]   ;;  %s11911_s15 = smov 35  }
  0x38   :  { %13933 = sst [smem:[#allocation86_spill]] %s12111_s12 }
  0x39   :  { %13934 = sst [smem:[#allocation87_spill]] %s12116_s8 }
  0x3a   :  { %s12131_s12 = sld [smem:[%s13854_s0 + %s11909_s28]]   ;;  %s11913_s28 = smov 37  }
  0x3b   :  { %s12136_s21 = sld [smem:[%s13854_s0 + %s11910_s7]]   ;;  %s11914_s7 = smov 38  }
  0x3c   :  { %s12146_s13 = sld [smem:[%s13854_s0 + %s11912_s22]]   ;;  %s11916_s22 = smov 40  }
  0x3d   :  { %13935 = sst [smem:[#allocation88_spill]] %s12121_s5 }
  0x3e   :  { %s12141_s5 = sld [smem:[%s13854_s0 + %s11911_s15]]   ;;  %s11915_s15 = smov 39  }
  0x3f   :  { %s12156_s6 = sld [smem:[%s13854_s0 + %s11914_s7]]   ;;  %s11918_s7 = smov 42  }
  0x40   :  { %13936 = sst [smem:[#allocation89_spill]] %s12131_s12 }
  0x41   :  { %s12151_s12 = sld [smem:[%s13854_s0 + %s11913_s28]]   ;;  %s11917_s28 = smov 41  }
  0x42   :  { %13938 = sst [smem:[#allocation91_spill]] %s12146_s13 }
  0x43   :  { %s12166_s13 = sld [smem:[%s13854_s0 + %s11916_s22]]  }
  0x44   :  { %13937 = sst [smem:[#allocation90_spill]] %s12141_s5 }
  0x45   :  { %13940 = sst [smem:[#allocation93_spill]] %s12156_s6 }
  0x46   :  { %s12161_s5 = sld [smem:[%s13854_s0 + %s11915_s15]]  }
  0x47   :  { %13939 = sst [smem:[#allocation92_spill]] %s12151_s12 }
  0x48   :  { %s12171_s12 = sld [smem:[%s13854_s0 + %s11917_s28]]  }
  0x49   :  { %13942 = sst [smem:[#allocation95_spill]] %s12166_s13 }
  0x4a   :  { %s12176_s6 = sld [smem:[%s13854_s0 + %s11918_s7]]  }
  0x4c   :  { %13941 = sst [smem:[#allocation94_spill]] %s12161_s5 }
  0x4e   :  { %13943 = sst [smem:[#allocation96_spill]] %s12171_s12 }
  0x50   :  { %13944 = sst [smem:[#allocation97_spill]] %s12176_s6 }
  0x51   :  { %91 = vsyncpa [#allocation4], 0 }
  0x52   :  { %93 = vsyncpa [#allocation4 + $0x1], 0 }
  0x53   :  { %94 = vsyncpa [#allocation7], 0 }
  0x54   :  { %96 = vsyncpa [#allocation7 + $0x1], 0 }
  0x55   :  { %97 = vsyncpa [#allocation10], 0 }
  0x56   :  { %99 = vsyncpa [#allocation10 + $0x1], 0 }
  0x57   :  { %100 = vsyncpa [#allocation13], 0 }
  0x58   :  { %102 = vsyncpa [#allocation13 + $0x1], 0 }
  0x59   :  { %103 = vsyncpa [#allocation16], 0 }
  0x5a   :  { %105 = vsyncpa [#allocation16 + $0x1], 0 }
  0x5b   :  { %106 = vsyncpa [#allocation19], 0 }
  0x5c   :  { %108 = vsyncpa [#allocation19 + $0x1], 0 }
  0x5d   :  { %109 = vsyncpa [#allocation22], 0 }
  0x5e   :  { %111 = vsyncpa [#allocation22 + $0x1], 0 }
  0x5f   :  { %112 = vsyncpa [#allocation25], 0 }
  0x60   :  { %113 = vsyncpa [#allocation28], 0 }
  0x61   :  { %114 = vsyncpa [#allocation31], 0 }
  0x62   :  { %115 = vsyncpa [#allocation34], 0 }
  0x63   :  { %116 = vsyncpa [#allocation37], 0 }
  0x64   :  { %117 = vsyncpa [#allocation5], 0 }
  0x65   :  { %118 = vsyncpa [#allocation40], 0 }
  0x66   :  { %119 = vsyncpa [#allocation43], 0 }
  0x67   :  { %120 = vsyncpa [#allocation46], 0  ;;  %s12178_s0 = smov 0   ;;  %s12180_s15 = smov 0  }
  0x68   :  { %s12182_s16 = smov 0   ;;  %s12184_s18 = smov 0  }
  0x69   :  { %s12186_s22 = smov 0   ;;  %s12188_s23 = smov 0  }
  0x6a LB: > { %s13945_s9 = sld [smem:[#allocation84_spill]]  ;;  %s13946_s3 = sld [smem:[#allocation69_spill]]  ;;  %s11871_s22 = sphi %s12186_s22, %s14029_s22   ;;  %s11867_s18 = sphi %s12184_s18, %s14028_s18   ;;  %s11863_s16 = sphi %s12182_s16, %s14027_s16   ;;  %s11859_s15 = sphi %s12180_s15, %s14026_s15   ;;  %s11855_s0 = sphi %s12178_s0, %s14025_s0   ;;  %s11875_s23 = sphi %s12188_s23, %s126_s23  }
  0x6b   : > { %s13947_s8 = sld [smem:[#allocation87_spill]]  ;;  %s13948_s4 = sld [smem:[#allocation77_spill]] }
  0x6c   : > { %s13949_s20 = sld [smem:[#allocation75_spill]]  ;;  %13950 = sst [smem:[#allocation98_spill]] %s11867_s18 }
  0x6d   : > { %s12207_s26 = sadd.s32 4294967295, %s11875_s23   ;;  %s135_s28 = sadd.s32 1, %s11871_s22 }
  0x6e   : > { %13951 = sst [smem:[#allocation99_spill]] %s12207_s26  ;;  %p136_p0 = scmp.ge.s32.totalorder %s135_s28, 3 }
  0x6f   : > { %s199_s1 = sadd.s32 1, %s11863_s16  ;;  %p206_p1 = scmp.ne.s32.totalorder %s11863_s16, %s11859_s15 }
  0x70   : > { %p207_p2 = scmp.eq.s32.totalorder %s11875_s23, 0  ;;  %s14031_s28 = smov (%p136_p0, %s135_s28), 0 }
  0x71   : > { %13952 = sst [smem:[#allocation100_spill]] %s14031_s28  ;;  %p212_p4 = scmp.ne.s32.totalorder %s11859_s15, %s11855_s0 }
  0x72   : > { %p12216_p3 = por %p207_p2, %p206_p1  ;;  %s195_s7 = ssub.s32 %s11871_s22, %s14031_s28 }
  0x73   : > { %p13877_p5 = scmp.eq.s32.totalorder %s12207_s26, 0  ;;  %p197_p6 = scmp.eq.s32.totalorder %s195_s7, 0 }
  0x74   : > { %s13953_s2 = scalar_select %p12216_p3, 1, 0 }
  0x75   : > { %p7352_p7 = scmp.ge.s32.totalorder %s11875_s23, 1  ;;  %p12227_p8 = por %p13877_p5, %p212_p4 }
  0x76   : > { %p1180_p9 = scmp.lt.s32.totalorder %s11875_s23, 4  ;;  %s11919_s0 = smov [#allocation24]  }
  0x77   : > { %s13954_s10 = scalar_select %p12227_p8, 1, 0 }
  0x78   : > { %s12233_s11 = scalar_select %p197_p6, %s11863_s16, %s199_s1  }
  0x79   : > { %p12235_p10 = pnand %p7352_p7, %p1180_p9  ;;  %s1212_s28 = sshll.u32 %s11919_s0, 4  ;;  %s1213_s28 = int_to_ptr.vmem [resolvable:$true] %s1212_s28 }
  0x7a   : > { %13955 = sst [smem:[#allocation101_spill]] %s12233_s11  ;;  %s11920_s7 = smov [#allocation27]  }
  0x7b   : > { %s13956_s6 = scalar_select %p12235_p10, 1, 0 }
  0x7c   : > { %p10791_p11 = pneg %p12235_p10  ;;  %s1242_s13 = sshll.u32 %s11920_s7, 4  ;;  %s12247_s13 = int_to_ptr.vmem [resolvable:$true] %s1242_s13 }
  0x7d   : > { %s10967_s1 = scalar_lea.hbm %s13949_s20, 16 }
  0x7e   : > { %p12243_p12 = pnand %p10791_p11, %p13877_p5  ;;  %p10968_p13 = scmp.ne.s32.totalorder %s13949_s20, %s10967_s1 }
  0x7f   : > { %p10974_p4 = scmp.lt.u32.totalorder %s10967_s1, %s13949_s20 }
  0x80   : > { %p12253_p0 = pneg %p12243_p12 }
  0x82   : > { %p10970_p1 = pnand %p12253_p0, %p10968_p13 }
  0x84   : > { %p10971_p2 = pneg %p10970_p1 }
  0x86   : > { %p10976_p6 = pnand %p10974_p4, %p10971_p2 }
  0x88   : > { %10979 = shalt.err (!%p10976_p6)
}
  0x89   : > { %s10980_s0 = scalar_lea.vmem %s1213_s28, 16  ;;  %s10987_s7 = scalar_lea.vmem %s1213_s28, 32 }
  0x8a   : > { %p10981_p7 = scmp.ne.s32.totalorder %s1213_s28, %s10980_s0  ;;  %p10988_p5 = scmp.lt.s32.totalorder %s1213_s28, %s1213_s28 }
  0x8b   : > { %p10989_p8 = scmp.lt.s32.totalorder %s10987_s7, %s10980_s0 }
  0x8c   : > { %p10983_p9 = pnand %p10981_p7, %p12253_p0 }
  0x8d   : > { %p10990_p10 = por %p10989_p8, %p10988_p5 }
  0x8e   : > { %p10984_p11 = pneg %p10983_p9 }
  0x90   : > { %p10991_p3 = pnand %p10990_p10, %p10984_p11 }
  0x92   : > { %10994 = shalt.err (!%p10991_p3)
}
  0x93   : > { %10794 = dma.hbm_to_vmem [thread:$0]  (!%p12243_p12), %s13949_s20, 16, %s1213_s28, [#allocation25]  }
  0x94   : > { %s10995_s1 = scalar_lea.hbm %s12066_s27, 2048 }
  0x95   : > { %p10996_p13 = scmp.ne.s32.totalorder %s12066_s27, %s10995_s1  ;;  %p11002_p4 = scmp.lt.u32.totalorder %s10995_s1, %s12066_s27 }
  0x97   : > { %p10998_p1 = pnand %p10996_p13, %p12253_p0 }
  0x99   : > { %p10999_p2 = pneg %p10998_p1 }
  0x9b   : > { %p11004_p6 = pnand %p11002_p4, %p10999_p2 }
  0x9d   : > { %11007 = shalt.err (!%p11004_p6)
}
  0x9e   : > { %s11008_s0 = scalar_lea.vmem %s12247_s13, 2048  ;;  %p11016_p10 = scmp.lt.s32.totalorder %s12247_s13, %s12247_s13 }
  0x9f   : > { %p11009_p3 = scmp.ne.s32.totalorder %s12247_s13, %s11008_s0  ;;  %p11017_p7 = scmp.lt.s32.totalorder %s11008_s0, %s11008_s0 }
  0xa1   : > { %p11011_p5 = pnand %p11009_p3, %p12253_p0  ;;  %p11018_p9 = por %p11017_p7, %p11016_p10 }
  0xa3   : > { %p11012_p8 = pneg %p11011_p5 }
  0xa5   : > { %p11019_p11 = pnand %p11018_p9, %p11012_p8 }
  0xa7   : > { %11022 = shalt.err (!%p11019_p11)
}
  0xa8   : > { %s11921_s28 = smov 128   ;;  %s11922_s7 = smov 8  }
  0xa9   : > { %10800 = dma.hbm_to_vmem [thread:$0]  (!%p12243_p12), %s12066_s27, 2048, %s12247_s13, [#allocation28], %s11921_s28, %s11921_s28, %s11922_s7  }
  0xaa   : > { %s11923_s1 = smov [#allocation30]   ;;  %s11924_s0 = smov [#allocation33]  }
  0xab   : > { %s1280_s20 = sshll.u32 %s11923_s1, 4  ;;  %s1312_s5 = sshll.u32 %s11924_s0, 4  ;;  %s1281_s20 = int_to_ptr.vmem [resolvable:$true] %s1280_s20  ;;  %s1313_s5 = int_to_ptr.vmem [resolvable:$true] %s1312_s5 }
  0xac   : > { %s11023_s18 = scalar_lea.hbm %s13945_s9, 6144 }
  0xad   : > { %p11024_p13 = scmp.ne.s32.totalorder %s13945_s9, %s11023_s18  ;;  %p11030_p4 = scmp.lt.u32.totalorder %s11023_s18, %s13945_s9 }
  0xaf   : > { %p11026_p1 = pnand %p11024_p13, %p12253_p0 }
  0xb1   : > { %p11027_p2 = pneg %p11026_p1 }
  0xb3   : > { %p11032_p6 = pnand %p11030_p4, %p11027_p2 }
  0xb5   : > { %11035 = shalt.err (!%p11032_p6)
}
  0xb6   : > { %s11036_s26 = scalar_lea.vmem %s1281_s20, 6144  ;;  %p11044_p10 = scmp.lt.s32.totalorder %s1281_s20, %s1281_s20 }
  0xb7   : > { %p11037_p3 = scmp.ne.s32.totalorder %s1281_s20, %s11036_s26  ;;  %p11045_p7 = scmp.lt.s32.totalorder %s11036_s26, %s11036_s26 }
  0xb9   : > { %p11039_p5 = pnand %p11037_p3, %p12253_p0  ;;  %p11046_p9 = por %p11045_p7, %p11044_p10 }
  0xbb   : > { %p11040_p8 = pneg %p11039_p5 }
  0xbd   : > { %p11047_p11 = pnand %p11046_p9, %p11040_p8 }
  0xbf   : > { %11050 = shalt.err (!%p11047_p11)
}
  0xc0   : > { %10806 = dma.hbm_to_vmem [thread:$0]  (!%p12243_p12), %s13945_s9, 6144, %s1281_s20, [#allocation31], %s11921_s28, %s11921_s28, %s11922_s7  }
  0xc1   : > { %s11051_s13 = scalar_lea.hbm %s13947_s8, 6144 }
  0xc2   : > { %p11052_p13 = scmp.ne.s32.totalorder %s13947_s8, %s11051_s13  ;;  %p11058_p4 = scmp.lt.u32.totalorder %s11051_s13, %s13947_s8 }
  0xc4   : > { %p11054_p1 = pnand %p11052_p13, %p12253_p0 }
  0xc6   : > { %p11055_p2 = pneg %p11054_p1 }
  0xc8   : > { %p11060_p6 = pnand %p11058_p4, %p11055_p2 }
  0xca   : > { %11063 = shalt.err (!%p11060_p6)
}
  0xcb   : > { %s11064_s18 = scalar_lea.vmem %s1313_s5, 6144  ;;  %p11072_p10 = scmp.lt.s32.totalorder %s1313_s5, %s1313_s5 }
  0xcc   : > { %p11065_p3 = scmp.ne.s32.totalorder %s1313_s5, %s11064_s18  ;;  %p11073_p7 = scmp.lt.s32.totalorder %s11064_s18, %s11064_s18 }
  0xce   : > { %p11067_p5 = pnand %p11065_p3, %p12253_p0  ;;  %p11074_p9 = por %p11073_p7, %p11072_p10 }
  0xd0   : > { %p11068_p8 = pneg %p11067_p5 }
  0xd2   : > { %p11075_p11 = pnand %p11074_p9, %p11068_p8 }
  0xd4   : > { %11078 = shalt.err (!%p11075_p11)
}
  0xd5   : > { %10812 = dma.hbm_to_vmem [thread:$0]  (!%p12243_p12), %s13947_s8, 6144, %s1313_s5, [#allocation34], %s11921_s28, %s11921_s28, %s11922_s7  }
  0xd6   : > { %s11925_s20 = smov [#allocation26]   ;;  %s11926_s1 = smov [#allocation29]  }
  0xd7   : > { %s1226_s26 = sshll.u32 %s11925_s20, 4  ;;  %s1264_s0 = sshll.u32 %s11926_s1, 4  ;;  %s1227_s26 = int_to_ptr.vmem [resolvable:$true] %s1226_s26  ;;  %s1265_s0 = int_to_ptr.vmem [resolvable:$true] %s1264_s0 }
  0xd8   : > { %s11079_s13 = scalar_lea.hbm %s13948_s4, 16 }
  0xd9   : > { %p11080_p13 = scmp.ne.s32.totalorder %s13948_s4, %s11079_s13  ;;  %p11086_p4 = scmp.lt.u32.totalorder %s11079_s13, %s13948_s4 }
  0xdb   : > { %p11082_p1 = pnand %p11080_p13, %p12253_p0 }
  0xdd   : > { %p11083_p2 = pneg %p11082_p1 }
  0xdf   : > { %p11088_p6 = pnand %p11086_p4, %p11083_p2 }
  0xe1   : > { %11091 = shalt.err (!%p11088_p6)
}
  0xe2   : > { %s11092_s18 = scalar_lea.vmem %s1227_s26, 16  ;;  %s11099_s5 = scalar_lea.vmem %s1227_s26, 32 }
  0xe3   : > { %p11093_p3 = scmp.ne.s32.totalorder %s1227_s26, %s11092_s18  ;;  %p11100_p10 = scmp.lt.s32.totalorder %s1227_s26, %s1227_s26 }
  0xe4   : > { %p11101_p7 = scmp.lt.s32.totalorder %s11099_s5, %s11092_s18 }
  0xe5   : > { %p11095_p5 = pnand %p11093_p3, %p12253_p0 }
  0xe6   : > { %p11102_p9 = por %p11101_p7, %p11100_p10 }
  0xe7   : > { %p11096_p8 = pneg %p11095_p5 }
  0xe9   : > { %p11103_p11 = pnand %p11102_p9, %p11096_p8 }
  0xeb   : > { %11106 = shalt.err (!%p11103_p11)
}
  0xec   : > { %10797 = dma.hbm_to_vmem [thread:$0]  (!%p12243_p12), %s13948_s4, 16, %s1227_s26, [#allocation25]  }
  0xed   : > { %s11107_s20 = scalar_lea.hbm %s12086_s30, 2048 }
  0xee   : > { %p11108_p13 = scmp.ne.s32.totalorder %s12086_s30, %s11107_s20  ;;  %p11114_p4 = scmp.lt.u32.totalorder %s11107_s20, %s12086_s30 }
  0xf0   : > { %p11110_p1 = pnand %p11108_p13, %p12253_p0 }
  0xf2   : > { %p11111_p2 = pneg %p11110_p1 }
  0xf4   : > { %p11116_p6 = pnand %p11114_p4, %p11111_p2 }
  0xf6   : > { %11119 = shalt.err (!%p11116_p6)
}
  0xf7   : > { %s11120_s1 = scalar_lea.vmem %s1265_s0, 2048  ;;  %p11128_p10 = scmp.lt.s32.totalorder %s1265_s0, %s1265_s0 }
  0xf8   : > { %p11121_p3 = scmp.ne.s32.totalorder %s1265_s0, %s11120_s1  ;;  %p11129_p7 = scmp.lt.s32.totalorder %s11120_s1, %s11120_s1 }
  0xfa   : > { %p11123_p5 = pnand %p11121_p3, %p12253_p0  ;;  %p11130_p9 = por %p11129_p7, %p11128_p10 }
  0xfc   : > { %p11124_p8 = pneg %p11123_p5 }
  0xfe   : > { %p11131_p11 = pnand %p11130_p9, %p11124_p8 }
 0x100   : > { %11134 = shalt.err (!%p11131_p11)
}
 0x101   : > { %10803 = dma.hbm_to_vmem [thread:$0]  (!%p12243_p12), %s12086_s30, 2048, %s1265_s0, [#allocation28], %s11921_s28, %s11921_s28, %s11922_s7  }
 0x102   : > { %s11927_s26 = smov [#allocation32]   ;;  %s11928_s18 = smov [#allocation35]  }
 0x103   : > { %s1296_s13 = sshll.u32 %s11927_s26, 4  ;;  %s1328_s5 = sshll.u32 %s11928_s18, 4  ;;  %s1297_s13 = int_to_ptr.vmem [resolvable:$true] %s1296_s13  ;;  %s1329_s5 = int_to_ptr.vmem [resolvable:$true] %s1328_s5 }
 0x104   : > { %s11135_s20 = scalar_lea.hbm %s12106_s19, 2048 }
 0x105   : > { %p11136_p13 = scmp.ne.s32.totalorder %s12106_s19, %s11135_s20  ;;  %p11142_p4 = scmp.lt.u32.totalorder %s11135_s20, %s12106_s19 }
 0x107   : > { %p11138_p1 = pnand %p11136_p13, %p12253_p0 }
 0x109   : > { %p11139_p2 = pneg %p11138_p1 }
 0x10b   : > { %p11144_p6 = pnand %p11142_p4, %p11139_p2 }
 0x10d   : > { %11147 = shalt.err (!%p11144_p6)
}
 0x10e   : > { %s11148_s1 = scalar_lea.vmem %s1297_s13, 2048  ;;  %p11156_p10 = scmp.lt.s32.totalorder %s1297_s13, %s1297_s13 }
 0x10f   : > { %p11149_p3 = scmp.ne.s32.totalorder %s1297_s13, %s11148_s1  ;;  %p11157_p7 = scmp.lt.s32.totalorder %s11148_s1, %s11148_s1 }
 0x111   : > { %p11151_p5 = pnand %p11149_p3, %p12253_p0  ;;  %p11158_p9 = por %p11157_p7, %p11156_p10 }
 0x113   : > { %p11152_p8 = pneg %p11151_p5 }
 0x115   : > { %p11159_p11 = pnand %p11158_p9, %p11152_p8 }
 0x117   : > { %11162 = shalt.err (!%p11159_p11)
}
 0x118   : > { %10809 = dma.hbm_to_vmem [thread:$0]  (!%p12243_p12), %s12106_s19, 2048, %s1297_s13, [#allocation31], %s11921_s28, %s11921_s28, %s11922_s7  }
 0x119   : > { %s11163_s0 = scalar_lea.hbm %s12126_s29, 6144 }
 0x11a   : > { %p11164_p13 = scmp.ne.s32.totalorder %s12126_s29, %s11163_s0  ;;  %p11170_p4 = scmp.lt.u32.totalorder %s11163_s0, %s12126_s29 }
 0x11c   : > { %p11166_p1 = pnand %p11164_p13, %p12253_p0 }
 0x11e   : > { %p11167_p2 = pneg %p11166_p1 }
 0x120   : > { %p11172_p6 = pnand %p11170_p4, %p11167_p2 }
 0x122   : > { %11175 = shalt.err (!%p11172_p6)
}
 0x123   : > { %s11176_s26 = scalar_lea.vmem %s1329_s5, 6144  ;;  %p11184_p10 = scmp.lt.s32.totalorder %s1329_s5, %s1329_s5 }
 0x124   : > { %p11177_p3 = scmp.ne.s32.totalorder %s1329_s5, %s11176_s26  ;;  %p11185_p7 = scmp.lt.s32.totalorder %s11176_s26, %s11176_s26 }
 0x126   : > { %p11179_p5 = pnand %p11177_p3, %p12253_p0  ;;  %p11186_p9 = por %p11185_p7, %p11184_p10 }
 0x128   : > { %p11180_p8 = pneg %p11179_p5 }
 0x12a   : > { %p11187_p11 = pnand %p11186_p9, %p11180_p8 }
 0x12c   : > { %11190 = shalt.err (!%p11187_p11)
}
 0x12d   : > { %10815 = dma.hbm_to_vmem [thread:$0]  (!%p12243_p12), %s12126_s29, 6144, %s1329_s5, [#allocation34], %s11921_s28, %s11921_s28, %s11922_s7  }
 0x12e   : > { %s11929_s13 = smov [#allocation36]   ;;  %s11191_s20 = scalar_lea.hbm %s12136_s21, 6144 }
 0x12f   : > { %s1344_s18 = sshll.u32 %s11929_s13, 4  ;;  %p11192_p13 = scmp.ne.s32.totalorder %s12136_s21, %s11191_s20  ;;  %s1345_s18 = int_to_ptr.vmem [resolvable:$true] %s1344_s18 }
 0x130   : > { %p11198_p4 = scmp.lt.u32.totalorder %s11191_s20, %s12136_s21 }
 0x131   : > { %p11194_p1 = pnand %p11192_p13, %p12253_p0 }
 0x133   : > { %p11195_p2 = pneg %p11194_p1 }
 0x135   : > { %p11200_p6 = pnand %p11198_p4, %p11195_p2 }
 0x137   : > { %11203 = shalt.err (!%p11200_p6)
}
 0x138   : > { %s11204_s1 = scalar_lea.vmem %s1345_s18, 6144  ;;  %p11212_p10 = scmp.lt.s32.totalorder %s1345_s18, %s1345_s18 }
 0x139   : > { %p11205_p3 = scmp.ne.s32.totalorder %s1345_s18, %s11204_s1  ;;  %p11213_p7 = scmp.lt.s32.totalorder %s11204_s1, %s11204_s1 }
 0x13b   : > { %p11207_p5 = pnand %p11205_p3, %p12253_p0  ;;  %p11214_p9 = por %p11213_p7, %p11212_p10 }
 0x13d   : > { %p11208_p8 = pneg %p11207_p5 }
 0x13f   : > { %p11215_p11 = pnand %p11214_p9, %p11208_p8 }
 0x141   : > { %11218 = shalt.err (!%p11215_p11)
}
 0x142   : > { %10818 = dma.hbm_to_vmem [thread:$0]  (!%p12243_p12), %s12136_s21, 6144, %s1345_s18, [#allocation37], %s11921_s28, %s11921_s28, %s11922_s7  }
 0x143   : > { %p7364_p13 = scmp.ge.s32.totalorder %s11875_s23, 3 }
 0x144   : > { %s12373_s11 = sand.u32 (!%p7364_p13), 1, %s11863_s16   ;;  %s12376_s5 = sshll.u32 (!%p7364_p13), %s11871_s22, 6 }
 0x145   : > { %1357 = sbr.rel (%p7364_p13) target bundleno = 664 (0x298), region = 108  ;;  %s12379_s12 = sshll.u32 (!%p7364_p13), %s12373_s11, 2 }
 0x146   : > { %s12382_s28 = sand.u32 (!%p7364_p13), 1, %s11875_s23   ;;  %s12386_s7 = scalar_lea.hbm (!%p7364_p13), %s11981_s17, %s12376_s5 }
 0x147   : > { %s1386_s0 = scalar_lea.vmem (!%p7364_p13), [#allocation6], %s12379_s12  ;;  %s11219_s18 = scalar_lea.hbm (!%p7364_p13), %s12386_s7, 64 }
 0x148   : > { %s1396_s26 = sshll.u32 (!%p7364_p13), %s1386_s0, 4  ;;  %p11220_p12 = scmp.ne.s32.totalorder (!%p7364_p13), %s12386_s7, %s11219_s18  ;;  %s1397_s26 = int_to_ptr.vmem [resolvable:$true] %s1396_s26 }
 0x149   : > { %p13959_p0 = scmp.ne.s32.totalorder (!%p7364_p13), %s13953_s2, 0  ;;  %s11223_s20 = scalar_lea.hbm (!%p7364_p13), %s11981_s17, 192 }
 0x14a   : > { %p11224_p4 = scmp.lt.u32.totalorder (!%p7364_p13), %s12386_s7, %s11981_s17  ;;  %p11225_p6 = scmp.lt.u32.totalorder (!%p7364_p13), %s11223_s20, %s11219_s18 }
 0x14b   : > { %p11221_p1 = pnand (!%p7364_p13), %p11220_p12, %p13959_p0  ;;  %p11227_p5 = scmp.lt.u32.totalorder (!%p7364_p13), %s11219_s18, %s12386_s7 }
 0x14c   : > { %p11226_p3 = por %p11225_p6, %p11224_p4 }
 0x14d   : > { %p11222_p2 = pneg %p11221_p1 }
 0x14e   : > { %p11228_p8 = por %p11227_p5, %p11226_p3 }
 0x150   : > { %p11229_p10 = pnand %p11228_p8, %p11222_p2 }
 0x152   : > { %11232 = shalt.err (!%p11229_p10)
}
 0x153   : > { %s11233_s1 = scalar_lea.vmem %s1397_s26, 64  ;;  %s11930_s0 = smov [#allocation6]  }
 0x154   : > { %p11234_p7 = scmp.ne.s32.totalorder %s1397_s26, %s11233_s1  ;;  %s11237_s13 = sshll.u32 %s11930_s0, 4  ;;  %s11238_s13 = int_to_ptr.vmem [resolvable:$false] %s11237_s13 }
 0x155   : > { %s11239_s4 = scalar_lea.vmem %s11238_s13, 128  ;;  %p11240_p13 = scmp.lt.s32.totalorder %s1397_s26, %s11238_s13 }
 0x156   : > { %p11235_p9 = pnand %p11234_p7, %p13959_p0  ;;  %p11241_p12 = scmp.lt.s32.totalorder %s11239_s4, %s11233_s1 }
 0x158   : > { %p11236_p11 = pneg %p11235_p9  ;;  %p11242_p1 = por %p11241_p12, %p11240_p13 }
 0x15a   : > { %p11243_p4 = pnand %p11242_p1, %p11236_p11 }
 0x15c   : > { %11246 = shalt.err (!%p11243_p4)
}
 0x15d   : > { %s13960_s18 = scalar_lea.sflag [#allocation7], %s12382_s28  ;;  %s12407_s20 = scalar_lea.hbm %s11991_s25, %s12376_s5 }
 0x15e   : > { %10720 = dma.hbm_to_vmem [thread:$0]  (%p13959_p0), %s12386_s7, 64, %s1397_s26, %s13960_s18  }
 0x15f   : > { %s1428_s4 = scalar_lea.vmem [#allocation9], %s12379_s12  ;;  %s13888_s1 = scalar_lea.sflag [#allocation10], %s12382_s28 }
 0x160   : > { %s1438_s13 = sshll.u32 %s1428_s4, 4  ;;  %s11247_s0 = scalar_lea.hbm %s12407_s20, 64  ;;  %s1439_s13 = int_to_ptr.vmem [resolvable:$true] %s1438_s13 }
 0x161   : > { %p11248_p2 = scmp.ne.s32.totalorder %s12407_s20, %s11247_s0  ;;  %s11251_s8 = scalar_lea.hbm %s11991_s25, 192 }
 0x162   : > { %p11252_p5 = scmp.lt.u32.totalorder %s12407_s20, %s11991_s25  ;;  %p11253_p8 = scmp.lt.u32.totalorder %s11251_s8, %s11247_s0 }
 0x163   : > { %p11249_p6 = pnand %p11248_p2, %p13959_p0  ;;  %p11255_p7 = scmp.lt.u32.totalorder %s11247_s0, %s12407_s20 }
 0x164   : > { %p11254_p10 = por %p11253_p8, %p11252_p5 }
 0x165   : > { %p11250_p3 = pneg %p11249_p6 }
 0x166   : > { %p11256_p9 = por %p11255_p7, %p11254_p10 }
 0x168   : > { %p11257_p11 = pnand %p11256_p9, %p11250_p3 }
 0x16a   : > { %11260 = shalt.err (!%p11257_p11)
}
 0x16b   : > { %s11261_s7 = scalar_lea.vmem %s1439_s13, 64  ;;  %s11931_s26 = smov [#allocation9]  }
 0x16c   : > { %p11262_p13 = scmp.ne.s32.totalorder %s1439_s13, %s11261_s7  ;;  %s11265_s18 = sshll.u32 %s11931_s26, 4  ;;  %s11266_s18 = int_to_ptr.vmem [resolvable:$false] %s11265_s18 }
 0x16d   : > { %s11267_s4 = scalar_lea.vmem %s11266_s18, 128  ;;  %p11268_p4 = scmp.lt.s32.totalorder %s1439_s13, %s11266_s18 }
 0x16e   : > { %p11263_p12 = pnand %p11262_p13, %p13959_p0  ;;  %p11269_p2 = scmp.lt.s32.totalorder %s11267_s4, %s11261_s7 }
 0x170   : > { %p11264_p1 = pneg %p11263_p12  ;;  %p11270_p6 = por %p11269_p2, %p11268_p4 }
 0x172   : > { %p11271_p5 = pnand %p11270_p6, %p11264_p1 }
 0x174   : > { %11274 = shalt.err (!%p11271_p5)
}
 0x175   : > { %10722 = dma.hbm_to_vmem [thread:$0]  (%p13959_p0), %s12407_s20, 64, %s1439_s13, %s13888_s1  }
 0x176   : > { %s12428_s8 = scalar_lea.hbm %s13946_s3, %s12376_s5  ;;  %s1470_s0 = scalar_lea.vmem [#allocation12], %s12379_s12 }
 0x177   : > { %s1480_s7 = sshll.u32 %s1470_s0, 4  ;;  %s13889_s26 = scalar_lea.sflag [#allocation13], %s12382_s28  ;;  %s1481_s7 = int_to_ptr.vmem [resolvable:$true] %s1480_s7 }
 0x178   : > { %s11275_s18 = scalar_lea.hbm %s12428_s8, 64  ;;  %s11279_s4 = scalar_lea.hbm %s13946_s3, 192 }
 0x179   : > { %p11276_p3 = scmp.ne.s32.totalorder %s12428_s8, %s11275_s18  ;;  %p11280_p7 = scmp.lt.u32.totalorder %s12428_s8, %s13946_s3 }
 0x17a   : > { %p11281_p9 = scmp.lt.u32.totalorder %s11279_s4, %s11275_s18  ;;  %p11283_p13 = scmp.lt.u32.totalorder %s11275_s18, %s12428_s8 }
 0x17b   : > { %p11277_p8 = pnand %p11276_p3, %p13959_p0 }
 0x17c   : > { %p11282_p11 = por %p11281_p9, %p11280_p7 }
 0x17d   : > { %p11278_p10 = pneg %p11277_p8 }
 0x17e   : > { %p11284_p12 = por %p11283_p13, %p11282_p11 }
 0x180   : > { %p11285_p1 = pnand %p11284_p12, %p11278_p10 }
 0x182   : > { %11288 = shalt.err (!%p11285_p1)
}
 0x183   : > { %s11289_s20 = scalar_lea.vmem %s1481_s7, 64  ;;  %s11932_s13 = smov [#allocation12]  }
 0x184   : > { %p11290_p4 = scmp.ne.s32.totalorder %s1481_s7, %s11289_s20  ;;  %s11293_s0 = sshll.u32 %s11932_s13, 4  ;;  %s11294_s0 = int_to_ptr.vmem [resolvable:$false] %s11293_s0 }
 0x185   : > { %s11295_s1 = scalar_lea.vmem %s11294_s0, 128  ;;  %p11296_p5 = scmp.lt.s32.totalorder %s1481_s7, %s11294_s0 }
 0x186   : > { %p11291_p2 = pnand %p11290_p4, %p13959_p0  ;;  %p11297_p3 = scmp.lt.s32.totalorder %s11295_s1, %s11289_s20 }
 0x188   : > { %p11292_p6 = pneg %p11291_p2  ;;  %p11298_p8 = por %p11297_p3, %p11296_p5 }
 0x18a   : > { %p11299_p7 = pnand %p11298_p8, %p11292_p6 }
 0x18c   : > { %11302 = shalt.err (!%p11299_p7)
}
 0x18d   : > { %10724 = dma.hbm_to_vmem [thread:$0]  (%p13959_p0), %s12428_s8, 64, %s1481_s7, %s13889_s26  }
 0x18e   : > { %s12449_s18 = scalar_lea.hbm %s12011_s14, %s12376_s5  ;;  %s1512_s1 = scalar_lea.vmem [#allocation15], %s12379_s12 }
 0x18f   : > { %s1522_s4 = sshll.u32 %s1512_s1, 4  ;;  %s13890_s20 = scalar_lea.sflag [#allocation16], %s12382_s28  ;;  %s1523_s4 = int_to_ptr.vmem [resolvable:$true] %s1522_s4 }
 0x190   : > { %s11303_s13 = scalar_lea.hbm %s12449_s18, 64  ;;  %s11307_s0 = scalar_lea.hbm %s12011_s14, 192 }
 0x191   : > { %p11304_p10 = scmp.ne.s32.totalorder %s12449_s18, %s11303_s13  ;;  %p11308_p13 = scmp.lt.u32.totalorder %s12449_s18, %s12011_s14 }
 0x192   : > { %p11309_p12 = scmp.lt.u32.totalorder %s11307_s0, %s11303_s13  ;;  %p11311_p4 = scmp.lt.u32.totalorder %s11303_s13, %s12449_s18 }
 0x193   : > { %p11305_p9 = pnand %p11304_p10, %p13959_p0 }
 0x194   : > { %p11310_p1 = por %p11309_p12, %p11308_p13 }
 0x195   : > { %p11306_p11 = pneg %p11305_p9 }
 0x196   : > { %p11312_p2 = por %p11311_p4, %p11310_p1 }
 0x198   : > { %p11313_p6 = pnand %p11312_p2, %p11306_p11 }
 0x19a   : > { %11316 = shalt.err (!%p11313_p6)
}
 0x19b   : > { %s11317_s8 = scalar_lea.vmem %s1523_s4, 64  ;;  %s11933_s7 = smov [#allocation15]  }
 0x19c   : > { %p11318_p5 = scmp.ne.s32.totalorder %s1523_s4, %s11317_s8  ;;  %s11321_s1 = sshll.u32 %s11933_s7, 4  ;;  %s11322_s1 = int_to_ptr.vmem [resolvable:$false] %s11321_s1 }
 0x19d   : > { %s11323_s26 = scalar_lea.vmem %s11322_s1, 128  ;;  %p11324_p7 = scmp.lt.s32.totalorder %s1523_s4, %s11322_s1 }
 0x19e   : > { %p11319_p3 = pnand %p11318_p5, %p13959_p0  ;;  %p11325_p10 = scmp.lt.s32.totalorder %s11323_s26, %s11317_s8 }
 0x1a0   : > { %p11320_p8 = pneg %p11319_p3  ;;  %p11326_p9 = por %p11325_p10, %p11324_p7 }
 0x1a2   : > { %p11327_p12 = pnand %p11326_p9, %p11320_p8 }
 0x1a4   : > { %11330 = shalt.err (!%p11327_p12)
}
 0x1a5   : > { %10726 = dma.hbm_to_vmem [thread:$0]  (%p13959_p0), %s12449_s18, 64, %s1523_s4, %s13890_s20  }
 0x1a6   : > { %s12470_s13 = scalar_lea.hbm %s12021_s24, %s12376_s5  ;;  %s1554_s26 = scalar_lea.vmem [#allocation18], %s12379_s12 }
 0x1a7   : > { %s1564_s0 = sshll.u32 %s1554_s26, 4  ;;  %s13892_s8 = scalar_lea.sflag [#allocation19], %s12382_s28  ;;  %s1565_s0 = int_to_ptr.vmem [resolvable:$true] %s1564_s0 }
 0x1a8   : > { %s11331_s7 = scalar_lea.hbm %s12470_s13, 64  ;;  %s11335_s1 = scalar_lea.hbm %s12021_s24, 192 }
 0x1a9   : > { %p11332_p11 = scmp.ne.s32.totalorder %s12470_s13, %s11331_s7  ;;  %p11336_p4 = scmp.lt.u32.totalorder %s12470_s13, %s12021_s24 }
 0x1aa   : > { %p11337_p2 = scmp.lt.u32.totalorder %s11335_s1, %s11331_s7  ;;  %p11339_p5 = scmp.lt.u32.totalorder %s11331_s7, %s12470_s13 }
 0x1ab   : > { %p11333_p13 = pnand %p11332_p11, %p13959_p0 }
 0x1ac   : > { %p11338_p6 = por %p11337_p2, %p11336_p4 }
 0x1ad   : > { %p11334_p1 = pneg %p11333_p13 }
 0x1ae   : > { %p11340_p3 = por %p11339_p5, %p11338_p6 }
 0x1b0   : > { %p11341_p8 = pnand %p11340_p3, %p11334_p1 }
 0x1b2   : > { %11344 = shalt.err (!%p11341_p8)
}
 0x1b3   : > { %s11345_s18 = scalar_lea.vmem %s1565_s0, 64  ;;  %s11934_s4 = smov [#allocation18]  }
 0x1b4   : > { %p11346_p7 = scmp.ne.s32.totalorder %s1565_s0, %s11345_s18  ;;  %s11349_s26 = sshll.u32 %s11934_s4, 4  ;;  %s11350_s26 = int_to_ptr.vmem [resolvable:$false] %s11349_s26 }
 0x1b5   : > { %s11351_s20 = scalar_lea.vmem %s11350_s26, 128  ;;  %p11352_p12 = scmp.lt.s32.totalorder %s1565_s0, %s11350_s26 }
 0x1b6   : > { %p11347_p10 = pnand %p11346_p7, %p13959_p0  ;;  %p11353_p11 = scmp.lt.s32.totalorder %s11351_s20, %s11345_s18 }
 0x1b8   : > { %p11348_p9 = pneg %p11347_p10  ;;  %p11354_p13 = por %p11353_p11, %p11352_p12 }
 0x1ba   : > { %p11355_p2 = pnand %p11354_p13, %p11348_p9 }
 0x1bc   : > { %11358 = shalt.err (!%p11355_p2)
}
 0x1bd   : > { %s13961_s7 = sld [smem:[#allocation73_spill]]  ;;  %s1596_s20 = scalar_lea.vmem [#allocation21], %s12379_s12 }
 0x1be   : > { %10728 = dma.hbm_to_vmem [thread:$0]  (%p13959_p0), %s12470_s13, 64, %s1565_s0, %s13892_s8  }
 0x1bf   : > { %s1606_s18 = sshll.u32 %s1596_s20, 4  ;;  %s13894_s4 = scalar_lea.sflag [#allocation22], %s12382_s28  ;;  %s1607_s18 = int_to_ptr.vmem [resolvable:$true] %s1606_s18 }
 0x1c3   : > { %s12491_s1 = scalar_lea.hbm %s13961_s7, %s12376_s5  ;;  %s11363_s3 = scalar_lea.hbm %s13961_s7, 192 }
 0x1c4   : > { %s11359_s26 = scalar_lea.hbm %s12491_s1, 64  ;;  %p11364_p5 = scmp.lt.u32.totalorder %s12491_s1, %s13961_s7 }
 0x1c5   : > { %p11360_p1 = scmp.ne.s32.totalorder %s12491_s1, %s11359_s26  ;;  %p11365_p3 = scmp.lt.u32.totalorder %s11363_s3, %s11359_s26 }
 0x1c6   : > { %p11367_p7 = scmp.lt.u32.totalorder %s11359_s26, %s12491_s1 }
 0x1c7   : > { %p11361_p4 = pnand %p11360_p1, %p13959_p0  ;;  %p11366_p8 = por %p11365_p3, %p11364_p5 }
 0x1c9   : > { %p11362_p6 = pneg %p11361_p4  ;;  %p11368_p10 = por %p11367_p7, %p11366_p8 }
 0x1cb   : > { %p11369_p9 = pnand %p11368_p10, %p11362_p6 }
 0x1cd   : > { %11372 = shalt.err (!%p11369_p9)
}
 0x1ce   : > { %s11373_s13 = scalar_lea.vmem %s1607_s18, 64  ;;  %s11935_s0 = smov [#allocation21]  }
 0x1cf   : > { %p11374_p12 = scmp.ne.s32.totalorder %s1607_s18, %s11373_s13  ;;  %s11377_s20 = sshll.u32 %s11935_s0, 4  ;;  %s11378_s20 = int_to_ptr.vmem [resolvable:$false] %s11377_s20 }
 0x1d0   : > { %s11379_s8 = scalar_lea.vmem %s11378_s20, 128  ;;  %p11380_p2 = scmp.lt.s32.totalorder %s1607_s18, %s11378_s20 }
 0x1d1   : > { %p11375_p11 = pnand %p11374_p12, %p13959_p0  ;;  %p11381_p1 = scmp.lt.s32.totalorder %s11379_s8, %s11373_s13 }
 0x1d3   : > { %p11376_p13 = pneg %p11375_p11  ;;  %p11382_p4 = por %p11381_p1, %p11380_p2 }
 0x1d5   : > { %p11383_p3 = pnand %p11382_p4, %p11376_p13 }
 0x1d7   : > { %11386 = shalt.err (!%p11383_p3)
}
 0x1d8   : > { %s13962_s3 = sld [smem:[#allocation66_spill]]  ;;  %s1365_s8 = scalar_lea.vmem [#allocation3], %s12379_s12 }
 0x1d9   : > { %10730 = dma.hbm_to_vmem [thread:$0]  (%p13959_p0), %s12491_s1, 64, %s1607_s18, %s13894_s4  }
 0x1da   : > { %s1375_s13 = sshll.u32 %s1365_s8, 4  ;;  %s1362_s0 = scalar_lea.sflag [#allocation4], %s12373_s11  ;;  %s1376_s13 = int_to_ptr.vmem [resolvable:$true] %s1375_s13 }
 0x1de   : > { %s12512_s26 = scalar_lea.hbm %s13962_s3, %s12376_s5  ;;  %s11391_s7 = scalar_lea.hbm %s13962_s3, 192 }
 0x1df   : > { %s11387_s20 = scalar_lea.hbm %s12512_s26, 64  ;;  %p11392_p7 = scmp.lt.u32.totalorder %s12512_s26, %s13962_s3 }
 0x1e0   : > { %p11388_p6 = scmp.ne.s32.totalorder %s12512_s26, %s11387_s20  ;;  %p11393_p10 = scmp.lt.u32.totalorder %s11391_s7, %s11387_s20 }
 0x1e1   : > { %p11395_p12 = scmp.lt.u32.totalorder %s11387_s20, %s12512_s26 }
 0x1e2   : > { %p11389_p5 = pnand %p11388_p6, %p13959_p0  ;;  %p11394_p9 = por %p11393_p10, %p11392_p7 }
 0x1e4   : > { %p11390_p8 = pneg %p11389_p5  ;;  %p11396_p11 = por %p11395_p12, %p11394_p9 }
 0x1e6   : > { %p11397_p13 = pnand %p11396_p11, %p11390_p8 }
 0x1e8   : > { %11400 = shalt.err (!%p11397_p13)
}
 0x1e9   : > { %s11401_s1 = scalar_lea.vmem %s1376_s13, 64  ;;  %s11936_s18 = smov [#allocation3]  }
 0x1ea   : > { %p11402_p2 = scmp.ne.s32.totalorder %s1376_s13, %s11401_s1  ;;  %s11405_s8 = sshll.u32 %s11936_s18, 4  ;;  %s11406_s8 = int_to_ptr.vmem [resolvable:$false] %s11405_s8 }
 0x1eb   : > { %s11407_s4 = scalar_lea.vmem %s11406_s8, 128  ;;  %p11408_p3 = scmp.lt.s32.totalorder %s1376_s13, %s11406_s8 }
 0x1ec   : > { %p11403_p1 = pnand %p11402_p2, %p13959_p0  ;;  %p11409_p6 = scmp.lt.s32.totalorder %s11407_s4, %s11401_s1 }
 0x1ee   : > { %p11404_p4 = pneg %p11403_p1  ;;  %p11410_p5 = por %p11409_p6, %p11408_p3 }
 0x1f0   : > { %p11411_p7 = pnand %p11410_p5, %p11404_p4 }
 0x1f2   : > { %11414 = shalt.err (!%p11411_p7)
}
 0x1f3   : > { %s13963_s7 = sld [smem:[#allocation67_spill]]  ;;  %s1407_s4 = scalar_lea.vmem [#allocation8], %s12379_s12 }
 0x1f4   : > { %10719 = dma.hbm_to_vmem [thread:$0]  (%p13959_p0), %s12512_s26, 64, %s1376_s13, %s1362_s0  }
 0x1f5   : > { %s1417_s1 = sshll.u32 %s1407_s4, 4  ;;  %s1418_s1 = int_to_ptr.vmem [resolvable:$true] %s1417_s1 }
 0x1f9   : > { %s12531_s20 = scalar_lea.hbm %s13963_s7, %s12376_s5  ;;  %s11419_s8 = scalar_lea.hbm %s13963_s7, 192 }
 0x1fa   : > { %s11415_s18 = scalar_lea.hbm %s12531_s20, 64  ;;  %p11420_p12 = scmp.lt.u32.totalorder %s12531_s20, %s13963_s7 }
 0x1fb   : > { %p11416_p8 = scmp.ne.s32.totalorder %s12531_s20, %s11415_s18  ;;  %p11421_p11 = scmp.lt.u32.totalorder %s11419_s8, %s11415_s18 }
 0x1fc   : > { %p11423_p2 = scmp.lt.u32.totalorder %s11415_s18, %s12531_s20 }
 0x1fd   : > { %p11417_p10 = pnand %p11416_p8, %p13959_p0  ;;  %p11422_p13 = por %p11421_p11, %p11420_p12 }
 0x1ff   : > { %p11418_p9 = pneg %p11417_p10  ;;  %p11424_p1 = por %p11423_p2, %p11422_p13 }
 0x201   : > { %p11425_p4 = pnand %p11424_p1, %p11418_p9 }
 0x203   : > { %11428 = shalt.err (!%p11425_p4)
}
 0x204   : > { %s11429_s26 = scalar_lea.vmem %s1418_s1, 64  ;;  %s11937_s13 = smov [#allocation8]  }
 0x205   : > { %p11430_p3 = scmp.ne.s32.totalorder %s1418_s1, %s11429_s26  ;;  %s11433_s0 = sshll.u32 %s11937_s13, 4  ;;  %s11434_s0 = int_to_ptr.vmem [resolvable:$false] %s11433_s0 }
 0x206   : > { %s11435_s4 = scalar_lea.vmem %s11434_s0, 128  ;;  %p11436_p7 = scmp.lt.s32.totalorder %s1418_s1, %s11434_s0 }
 0x207   : > { %p11431_p6 = pnand %p11430_p3, %p13959_p0  ;;  %p11437_p8 = scmp.lt.s32.totalorder %s11435_s4, %s11429_s26 }
 0x209   : > { %p11432_p5 = pneg %p11431_p6  ;;  %p11438_p10 = por %p11437_p8, %p11436_p7 }
 0x20b   : > { %p11439_p11 = pnand %p11438_p10, %p11432_p5 }
 0x20d   : > { %11442 = shalt.err (!%p11439_p11)
}
 0x20e   : > { %s13964_s18 = scalar_lea.sflag [#allocation7], %s12382_s28  ;;  %s13965_s8 = sld [smem:[#allocation68_spill]] }
 0x20f   : > { %10721 = dma.hbm_to_vmem [thread:$0]  (%p13959_p0), %s12531_s20, 64, %s1418_s1, %s13964_s18  }
 0x210   : > { %s1449_s26 = scalar_lea.vmem [#allocation11], %s12379_s12 }
 0x211   : > { %s1459_s0 = sshll.u32 %s1449_s26, 4  ;;  %s1460_s0 = int_to_ptr.vmem [resolvable:$true] %s1459_s0 }
 0x214   : > { %s12551_s13 = scalar_lea.hbm %s13965_s8, %s12376_s5  ;;  %s11447_s3 = scalar_lea.hbm %s13965_s8, 192 }
 0x215   : > { %s11443_s4 = scalar_lea.hbm %s12551_s13, 64  ;;  %p11448_p2 = scmp.lt.u32.totalorder %s12551_s13, %s13965_s8 }
 0x216   : > { %p11444_p9 = scmp.ne.s32.totalorder %s12551_s13, %s11443_s4  ;;  %p11449_p1 = scmp.lt.u32.totalorder %s11447_s3, %s11443_s4 }
 0x217   : > { %p11451_p3 = scmp.lt.u32.totalorder %s11443_s4, %s12551_s13 }
 0x218   : > { %p11445_p12 = pnand %p11444_p9, %p13959_p0  ;;  %p11450_p4 = por %p11449_p1, %p11448_p2 }
 0x21a   : > { %p11446_p13 = pneg %p11445_p12  ;;  %p11452_p6 = por %p11451_p3, %p11450_p4 }
 0x21c   : > { %p11453_p5 = pnand %p11452_p6, %p11446_p13 }
 0x21e   : > { %11456 = shalt.err (!%p11453_p5)
}
 0x21f   : > { %s11457_s20 = scalar_lea.vmem %s1460_s0, 64  ;;  %s11938_s1 = smov [#allocation11]  }
 0x220   : > { %p11458_p7 = scmp.ne.s32.totalorder %s1460_s0, %s11457_s20  ;;  %s11461_s18 = sshll.u32 %s11938_s1, 4  ;;  %s11462_s18 = int_to_ptr.vmem [resolvable:$false] %s11461_s18 }
 0x221   : > { %s11463_s26 = scalar_lea.vmem %s11462_s18, 128  ;;  %p11464_p11 = scmp.lt.s32.totalorder %s1460_s0, %s11462_s18 }
 0x222   : > { %p11459_p8 = pnand %p11458_p7, %p13959_p0  ;;  %p11465_p9 = scmp.lt.s32.totalorder %s11463_s26, %s11457_s20 }
 0x224   : > { %p11460_p10 = pneg %p11459_p8  ;;  %p11466_p12 = por %p11465_p9, %p11464_p11 }
 0x226   : > { %p11467_p1 = pnand %p11466_p12, %p11460_p10 }
 0x228   : > { %11470 = shalt.err (!%p11467_p1)
}
 0x229   : > { %s13966_s3 = scalar_lea.sflag [#allocation10], %s12382_s28  ;;  %s13967_s4 = sld [smem:[#allocation70_spill]] }
 0x22a   : > { %10723 = dma.hbm_to_vmem [thread:$0]  (%p13959_p0), %s12551_s13, 64, %s1460_s0, %s13966_s3  }
 0x22b   : > { %s1491_s20 = scalar_lea.vmem [#allocation14], %s12379_s12 }
 0x22c   : > { %s1501_s18 = sshll.u32 %s1491_s20, 4  ;;  %s1502_s18 = int_to_ptr.vmem [resolvable:$true] %s1501_s18 }
 0x22f   : > { %s12571_s1 = scalar_lea.hbm %s13967_s4, %s12376_s5  ;;  %s11475_s7 = scalar_lea.hbm %s13967_s4, 192 }
 0x230   : > { %s11471_s26 = scalar_lea.hbm %s12571_s1, 64  ;;  %p11476_p3 = scmp.lt.u32.totalorder %s12571_s1, %s13967_s4 }
 0x231   : > { %p11472_p13 = scmp.ne.s32.totalorder %s12571_s1, %s11471_s26  ;;  %p11477_p6 = scmp.lt.u32.totalorder %s11475_s7, %s11471_s26 }
 0x232   : > { %p11479_p7 = scmp.lt.u32.totalorder %s11471_s26, %s12571_s1 }
 0x233   : > { %p11473_p2 = pnand %p11472_p13, %p13959_p0  ;;  %p11478_p5 = por %p11477_p6, %p11476_p3 }
 0x235   : > { %p11474_p4 = pneg %p11473_p2  ;;  %p11480_p8 = por %p11479_p7, %p11478_p5 }
 0x237   : > { %p11481_p10 = pnand %p11480_p8, %p11474_p4 }
 0x239   : > { %11484 = shalt.err (!%p11481_p10)
}
 0x23a   : > { %s11485_s13 = scalar_lea.vmem %s1502_s18, 64  ;;  %s11939_s0 = smov [#allocation14]  }
 0x23b   : > { %p11486_p11 = scmp.ne.s32.totalorder %s1502_s18, %s11485_s13  ;;  %s11489_s3 = sshll.u32 %s11939_s0, 4  ;;  %s11490_s3 = int_to_ptr.vmem [resolvable:$false] %s11489_s3 }
 0x23c   : > { %s11491_s20 = scalar_lea.vmem %s11490_s3, 128  ;;  %p11492_p1 = scmp.lt.s32.totalorder %s1502_s18, %s11490_s3 }
 0x23d   : > { %p11487_p9 = pnand %p11486_p11, %p13959_p0  ;;  %p11493_p13 = scmp.lt.s32.totalorder %s11491_s20, %s11485_s13 }
 0x23f   : > { %p11488_p12 = pneg %p11487_p9  ;;  %p11494_p2 = por %p11493_p13, %p11492_p1 }
 0x241   : > { %p11495_p3 = pnand %p11494_p2, %p11488_p12 }
 0x243   : > { %11498 = shalt.err (!%p11495_p3)
}
 0x244   : > { %s13968_s7 = scalar_lea.sflag [#allocation13], %s12382_s28  ;;  %s13969_s26 = sld [smem:[#allocation71_spill]] }
 0x245   : > { %10725 = dma.hbm_to_vmem [thread:$0]  (%p13959_p0), %s12571_s1, 64, %s1502_s18, %s13968_s7  }
 0x246   : > { %s1533_s13 = scalar_lea.vmem [#allocation17], %s12379_s12 }
 0x247   : > { %s1543_s3 = sshll.u32 %s1533_s13, 4  ;;  %s1544_s3 = int_to_ptr.vmem [resolvable:$true] %s1543_s3 }
 0x24a   : > { %s12591_s0 = scalar_lea.hbm %s13969_s26, %s12376_s5  ;;  %s11503_s4 = scalar_lea.hbm %s13969_s26, 192 }
 0x24b   : > { %s11499_s20 = scalar_lea.hbm %s12591_s0, 64  ;;  %p11504_p7 = scmp.lt.u32.totalorder %s12591_s0, %s13969_s26 }
 0x24c   : > { %p11500_p4 = scmp.ne.s32.totalorder %s12591_s0, %s11499_s20  ;;  %p11505_p8 = scmp.lt.u32.totalorder %s11503_s4, %s11499_s20 }
 0x24d   : > { %p11507_p11 = scmp.lt.u32.totalorder %s11499_s20, %s12591_s0 }
 0x24e   : > { %p11501_p6 = pnand %p11500_p4, %p13959_p0  ;;  %p11506_p10 = por %p11505_p8, %p11504_p7 }
 0x250   : > { %p11502_p5 = pneg %p11501_p6  ;;  %p11508_p9 = por %p11507_p11, %p11506_p10 }
 0x252   : > { %p11509_p12 = pnand %p11508_p9, %p11502_p5 }
 0x254   : > { %11512 = shalt.err (!%p11509_p12)
}
 0x255   : > { %s11513_s1 = scalar_lea.vmem %s1544_s3, 64  ;;  %s11940_s18 = smov [#allocation17]  }
 0x256   : > { %p11514_p1 = scmp.ne.s32.totalorder %s1544_s3, %s11513_s1  ;;  %s11517_s7 = sshll.u32 %s11940_s18, 4  ;;  %s11518_s7 = int_to_ptr.vmem [resolvable:$false] %s11517_s7 }
 0x257   : > { %s11519_s13 = scalar_lea.vmem %s11518_s7, 128  ;;  %p11520_p3 = scmp.lt.s32.totalorder %s1544_s3, %s11518_s7 }
 0x258   : > { %p11515_p13 = pnand %p11514_p1, %p13959_p0  ;;  %p11521_p4 = scmp.lt.s32.totalorder %s11519_s13, %s11513_s1 }
 0x25a   : > { %p11516_p2 = pneg %p11515_p13  ;;  %p11522_p6 = por %p11521_p4, %p11520_p3 }
 0x25c   : > { %p11523_p7 = pnand %p11522_p6, %p11516_p2 }
 0x25e   : > { %11526 = shalt.err (!%p11523_p7)
}
 0x25f   : > { %s13970_s4 = scalar_lea.sflag [#allocation16], %s12382_s28  ;;  %s13971_s20 = sld [smem:[#allocation72_spill]] }
 0x260   : > { %10727 = dma.hbm_to_vmem [thread:$0]  (%p13959_p0), %s12591_s0, 64, %s1544_s3, %s13970_s4  }
 0x261   : > { %s1575_s1 = scalar_lea.vmem [#allocation20], %s12379_s12  ;;  %s7401_s13 = sshll.u32 %s12373_s11, 8 }
 0x262   : > { %s1585_s7 = sshll.u32 %s1575_s1, 4  ;;  %s1586_s7 = int_to_ptr.vmem [resolvable:$true] %s1585_s7 }
 0x265   : > { %s12611_s18 = scalar_lea.hbm %s13971_s20, %s12376_s5  ;;  %s11531_s9 = scalar_lea.hbm %s13971_s20, 192 }
 0x266   : > { %s11527_s8 = scalar_lea.hbm %s12611_s18, 64  ;;  %p11532_p11 = scmp.lt.u32.totalorder %s12611_s18, %s13971_s20 }
 0x267   : > { %p11528_p5 = scmp.ne.s32.totalorder %s12611_s18, %s11527_s8  ;;  %p11533_p9 = scmp.lt.u32.totalorder %s11531_s9, %s11527_s8 }
 0x268   : > { %p11535_p1 = scmp.lt.u32.totalorder %s11527_s8, %s12611_s18 }
 0x269   : > { %p11529_p8 = pnand %p11528_p5, %p13959_p0  ;;  %p11534_p12 = por %p11533_p9, %p11532_p11 }
 0x26b   : > { %p11530_p10 = pneg %p11529_p8  ;;  %p11536_p13 = por %p11535_p1, %p11534_p12 }
 0x26d   : > { %p11537_p2 = pnand %p11536_p13, %p11530_p10 }
 0x26f   : > { %11540 = shalt.err (!%p11537_p2)
}
 0x270   : > { %s11541_s5 = scalar_lea.vmem %s1586_s7, 64  ;;  %s11941_s12 = smov [#allocation20]  }
 0x271   : > { %p11542_p3 = scmp.ne.s32.totalorder %s1586_s7, %s11541_s5  ;;  %s11545_s0 = sshll.u32 %s11941_s12, 4  ;;  %s11546_s0 = int_to_ptr.vmem [resolvable:$false] %s11545_s0 }
 0x272   : > { %s11547_s3 = scalar_lea.vmem %s11546_s0, 128  ;;  %p11548_p7 = scmp.lt.s32.totalorder %s1586_s7, %s11546_s0 }
 0x273   : > { %p11543_p4 = pnand %p11542_p3, %p13959_p0  ;;  %p11549_p5 = scmp.lt.s32.totalorder %s11547_s3, %s11541_s5 }
 0x275   : > { %p11544_p6 = pneg %p11543_p4  ;;  %p11550_p8 = por %p11549_p5, %p11548_p7 }
 0x277   : > { %p11551_p9 = pnand %p11550_p8, %p11544_p6 }
 0x279   : > { %11554 = shalt.err (!%p11551_p9)
}
 0x27a   : > { %s13972_s9 = scalar_lea.sflag [#allocation19], %s12382_s28  ;;  %s13973_s8 = sld [smem:[#allocation74_spill]] }
 0x27b   : > { %10729 = dma.hbm_to_vmem [thread:$0]  (%p13959_p0), %s12611_s18, 64, %s1586_s7, %s13972_s9  }
 0x27c   : > { %s7548_s4 = sshll.u32 %s11871_s22, 12  ;;  %s1617_s5 = scalar_lea.vmem [#allocation23], %s7401_s13 }
 0x27d   : > { %s1624_s12 = sshll.u32 %s1617_s5, 4  ;;  %s12636_s12 = int_to_ptr.vmem [resolvable:$true] %s1624_s12 }
 0x280   : > { %s12632_s1 = scalar_lea.hbm %s13973_s8, %s7548_s4  ;;  %s11559_s3 = scalar_lea.hbm %s13973_s8, 12288 }
 0x281   : > { %s11555_s0 = scalar_lea.hbm %s12632_s1, 4096  ;;  %p11560_p1 = scmp.lt.u32.totalorder %s12632_s1, %s13973_s8 }
 0x282   : > { %p11556_p10 = scmp.ne.s32.totalorder %s12632_s1, %s11555_s0  ;;  %p11561_p13 = scmp.lt.u32.totalorder %s11559_s3, %s11555_s0 }
 0x283   : > { %p11563_p3 = scmp.lt.u32.totalorder %s11555_s0, %s12632_s1 }
 0x284   : > { %p11557_p11 = pnand %p11556_p10, %p13959_p0  ;;  %p11562_p2 = por %p11561_p13, %p11560_p1 }
 0x286   : > { %p11558_p12 = pneg %p11557_p11  ;;  %p11564_p4 = por %p11563_p3, %p11562_p2 }
 0x288   : > { %p11565_p6 = pnand %p11564_p4, %p11558_p12 }
 0x28a   : > { %11568 = shalt.err (!%p11565_p6)
}
 0x28b   : > { %s11569_s11 = scalar_lea.vmem %s12636_s12, 4096  ;;  %s11942_s18 = smov [#allocation23]  }
 0x28c   : > { %p11570_p7 = scmp.ne.s32.totalorder %s12636_s12, %s11569_s11  ;;  %s11573_s7 = sshll.u32 %s11942_s18, 4  ;;  %s11574_s7 = int_to_ptr.vmem [resolvable:$false] %s11573_s7 }
 0x28d   : > { %s11575_s13 = scalar_lea.vmem %s11574_s7, 8192  ;;  %p11576_p9 = scmp.lt.s32.totalorder %s12636_s12, %s11574_s7 }
 0x28e   : > { %p11571_p5 = pnand %p11570_p7, %p13959_p0  ;;  %p11577_p10 = scmp.lt.s32.totalorder %s11575_s13, %s11569_s11 }
 0x290   : > { %p11572_p8 = pneg %p11571_p5  ;;  %p11578_p11 = por %p11577_p10, %p11576_p9 }
 0x292   : > { %p11579_p1 = pnand %p11578_p11, %p11572_p8 }
 0x294   : > { %11582 = shalt.err (!%p11579_p1)
}
 0x295   : > { %s11943_s9 = smov 128   ;;  %s11944_s4 = smov 8  }
 0x296   : > { %s13974_s5 = scalar_lea.sflag [#allocation22], %s12382_s28 }
 0x297   : > { %10731 = dma.hbm_to_vmem [thread:$0]  (%p13959_p0), %s12632_s1, 4096, %s12636_s12, %s13974_s5, %s11943_s9, %s11943_s9, %s11944_s4  }
 0x298 PF: > { %p13975_p12 = scmp.ne.s32.totalorder %s13956_s6, 0 }
 0x299   : > { %s12660_s0 = sand.u32 (!%p13975_p12), 1, %s11859_s15   ;;  %p13976_p13 = scmp.ne.s32.totalorder (!%p13975_p12), %s13954_s10, 0 }
 0x29a   : > { %1636 = sbr.rel (%p13975_p12) target bundleno = 3389 (0xd3d), region = 164  ;;  %s12663_s3 = sshll.u32 (!%p13975_p12), %s12660_s0, 2 }
 0x29b   : > { %s1639_s11 = scalar_lea.sflag (!%p13975_p12), [#allocation4], %s12660_s0  ;;  %s1642_s18 = scalar_lea.vmem (!%p13975_p12), [#allocation3], %s12663_s3 }
 0x2a1   : > { %11790 = dma.done.wait (%p13976_p13), %s1639_s11, 64  }
 0x2a2   : > { %11792 = vsyncadd (%p13976_p13), %s1639_s11, 4294967232  ;;  %s13977_s2 = sld [smem:[#allocation99_spill]]  ;;  %s1651_s1 = scalar_lea.vmem [#allocation6], %s12663_s3 }
 0x2a8   : > { %s12672_s6 = sand.u32 1, %s13977_s2  }
 0x2a9   : > { %s1648_s28 = scalar_lea.sflag [#allocation7], %s12672_s6 }
 0x2aa   : > { %11794 = dma.done.wait (%p13976_p13), %s1648_s28, 128  }
 0x2ab   : > { %11796 = vsyncadd (%p13976_p13), %s1648_s28, 4294967168  ;;  %s1660_s12 = scalar_lea.vmem [#allocation8], %s12663_s3  ;;  %s1666_s7 = scalar_lea.sflag [#allocation10], %s12672_s6 }
 0x2ac   : > { %11798 = dma.done.wait (%p13976_p13), %s1666_s7, 128  }
 0x2ad   : > { %11800 = vsyncadd (%p13976_p13), %s1666_s7, 4294967168  ;;  %s1684_s4 = scalar_lea.sflag [#allocation13], %s12672_s6 }
 0x2ae   : > { %11802 = dma.done.wait (%p13976_p13), %s1684_s4, 128  }
 0x2af   : > { %11804 = vsyncadd (%p13976_p13), %s1684_s4, 4294967168  ;;  %s1702_s28 = scalar_lea.sflag [#allocation16], %s12672_s6 }
 0x2b0   : > { %11806 = dma.done.wait (%p13976_p13), %s1702_s28, 128  }
 0x2b1   : > { %11808 = vsyncadd (%p13976_p13), %s1702_s28, 4294967168  ;;  %s1714_s7 = scalar_lea.vmem [#allocation17], %s12663_s3  ;;  %s1720_s5 = scalar_lea.sflag [#allocation19], %s12672_s6 }
 0x2b2   : > { %11810 = dma.done.wait (%p13976_p13), %s1720_s5, 128  }
 0x2b3   : > { %11812 = vsyncadd (%p13976_p13), %s1720_s5, 4294967168  ;;  %s1732_s4 = scalar_lea.vmem [#allocation20], %s12663_s3  ;;  %s1738_s13 = scalar_lea.sflag [#allocation22], %s12672_s6 }
 0x2b4   : > { %s1741_s11 = scalar_lea.vmem [#allocation21], %s12663_s3 }
 0x2b5   : > { %11814 = dma.done.wait (%p13976_p13), %s1738_s13, 4160  }
 0x2b6   : > { %11816 = vsyncadd (%p13976_p13), %s1738_s13, 4294963136  ;;  %s7417_s28 = sshll.u32 %s12660_s0, 8  ;;  %p13978_p0 = scmp.eq.s32.totalorder %s13977_s2, 0 }
 0x2b7   : > { %s12716_s9 = scalar_lea.vmem [#allocation23], %s7417_s28 }
 0x2b8   : > { %11818 = dma.done.wait (%p13978_p0), [#allocation25], 32   ;;  %p13979_p2 = pmov %p13978_p0 }
 0x2b9   : > { %p13980_p3 = pmov %p13978_p0 }
 0x2ba   : > { %11820 = vsyncadd (%p13979_p2), [#allocation25], 4294967264 }
 0x2bb   : > { %11822 = dma.done.wait (%p13980_p3), [#allocation28], 4096   ;;  %p13981_p4 = pmov %p13978_p0 }
 0x2bc   : > { %p13982_p6 = pmov %p13978_p0 }
 0x2bd   : > { %11824 = vsyncadd (%p13981_p4), [#allocation28], 4294963200 }
 0x2be   : > { %11826 = dma.done.wait (%p13982_p6), [#allocation31], 8192   ;;  %p13983_p7 = pmov %p13978_p0 }
 0x2bf   : > { %p13984_p5 = pmov %p13978_p0 }
 0x2c0   : > { %11828 = vsyncadd (%p13983_p7), [#allocation31], 4294959104 }
 0x2c1   : > { %11830 = dma.done.wait (%p13984_p5), [#allocation34], 12288   ;;  %p13985_p8 = pmov %p13978_p0 }
 0x2c2   : > { %p13986_p9 = pmov %p13978_p0 }
 0x2c3   : > { %11832 = vsyncadd (%p13985_p8), [#allocation34], 4294955008 }
 0x2c4   : > { %11834 = dma.done.wait (%p13986_p9), [#allocation37], 6144   ;;  %p13987_p10 = pmov %p13978_p0 }
 0x2c5   : > { %s13988_s10 = sld [smem:[#allocation98_spill]] }
 0x2c6   : > { %11836 = vsyncadd (%p13987_p10), [#allocation37], 4294961152 }
 0x2cb   : > { %p7427_p11 = scmp.ne.s32.totalorder %s13988_s10, 0 }
 0x2cc   : > { %v11945_v0 = vmov (!%p7427_p11), 0.0  }
 0x2cd   : > { %1982 = sbr.rel (%p7427_p11) target bundleno = 724 (0x2d4), region = 256  ;;  %1983 = vst [vmem:[#allocation2] sm:$0x3] (!%p7427_p11), %v11945_v0  ;;  %1984 = vst [vmem:[#allocation2 + $0x2] sm:$0x3] (!%p7427_p11), %v11945_v0 }
 0x2ce   : > { %1985 = vst [vmem:[#allocation2 + $0x4] sm:$0x3] (!%p7427_p11), %v11945_v0  ;;  %1986 = vst [vmem:[#allocation2 + $0x6] sm:$0x3] (!%p7427_p11), %v11945_v0 }
 0x2cf   : > { %1987 = vst [vmem:[#allocation2 + $0x8] sm:$0x3] (!%p7427_p11), %v11945_v0  ;;  %1988 = vst [vmem:[#allocation2 + $0xa] sm:$0x3] (!%p7427_p11), %v11945_v0 }
 0x2d0   : > { %1989 = vst [vmem:[#allocation2 + $0xc] sm:$0x3] (!%p7427_p11), %v11945_v0  ;;  %1990 = vst [vmem:[#allocation2 + $0xe] sm:$0x3] (!%p7427_p11), %v11945_v0 }
 0x2d1   : > { %1991 = vst [vmem:[#allocation2 + $0x10] sm:$0x3] (!%p7427_p11), %v11945_v0  ;;  %1992 = vst [vmem:[#allocation2 + $0x12] sm:$0x3] (!%p7427_p11), %v11945_v0 }
 0x2d2   : > { %1993 = vst [vmem:[#allocation2 + $0x14] sm:$0x3] (!%p7427_p11), %v11945_v0  ;;  %1994 = vst [vmem:[#allocation2 + $0x16] sm:$0x3] (!%p7427_p11), %v11945_v0 }
 0x2d4 PF: > { %v2011_v1 = vld [vmem:[%s12716_s9 + $0x80] sm:$0xff]  ;;  %v2012_v2 = vld [vmem:[%s12716_s9 + $0x88] sm:$0xff]  ;;  %v2013_v6 = vld [vmem:[%s12716_s9 + $0x90] sm:$0xff]  ;;  %s13989_s0 = scalar_lea.vmem [#allocation9], %s12663_s3  ;;  %s13991_s2 = scalar_lea.vmem [#allocation12], %s12663_s3 }
 0x2d5   : > { %v1995_v3 = vld [vmem:[%s12716_s9] sm:$0xff]  ;;  %v12742_v4 = vpack.c.bf16 %v2012_v2, %v2011_v1  ;;  %v1996_v5 = vld [vmem:[%s12716_s9 + $0x8] sm:$0xff]  ;;  %v2014_v7 = vld [vmem:[%s12716_s9 + $0x98] sm:$0xff]  ;;  %s13992_s6 = scalar_lea.vmem [#allocation14], %s12663_s3 }
 0x2d6   : > { %v12747_v8 = vpack.c.bf16 %v1996_v5, %v1995_v3  ;;  %v12749_v9 = vpack.c.bf16 %v2014_v7, %v2013_v6  ;;  %v1997_v10 = vld [vmem:[%s12716_s9 + $0x10] sm:$0xff]  ;;  %v1998_v11 = vld [vmem:[%s12716_s9 + $0x18] sm:$0xff]  ;;  %v2015_v12 = vld [vmem:[%s12716_s9 + $0xa0] sm:$0xff] }
 0x2d7   : > { %9630 = vmatprep.subr.bf16.mxu0 %v12742_v4  ;;  %9662 = vmatprep.subr.bf16.mxu1 %v12742_v4  ;;  %v2016_v13 = vld [vmem:[%s12716_s9 + $0xa8] sm:$0xff]  ;;  %v12759_v14 = vpack.c.bf16 %v1998_v11, %v1997_v10  ;;  %v1999_v16 = vld [vmem:[%s12716_s9 + $0x20] sm:$0xff]  ;;  %v2017_v18 = vld [vmem:[%s12716_s9 + $0xb0] sm:$0xff] }
 0x2d8   : > { %9632 = vmatpush3.bf16.msra.mxu0 %v12747_v8  ;;  %9664 = vmatpush3.bf16.msra.mxu1 %v12747_v8  ;;  %v12763_v15 = vpack.c.bf16 %v2016_v13, %v2015_v12  ;;  %v2000_v17 = vld [vmem:[%s12716_s9 + $0x28] sm:$0xff]  ;;  %v2018_v19 = vld [vmem:[%s12716_s9 + $0xb8] sm:$0xff]  ;;  %v2001_v22 = vld [vmem:[%s12716_s9 + $0x30] sm:$0xff] }
 0x2d9   : > { %9634 = vmatprep.subr.bf16.mxu0 %v12749_v9  ;;  %9666 = vmatprep.subr.bf16.mxu1 %v12749_v9  ;;  %v12771_v20 = vpack.c.bf16 %v2000_v17, %v1999_v16  ;;  %v12775_v21 = vpack.c.bf16 %v2018_v19, %v2017_v18  ;;  %v2002_v23 = vld [vmem:[%s12716_s9 + $0x38] sm:$0xff]  ;;  %v2019_v24 = vld [vmem:[%s12716_s9 + $0xc0] sm:$0xff]  ;;  %v2020_v25 = vld [vmem:[%s12716_s9 + $0xc8] sm:$0xff] }
 0x2da   : > { %v7428_v26 = vld.sshfl [vmem:[%s1642_s18] sm:$0x33 pattern:$0x76325410]  ;;  %v12787_v29 = vpack.c.bf16 %v2002_v23, %v2001_v22  ;;  %v12791_v31 = vpack.c.bf16 %v2020_v25, %v2019_v24  ;;  %v2004_v33 = vld [vmem:[%s12716_s9 + $0x48] sm:$0xff]  ;;  %v2021_v34 = vld [vmem:[%s12716_s9 + $0xd0] sm:$0xff] }
 0x2db   : > { %v2037_v27 = vcombine.high %v7428_v26, %v7428_v26  ;;  %v7429_v28 = vld.sshfl [vmem:[%s1651_s1] sm:$0x33 pattern:$0x76325410]  ;;  %v2003_v32 = vld [vmem:[%s12716_s9 + $0x40] sm:$0xff]  ;;  %v2022_v35 = vld [vmem:[%s12716_s9 + $0xd8] sm:$0xff] }
 0x2dc   : > { %9636 = vmatpush3.bf16.msra.mxu0 %v12759_v14  ;;  %9668 = vmatpush3.bf16.msra.mxu1 %v12759_v14  ;;  %v2123_v30 = vcombine.high %v7429_v28, %v7429_v28  ;;  %v12799_v36 = vpack.c.bf16 %v2004_v33, %v2003_v32  ;;  %v12803_v37 = vpack.c.bf16 %v2022_v35, %v2021_v34  ;;  %v2005_v38 = vld [vmem:[%s12716_s9 + $0x50] sm:$0xff]  ;;  %v2006_v39 = vld [vmem:[%s12716_s9 + $0x58] sm:$0xff]  ;;  %v2023_v40 = vld [vmem:[%s12716_s9 + $0xe0] sm:$0xff]  ;;  %s13990_s18 = scalar_lea.vmem [#allocation11], %s12663_s3  ;;  %s13993_s1 = scalar_lea.vmem [#allocation15], %s12663_s3 }
 0x2dd   : > { %9638 = vmatprep.subr.bf16.mxu0 %v12763_v15  ;;  %9670 = vmatprep.subr.bf16.mxu1 %v12763_v15  ;;  %v2024_v41 = vld [vmem:[%s12716_s9 + $0xe8] sm:$0xff]  ;;  %v12811_v42 = vpack.c.bf16 %v2006_v39, %v2005_v38  ;;  %v2007_v44 = vld [vmem:[%s12716_s9 + $0x60] sm:$0xff]  ;;  %v2025_v46 = vld [vmem:[%s12716_s9 + $0xf0] sm:$0xff] }
 0x2de   : > { %2104 = vmatprep.mubr.f32.mxu0 %v2037_v27  ;;  %2190 = vmatprep.mubr.f32.mxu1 %v2123_v30  ;;  %v12815_v43 = vpack.c.bf16 %v2024_v41, %v2023_v40  ;;  %v2008_v45 = vld [vmem:[%s12716_s9 + $0x68] sm:$0xff]  ;;  %v2026_v47 = vld [vmem:[%s12716_s9 + $0xf8] sm:$0xff]  ;;  %v2009_v50 = vld [vmem:[%s12716_s9 + $0x70] sm:$0xff] }
 0x2df   : > { %v12823_v48 = vpack.c.bf16 %v2008_v45, %v2007_v44  ;;  %v12827_v49 = vpack.c.bf16 %v2026_v47, %v2025_v46  ;;  %v2010_v51 = vld [vmem:[%s12716_s9 + $0x78] sm:$0xff]  ;;  %v7430_v53 = vld.sshfl [vmem:[%s1660_s12] sm:$0x33 pattern:$0x76325410]  ;;  %s13994_s12 = scalar_lea.vmem [#allocation18], %s12663_s3 }
 0x2e0   : > { %9640 = vmatpush3.bf16.msra.mxu0 %v12771_v20  ;;  %9672 = vmatpush3.bf16.msra.mxu1 %v12771_v20  ;;  %v12833_v52 = vpack.c.bf16 %v2010_v51, %v2009_v50  ;;  %v7431_v54 = vld.sshfl [vmem:[%s13989_s0] sm:$0x33 pattern:$0x76325410]  ;;  %v2209_v55 = vcombine.high %v7430_v53, %v7430_v53  ;;  %v2113_v13 = vld [vmem:[#allocation2 + $0x2] sm:$0x3] }
 0x2e1   : > { %9642 = vmatprep.subr.bf16.mxu0 %v12775_v21  ;;  %9674 = vmatprep.subr.bf16.mxu1 %v12775_v21  ;;  %v2295_v56 = vcombine.high %v7431_v54, %v7431_v54  ;;  %v7432_v57 = vld.sshfl [vmem:[%s13990_s18] sm:$0x33 pattern:$0x76325410]  ;;  %v2285_v23 = vld [vmem:[#allocation2 + $0x6] sm:$0x3] }
 0x2e2   : > { %v7433_v58 = vld.sshfl [vmem:[%s13991_s2] sm:$0x33 pattern:$0x76325410]  ;;  %v2381_v59 = vcombine.high %v7432_v57, %v7432_v57  ;;  %v2457_v33 = vld [vmem:[#allocation2 + $0xa] sm:$0x3] }
 0x2e3   : > { %v2467_v60 = vcombine.high %v7433_v58, %v7433_v58  ;;  %v7434_v61 = vld.sshfl [vmem:[%s13992_s6] sm:$0x33 pattern:$0x76325410]  ;;  %v2715_v51 = vld [vmem:[#allocation2 + $0x10] sm:$0x3] }
 0x2e4   : > { %9644 = vmatpush3.bf16.msra.mxu0 %v12787_v29  ;;  %9676 = vmatpush3.bf16.msra.mxu1 %v12787_v29  ;;  %v7435_v62 = vld.sshfl [vmem:[%s13993_s1] sm:$0x33 pattern:$0x76325410]  ;;  %v2553_v63 = vcombine.high %v7434_v61, %v7434_v61  ;;  %v2543_v41 = vld [vmem:[#allocation2 + $0xc] sm:$0x3] }
 0x2e5   : > { %9646 = vmatprep.subr.bf16.mxu0 %v12791_v31  ;;  %9678 = vmatprep.subr.bf16.mxu1 %v12791_v31  ;;  %v2639_v0 = vcombine.high %v7435_v62, %v7435_v62  ;;  %v7436_v1 = vld.sshfl [vmem:[%s1714_s7] sm:$0x33 pattern:$0x76325410]  ;;  %s13995_s3 = sld [smem:[#allocation98_spill]] }
 0x2e6   : > { %v7437_v2 = vld.sshfl [vmem:[%s13994_s12] sm:$0x33 pattern:$0x76325410]  ;;  %v2725_v3 = vcombine.high %v7436_v1, %v7436_v1 }
 0x2e7   : > { %v2811_v5 = vcombine.high %v7437_v2, %v7437_v2  ;;  %v7438_v6 = vld.sshfl [vmem:[%s1732_s4] sm:$0x33 pattern:$0x76325410] }
 0x2e8   : > { %9648 = vmatpush3.bf16.msra.mxu0 %v12799_v36  ;;  %9680 = vmatpush3.bf16.msra.mxu1 %v12799_v36  ;;  %v7439_v7 = vld.sshfl [vmem:[%s1741_s11] sm:$0x33 pattern:$0x76325410]  ;;  %v2897_v10 = vcombine.high %v7438_v6, %v7438_v6 }
 0x2e9   : > { %9650 = vmatprep.subr.bf16.mxu0 %v12803_v37  ;;  %9682 = vmatprep.subr.bf16.mxu1 %v12803_v37  ;;  %v2983_v11 = vcombine.high %v7439_v7, %v7439_v7 }
 0x2eb   : > { %p7440_p1 = scmp.ne.s32.totalorder %s13995_s3, 2 }
 0x2ec   : > { %9652 = vmatpush3.bf16.msra.mxu0 %v12811_v42  ;;  %9684 = vmatpush3.bf16.msra.mxu1 %v12811_v42  ;;  %s13996_s13 = sld [smem:[#allocation76_spill]] (!%p7440_p1)  ;;  %s13997_s9 = sld [smem:[#allocation64_spill]] (!%p7440_p1)  ;;  %vm11947_vm0 = vmmov (!%p7440_p1), 0   ;;  %vm4093_vm1 = vcmask (!%p7440_p1), 1042432   ;;  %vm4044_vm2 = vcmask (!%p7440_p1), 23552   ;;  %vm4928_vm3 = vcmask (!%p7440_p1), 1041408  }
 0x2ed   : > { %9654 = vmatprep.subr.bf16.mxu0 %v12815_v43  ;;  %9686 = vmatprep.subr.bf16.mxu1 %v12815_v43  ;;  %s13998_s5 = sld [smem:[#allocation65_spill]] (!%p7440_p1)  ;;  %s13999_s11 = sld [smem:[#allocation78_spill]] (!%p7440_p1)  ;;  %vm4903_vm4 = vcmask (!%p7440_p1), 146432  }
 0x2ee   : > { %s14000_s7 = sld [smem:[#allocation81_spill]] (!%p7440_p1)  ;;  %s14001_s4 = sld [smem:[#allocation79_spill]] (!%p7440_p1) }
 0x2ef   : > { %s14002_s28 = sld [smem:[#allocation80_spill]] (!%p7440_p1)  ;;  %s14003_s10 = sld [smem:[#allocation82_spill]] (!%p7440_p1) }
 0x2f0   : > { %9656 = vmatpush3.bf16.msra.mxu0 %v12823_v48  ;;  %9688 = vmatpush3.bf16.msra.mxu1 %v12823_v48  ;;  %s14004_s0 = sld [smem:[#allocation83_spill]] (!%p7440_p1)  ;;  %s14005_s18 = sld [smem:[#allocation85_spill]] (!%p7440_p1) }
 0x2f1   : > { %9658 = vmatprep.subr.bf16.mxu0 %v12827_v49  ;;  %9690 = vmatprep.subr.bf16.mxu1 %v12827_v49  ;;  %s14006_s2 = sld [smem:[#allocation88_spill]] (!%p7440_p1)  ;;  %s14007_s6 = sld [smem:[#allocation86_spill]] (!%p7440_p1) }
 0x2f2   : > { %s14008_s1 = sld [smem:[#allocation89_spill]] (!%p7440_p1)  ;;  %s14009_s12 = sld [smem:[#allocation90_spill]] (!%p7440_p1) }
 0x2f4   : > { %9660 = vmatpush3.bf16.msra.mxu0 %v12833_v52  ;;  %9692 = vmatpush3.bf16.msra.mxu1 %v12833_v52 }
 0x2f5   : > { %9694 = vmatprep.subr.bf16.mxu0 %v12742_v4  ;;  %9726 = vmatprep.subr.bf16.mxu1 %v12742_v4 }
 0x2f7   : > { %2105 = vmatmul.mubr.f32.vlgmr.msra.gmra.mrb[0].mxu0 %v7428_v26  ;;  %2191 = vmatmul.mubr.f32.vlgmr.msra.gmra.mrb[0].mxu1 %v7429_v28 }
 0x2f8   : > { %9696 = vmatpush3.bf16.msra.mxu0 %v12747_v8  ;;  %9728 = vmatpush3.bf16.msra.mxu1 %v12747_v8 }
 0x2f9   : > { %9698 = vmatprep.subr.bf16.mxu0 %v12749_v9  ;;  %9730 = vmatprep.subr.bf16.mxu1 %v12749_v9 }
 0x2fa   : > { %2276 = vmatprep.mubr.f32.mxu0 %v2209_v55  ;;  %2362 = vmatprep.mubr.f32.mxu1 %v2295_v56 }
 0x2fc   : > { %9700 = vmatpush3.bf16.msra.mxu0 %v12759_v14  ;;  %9732 = vmatpush3.bf16.msra.mxu1 %v12759_v14 }
 0x2fd   : > { %9702 = vmatprep.subr.bf16.mxu0 %v12763_v15  ;;  %9734 = vmatprep.subr.bf16.mxu1 %v12763_v15 }
 0x300   : > { %9704 = vmatpush3.bf16.msra.mxu0 %v12771_v20  ;;  %9736 = vmatpush3.bf16.msra.mxu1 %v12771_v20 }
 0x301   : > { %9706 = vmatprep.subr.bf16.mxu0 %v12775_v21  ;;  %9738 = vmatprep.subr.bf16.mxu1 %v12775_v21 }
 0x304   : > { %9708 = vmatpush3.bf16.msra.mxu0 %v12787_v29  ;;  %9740 = vmatpush3.bf16.msra.mxu1 %v12787_v29 }
 0x305   : > { %9710 = vmatprep.subr.bf16.mxu0 %v12791_v31  ;;  %9742 = vmatprep.subr.bf16.mxu1 %v12791_v31 }
 0x308   : > { %9712 = vmatpush3.bf16.msra.mxu0 %v12799_v36  ;;  %9744 = vmatpush3.bf16.msra.mxu1 %v12799_v36 }
 0x309   : > { %9714 = vmatprep.subr.bf16.mxu0 %v12803_v37  ;;  %9746 = vmatprep.subr.bf16.mxu1 %v12803_v37 }
 0x30c   : > { %9716 = vmatpush3.bf16.msra.mxu0 %v12811_v42  ;;  %9748 = vmatpush3.bf16.msra.mxu1 %v12811_v42 }
 0x30d   : > { %9718 = vmatprep.subr.bf16.mxu0 %v12815_v43  ;;  %9750 = vmatprep.subr.bf16.mxu1 %v12815_v43 }
 0x310   : > { %9720 = vmatpush3.bf16.msra.mxu0 %v12823_v48  ;;  %9752 = vmatpush3.bf16.msra.mxu1 %v12823_v48 }
 0x311   : > { %9722 = vmatprep.subr.bf16.mxu0 %v12827_v49  ;;  %9754 = vmatprep.subr.bf16.mxu1 %v12827_v49 }
 0x314   : > { %9724 = vmatpush3.bf16.msra.mxu0 %v12833_v52  ;;  %9756 = vmatpush3.bf16.msra.mxu1 %v12833_v52 }
 0x315   : > { %9758 = vmatprep.subr.bf16.mxu0 %v12742_v4  ;;  %9790 = vmatprep.subr.bf16.mxu1 %v12742_v4 }
 0x317   : > { %2277 = vmatmul.mubr.f32.vlgmr.msra.gmra.mrb[2].mxu0 %v7430_v53  ;;  %2363 = vmatmul.mubr.f32.vlgmr.msra.gmra.mrb[2].mxu1 %v7431_v54  ;;  %v2801_v53 = vld [vmem:[#allocation2 + $0x12] sm:$0x3] }
 0x318   : > { %9760 = vmatpush3.bf16.msra.mxu0 %v12747_v8  ;;  %9792 = vmatpush3.bf16.msra.mxu1 %v12747_v8 }
 0x319   : > { %9762 = vmatprep.subr.bf16.mxu0 %v12749_v9  ;;  %9794 = vmatprep.subr.bf16.mxu1 %v12749_v9 }
 0x31a   : > { %2448 = vmatprep.mubr.f32.mxu0 %v2381_v59  ;;  %2534 = vmatprep.mubr.f32.mxu1 %v2467_v60 }
 0x31c   : > { %9764 = vmatpush3.bf16.msra.mxu0 %v12759_v14  ;;  %9796 = vmatpush3.bf16.msra.mxu1 %v12759_v14 }
 0x31d   : > { %9766 = vmatprep.subr.bf16.mxu0 %v12763_v15  ;;  %9798 = vmatprep.subr.bf16.mxu1 %v12763_v15 }
 0x320   : > { %9768 = vmatpush3.bf16.msra.mxu0 %v12771_v20  ;;  %9800 = vmatpush3.bf16.msra.mxu1 %v12771_v20 }
 0x321   : > { %9770 = vmatprep.subr.bf16.mxu0 %v12775_v21  ;;  %9802 = vmatprep.subr.bf16.mxu1 %v12775_v21 }
 0x324   : > { %9772 = vmatpush3.bf16.msra.mxu0 %v12787_v29  ;;  %9804 = vmatpush3.bf16.msra.mxu1 %v12787_v29 }
 0x325   : > { %9774 = vmatprep.subr.bf16.mxu0 %v12791_v31  ;;  %9806 = vmatprep.subr.bf16.mxu1 %v12791_v31 }
 0x328   : > { %9776 = vmatpush3.bf16.msra.mxu0 %v12799_v36  ;;  %9808 = vmatpush3.bf16.msra.mxu1 %v12799_v36 }
 0x329   : > { %9778 = vmatprep.subr.bf16.mxu0 %v12803_v37  ;;  %9810 = vmatprep.subr.bf16.mxu1 %v12803_v37 }
 0x32c   : > { %9780 = vmatpush3.bf16.msra.mxu0 %v12811_v42  ;;  %9812 = vmatpush3.bf16.msra.mxu1 %v12811_v42 }
 0x32d   : > { %9782 = vmatprep.subr.bf16.mxu0 %v12815_v43  ;;  %9814 = vmatprep.subr.bf16.mxu1 %v12815_v43 }
 0x330   : > { %9784 = vmatpush3.bf16.msra.mxu0 %v12823_v48  ;;  %9816 = vmatpush3.bf16.msra.mxu1 %v12823_v48 }
 0x331   : > { %9786 = vmatprep.subr.bf16.mxu0 %v12827_v49  ;;  %9818 = vmatprep.subr.bf16.mxu1 %v12827_v49 }
 0x334   : > { %9788 = vmatpush3.bf16.msra.mxu0 %v12833_v52  ;;  %9820 = vmatpush3.bf16.msra.mxu1 %v12833_v52 }
 0x335   : > { %9822 = vmatprep.subr.bf16.mxu0 %v12742_v4  ;;  %9854 = vmatprep.subr.bf16.mxu1 %v12742_v4 }
 0x337   : > { %2449 = vmatmul.mubr.f32.vlgmr.msra.gmra.mrb[4].mxu0 %v7432_v57  ;;  %2535 = vmatmul.mubr.f32.vlgmr.msra.gmra.mrb[4].mxu1 %v7433_v58 }
 0x338   : > { %9824 = vmatpush3.bf16.msra.mxu0 %v12747_v8  ;;  %9856 = vmatpush3.bf16.msra.mxu1 %v12747_v8 }
 0x339   : > { %9826 = vmatprep.subr.bf16.mxu0 %v12749_v9  ;;  %9858 = vmatprep.subr.bf16.mxu1 %v12749_v9 }
 0x33a   : > { %2620 = vmatprep.mubr.f32.mxu0 %v2553_v63  ;;  %2706 = vmatprep.mubr.f32.mxu1 %v2639_v0  ;;  %v2973_v63 = vld [vmem:[#allocation2 + $0x16] sm:$0x3] }
 0x33c   : > { %9828 = vmatpush3.bf16.msra.mxu0 %v12759_v14  ;;  %9860 = vmatpush3.bf16.msra.mxu1 %v12759_v14 }
 0x33d   : > { %9830 = vmatprep.subr.bf16.mxu0 %v12763_v15  ;;  %9862 = vmatprep.subr.bf16.mxu1 %v12763_v15 }
 0x340   : > { %9832 = vmatpush3.bf16.msra.mxu0 %v12771_v20  ;;  %9864 = vmatpush3.bf16.msra.mxu1 %v12771_v20 }
 0x341   : > { %9834 = vmatprep.subr.bf16.mxu0 %v12775_v21  ;;  %9866 = vmatprep.subr.bf16.mxu1 %v12775_v21 }
 0x344   : > { %9836 = vmatpush3.bf16.msra.mxu0 %v12787_v29  ;;  %9868 = vmatpush3.bf16.msra.mxu1 %v12787_v29 }
 0x345   : > { %9838 = vmatprep.subr.bf16.mxu0 %v12791_v31  ;;  %9870 = vmatprep.subr.bf16.mxu1 %v12791_v31 }
 0x348   : > { %9840 = vmatpush3.bf16.msra.mxu0 %v12799_v36  ;;  %9872 = vmatpush3.bf16.msra.mxu1 %v12799_v36 }
 0x349   : > { %9842 = vmatprep.subr.bf16.mxu0 %v12803_v37  ;;  %9874 = vmatprep.subr.bf16.mxu1 %v12803_v37 }
 0x34c   : > { %9844 = vmatpush3.bf16.msra.mxu0 %v12811_v42  ;;  %9876 = vmatpush3.bf16.msra.mxu1 %v12811_v42 }
 0x34d   : > { %9846 = vmatprep.subr.bf16.mxu0 %v12815_v43  ;;  %9878 = vmatprep.subr.bf16.mxu1 %v12815_v43 }
 0x350   : > { %9848 = vmatpush3.bf16.msra.mxu0 %v12823_v48  ;;  %9880 = vmatpush3.bf16.msra.mxu1 %v12823_v48 }
 0x351   : > { %9850 = vmatprep.subr.bf16.mxu0 %v12827_v49  ;;  %9882 = vmatprep.subr.bf16.mxu1 %v12827_v49 }
 0x354   : > { %9852 = vmatpush3.bf16.msra.mxu0 %v12833_v52  ;;  %9884 = vmatpush3.bf16.msra.mxu1 %v12833_v52 }
 0x355   : > { %9886 = vmatprep.subr.bf16.mxu0 %v12742_v4  ;;  %9918 = vmatprep.subr.bf16.mxu1 %v12742_v4 }
 0x357   : > { %2621 = vmatmul.mubr.f32.vlgmr.msra.gmra.mrb[6].mxu0 %v7434_v61  ;;  %2707 = vmatmul.mubr.f32.vlgmr.msra.gmra.mrb[6].mxu1 %v7435_v62  ;;  %v2887_v61 = vld [vmem:[#allocation2 + $0x14] sm:$0x3] }
 0x358   : > { %9888 = vmatpush3.bf16.msra.mxu0 %v12747_v8  ;;  %9920 = vmatpush3.bf16.msra.mxu1 %v12747_v8 }
 0x359   : > { %9890 = vmatprep.subr.bf16.mxu0 %v12749_v9  ;;  %9922 = vmatprep.subr.bf16.mxu1 %v12749_v9 }
 0x35a   : > { %2792 = vmatprep.mubr.f32.mxu0 %v2725_v3  ;;  %2878 = vmatprep.mubr.f32.mxu1 %v2811_v5 }
 0x35c   : > { %9892 = vmatpush3.bf16.msra.mxu0 %v12759_v14  ;;  %9924 = vmatpush3.bf16.msra.mxu1 %v12759_v14 }
 0x35d   : > { %9894 = vmatprep.subr.bf16.mxu0 %v12763_v15  ;;  %9926 = vmatprep.subr.bf16.mxu1 %v12763_v15 }
 0x360   : > { %9896 = vmatpush3.bf16.msra.mxu0 %v12771_v20  ;;  %9928 = vmatpush3.bf16.msra.mxu1 %v12771_v20 }
 0x361   : > { %9898 = vmatprep.subr.bf16.mxu0 %v12775_v21  ;;  %9930 = vmatprep.subr.bf16.mxu1 %v12775_v21 }
 0x364   : > { %9900 = vmatpush3.bf16.msra.mxu0 %v12787_v29  ;;  %9932 = vmatpush3.bf16.msra.mxu1 %v12787_v29 }
 0x365   : > { %9902 = vmatprep.subr.bf16.mxu0 %v12791_v31  ;;  %9934 = vmatprep.subr.bf16.mxu1 %v12791_v31 }
 0x368   : > { %9904 = vmatpush3.bf16.msra.mxu0 %v12799_v36  ;;  %9936 = vmatpush3.bf16.msra.mxu1 %v12799_v36 }
 0x369   : > { %9906 = vmatprep.subr.bf16.mxu0 %v12803_v37  ;;  %9938 = vmatprep.subr.bf16.mxu1 %v12803_v37 }
 0x36c   : > { %9908 = vmatpush3.bf16.msra.mxu0 %v12811_v42  ;;  %9940 = vmatpush3.bf16.msra.mxu1 %v12811_v42 }
 0x36d   : > { %9910 = vmatprep.subr.bf16.mxu0 %v12815_v43  ;;  %9942 = vmatprep.subr.bf16.mxu1 %v12815_v43 }
 0x370   : > { %9912 = vmatpush3.bf16.msra.mxu0 %v12823_v48  ;;  %9944 = vmatpush3.bf16.msra.mxu1 %v12823_v48 }
 0x371   : > { %9914 = vmatprep.subr.bf16.mxu0 %v12827_v49  ;;  %9946 = vmatprep.subr.bf16.mxu1 %v12827_v49 }
 0x374   : > { %9916 = vmatpush3.bf16.msra.mxu0 %v12833_v52  ;;  %9948 = vmatpush3.bf16.msra.mxu1 %v12833_v52 }
 0x375   : > { %9950 = vmatprep.subr.bf16.mxu0 %v12742_v4  ;;  %9982 = vmatprep.subr.bf16.mxu1 %v12742_v4 }
 0x377   : > { %2793 = vmatmul.mubr.f32.vlgmr.msra.gmra.mrb[8].mxu0 %v7436_v1  ;;  %2879 = vmatmul.mubr.f32.vlgmr.msra.gmra.mrb[8].mxu1 %v7437_v2 }
 0x378   : > { %9952 = vmatpush3.bf16.msra.mxu0 %v12747_v8  ;;  %9984 = vmatpush3.bf16.msra.mxu1 %v12747_v8 }
 0x379   : > { %9954 = vmatprep.subr.bf16.mxu0 %v12749_v9  ;;  %9986 = vmatprep.subr.bf16.mxu1 %v12749_v9  ;;  %v2027_v9 = vld [vmem:[#allocation2] sm:$0x3] }
 0x37a   : > { %2964 = vmatprep.mubr.f32.mxu0 %v2897_v10  ;;  %3050 = vmatprep.mubr.f32.mxu1 %v2983_v11  ;;  %v3065_v10 = vld [vmem:[%s13996_s13 + $0x10] sm:$0xff] (!%p7440_p1)  ;;  %v11946_v11 = vmov (!%p7440_p1), 0.0|0.0  }
 0x37c   : > { %9956 = vmatpush3.bf16.msra.mxu0 %v12759_v14  ;;  %9988 = vmatpush3.bf16.msra.mxu1 %v12759_v14 }
 0x37d   : > { %9958 = vmatprep.subr.bf16.mxu0 %v12763_v15  ;;  %9990 = vmatprep.subr.bf16.mxu1 %v12763_v15 }
 0x380   : > { %9960 = vmatpush3.bf16.msra.mxu0 %v12771_v20  ;;  %9992 = vmatpush3.bf16.msra.mxu1 %v12771_v20 }
 0x381   : > { %9962 = vmatprep.subr.bf16.mxu0 %v12775_v21  ;;  %9994 = vmatprep.subr.bf16.mxu1 %v12775_v21  ;;  %v2199_v21 = vld [vmem:[#allocation2 + $0x4] sm:$0x3] }
 0x384   : > { %9964 = vmatpush3.bf16.msra.mxu0 %v12787_v29  ;;  %9996 = vmatpush3.bf16.msra.mxu1 %v12787_v29 }
 0x385   : > { %9966 = vmatprep.subr.bf16.mxu0 %v12791_v31  ;;  %9998 = vmatprep.subr.bf16.mxu1 %v12791_v31  ;;  %v2371_v31 = vld [vmem:[#allocation2 + $0x8] sm:$0x3] }
 0x388   : > { %9968 = vmatpush3.bf16.msra.mxu0 %v12799_v36  ;;  %10000 = vmatpush3.bf16.msra.mxu1 %v12799_v36 }
 0x389   : > { %9970 = vmatprep.subr.bf16.mxu0 %v12803_v37  ;;  %10002 = vmatprep.subr.bf16.mxu1 %v12803_v37 }
 0x38c   : > { %9972 = vmatpush3.bf16.msra.mxu0 %v12811_v42  ;;  %10004 = vmatpush3.bf16.msra.mxu1 %v12811_v42 }
 0x38d   : > { %9974 = vmatprep.subr.bf16.mxu0 %v12815_v43  ;;  %10006 = vmatprep.subr.bf16.mxu1 %v12815_v43  ;;  %v2629_v43 = vld [vmem:[#allocation2 + $0xe] sm:$0x3] }
 0x390   : > { %9976 = vmatpush3.bf16.msra.mxu0 %v12823_v48  ;;  %10008 = vmatpush3.bf16.msra.mxu1 %v12823_v48 }
 0x391   : > { %9978 = vmatprep.subr.bf16.mxu0 %v12827_v49  ;;  %10010 = vmatprep.subr.bf16.mxu1 %v12827_v49 }
 0x394   : > { %9980 = vmatpush3.bf16.msra.mxu0 %v12833_v52  ;;  %10012 = vmatpush3.bf16.msra.mxu1 %v12833_v52 }
 0x395   : > { %10013 = vmatprep.subr.bf16.mxu0 (!%p7440_p1), %v11946_v11  ;;  %10037 = vmatprep.subr.bf16.mxu1 (!%p7440_p1), %v11946_v11 }
 0x397   : > { %2965 = vmatmul.mubr.f32.vlgmr.msra.gmra.mrb[10].mxu0 %v7438_v6  ;;  %3051 = vmatmul.mubr.f32.vlgmr.msra.gmra.mrb[10].mxu1 %v7439_v7  ;;  %v3063_v6 = vld [vmem:[%s13996_s13] sm:$0xff] (!%p7440_p1)  ;;  %v3064_v7 = vld [vmem:[%s13996_s13 + $0x8] sm:$0xff] (!%p7440_p1) }
 0x3ca   : > { %v7581_v4 = vpop.f32.mrb[0].mxu0  ;;  %v7616_v8 = vpop.f32.mrb[0].mxu1 }
 0x3cb   : > { %v7582_v12 = vpop.f32.mrb[1].mxu0  ;;  %v7617_v14 = vpop.f32.mrb[1].mxu1 }
 0x3cc   : > { %v7583_v15 = vadd.f32 %v7582_v12, %v7581_v4  ;;  %v7618_v16 = vadd.f32 %v7617_v14, %v7616_v8  ;;  %v13025_v4 = vpack.c.bf16 (!%p7440_p1), %v3064_v7, %v3063_v6  ;;  %v3066_v8 = vld [vmem:[%s13996_s13 + $0x18] sm:$0xff] (!%p7440_p1)  ;;  %v3068_v14 = vld [vmem:[%s13996_s13 + $0x28] sm:$0xff] (!%p7440_p1)  ;;  %v4868_v7 = vld [vmem:[%s13998_s5] sm:$0xff] (!%p7440_p1) }
 0x3cd   : > { %v13034_v12 = vpack.c.bf16 (!%p7440_p1), %v3066_v8, %v3065_v10 }
 0x3ce   : > { %v2110_v17 = vadd.f32 %v7583_v15, %v2027_v9  ;;  %v2196_v18 = vadd.f32 %v7618_v16, %v2113_v13  ;;  %v11948_v9 = vmov (!%p7440_p1), 0.0   ;;  %10015 = vmatpush3.bf16.msra.mxu0 (!%p7440_p1), %v13025_v4  ;;  %10039 = vmatpush3.bf16.msra.mxu1 (!%p7440_p1), %v13025_v4  ;;  %v3067_v13 = vld [vmem:[%s13996_s13 + $0x20] sm:$0xff] (!%p7440_p1) }
 0x3cf   : > { %8597 = vmatprep.mubr.msk.f32.mxu1 (!%p7440_p1), %vm11947_vm0, %v11948_v9  ;;  %8562 = vmatprep.mubr.msk.f32.mxu0 (!%p7440_p1), %vm11947_vm0, %v11948_v9  ;;  %v7460_v15 = vld [vmem:[%s13997_s9 + $0x4] sm:$0x7] (!%p7440_p1)  ;;  %v4011_v16 = vld [vmem:[%s13997_s9] sm:$0x7] (!%p7440_p1) }
 0x3d0   : > { %2111 = vst [vmem:[#allocation2] sm:$0x3] %v2110_v17  ;;  %2197 = vst [vmem:[#allocation2 + $0x2] sm:$0x3] %v2196_v18  ;;  %10016 = vmatprep.subr.bf16.mxu0 (!%p7440_p1), %v11946_v11  ;;  %10040 = vmatprep.subr.bf16.mxu1 (!%p7440_p1), %v11946_v11  ;;  %v13044_v17 = vpack.c.bf16 (!%p7440_p1), %v3068_v14, %v3067_v13  ;;  %v3069_v18 = vld [vmem:[%s13996_s13 + $0x30] sm:$0xff] (!%p7440_p1) }
 0x3d1   : > { %4244 = vxpose.xlu0.b32.start.end [1/1] (short) (!%p7440_p1), %v7460_v15, 128  ;;  %4012 = vxpose.xlu1.b32.start.end [1/1] (short) (!%p7440_p1), %v4011_v16, 128  ;;  %v4869_v15 = vld [vmem:[%s13998_s5 + $0x8] sm:$0xff] (!%p7440_p1) }
 0x3d2   : > { %10018 = vmatpush3.bf16.msra.mxu0 (!%p7440_p1), %v13034_v12  ;;  %10042 = vmatpush3.bf16.msra.mxu1 (!%p7440_p1), %v13034_v12 }
 0x3d3   : > { %10019 = vmatprep.subr.bf16.mxu0 (!%p7440_p1), %v11946_v11  ;;  %10043 = vmatprep.subr.bf16.mxu1 (!%p7440_p1), %v11946_v11 }
 0x3d6   : > { %10021 = vmatpush3.bf16.msra.mxu0 (!%p7440_p1), %v13044_v17  ;;  %10045 = vmatpush3.bf16.msra.mxu1 (!%p7440_p1), %v13044_v17 }
 0x3d7   : > { %10022 = vmatprep.subr.bf16.mxu0 (!%p7440_p1), %v11946_v11  ;;  %10046 = vmatprep.subr.bf16.mxu1 (!%p7440_p1), %v11946_v11 }
 0x3ea   : > { %v7651_v19 = vpop.f32.mrb[2].mxu0  ;;  %v7686_v20 = vpop.f32.mrb[2].mxu1 }
 0x3eb   : > { %v7652_v22 = vpop.f32.mrb[3].mxu0  ;;  %v7687_v24 = vpop.f32.mrb[3].mxu1 }
 0x3ec   : > { %v7653_v25 = vadd.f32 %v7652_v22, %v7651_v19  ;;  %v7688_v26 = vadd.f32 %v7687_v24, %v7686_v20  ;;  %v3070_v19 = vld [vmem:[%s13996_s13 + $0x38] sm:$0xff] (!%p7440_p1)  ;;  %v3072_v22 = vld [vmem:[%s13996_s13 + $0x48] sm:$0xff] (!%p7440_p1)  ;;  %v3073_v24 = vld [vmem:[%s13996_s13 + $0x50] sm:$0xff] (!%p7440_p1) }
 0x3ed   : > { %v13052_v20 = vpack.c.bf16 (!%p7440_p1), %v3070_v19, %v3069_v18 }
 0x3ee   : > { %v2282_v27 = vadd.f32 %v7653_v25, %v2199_v21  ;;  %v2368_v28 = vadd.f32 %v7688_v26, %v2285_v23  ;;  %v3071_v21 = vld [vmem:[%s13996_s13 + $0x40] sm:$0xff] (!%p7440_p1)  ;;  %v3074_v25 = vld [vmem:[%s13996_s13 + $0x58] sm:$0xff] (!%p7440_p1) }
 0x3ef   : > { %10024 = vmatpush3.bf16.msra.mxu0 (!%p7440_p1), %v13052_v20  ;;  %10048 = vmatpush3.bf16.msra.mxu1 (!%p7440_p1), %v13052_v20  ;;  %v13060_v23 = vpack.c.bf16 (!%p7440_p1), %v3072_v22, %v3071_v21  ;;  %v13068_v26 = vpack.c.bf16 (!%p7440_p1), %v3074_v25, %v3073_v24  ;;  %v4870_v24 = vld [vmem:[%s13998_s5 + $0x10] sm:$0x3] (!%p7440_p1) }
 0x3f0   : > { %2283 = vst [vmem:[#allocation2 + $0x4] sm:$0x3] %v2282_v27  ;;  %2369 = vst [vmem:[#allocation2 + $0x6] sm:$0x3] %v2368_v28  ;;  %10025 = vmatprep.subr.bf16.mxu0 (!%p7440_p1), %v11946_v11  ;;  %10049 = vmatprep.subr.bf16.mxu1 (!%p7440_p1), %v11946_v11  ;;  %v3075_v27 = vld [vmem:[%s13996_s13 + $0x60] sm:$0xff] (!%p7440_p1)  ;;  %v3076_v28 = vld [vmem:[%s13996_s13 + $0x68] sm:$0xff] (!%p7440_p1) }
 0x3f3   : > { %10027 = vmatpush3.bf16.msra.mxu0 (!%p7440_p1), %v13060_v23  ;;  %10051 = vmatpush3.bf16.msra.mxu1 (!%p7440_p1), %v13060_v23 }
 0x3f4   : > { %10028 = vmatprep.subr.bf16.mxu0 (!%p7440_p1), %v11946_v11  ;;  %10052 = vmatprep.subr.bf16.mxu1 (!%p7440_p1), %v11946_v11 }
 0x3f7   : > { %10030 = vmatpush3.bf16.msra.mxu0 (!%p7440_p1), %v13068_v26  ;;  %10054 = vmatpush3.bf16.msra.mxu1 (!%p7440_p1), %v13068_v26 }
 0x3f8   : > { %10031 = vmatprep.subr.bf16.mxu0 (!%p7440_p1), %v11946_v11  ;;  %10055 = vmatprep.subr.bf16.mxu1 (!%p7440_p1), %v11946_v11 }
 0x40a   : > { %v7721_v29 = vpop.f32.mrb[4].mxu0  ;;  %v7756_v30 = vpop.f32.mrb[4].mxu1 }
 0x40b   : > { %v7722_v32 = vpop.f32.mrb[5].mxu0  ;;  %v7757_v34 = vpop.f32.mrb[5].mxu1 }
 0x40c   : > { %v7723_v35 = vadd.f32 %v7722_v32, %v7721_v29  ;;  %v7758_v36 = vadd.f32 %v7757_v34, %v7756_v30  ;;  %v13076_v29 = vpack.c.bf16 (!%p7440_p1), %v3076_v28, %v3075_v27  ;;  %v13078_v30 = vld [vmem:[#allocation24] ss:$0 sm:$0xff] (!%p7440_p1)  ;;  %v3080_v32 = vld [vmem:[#allocation2] sm:$0x3] (!%p7440_p1)  ;;  %v3078_v34 = vld [vmem:[%s13996_s13 + $0x78] sm:$0xff] (!%p7440_p1) }
 0x40e   : > { %v2454_v37 = vadd.f32 %v7723_v35, %v2371_v31  ;;  %v2540_v38 = vadd.f32 %v7758_v36, %v2457_v33  ;;  %v3166_v31 = vld [vmem:[#allocation2 + $0x2] sm:$0x3] (!%p7440_p1)  ;;  %v3077_v33 = vld [vmem:[%s13996_s13 + $0x70] sm:$0xff] (!%p7440_p1)  ;;  %v3087_v36 = vadd.f32 (!%p7440_p1), %v13078_v30, %v3080_v32  ;;  %10033 = vmatpush3.bf16.msra.mxu0 (!%p7440_p1), %v13076_v29  ;;  %10057 = vmatpush3.bf16.msra.mxu1 (!%p7440_p1), %v13076_v29  ;;  %v3992_v32 = vld [vmem:[%s13999_s11] sm:$0x7] (!%p7440_p1) }
 0x40f   : > { %v3167_v35 = vadd.f32 (!%p7440_p1), %v13078_v30, %v3166_v31  ;;  %10034 = vmatprep.subr.bf16.mxu0 (!%p7440_p1), %v11946_v11  ;;  %10058 = vmatprep.subr.bf16.mxu1 (!%p7440_p1), %v11946_v11 }
 0x410   : > { %2455 = vst [vmem:[#allocation2 + $0x8] sm:$0x3] %v2454_v37  ;;  %2541 = vst [vmem:[#allocation2 + $0xa] sm:$0x3] %v2540_v38  ;;  %v13088_v37 = vpack.c.bf16 (!%p7440_p1), %v3078_v34, %v3077_v33  ;;  %4871 = vxpose.xlu0.b32.start [1/3] (short) (narrow) (!%p7440_p1), %v4868_v7, 64  ;;  %v4003_v7 = vld [vmem:[#allocation27 + $0x48] sm:$0xff] (!%p7440_p1) }
 0x411   : > { %v3168_v38 = vmax.f32 (!%p7440_p1), %v3167_v35, 0.0  ;;  %v7490_v35 = vld [vmem:[%s13998_s5 + $0x20] sm:$0xff] (!%p7440_p1) }
 0x412   : > { %10036 = vmatpush3.bf16.msra.mxu0 (!%p7440_p1), %v13088_v37  ;;  %10060 = vmatpush3.bf16.msra.mxu1 (!%p7440_p1), %v13088_v37 }
 0x413   : > { %10061 = vmatprep.subr.bf16.mxu0 (!%p7440_p1), %v11946_v11  ;;  %10085 = vmatprep.subr.bf16.mxu1 (!%p7440_p1), %v11946_v11 }
 0x414   : > { %4872 = vxpose.xlu0.b32.cont [2/3] (short) (narrow) (!%p7440_p1), %v4869_v15, 64 }
 0x415   : > { %8598 = vmatmul.mubr.f32.vlgmr.msra.gmra.mrb[0].mxu1 (!%p7440_p1), %v3168_v38 }
 0x416   : > { %10087 = vmatpush3.bf16.msra.mxu1 (!%p7440_p1), %v13025_v4  ;;  %8667 = vmatprep.mubr.msk.f32.mxu1 (!%p7440_p1), %vm11947_vm0, %v11948_v9 }
 0x417   : > { %10088 = vmatprep.subr.bf16.mxu1 (!%p7440_p1), %v11946_v11 }
 0x418   : > { %4873 = vxpose.xlu0.b32.end [3/3] (short) (narrow) (!%p7440_p1), %v4870_v24, 64 }
 0x41a   : > { %10090 = vmatpush3.bf16.msra.mxu1 (!%p7440_p1), %v13034_v12 }
 0x41b   : > { %10091 = vmatprep.subr.bf16.mxu1 (!%p7440_p1), %v11946_v11 }
 0x41e   : > { %10093 = vmatpush3.bf16.msra.mxu1 (!%p7440_p1), %v13044_v17 }
 0x41f   : > { %10094 = vmatprep.subr.bf16.mxu1 (!%p7440_p1), %v11946_v11 }
 0x422   : > { %10096 = vmatpush3.bf16.msra.mxu1 (!%p7440_p1), %v13052_v20 }
 0x423   : > { %10097 = vmatprep.subr.bf16.mxu1 (!%p7440_p1), %v11946_v11 }
 0x426   : > { %10099 = vmatpush3.bf16.msra.mxu1 (!%p7440_p1), %v13060_v23 }
 0x427   : > { %10100 = vmatprep.subr.bf16.mxu1 (!%p7440_p1), %v11946_v11 }
 0x42a   : > { %v7791_v39 = vpop.f32.mrb[6].mxu0  ;;  %v7826_v40 = vpop.f32.mrb[6].mxu1  ;;  %10102 = vmatpush3.bf16.msra.mxu1 (!%p7440_p1), %v13068_v26 }
 0x42b   : > { %v7792_v42 = vpop.f32.mrb[7].mxu0  ;;  %v7827_v44 = vpop.f32.mrb[7].mxu1  ;;  %10103 = vmatprep.subr.bf16.mxu1 (!%p7440_p1), %v11946_v11 }
 0x42c   : > { %v7793_v45 = vadd.f32 %v7792_v42, %v7791_v39  ;;  %v7828_v46 = vadd.f32 %v7827_v44, %v7826_v40  ;;  %v3088_v39 = vmax.f32 (!%p7440_p1), %v3087_v36, 0.0  ;;  %v3241_v40 = vld [vmem:[#allocation2 + $0x4] sm:$0x3] (!%p7440_p1)  ;;  %v7491_v36 = vld [vmem:[%s13998_s5 + $0x28] sm:$0x3] (!%p7440_p1) }
 0x42d   : > { %v3242_v42 = vadd.f32 (!%p7440_p1), %v13078_v30, %v3241_v40 }
 0x42e   : > { %v2626_v47 = vadd.f32 %v7793_v45, %v2543_v41  ;;  %v2712_v48 = vadd.f32 %v7828_v46, %v2629_v43  ;;  %8563 = vmatmul.mubr.f32.vlgmr.msra.gmra.mrb[0].mxu0 (!%p7440_p1), %v3088_v39  ;;  %v3316_v41 = vld [vmem:[#allocation2 + $0x6] sm:$0x3] (!%p7440_p1)  ;;  %10105 = vmatpush3.bf16.msra.mxu1 (!%p7440_p1), %v13076_v29  ;;  %v3391_v46 = vld [vmem:[#allocation2 + $0x8] sm:$0x3] (!%p7440_p1) }
 0x42f   : > { %10063 = vmatpush3.bf16.msra.mxu0 (!%p7440_p1), %v13025_v4  ;;  %8632 = vmatprep.mubr.msk.f32.mxu0 (!%p7440_p1), %vm11947_vm0, %v11948_v9  ;;  %v3317_v43 = vadd.f32 (!%p7440_p1), %v13078_v30, %v3316_v41  ;;  %v3243_v44 = vmax.f32 (!%p7440_p1), %v3242_v42, 0.0 }
 0x430   : > { %2627 = vst [vmem:[#allocation2 + $0xc] sm:$0x3] %v2626_v47  ;;  %2713 = vst [vmem:[#allocation2 + $0xe] sm:$0x3] %v2712_v48  ;;  %10064 = vmatprep.subr.bf16.mxu0 (!%p7440_p1), %v11946_v11  ;;  %10106 = vmatprep.subr.bf16.mxu1 (!%p7440_p1), %v11946_v11  ;;  %v3466_v47 = vld [vmem:[#allocation2 + $0xa] sm:$0x3] (!%p7440_p1)  ;;  %v3392_v48 = vadd.f32 (!%p7440_p1), %v13078_v30, %v3391_v46 }
 0x431   : > { %v3318_v45 = vmax.f32 (!%p7440_p1), %v3317_v43, 0.0 }
 0x432   : > { %10108 = vmatpush3.bf16.msra.mxu1 (!%p7440_p1), %v13088_v37 }
 0x433   : > { %10066 = vmatpush3.bf16.msra.mxu0 (!%p7440_p1), %v13034_v12  ;;  %10133 = vmatprep.subr.bf16.mxu1 (!%p7440_p1), %v11946_v11 }
 0x434   : > { %10067 = vmatprep.subr.bf16.mxu0 (!%p7440_p1), %v11946_v11 }
 0x435   : > { %8668 = vmatmul.mubr.f32.vlgmr.msra.gmra.mrb[2].mxu1 (!%p7440_p1), %v3318_v45 }
 0x436   : > { %10135 = vmatpush3.bf16.msra.mxu1 (!%p7440_p1), %v13025_v4  ;;  %8737 = vmatprep.mubr.msk.f32.mxu1 (!%p7440_p1), %vm11947_vm0, %v11948_v9 }
 0x437   : > { %10069 = vmatpush3.bf16.msra.mxu0 (!%p7440_p1), %v13044_v17  ;;  %10136 = vmatprep.subr.bf16.mxu1 (!%p7440_p1), %v11946_v11 }
 0x438   : > { %10070 = vmatprep.subr.bf16.mxu0 (!%p7440_p1), %v11946_v11 }
 0x43a   : > { %10138 = vmatpush3.bf16.msra.mxu1 (!%p7440_p1), %v13034_v12 }
 0x43b   : > { %10072 = vmatpush3.bf16.msra.mxu0 (!%p7440_p1), %v13052_v20  ;;  %10139 = vmatprep.subr.bf16.mxu1 (!%p7440_p1), %v11946_v11 }
 0x43c   : > { %10073 = vmatprep.subr.bf16.mxu0 (!%p7440_p1), %v11946_v11 }
 0x43e   : > { %10141 = vmatpush3.bf16.msra.mxu1 (!%p7440_p1), %v13044_v17 }
 0x43f   : > { %10075 = vmatpush3.bf16.msra.mxu0 (!%p7440_p1), %v13060_v23  ;;  %10142 = vmatprep.subr.bf16.mxu1 (!%p7440_p1), %v11946_v11 }
 0x440   : > { %10076 = vmatprep.subr.bf16.mxu0 (!%p7440_p1), %v11946_v11 }
 0x442   : > { %10144 = vmatpush3.bf16.msra.mxu1 (!%p7440_p1), %v13052_v20 }
 0x443   : > { %10078 = vmatpush3.bf16.msra.mxu0 (!%p7440_p1), %v13068_v26  ;;  %10145 = vmatprep.subr.bf16.mxu1 (!%p7440_p1), %v11946_v11 }
 0x444   : > { %10079 = vmatprep.subr.bf16.mxu0 (!%p7440_p1), %v11946_v11 }
 0x446   : > { %10147 = vmatpush3.bf16.msra.mxu1 (!%p7440_p1), %v13060_v23 }
 0x447   : > { %10081 = vmatpush3.bf16.msra.mxu0 (!%p7440_p1), %v13076_v29  ;;  %10148 = vmatprep.subr.bf16.mxu1 (!%p7440_p1), %v11946_v11 }
 0x448   : > { %10082 = vmatprep.subr.bf16.mxu0 (!%p7440_p1), %v11946_v11 }
 0x44a   : > { %v7861_v49 = vpop.f32.mrb[8].mxu0  ;;  %v7896_v50 = vpop.f32.mrb[8].mxu1  ;;  %10150 = vmatpush3.bf16.msra.mxu1 (!%p7440_p1), %v13068_v26 }
 0x44b   : > { %v7862_v52 = vpop.f32.mrb[9].mxu0  ;;  %v7897_v54 = vpop.f32.mrb[9].mxu1  ;;  %10084 = vmatpush3.bf16.msra.mxu0 (!%p7440_p1), %v13088_v37  ;;  %10151 = vmatprep.subr.bf16.mxu1 (!%p7440_p1), %v11946_v11 }
 0x44c   : > { %v7863_v55 = vadd.f32 %v7862_v52, %v7861_v49  ;;  %v7898_v56 = vadd.f32 %v7897_v54, %v7896_v50  ;;  %10109 = vmatprep.subr.bf16.mxu0 (!%p7440_p1), %v11946_v11  ;;  %v3467_v49 = vadd.f32 (!%p7440_p1), %v13078_v30, %v3466_v47  ;;  %v3393_v50 = vmax.f32 (!%p7440_p1), %v3392_v48, 0.0  ;;  %v3541_v52 = vld [vmem:[#allocation2 + $0xc] sm:$0x3] (!%p7440_p1)  ;;  %v13375_v47 = vld [vmem:[#allocation26] ss:$0 sm:$0xff] (!%p7440_p1) }
 0x44d   : > { %v3542_v54 = vadd.f32 (!%p7440_p1), %v13078_v30, %v3541_v52 }
 0x44e   : > { %v2798_v57 = vadd.f32 %v7863_v55, %v2715_v51  ;;  %v2884_v58 = vadd.f32 %v7898_v56, %v2801_v53  ;;  %8633 = vmatmul.mubr.f32.vlgmr.msra.gmra.mrb[2].mxu0 (!%p7440_p1), %v3243_v44  ;;  %10153 = vmatpush3.bf16.msra.mxu1 (!%p7440_p1), %v13076_v29  ;;  %v3468_v51 = vmax.f32 (!%p7440_p1), %v3467_v49, 0.0  ;;  %v3616_v53 = vld [vmem:[#allocation2 + $0xe] sm:$0x3] (!%p7440_p1) }
 0x44f   : > { %10111 = vmatpush3.bf16.msra.mxu0 (!%p7440_p1), %v13025_v4  ;;  %8702 = vmatprep.mubr.msk.f32.mxu0 (!%p7440_p1), %vm11947_vm0, %v11948_v9  ;;  %v3617_v55 = vadd.f32 (!%p7440_p1), %v13078_v30, %v3616_v53  ;;  %v3543_v56 = vmax.f32 (!%p7440_p1), %v3542_v54, 0.0 }
 0x450   : > { %2799 = vst [vmem:[#allocation2 + $0x10] sm:$0x3] %v2798_v57  ;;  %2885 = vst [vmem:[#allocation2 + $0x12] sm:$0x3] %v2884_v58  ;;  %10112 = vmatprep.subr.bf16.mxu0 (!%p7440_p1), %v11946_v11  ;;  %10154 = vmatprep.subr.bf16.mxu1 (!%p7440_p1), %v11946_v11 }
 0x451   : > { %v3618_v57 = vmax.f32 (!%p7440_p1), %v3617_v55, 0.0  ;;  %v13222_v58 = vpop.trf.xlu0 (!%p7440_p1) }
 0x452   : > { %10156 = vmatpush3.bf16.msra.mxu1 (!%p7440_p1), %v13088_v37 }
 0x453   : > { %10114 = vmatpush3.bf16.msra.mxu0 (!%p7440_p1), %v13034_v12  ;;  %10181 = vmatprep.subr.bf16.mxu1 (!%p7440_p1), %v11946_v11 }
 0x454   : > { %10115 = vmatprep.subr.bf16.mxu0 (!%p7440_p1), %v11946_v11 }
 0x455   : > { %8738 = vmatmul.mubr.f32.vlgmr.msra.gmra.mrb[4].mxu1 (!%p7440_p1), %v3468_v51 }
 0x456   : > { %10183 = vmatpush3.bf16.msra.mxu1 (!%p7440_p1), %v13025_v4  ;;  %8807 = vmatprep.mubr.msk.f32.mxu1 (!%p7440_p1), %vm11947_vm0, %v11948_v9 }
 0x457   : > { %10117 = vmatpush3.bf16.msra.mxu0 (!%p7440_p1), %v13044_v17  ;;  %10184 = vmatprep.subr.bf16.mxu1 (!%p7440_p1), %v11946_v11 }
 0x458   : > { %10118 = vmatprep.subr.bf16.mxu0 (!%p7440_p1), %v11946_v11 }
 0x45a   : > { %10186 = vmatpush3.bf16.msra.mxu1 (!%p7440_p1), %v13034_v12 }
 0x45b   : > { %10120 = vmatpush3.bf16.msra.mxu0 (!%p7440_p1), %v13052_v20  ;;  %10187 = vmatprep.subr.bf16.mxu1 (!%p7440_p1), %v11946_v11 }
 0x45c   : > { %10121 = vmatprep.subr.bf16.mxu0 (!%p7440_p1), %v11946_v11 }
 0x45e   : > { %10189 = vmatpush3.bf16.msra.mxu1 (!%p7440_p1), %v13044_v17 }
 0x45f   : > { %10123 = vmatpush3.bf16.msra.mxu0 (!%p7440_p1), %v13060_v23  ;;  %10190 = vmatprep.subr.bf16.mxu1 (!%p7440_p1), %v11946_v11 }
 0x460   : > { %10124 = vmatprep.subr.bf16.mxu0 (!%p7440_p1), %v11946_v11 }
 0x462   : > { %10192 = vmatpush3.bf16.msra.mxu1 (!%p7440_p1), %v13052_v20 }
 0x463   : > { %10126 = vmatpush3.bf16.msra.mxu0 (!%p7440_p1), %v13068_v26  ;;  %10193 = vmatprep.subr.bf16.mxu1 (!%p7440_p1), %v11946_v11 }
 0x464   : > { %10127 = vmatprep.subr.bf16.mxu0 (!%p7440_p1), %v11946_v11 }
 0x466   : > { %10195 = vmatpush3.bf16.msra.mxu1 (!%p7440_p1), %v13060_v23 }
 0x467   : > { %10129 = vmatpush3.bf16.msra.mxu0 (!%p7440_p1), %v13076_v29  ;;  %10196 = vmatprep.subr.bf16.mxu1 (!%p7440_p1), %v11946_v11 }
 0x468   : > { %10130 = vmatprep.subr.bf16.mxu0 (!%p7440_p1), %v11946_v11 }
 0x46a   : > { %v7931_v59 = vpop.f32.mrb[10].mxu0  ;;  %v7966_v60 = vpop.f32.mrb[10].mxu1  ;;  %3061 = sbr.rel (%p7440_p1) target bundleno = 3179 (0xc6b), region = 260  ;;  %10198 = vmatpush3.bf16.msra.mxu1 (!%p7440_p1), %v13068_v26 }
 0x46b   : > { %v7932_v62 = vpop.f32.mrb[11].mxu0  ;;  %v7967_v0 = vpop.f32.mrb[11].mxu1  ;;  %10132 = vmatpush3.bf16.msra.mxu0 (!%p7440_p1), %v13088_v37  ;;  %10199 = vmatprep.subr.bf16.mxu1 (!%p7440_p1), %v11946_v11 }
 0x46c   : > { %v7933_v1 = vadd.f32 %v7932_v62, %v7931_v59  ;;  %v7968_v2 = vadd.f32 %v7967_v0, %v7966_v60  ;;  %10157 = vmatprep.subr.bf16.mxu0 (!%p7440_p1), %v11946_v11  ;;  %v13224_v59 = vpop.trf.xlu1 (!%p7440_p1)  ;;  %v13230_v60 = vpop.trf.xlu0 (!%p7440_p1)  ;;  %v3691_v0 = vld [vmem:[#allocation2 + $0x10] sm:$0x3] (!%p7440_p1) }
 0x46e   : > { %v2970_v3 = vadd.f32 %v7933_v1, %v2887_v61  ;;  %v3056_v5 = vadd.f32 %v7968_v2, %v2973_v63  ;;  %8703 = vmatmul.mubr.f32.vlgmr.msra.gmra.mrb[4].mxu0 (!%p7440_p1), %v3393_v50  ;;  %10201 = vmatpush3.bf16.msra.mxu1 (!%p7440_p1), %v13076_v29  ;;  %v3766_v1 = vld [vmem:[#allocation2 + $0x12] sm:$0x3] (!%p7440_p1) }
 0x46f   : > { %10159 = vmatpush3.bf16.msra.mxu0 (!%p7440_p1), %v13025_v4  ;;  %8772 = vmatprep.mubr.msk.f32.mxu0 (!%p7440_p1), %vm11947_vm0, %v11948_v9  ;;  %v3767_v6 = vadd.f32 (!%p7440_p1), %v13078_v30, %v3766_v1 }
 0x470   : > { %2971 = vst [vmem:[#allocation2 + $0x14] sm:$0x3] %v2970_v3  ;;  %3057 = vst [vmem:[#allocation2 + $0x16] sm:$0x3] %v3056_v5  ;;  %10160 = vmatprep.subr.bf16.mxu0 (!%p7440_p1), %v11946_v11  ;;  %10202 = vmatprep.subr.bf16.mxu1 (!%p7440_p1), %v11946_v11  ;;  %v13232_v61 = vpop.trf.xlu1 (!%p7440_p1)  ;;  %v13238_v62 = vpop.trf.xlu0 (!%p7440_p1)  ;;  %v3692_v5 = vadd.f32 (!%p7440_p1), %v13078_v30, %v3691_v0  ;;  %v3999_v0 = vld [vmem:[#allocation27 + $0x28] sm:$0xff] (!%p7440_p1) }
 0x471   : > { %v3768_v14 = vmax.f32 %v3767_v6, 0.0  ;;  %v4002_v6 = vld [vmem:[#allocation27 + $0x40] sm:$0xff] }
 0x472   : > { %10204 = vmatpush3.bf16.msra.mxu1 %v13088_v37  ;;  %v3693_v13 = vmax.f32 %v3692_v5, 0.0 }
 0x473   : > { %10162 = vmatpush3.bf16.msra.mxu0 %v13034_v12  ;;  %10229 = vmatprep.subr.bf16.mxu1 %v11946_v11 }
 0x474   : > { %10163 = vmatprep.subr.bf16.mxu0 %v11946_v11  ;;  %v13240_v63 = vpop.trf.xlu1  ;;  %v13248_v2 = vpop.trf.xlu0 }
 0x475   : > { %8808 = vmatmul.mubr.f32.vlgmr.msra.gmra.mrb[6].mxu1 %v3618_v57  ;;  %v3994_v57 = vld [vmem:[#allocation27] sm:$0xff] }
 0x476   : > { %10231 = vmatpush3.bf16.msra.mxu1 %v13025_v4  ;;  %8877 = vmatprep.mubr.msk.f32.mxu1 %vm11947_vm0, %v11948_v9 }
 0x477   : > { %10165 = vmatpush3.bf16.msra.mxu0 %v13044_v17  ;;  %10232 = vmatprep.subr.bf16.mxu1 %v11946_v11  ;;  %v3916_v25 = vld [vmem:[#allocation2 + $0x16] sm:$0x3] }
 0x478   : > { %10166 = vmatprep.subr.bf16.mxu0 %v11946_v11  ;;  %v13250_v3 = vpop.trf.xlu1  ;;  %v13261_v10 = vpop.trf.xlu0  ;;  %v3917_v27 = vadd.f32 %v13078_v30, %v3916_v25  ;;  %v4008_v25 = vld [vmem:[#allocation27 + $0x70] sm:$0xff] }
 0x47a   : > { %10234 = vmatpush3.bf16.msra.mxu1 %v13034_v12  ;;  %v3918_v34 = vmax.f32 %v3917_v27, 0.0 }
 0x47b   : > { %10168 = vmatpush3.bf16.msra.mxu0 %v13052_v20  ;;  %10235 = vmatprep.subr.bf16.mxu1 %v11946_v11 }
 0x47c   : > { %10169 = vmatprep.subr.bf16.mxu0 %v11946_v11  ;;  %v13263_v8 = vpop.trf.xlu1  ;;  %v13272_v16 = vpop.trf.xlu0 }
 0x47e   : > { %10237 = vmatpush3.bf16.msra.mxu1 %v13044_v17 }
 0x47f   : > { %10171 = vmatpush3.bf16.msra.mxu0 %v13060_v23  ;;  %10238 = vmatprep.subr.bf16.mxu1 %v11946_v11 }
 0x480   : > { %10172 = vmatprep.subr.bf16.mxu0 %v11946_v11  ;;  %v13274_v18 = vpop.trf.xlu1 }
 0x482   : > { %10240 = vmatpush3.bf16.msra.mxu1 %v13052_v20 }
 0x483   : > { %10174 = vmatpush3.bf16.msra.mxu0 %v13068_v26  ;;  %10241 = vmatprep.subr.bf16.mxu1 %v11946_v11 }
 0x484   : > { %10175 = vmatprep.subr.bf16.mxu0 %v11946_v11  ;;  %v13288_v19 = vpop.trf.xlu1 }
 0x486   : > { %10243 = vmatpush3.bf16.msra.mxu1 %v13060_v23 }
 0x487   : > { %10177 = vmatpush3.bf16.msra.mxu0 %v13076_v29  ;;  %10244 = vmatprep.subr.bf16.mxu1 %v11946_v11 }
 0x488   : > { %10178 = vmatprep.subr.bf16.mxu0 %v11946_v11  ;;  %v13298_v21 = vpop.trf.xlu1 }
 0x48a   : > { %10246 = vmatpush3.bf16.msra.mxu1 %v13068_v26 }
 0x48b   : > { %10180 = vmatpush3.bf16.msra.mxu0 %v13088_v37  ;;  %10247 = vmatprep.subr.bf16.mxu1 %v11946_v11 }
 0x48c   : > { %10205 = vmatprep.subr.bf16.mxu0 %v11946_v11  ;;  %v4036_v22 = vpop.trf.xlu1 }
 0x48e   : > { %8773 = vmatmul.mubr.f32.vlgmr.msra.gmra.mrb[6].mxu0 %v3543_v56  ;;  %10249 = vmatpush3.bf16.msra.mxu1 %v13076_v29 }
 0x48f   : > { %10207 = vmatpush3.bf16.msra.mxu0 %v13025_v4  ;;  %8842 = vmatprep.mubr.msk.f32.mxu0 %vm11947_vm0, %v11948_v9 }
 0x490   : > { %10208 = vmatprep.subr.bf16.mxu0 %v11946_v11  ;;  %10250 = vmatprep.subr.bf16.mxu1 %v11946_v11  ;;  %v4037_v31 = vpop.trf.xlu1 }
 0x492   : > { %10252 = vmatpush3.bf16.msra.mxu1 %v13088_v37 }
 0x493   : > { %10210 = vmatpush3.bf16.msra.mxu0 %v13034_v12  ;;  %10277 = vmatprep.subr.bf16.mxu1 %v11946_v11 }
 0x494   : > { %10211 = vmatprep.subr.bf16.mxu0 %v11946_v11 }
 0x495   : > { %8878 = vmatmul.mubr.f32.vlgmr.msra.gmra.mrb[8].mxu1 %v3768_v14 }
 0x496   : > { %10279 = vmatpush3.bf16.msra.mxu1 %v13025_v4  ;;  %8947 = vmatprep.mubr.msk.f32.mxu1 %vm11947_vm0, %v11948_v9 }
 0x497   : > { %10213 = vmatpush3.bf16.msra.mxu0 %v13044_v17  ;;  %10280 = vmatprep.subr.bf16.mxu1 %v11946_v11 }
 0x498   : > { %10214 = vmatprep.subr.bf16.mxu0 %v11946_v11 }
 0x49a   : > { %10282 = vmatpush3.bf16.msra.mxu1 %v13034_v12 }
 0x49b   : > { %10216 = vmatpush3.bf16.msra.mxu0 %v13052_v20  ;;  %10283 = vmatprep.subr.bf16.mxu1 %v11946_v11 }
 0x49c   : > { %10217 = vmatprep.subr.bf16.mxu0 %v11946_v11 }
 0x49e   : > { %10285 = vmatpush3.bf16.msra.mxu1 %v13044_v17 }
 0x49f   : > { %10219 = vmatpush3.bf16.msra.mxu0 %v13060_v23  ;;  %10286 = vmatprep.subr.bf16.mxu1 %v11946_v11 }
 0x4a0   : > { %10220 = vmatprep.subr.bf16.mxu0 %v11946_v11 }
 0x4a2   : > { %10288 = vmatpush3.bf16.msra.mxu1 %v13052_v20 }
 0x4a3   : > { %10222 = vmatpush3.bf16.msra.mxu0 %v13068_v26  ;;  %10289 = vmatprep.subr.bf16.mxu1 %v11946_v11 }
 0x4a4   : > { %10223 = vmatprep.subr.bf16.mxu0 %v11946_v11 }
 0x4a6   : > { %10291 = vmatpush3.bf16.msra.mxu1 %v13060_v23 }
 0x4a7   : > { %10225 = vmatpush3.bf16.msra.mxu0 %v13076_v29  ;;  %10292 = vmatprep.subr.bf16.mxu1 %v11946_v11 }
 0x4a8   : > { %10226 = vmatprep.subr.bf16.mxu0 %v11946_v11 }
 0x4aa   : > { %10294 = vmatpush3.bf16.msra.mxu1 %v13068_v26 }
 0x4ab   : > { %10228 = vmatpush3.bf16.msra.mxu0 %v13088_v37  ;;  %10295 = vmatprep.subr.bf16.mxu1 %v11946_v11 }
 0x4ac   : > { %10253 = vmatprep.subr.bf16.mxu0 %v11946_v11 }
 0x4ae   : > { %8843 = vmatmul.mubr.f32.vlgmr.msra.gmra.mrb[8].mxu0 %v3693_v13  ;;  %10297 = vmatpush3.bf16.msra.mxu1 %v13076_v29  ;;  %v4005_v13 = vld [vmem:[#allocation27 + $0x58] sm:$0xff] }
 0x4af   : > { %10255 = vmatpush3.bf16.msra.mxu0 %v13025_v4  ;;  %8912 = vmatprep.mubr.msk.f32.mxu0 %vm11947_vm0, %v11948_v9  ;;  %v13286_v4 = vpop.trf.xlu0 }
 0x4b0   : > { %10256 = vmatprep.subr.bf16.mxu0 %v11946_v11  ;;  %10298 = vmatprep.subr.bf16.mxu1 %v11946_v11 }
 0x4b2   : > { %10300 = vmatpush3.bf16.msra.mxu1 %v13088_v37 }
 0x4b3   : > { %10258 = vmatpush3.bf16.msra.mxu0 %v13034_v12  ;;  %v13296_v12 = vpop.trf.xlu0  ;;  %8976 = vmatprep.subr.msk.mxu1 %vm4093_vm1, %v3992_v32 }
 0x4b4   : > { %10259 = vmatprep.subr.bf16.mxu0 %v11946_v11 }
 0x4b5   : > { %8948 = vmatmul.mubr.f32.vlgmr.msra.gmra.mrb[10].mxu1 %v3918_v34 }
 0x4b6   : > { %8977 = vmatpush3.msk.msra.mxu1 %vm4093_vm1, %v3992_v32  ;;  %8978 = vmatprep.mubr.msk.f32.mxu1 %vm4044_vm2, %v13222_v58  ;;  %v3995_v58 = vld [vmem:[#allocation27 + $0x8] sm:$0xff] }
 0x4b7   : > { %10261 = vmatpush3.bf16.msra.mxu0 %v13044_v17  ;;  %v4268_v17 = vpop.trf.xlu0 }
 0x4b8   : > { %10262 = vmatprep.subr.bf16.mxu0 %v11946_v11 }
 0x4b9   : > { %8979 = vmatmul.mubr.msk.f32.vlgmr.msra.gmra.mrb[12].mxu1 %vm4044_vm2, %v13230_v60  ;;  %v10301_v60 = vpack.c.bf16 %v3995_v58, %v3994_v57 }
 0x4ba   : > { %8981 = vmatprep.mubr.msk.f32.mxu1 %vm4044_vm2, %v13238_v62 }
 0x4bb   : > { %10264 = vmatpush3.bf16.msra.mxu0 %v13052_v20  ;;  %v3841_v20 = vld [vmem:[#allocation2 + $0x14] sm:$0x3]  ;;  %v4269_v28 = vpop.trf.xlu0  ;;  %10685 = vmatprep.subr.bf16.mxu1 %v10301_v60 }
 0x4bc   : > { %10265 = vmatprep.subr.bf16.mxu0 %v11946_v11  ;;  %10693 = vmatpush3.bf16.msra.mxu1 %v10301_v60 }
 0x4bd   : > { %8982 = vmatmul.mubr.msk.f32.gmra.mrb[14].mxu1 %vm4044_vm2, %v13248_v2  ;;  %v4000_v2 = vld [vmem:[#allocation27 + $0x30] sm:$0xff] }
 0x4be   : > { %8984 = vmatprep.mubr.msk.f32.mxu1 %vm4044_vm2, %v13261_v10  ;;  %v10317_v10 = vpack.c.bf16 %v4003_v7, %v4002_v6  ;;  %v13396_v7 = vld [vmem:[%s14001_s4] ss:$0 sm:$0xff] }
 0x4bf   : > { %10267 = vmatpush3.bf16.msra.mxu0 %v13060_v23  ;;  %v3842_v23 = vadd.f32 %v13078_v30, %v3841_v20  ;;  %v4038_v30 = vpop.trf.xlu1 }
 0x4c0   : > { %10268 = vmatprep.subr.bf16.mxu0 %v11946_v11 }
 0x4c1   : > { %v3843_v33 = vmax.f32 %v3842_v23, 0.0  ;;  %8985 = vmatmul.mubr.msk.f32.gmra.mrb[16].mxu1 %vm4044_vm2, %v13272_v16  ;;  %v4009_v23 = vld [vmem:[#allocation27 + $0x78] sm:$0xff] }
 0x4c2   : > { %8987 = vmatprep.mubr.msk.f32.mxu1 %vm4044_vm2, %v13286_v4  ;;  %v4007_v4 = vld [vmem:[#allocation27 + $0x68] sm:$0xff] }
 0x4c3   : > { %10270 = vmatpush3.bf16.msra.mxu0 %v13068_v26  ;;  %v7489_v26 = vld [vmem:[%s13998_s5 + $0x18] sm:$0xff]  ;;  %v4039_v38 = vpop.trf.xlu1 }
 0x4c4   : > { %10271 = vmatprep.subr.bf16.mxu0 %v11946_v11  ;;  %5041 = vxpose.xlu1.b32.start [1/3] (short) (narrow) %v7489_v26, 64 }
 0x4c5   : > { %8988 = vmatmul.mubr.msk.f32.gmra.mrb[18].mxu1 %vm4044_vm2, %v13296_v12 }
 0x4c6   : > { %8990 = vmatprep.mubr.msk.f32.mxu1 %vm4044_vm2, %v4268_v17 }
 0x4c7   : > { %10273 = vmatpush3.bf16.msra.mxu0 %v13076_v29  ;;  %v4270_v29 = vpop.trf.xlu0  ;;  %v4040_v40 = vpop.trf.xlu1 }
 0x4c8   : > { %10274 = vmatprep.subr.bf16.mxu0 %v11946_v11  ;;  %5042 = vxpose.xlu1.b32.cont [2/3] (short) (narrow) %v7490_v35, 64 }
 0x4c9   : > { %8991 = vmatmul.mubr.msk.f32.gmra.mrb[20].mxu1 %vm4044_vm2, %v4269_v28  ;;  %v10329_v28 = vpack.c.bf16 %v4009_v23, %v4008_v25 }
 0x4ca   : > { %8993 = vmatprep.mubr.msk.f32.mxu1 %vm4044_vm2, %v4270_v29 }
 0x4cb   : > { %10276 = vmatpush3.bf16.msra.mxu0 %v13088_v37  ;;  %v4271_v37 = vpop.trf.xlu0  ;;  %v4041_v42 = vpop.trf.xlu1 }
 0x4cc   : > { %8950 = vmatprep.subr.msk.mxu0 %vm4093_vm1, %v3992_v32  ;;  %5043 = vxpose.xlu1.b32.end [3/3] (short) (narrow) %v7491_v36, 64  ;;  %v4848_v36 = vld [vmem:[%s14000_s7 + $0x8] sm:$0xff] }
 0x4cd   : > { %8994 = vmatmul.mubr.msk.f32.gmra.mrb[22].mxu1 %vm4044_vm2, %v4271_v37 }
 0x4ce   : > { %8913 = vmatmul.mubr.f32.vlgmr.msra.gmra.mrb[10].mxu0 %v3843_v33 }
 0x4cf   : > { %8951 = vmatpush3.msk.msra.mxu0 %vm4093_vm1, %v3992_v32  ;;  %8952 = vmatprep.mubr.msk.f32.mxu0 %vm4044_vm2, %v13224_v59  ;;  %v4272_v39 = vpop.trf.xlu0  ;;  %v4042_v44 = vpop.trf.xlu1  ;;  %v3996_v59 = vld [vmem:[#allocation27 + $0x10] sm:$0xff] }
 0x4d0   : > { %8996 = vmatprep.mubr.msk.f32.mxu1 %vm4044_vm2, %v4272_v39  ;;  %10302 = vmatprep.subr.bf16.mxu0 %v10301_v60 }
 0x4d2   : > { %8953 = vmatmul.mubr.msk.f32.vlgmr.msra.gmra.mrb[12].mxu0 %vm4044_vm2, %v13232_v61  ;;  %v3997_v61 = vld [vmem:[#allocation27 + $0x18] sm:$0xff] }
 0x4d3   : > { %8955 = vmatprep.mubr.msk.f32.mxu0 %vm4044_vm2, %v13240_v63  ;;  %v4273_v41 = vpop.trf.xlu0  ;;  %v4043_v46 = vpop.trf.xlu1  ;;  %v10305_v62 = vpack.c.bf16 %v3997_v61, %v3996_v59  ;;  %v3998_v63 = vld [vmem:[#allocation27 + $0x20] sm:$0xff]  ;;  %10304 = vmatpush3.bf16.msra.mxu0 %v10301_v60 }
 0x4d4   : > { %8997 = vmatmul.mubr.msk.f32.gmra.mrb[24].mxu1 %vm4044_vm2, %v4273_v41  ;;  %v10309_v1 = vpack.c.bf16 %v3999_v0, %v3998_v63 }
 0x4d5   : > { %10306 = vmatprep.subr.bf16.mxu0 %v10305_v62  ;;  %10686 = vmatprep.subr.bf16.mxu1 %v10305_v62 }
 0x4d6   : > { %8956 = vmatmul.mubr.msk.f32.gmra.mrb[14].mxu0 %vm4044_vm2, %v13250_v3  ;;  %v4001_v3 = vld [vmem:[#allocation27 + $0x38] sm:$0xff]  ;;  %10694 = vmatpush3.bf16.msra.mxu1 %v10305_v62 }
 0x4d7   : > { %8958 = vmatprep.mubr.msk.f32.mxu0 %vm4044_vm2, %v13263_v8  ;;  %v4274_v43 = vpop.trf.xlu0  ;;  %10308 = vmatpush3.bf16.msra.mxu0 %v10305_v62  ;;  %v10313_v5 = vpack.c.bf16 %v4001_v3, %v4000_v2  ;;  %v4004_v8 = vld [vmem:[#allocation27 + $0x50] sm:$0xff] }
 0x4d8   : > { %8999 = vmatprep.mubr.msk.f32.mxu1 %vm4044_vm2, %v4274_v43  ;;  %10310 = vmatprep.subr.bf16.mxu0 %v10309_v1  ;;  %v10321_v14 = vpack.c.bf16 %v4005_v13, %v4004_v8 }
 0x4d9   : > { %10687 = vmatprep.subr.bf16.mxu1 %v10309_v1 }
 0x4da   : > { %8959 = vmatmul.mubr.msk.f32.gmra.mrb[16].mxu0 %vm4044_vm2, %v13274_v18  ;;  %10695 = vmatpush3.bf16.msra.mxu1 %v10309_v1  ;;  %v4006_v18 = vld [vmem:[#allocation27 + $0x60] sm:$0xff] }
 0x4db   : > { %8961 = vmatprep.mubr.msk.f32.mxu0 %vm4044_vm2, %v13288_v19  ;;  %v4275_v45 = vpop.trf.xlu0  ;;  %10312 = vmatpush3.bf16.msra.mxu0 %v10309_v1 }
 0x4dc   : > { %9000 = vmatmul.mubr.msk.f32.gmra.mrb[26].mxu1 %vm4044_vm2, %v4275_v45  ;;  %10314 = vmatprep.subr.bf16.mxu0 %v10313_v5 }
 0x4dd   : > { %10688 = vmatprep.subr.bf16.mxu1 %v10313_v5 }
 0x4de   : > { %8962 = vmatmul.mubr.msk.f32.gmra.mrb[18].mxu0 %vm4044_vm2, %v13298_v21  ;;  %10696 = vmatpush3.bf16.msra.mxu1 %v10313_v5 }
 0x4df   : > { %8964 = vmatprep.mubr.msk.f32.mxu0 %vm4044_vm2, %v4036_v22  ;;  %10316 = vmatpush3.bf16.msra.mxu0 %v10313_v5  ;;  %v10325_v22 = vpack.c.bf16 %v4007_v4, %v4006_v18 }
 0x4e0   : > { %10318 = vmatprep.subr.bf16.mxu0 %v10317_v10  ;;  %10689 = vmatprep.subr.bf16.mxu1 %v10317_v10 }
 0x4e2   : > { %8965 = vmatmul.mubr.msk.f32.gmra.mrb[20].mxu0 %vm4044_vm2, %v4037_v31  ;;  %10697 = vmatpush3.bf16.msra.mxu1 %v10317_v10 }
 0x4e3   : > { %8967 = vmatprep.mubr.msk.f32.mxu0 %vm4044_vm2, %v4038_v30  ;;  %10320 = vmatpush3.bf16.msra.mxu0 %v10317_v10  ;;  %v4847_v30 = vld [vmem:[%s14000_s7] sm:$0xff]  ;;  %v13398_v10 = vpop.trf.xlu0 }
 0x4e4   : > { %10322 = vmatprep.subr.bf16.mxu0 %v10321_v14  ;;  %10690 = vmatprep.subr.bf16.mxu1 %v10321_v14  ;;  %v13386_v39 = vpack.c.bf16 %v4848_v36, %v4847_v30 }
 0x4e6   : > { %8968 = vmatmul.mubr.msk.f32.gmra.mrb[22].mxu0 %vm4044_vm2, %v4039_v38  ;;  %10698 = vmatpush3.bf16.msra.mxu1 %v10321_v14 }
 0x4e7   : > { %8970 = vmatprep.mubr.msk.f32.mxu0 %vm4044_vm2, %v4040_v40  ;;  %10324 = vmatpush3.bf16.msra.mxu0 %v10321_v14 }
 0x4e8   : > { %v3235_v48 = vpop.f32.mrb[0].mxu1  ;;  %10326 = vmatprep.subr.bf16.mxu0 %v10325_v22  ;;  %10691 = vmatprep.subr.bf16.mxu1 %v10325_v22 }
 0x4e9   : > { %v3236_v50 = vadd.f32 %v13375_v47, %v3235_v48  ;;  %v8599_v52 = vpop.f32.mrb[1].mxu1 }
 0x4ea   : > { %8971 = vmatmul.mubr.msk.f32.gmra.mrb[24].mxu0 %vm4044_vm2, %v4041_v42  ;;  %10699 = vmatpush3.bf16.msra.mxu1 %v10325_v22 }
 0x4eb   : > { %8973 = vmatprep.mubr.msk.f32.mxu0 %vm4044_vm2, %v4042_v44  ;;  %v3239_v54 = vmax.f32 %v3236_v50, 0.0  ;;  %10328 = vmatpush3.bf16.msra.mxu0 %v10325_v22 }
 0x4ec   : > { %10330 = vmatprep.subr.bf16.mxu0 %v10329_v28  ;;  %10692 = vmatprep.subr.bf16.mxu1 %v10329_v28 }
 0x4ee   : > { %8974 = vmatmul.mubr.msk.f32.gmra.mrb[26].mxu0 %vm4044_vm2, %v4043_v46  ;;  %10700 = vmatpush3.bf16.msra.mxu1 %v10329_v28 }
 0x4ef   : > { %10332 = vmatpush3.bf16.msra.mxu0 %v10329_v28  ;;  %10334 = vmatprep.subr.bf16.mxu1 %v13386_v39  ;;  %v13415_v28 = vpop.trf.xlu0 }
 0x4f0   : > { %10373 = vmatprep.subr.bf16.mxu0 %v11946_v11 }
 0x501   : > { %v3161_v49 = vpop.f32.mrb[0].mxu0 }
 0x502   : > { %v3162_v51 = vadd.f32 %v13375_v47, %v3161_v49  ;;  %v8564_v53 = vpop.f32.mrb[1].mxu0 }
 0x504   : > { %v3165_v55 = vmax.f32 %v3162_v51, 0.0 }
 0x506   : > { %v3240_v56 = vmax.f32 %v3165_v55, %v3239_v54 }
 0x508   : > { %v3385_v16 = vpop.f32.mrb[2].mxu1 }
 0x509   : > { %v3386_v12 = vadd.f32 %v13375_v47, %v3385_v16  ;;  %v8669_v21 = vpop.f32.mrb[3].mxu1 }
 0x50b   : > { %v3389_v20 = vmax.f32 %v3386_v12, 0.0 }
 0x521   : > { %v3310_v15 = vpop.f32.mrb[2].mxu0 }
 0x522   : > { %v3311_v19 = vadd.f32 %v13375_v47, %v3310_v15  ;;  %v8634_v17 = vpop.f32.mrb[3].mxu0 }
 0x524   : > { %v3314_v24 = vmax.f32 %v3311_v19, 0.0 }
 0x526   : > { %v3315_v27 = vmax.f32 %v3240_v56, %v3314_v24 }
 0x528   : > { %v3390_v31 = vmax.f32 %v3315_v27, %v3389_v20  ;;  %v3535_v32 = vpop.f32.mrb[4].mxu1 }
 0x529   : > { %v3536_v34 = vadd.f32 %v13375_v47, %v3535_v32  ;;  %v8739_v35 = vpop.f32.mrb[5].mxu1 }
 0x52b   : > { %v3539_v38 = vmax.f32 %v3536_v34, 0.0 }
 0x541   : > { %v3460_v26 = vpop.f32.mrb[4].mxu0 }
 0x542   : > { %v3461_v33 = vadd.f32 %v13375_v47, %v3460_v26  ;;  %v8704_v29 = vpop.f32.mrb[5].mxu0 }
 0x544   : > { %v3464_v37 = vmax.f32 %v3461_v33, 0.0 }
 0x546   : > { %v3465_v40 = vmax.f32 %v3390_v31, %v3464_v37 }
 0x548   : > { %v3540_v41 = vmax.f32 %v3465_v40, %v3539_v38  ;;  %v3685_v43 = vpop.f32.mrb[6].mxu1 }
 0x549   : > { %v3686_v45 = vadd.f32 %v13375_v47, %v3685_v43  ;;  %v8809_v46 = vpop.f32.mrb[7].mxu1 }
 0x54b   : > { %v3689_v50 = vmax.f32 %v3686_v45, 0.0  ;;  %v13429_v45 = vpop.trf.xlu0 }
 0x561   : > { %v3610_v42 = vpop.f32.mrb[6].mxu0 }
 0x562   : > { %v3611_v44 = vadd.f32 %v13375_v47, %v3610_v42  ;;  %v8774_v48 = vpop.f32.mrb[7].mxu0 }
 0x564   : > { %v3614_v49 = vmax.f32 %v3611_v44, 0.0 }
 0x566   : > { %v3615_v51 = vmax.f32 %v3540_v41, %v3614_v49 }
 0x568   : > { %v3690_v52 = vmax.f32 %v3615_v51, %v3689_v50  ;;  %v3835_v54 = vpop.f32.mrb[8].mxu1 }
 0x569   : > { %v3836_v56 = vadd.f32 %v13375_v47, %v3835_v54  ;;  %v8879_v57 = vpop.f32.mrb[9].mxu1 }
 0x56b   : > { %v3839_v60 = vmax.f32 %v3836_v56, 0.0 }
 0x581   : > { %v3760_v53 = vpop.f32.mrb[8].mxu0 }
 0x582   : > { %v3761_v55 = vadd.f32 %v13375_v47, %v3760_v53  ;;  %v8844_v58 = vpop.f32.mrb[9].mxu0 }
 0x584   : > { %v3764_v59 = vmax.f32 %v3761_v55, 0.0  ;;  %v13437_v55 = vpop.trf.xlu1 }
 0x586   : > { %v3765_v61 = vmax.f32 %v3690_v52, %v3764_v59 }
 0x588   : > { %v3840_v62 = vmax.f32 %v3765_v61, %v3839_v60  ;;  %v3985_v0 = vpop.f32.mrb[10].mxu1 }
 0x589   : > { %v3986_v2 = vadd.f32 %v13375_v47, %v3985_v0  ;;  %v8949_v3 = vpop.f32.mrb[11].mxu1  ;;  %v13445_v0 = vpop.trf.xlu0 }
 0x58b   : > { %v3989_v15 = vmax.f32 %v3986_v2, 0.0 }
 0x58c   : > { %v13400_v13 = vpop.f32.mrb[12].mxu1 }
 0x58d   : > { %v13403_v4 = vpop.f32.mrb[13].mxu1 }
 0x590   : > { %v13408_v22 = vpop.f32.mrb[14].mxu1 }
 0x591   : > { %v13412_v25 = vpop.f32.mrb[15].mxu1 }
 0x594   : > { %v13417_v32 = vpop.f32.mrb[16].mxu1 }
 0x595   : > { %v13420_v35 = vpop.f32.mrb[17].mxu1 }
 0x598   : > { %v13423_v38 = vpop.f32.mrb[18].mxu1 }
 0x599   : > { %v13426_v42 = vpop.f32.mrb[19].mxu1 }
 0x59c   : > { %v13431_v49 = vpop.f32.mrb[20].mxu1 }
 0x59d   : > { %v13434_v52 = vpop.f32.mrb[21].mxu1 }
 0x5a0   : > { %v13439_v58 = vpop.f32.mrb[22].mxu1 }
 0x5a1   : > { %v3910_v63 = vpop.f32.mrb[10].mxu0  ;;  %v13442_v61 = vpop.f32.mrb[23].mxu1 }
 0x5a2   : > { %v3911_v1 = vadd.f32 %v13375_v47, %v3910_v63  ;;  %v8914_v5 = vpop.f32.mrb[11].mxu0 }
 0x5a4   : > { %v3914_v6 = vmax.f32 %v3911_v1, 0.0 }
 0x5a5   : > { %v8954_v8 = vpop.f32.mrb[12].mxu0 }
 0x5a6   : > { %v3915_v14 = vmax.f32 %v3840_v62, %v3914_v6  ;;  %v4476_v16 = vadd.f32 %v8954_v8, %v13396_v7  ;;  %v4163_v18 = vpop.f32.mrb[13].mxu0 }
 0x5a7   : > { %v4475_v19 = vadd.f32 %v13396_v7, %v4163_v18  ;;  %v8998_v3 = vpop.f32.mrb[24].mxu1 }
 0x5a8   : > { %v13406_v47 = vmax.f32 %v3915_v14, %v3989_v15  ;;  %v4508_v12 = vmax.f32 %v4476_v16, 0.0  ;;  %v4504_v6 = vadd.f32 %v8998_v3, %v13396_v7  ;;  %v4450_v14 = vpop.f32.mrb[25].mxu1  ;;  %v4854_v3 = vld [vmem:[#allocation29 + $0x18] sm:$0xff] }
 0x5a9   : > { %v4507_v21 = vmax.f32 %v4475_v19, 0.0  ;;  %v8957_v17 = vpop.f32.mrb[14].mxu0  ;;  %v4503_v16 = vadd.f32 %v13396_v7, %v4450_v14  ;;  %v13451_v19 = vpop.trf.xlu1 }
 0x5aa   : > { %3991 = vst [vmem:[#allocation41] sm:$0x3] %v13406_v47  ;;  %v4478_v24 = vadd.f32 %v8957_v17, %v13396_v7  ;;  %v4173_v20 = vpop.f32.mrb[15].mxu0 }
 0x5ab   : > { %v4477_v23 = vadd.f32 %v13396_v7, %v4173_v20  ;;  %9034 = vmatprep.mubr.f32.mxu0 %v4507_v21  ;;  %v4535_v21 = vmax.f32 %v4503_v16, 0.0  ;;  %v4536_v20 = vmax.f32 %v4504_v6, 0.0 }
 0x5ac   : > { %v4510_v27 = vmax.f32 %v4478_v24, 0.0  ;;  %9035 = vmatmul.mubr.f32.vlgmr.msra.gmra.mrb[28].mxu0 %v4508_v12 }
 0x5ad   : > { %v4509_v31 = vmax.f32 %v4477_v23, 0.0  ;;  %v8960_v26 = vpop.f32.mrb[16].mxu0  ;;  %9076 = vmatprep.mubr.f32.mxu1 %v4535_v21  ;;  %v4859_v21 = vld [vmem:[#allocation29 + $0x40] sm:$0xff] }
 0x5ae   : > { %v4480_v33 = vadd.f32 %v8960_v26, %v13396_v7  ;;  %v4183_v34 = vpop.f32.mrb[17].mxu0  ;;  %9077 = vmatmul.mubr.f32.vlgmr.msra.gmra.mrb[28].mxu1 %v4536_v20  ;;  %v4861_v20 = vld [vmem:[#allocation29 + $0x50] sm:$0xff] }
 0x5af   : > { %v4479_v29 = vadd.f32 %v13396_v7, %v4183_v34  ;;  %9037 = vmatprep.mubr.f32.mxu0 %v4509_v31  ;;  %v9001_v24 = vpop.f32.mrb[26].mxu1  ;;  %10336 = vmatpush3.bf16.msra.mxu1 %v13386_v39 }
 0x5b0   : > { %v4512_v30 = vmax.f32 %v4480_v33, 0.0  ;;  %9038 = vmatmul.mubr.f32.gmra.mrb[30].mxu0 %v4510_v27  ;;  %v4506_v27 = vadd.f32 %v9001_v24, %v13396_v7  ;;  %v4460_v26 = vpop.f32.mrb[27].mxu1  ;;  %v4491_v33 = vadd.f32 %v13396_v7, %v13403_v4 }
 0x5b1   : > { %v4511_v36 = vmax.f32 %v4479_v29, 0.0  ;;  %v8963_v37 = vpop.f32.mrb[18].mxu0  ;;  %v4505_v29 = vadd.f32 %v13396_v7, %v4460_v26  ;;  %v4864_v26 = vld [vmem:[#allocation29 + $0x68] sm:$0xff] }
 0x5b2   : > { %v4482_v40 = vadd.f32 %v8963_v37, %v13396_v7  ;;  %v4193_v41 = vpop.f32.mrb[19].mxu0  ;;  %v4538_v4 = vmax.f32 %v4506_v27, 0.0 }
 0x5b3   : > { %v4481_v43 = vadd.f32 %v13396_v7, %v4193_v41  ;;  %9040 = vmatprep.mubr.f32.mxu0 %v4511_v36  ;;  %v4891_v36 = vpop.trf.xlu0  ;;  %v4537_v41 = vmax.f32 %v4505_v29, 0.0  ;;  %v4866_v29 = vld [vmem:[#allocation29 + $0x78] sm:$0xff] }
 0x5b4   : > { %v4514_v44 = vmax.f32 %v4482_v40, 0.0  ;;  %9041 = vmatmul.mubr.f32.gmra.mrb[32].mxu0 %v4512_v30  ;;  %v4849_v30 = vld [vmem:[%s14000_s7 + $0x10] sm:$0x3] }
 0x5b5   : > { %v4513_v46 = vmax.f32 %v4481_v43, 0.0  ;;  %v8966_v48 = vpop.f32.mrb[20].mxu0  ;;  %v4492_v43 = vadd.f32 %v13400_v13, %v13396_v7  ;;  %9086 = vmatprep.subr.msk.mxu1 %vm4928_vm3, %v4849_v30  ;;  %9079 = vmatprep.mubr.f32.mxu1 %v4537_v41  ;;  %v4494_v13 = vadd.f32 %v13408_v22, %v13396_v7 }
 0x5b6   : > { %v4484_v50 = vadd.f32 %v8966_v48, %v13396_v7  ;;  %v4203_v51 = vpop.f32.mrb[21].mxu0  ;;  %v13466_v48 = vpop.trf.xlu1  ;;  %9080 = vmatmul.mubr.f32.gmra.mrb[30].mxu1 %v4538_v4 }
 0x5b7   : > { %v4483_v53 = vadd.f32 %v13396_v7, %v4203_v51  ;;  %9043 = vmatprep.mubr.f32.mxu0 %v4513_v46  ;;  %v4493_v46 = vadd.f32 %v13396_v7, %v13412_v25  ;;  %9087 = vmatpush3.msk.msra.mxu1 %vm4928_vm3, %v4849_v30  ;;  %v4524_v51 = vmax.f32 %v4492_v43, 0.0 }
 0x5b8   : > { %v4516_v54 = vmax.f32 %v4484_v50, 0.0  ;;  %9044 = vmatmul.mubr.f32.gmra.mrb[34].mxu0 %v4514_v44  ;;  %v4523_v44 = vmax.f32 %v4491_v33, 0.0  ;;  %v4892_v50 = vpop.trf.xlu0  ;;  %9088 = vmatprep.mubr.msk.f32.mxu1 %vm4903_vm4, %v13398_v10  ;;  %v4496_v10 = vadd.f32 %v13417_v32, %v13396_v7  ;;  %v4498_v32 = vadd.f32 %v13423_v38, %v13396_v7 }
 0x5b9   : > { %v4515_v56 = vmax.f32 %v4483_v53, 0.0  ;;  %v8969_v57 = vpop.f32.mrb[22].mxu0  ;;  %10338 = vmatprep.subr.bf16.mxu1 %v13386_v39  ;;  %v4525_v25 = vmax.f32 %v4493_v46, 0.0  ;;  %v4495_v53 = vadd.f32 %v13396_v7, %v13420_v35  ;;  %v4497_v35 = vadd.f32 %v13396_v7, %v13426_v42 }
 0x5ba   : > { %v4486_v59 = vadd.f32 %v8969_v57, %v13396_v7  ;;  %v4213_v60 = vpop.f32.mrb[23].mxu0  ;;  %9089 = vmatmul.mubr.msk.f32.vlgmr.msra.gmra.mrb[32].mxu1 %vm4903_vm4, %v13415_v28  ;;  %v5060_v22 = vpop.trf.xlu1  ;;  %v4526_v57 = vmax.f32 %v4494_v13, 0.0  ;;  %v4499_v42 = vadd.f32 %v13396_v7, %v13434_v52  ;;  %v4853_v52 = vld [vmem:[#allocation29 + $0x10] sm:$0xff] }
 0x5bb   : > { %v4485_v62 = vadd.f32 %v13396_v7, %v4213_v60  ;;  %9046 = vmatprep.mubr.f32.mxu0 %v4515_v56  ;;  %v4852_v56 = vld [vmem:[#allocation29 + $0x8] sm:$0xff]  ;;  %9091 = vmatprep.mubr.msk.f32.mxu1 %vm4903_vm4, %v13429_v45  ;;  %v4528_v45 = vmax.f32 %v4496_v10, 0.0 }
 0x5bc   : > { %v4518_v63 = vmax.f32 %v4486_v59, 0.0  ;;  %9047 = vmatmul.mubr.f32.gmra.mrb[36].mxu0 %v4516_v54  ;;  %v4851_v54 = vld [vmem:[#allocation29] sm:$0xff]  ;;  %10340 = vmatpush3.bf16.msra.mxu1 %v13386_v39  ;;  %v4527_v59 = vmax.f32 %v4495_v53, 0.0  ;;  %v4893_v60 = vpop.trf.xlu0  ;;  %v4529_v39 = vmax.f32 %v4497_v35, 0.0  ;;  %v4531_v38 = vmax.f32 %v4499_v42, 0.0 }
 0x5bd   : > { %v4517_v1 = vmax.f32 %v4485_v62, 0.0  ;;  %v8972_v2 = vpop.f32.mrb[24].mxu0  ;;  %9104 = vmatprep.subr.msk.mxu1 %vm4928_vm3, %v4849_v30  ;;  %v10341_v28 = vpack.c.bf16 %v4852_v56, %v4851_v54 }
 0x5be   : > { %v4488_v5 = vadd.f32 %v8972_v2, %v13396_v7  ;;  %v4223_v8 = vpop.f32.mrb[25].mxu0  ;;  %9092 = vmatmul.mubr.msk.f32.gmra.mrb[34].mxu1 %vm4903_vm4, %v13445_v0  ;;  %v5061_v62 = vpop.trf.xlu1  ;;  %v4530_v0 = vmax.f32 %v4498_v32, 0.0  ;;  %v4501_v2 = vadd.f32 %v13396_v7, %v13442_v61  ;;  %v4855_v61 = vld [vmem:[#allocation29 + $0x20] sm:$0xff] }
 0x5bf   : > { %v4487_v15 = vadd.f32 %v13396_v7, %v4223_v8  ;;  %9049 = vmatprep.mubr.f32.mxu0 %v4517_v1  ;;  %9094 = vmatprep.mubr.msk.f32.mxu1 %vm4903_vm4, %v4891_v36  ;;  %v4500_v1 = vadd.f32 %v13431_v49, %v13396_v7  ;;  %v4502_v8 = vadd.f32 %v13439_v58, %v13396_v7  ;;  %v4857_v58 = vld [vmem:[#allocation29 + $0x30] sm:$0xff] }
 0x5c0   : > { %v4520_v18 = vmax.f32 %v4488_v5, 0.0  ;;  %9050 = vmatmul.mubr.f32.gmra.mrb[38].mxu0 %v4518_v63  ;;  %9105 = vmatpush3.msk.msra.mxu1 %vm4928_vm3, %v4849_v30  ;;  %v4894_v63 = vpop.trf.xlu0  ;;  %v4533_v14 = vmax.f32 %v4501_v2, 0.0  ;;  %v10345_v49 = vpack.c.bf16 %v4854_v3, %v4853_v52 }
 0x5c1   : > { %v4519_v12 = vmax.f32 %v4487_v15, 0.0  ;;  %v8975_v17 = vpop.f32.mrb[26].mxu0  ;;  %10342 = vmatprep.subr.bf16.mxu1 %v10341_v28  ;;  %v4532_v6 = vmax.f32 %v4500_v1, 0.0  ;;  %v4856_v15 = vld [vmem:[#allocation29 + $0x28] sm:$0xff]  ;;  %v4534_v16 = vmax.f32 %v4502_v8, 0.0 }
 0x5c2   : > { %v4490_v23 = vadd.f32 %v8975_v17, %v13396_v7  ;;  %v4233_v31 = vpop.f32.mrb[27].mxu0  ;;  %9095 = vmatmul.mubr.msk.f32.gmra.mrb[36].mxu1 %vm4903_vm4, %v4892_v50  ;;  %v5062_v5 = vpop.trf.xlu1  ;;  %v4860_v17 = vld [vmem:[#allocation29 + $0x48] sm:$0xff] }
 0x5c3   : > { %v4489_v34 = vadd.f32 %v13396_v7, %v4233_v31  ;;  %9052 = vmatprep.mubr.f32.mxu0 %v4519_v12  ;;  %9097 = vmatprep.mubr.msk.f32.mxu1 %vm4903_vm4, %v4893_v60  ;;  %v10357_v24 = vpack.c.bf16 %v4860_v17, %v4859_v21  ;;  %v4863_v31 = vld [vmem:[#allocation29 + $0x60] sm:$0xff] }
 0x5c4   : > { %v4522_v37 = vmax.f32 %v4490_v23, 0.0  ;;  %9053 = vmatmul.mubr.f32.gmra.mrb[40].mxu0 %v4520_v18  ;;  %v10349_v18 = vpack.c.bf16 %v4856_v15, %v4855_v61  ;;  %v4862_v23 = vld [vmem:[#allocation29 + $0x58] sm:$0xff]  ;;  %v10365_v33 = vpack.c.bf16 %v4864_v26, %v4863_v31 }
 0x5c5   : > { %v4521_v40 = vmax.f32 %v4489_v34, 0.0  ;;  %v10361_v27 = vpack.c.bf16 %v4862_v23, %v4861_v20  ;;  %v4865_v34 = vld [vmem:[#allocation29 + $0x70] sm:$0xff] }
 0x5c6   : > { %9098 = vmatmul.mubr.msk.f32.gmra.mrb[38].mxu1 %vm4903_vm4, %v4894_v63  ;;  %v10369_v30 = vpack.c.bf16 %v4866_v29, %v4865_v34 }
 0x5c7   : > { %9055 = vmatprep.mubr.f32.mxu0 %v4521_v40  ;;  %9106 = vmatprep.mubr.msk.f32.mxu1 %vm4903_vm4, %v13437_v55  ;;  %v5063_v55 = vpop.trf.xlu1  ;;  %v13518_v40 = vld [vmem:[%s14002_s28] ss:$0 sm:$0xff] }
 0x5c8   : > { %9056 = vmatmul.mubr.f32.gmra.mrb[42].mxu0 %v4522_v37 }
 0x5c9   : > { %9058 = vmatprep.mubr.f32.mxu0 %v4523_v44 }
 0x5ca   : > { %9107 = vmatmul.mubr.msk.f32.vlgmr.msra.gmra.mrb[40].mxu1 %vm4903_vm4, %v13451_v19  ;;  %v4858_v19 = vld [vmem:[#allocation29 + $0x38] sm:$0xff] }
 0x5cb   : > { %9109 = vmatprep.mubr.msk.f32.mxu1 %vm4903_vm4, %v13466_v48  ;;  %10344 = vmatpush3.bf16.msra.mxu1 %v10341_v28  ;;  %v5064_v7 = vpop.trf.xlu1  ;;  %v10353_v12 = vpack.c.bf16 %v4858_v19, %v4857_v58 }
 0x5cc   : > { %9059 = vmatmul.mubr.f32.gmra.mrb[44].mxu0 %v4524_v51  ;;  %10346 = vmatprep.subr.bf16.mxu1 %v10345_v49 }
 0x5cd   : > { %9061 = vmatprep.mubr.f32.mxu0 %v4525_v25 }
 0x5ce   : > { %9110 = vmatmul.mubr.msk.f32.gmra.mrb[42].mxu1 %vm4903_vm4, %v5060_v22 }
 0x5cf   : > { %9112 = vmatprep.mubr.msk.f32.mxu1 %vm4903_vm4, %v5061_v62  ;;  %10348 = vmatpush3.bf16.msra.mxu1 %v10345_v49 }
 0x5d0   : > { %9062 = vmatmul.mubr.f32.gmra.mrb[46].mxu0 %v4526_v57  ;;  %10350 = vmatprep.subr.bf16.mxu1 %v10349_v18 }
 0x5d1   : > { %9064 = vmatprep.mubr.f32.mxu0 %v4527_v59 }
 0x5d2   : > { %9113 = vmatmul.mubr.msk.f32.gmra.mrb[44].mxu1 %vm4903_vm4, %v5062_v5 }
 0x5d3   : > { %9115 = vmatprep.mubr.msk.f32.mxu1 %vm4903_vm4, %v5063_v55  ;;  %10352 = vmatpush3.bf16.msra.mxu1 %v10349_v18 }
 0x5d4   : > { %9065 = vmatmul.mubr.f32.gmra.mrb[48].mxu0 %v4528_v45  ;;  %10354 = vmatprep.subr.bf16.mxu1 %v10353_v12 }
 0x5d5   : > { %9067 = vmatprep.mubr.f32.mxu0 %v4529_v39 }
 0x5d6   : > { %9116 = vmatmul.mubr.msk.f32.gmra.mrb[46].mxu1 %vm4903_vm4, %v5064_v7 }
 0x5d7   : > { %10356 = vmatpush3.bf16.msra.mxu1 %v10353_v12 }
 0x5d8   : > { %9068 = vmatmul.mubr.f32.gmra.mrb[50].mxu0 %v4530_v0  ;;  %10358 = vmatprep.subr.bf16.mxu1 %v10357_v24 }
 0x5d9   : > { %9070 = vmatprep.mubr.f32.mxu0 %v4531_v38 }
 0x5db   : > { %10360 = vmatpush3.bf16.msra.mxu1 %v10357_v24 }
 0x5dc   : > { %9071 = vmatmul.mubr.f32.gmra.mrb[52].mxu0 %v4532_v6  ;;  %10362 = vmatprep.subr.bf16.mxu1 %v10361_v27 }
 0x5dd   : > { %9073 = vmatprep.mubr.f32.mxu0 %v4533_v14 }
 0x5df   : > { %10364 = vmatpush3.bf16.msra.mxu1 %v10361_v27 }
 0x5e0   : > { %9074 = vmatmul.mubr.f32.gmra.mrb[54].mxu0 %v4534_v16  ;;  %10366 = vmatprep.subr.bf16.mxu1 %v10365_v33 }
 0x5e1   : > { %9206 = vmatprep.mubr.msk.f32.mxu0 %vm11947_vm0, %v11948_v9 }
 0x5e3   : > { %10368 = vmatpush3.bf16.msra.mxu1 %v10365_v33 }
 0x5e4   : > { %10370 = vmatprep.subr.bf16.mxu1 %v10369_v30 }
 0x5e7   : > { %10372 = vmatpush3.bf16.msra.mxu1 %v10369_v30 }
 0x5e8   : > { %10397 = vmatprep.subr.bf16.mxu1 %v11946_v11 }
 0x67f   : > { %v9036_v36 = vpop.f32.mrb[28].mxu0 }
 0x680   : > { %v4611_v37 = vpop.f32.mrb[29].mxu0  ;;  %v4617_v43 = vadd.f32 %v9036_v36, %v13518_v40  ;;  %v13545_v36 = vld [vmem:[%s14003_s10] ss:$0 sm:$0xff] }
 0x681   : > { %v4612_v44 = vadd.f32 %v13518_v40, %v4611_v37  ;;  %v13532_v16 = vpop.f32.mrb[28].mxu1 }
 0x682   : > { %v4771_v48 = vmax.f32 %v4617_v43, 0.0  ;;  %v13534_v7 = vpop.f32.mrb[29].mxu1 }
 0x683   : > { %v9039_v41 = vpop.f32.mrb[30].mxu0  ;;  %v4770_v25 = vmax.f32 %v4612_v44, 0.0 }
 0x684   : > { %v4621_v4 = vpop.f32.mrb[31].mxu0  ;;  %v4627_v50 = vadd.f32 %v9039_v41, %v13518_v40 }
 0x685   : > { %v4622_v53 = vadd.f32 %v13518_v40, %v4621_v4 }
 0x686   : > { %v4773_v10 = vmax.f32 %v4627_v50, 0.0 }
 0x687   : > { %v9042_v46 = vpop.f32.mrb[32].mxu0  ;;  %v4772_v28 = vmax.f32 %v4622_v53, 0.0 }
 0x688   : > { %v4637_v51 = vadd.f32 %v9042_v46, %v13518_v40  ;;  %v4631_v13 = vpop.f32.mrb[33].mxu0 }
 0x689   : > { %v4632_v54 = vadd.f32 %v13518_v40, %v4631_v13  ;;  %v13538_v20 = vpop.f32.mrb[30].mxu1  ;;  %v5436_v13 = vld [vmem:[#allocation30] sm:$0xff] }
 0x68a   : > { %v4775_v56 = vmax.f32 %v4637_v51, 0.0  ;;  %v13540_v26 = vpop.f32.mrb[31].mxu1 }
 0x68b   : > { %v4774_v22 = vmax.f32 %v4632_v54, 0.0  ;;  %v9045_v57 = vpop.f32.mrb[34].mxu0 }
 0x68c   : > { %v4803_v59 = vmax.f32 %v4771_v48, %v4775_v56  ;;  %v4647_v35 = vadd.f32 %v9045_v57, %v13518_v40  ;;  %v4641_v60 = vpop.f32.mrb[35].mxu0 }
 0x68d   : > { %v4802_v45 = vmax.f32 %v4770_v25, %v4774_v22  ;;  %v4642_v32 = vadd.f32 %v13518_v40, %v4641_v60  ;;  %v9090_v44 = vpop.f32.mrb[32].mxu1  ;;  %v5437_v25 = vld [vmem:[#allocation30 + $0x8] sm:$0xff] }
 0x68e   : > { %v4777_v39 = vmax.f32 %v4647_v35, 0.0  ;;  %v5209_v48 = vadd.f32 %v9090_v44, %v13545_v36  ;;  %v4998_v51 = vpop.f32.mrb[33].mxu1 }
 0x68f   : > { %v4776_v42 = vmax.f32 %v4642_v32, 0.0  ;;  %v9048_v62 = vpop.f32.mrb[36].mxu0  ;;  %v5208_v54 = vadd.f32 %v13545_v36, %v4998_v51  ;;  %v5438_v32 = vld [vmem:[#allocation30 + $0x10] sm:$0xff] }
 0x690   : > { %v4805_v63 = vmax.f32 %v4773_v10, %v4777_v39  ;;  %v4657_v0 = vadd.f32 %v9048_v62, %v13518_v40  ;;  %v4651_v1 = vpop.f32.mrb[37].mxu0  ;;  %v5225_v35 = vmax.f32 %v5209_v48, 0.0  ;;  %v5439_v39 = vld [vmem:[#allocation30 + $0x18] sm:$0xff] }
 0x691   : > { %v4804_v38 = vmax.f32 %v4772_v28, %v4776_v42  ;;  %v4652_v2 = vadd.f32 %v13518_v40, %v4651_v1  ;;  %v5224_v22 = vmax.f32 %v5208_v54, 0.0  ;;  %v9093_v10 = vpop.f32.mrb[34].mxu1  ;;  %v4757_v54 = vadd.f32 %v13532_v16, %v13518_v40 }
 0x692   : > { %v4779_v52 = vmax.f32 %v4657_v0, 0.0  ;;  %v5211_v60 = vadd.f32 %v9093_v10, %v13545_v36  ;;  %v5441_v0 = vld [vmem:[#allocation30 + $0x28] sm:$0xff]  ;;  %v5444_v10 = vld [vmem:[#allocation30 + $0x40] sm:$0xff] }
 0x693   : > { %v4778_v3 = vmax.f32 %v4652_v2, 0.0  ;;  %v9051_v5 = vpop.f32.mrb[38].mxu0  ;;  %9150 = vmatprep.mubr.f32.mxu1 %v5224_v22  ;;  %v13553_v2 = vld [vmem:[#allocation30 + $0x30] sm:$0xff] }
 0x694   : > { %v4807_v6 = vmax.f32 %v4803_v59, %v4779_v52  ;;  %v4667_v8 = vadd.f32 %v9051_v5, %v13518_v40  ;;  %v4661_v14 = vpop.f32.mrb[39].mxu0  ;;  %v10398_v59 = vpack.c.bf16 %v5437_v25, %v5436_v13  ;;  %9151 = vmatmul.mubr.f32.vlgmr.msra.gmra.mrb[48].mxu1 %v5225_v35  ;;  %v13555_v52 = vld [vmem:[#allocation30 + $0x38] sm:$0xff] }
 0x695   : > { %v4806_v49 = vmax.f32 %v4802_v45, %v4778_v3  ;;  %v4662_v61 = vadd.f32 %v13518_v40, %v4661_v14  ;;  %v5008_v45 = vpop.f32.mrb[35].mxu1  ;;  %v10401_v14 = vpack.c.bf16 %v5439_v39, %v5438_v32 }
 0x696   : > { %v4781_v15 = vmax.f32 %v4667_v8, 0.0  ;;  %v5210_v62 = vadd.f32 %v13545_v36, %v5008_v45  ;;  %v9096_v8 = vpop.f32.mrb[36].mxu1  ;;  %10399 = vmatpush3.bf16.msra.mxu1 %v10398_v59  ;;  %v5445_v59 = vld [vmem:[#allocation30 + $0x48] sm:$0xff] }
 0x697   : > { %v4780_v55 = vmax.f32 %v4662_v61, 0.0  ;;  %v9054_v18 = vpop.f32.mrb[40].mxu0  ;;  %10400 = vmatprep.subr.bf16.mxu1 %v11946_v11 }
 0x698   : > { %v4809_v58 = vmax.f32 %v4805_v63, %v4781_v15  ;;  %v4677_v19 = vadd.f32 %v9054_v18, %v13518_v40  ;;  %v4671_v12 = vpop.f32.mrb[41].mxu0  ;;  %v5440_v63 = vld [vmem:[#allocation30 + $0x20] sm:$0xff]  ;;  %v5226_v5 = vmax.f32 %v5210_v62, 0.0  ;;  %v5213_v15 = vadd.f32 %v9096_v8, %v13545_v36  ;;  %v5018_v18 = vpop.f32.mrb[37].mxu1 }
 0x699   : > { %v4808_v21 = vmax.f32 %v4804_v38, %v4780_v55  ;;  %v4672_v17 = vadd.f32 %v13518_v40, %v4671_v12 }
 0x69a   : > { %v4783_v24 = vmax.f32 %v4677_v19, 0.0  ;;  %9153 = vmatprep.mubr.f32.mxu1 %v5226_v5  ;;  %10402 = vmatpush3.bf16.msra.mxu1 %v10401_v14  ;;  %v4767_v14 = vadd.f32 %v13538_v20, %v13518_v40  ;;  %v4762_v20 = vadd.f32 %v13518_v40, %v13540_v26 }
 0x69b   : > { %v4782_v23 = vmax.f32 %v4672_v17, 0.0  ;;  %v9057_v27 = vpop.f32.mrb[42].mxu0  ;;  %v10407_v17 = vpack.c.bf16 %v13555_v52, %v13553_v2  ;;  %10403 = vmatprep.subr.bf16.mxu1 %v11946_v11 }
 0x69c   : > { %v4811_v31 = vmax.f32 %v4807_v6, %v4783_v24  ;;  %v4687_v33 = vadd.f32 %v9057_v27, %v13518_v40  ;;  %v4681_v34 = vpop.f32.mrb[43].mxu0 }
 0x69d   : > { %v4810_v29 = vmax.f32 %v4806_v49, %v4782_v23  ;;  %v4682_v30 = vadd.f32 %v13518_v40, %v4681_v34  ;;  %v5227_v49 = vmax.f32 %v5211_v60, 0.0 }
 0x69e   : > { %v4785_v37 = vmax.f32 %v4687_v33, 0.0 }
 0x69f   : > { %v4814_v41 = vmax.f32 %v4810_v29, %v4811_v31  ;;  %v4784_v43 = vmax.f32 %v4682_v30, 0.0  ;;  %v9060_v4 = vpop.f32.mrb[44].mxu0  ;;  %9154 = vmatmul.mubr.f32.gmra.mrb[50].mxu1 %v5227_v49 }
 0x6a0   : > { %v4813_v46 = vmax.f32 %v4809_v58, %v4785_v37  ;;  %v4691_v50 = vpop.f32.mrb[45].mxu0  ;;  %v4697_v1 = vadd.f32 %v9060_v4, %v13518_v40  ;;  %v10404_v58 = vpack.c.bf16 %v5441_v0, %v5440_v63  ;;  %v5229_v4 = vmax.f32 %v5213_v15, 0.0 }
 0x6a1   : > { %v4812_v53 = vmax.f32 %v4808_v21, %v4784_v43  ;;  %v4692_v38 = vadd.f32 %v13518_v40, %v4691_v50  ;;  %v5212_v21 = vadd.f32 %v13545_v36, %v5018_v18 }
 0x6a2   : > { %v4787_v24 = vmax.f32 %v4697_v1, 0.0  ;;  %10405 = vmatpush3.bf16.msra.mxu1 %v10404_v58 }
 0x6a3   : > { %v4815_v56 = vmax.f32 %v4812_v53, %v4813_v46  ;;  %v9063_v57 = vpop.f32.mrb[46].mxu0  ;;  %v4786_v23 = vmax.f32 %v4692_v38, 0.0  ;;  %v5228_v30 = vmax.f32 %v5212_v21, 0.0  ;;  %10406 = vmatprep.subr.bf16.mxu1 %v11946_v11 }
 0x6a4   : > { %v4701_v28 = vpop.f32.mrb[47].mxu0  ;;  %v4707_v27 = vadd.f32 %v9063_v57, %v13518_v40 }
 0x6a5   : > { %v4816_v42 = vmax.f32 %v4814_v41, %v4815_v56  ;;  %v4702_v34 = vadd.f32 %v13518_v40, %v4701_v28  ;;  %v9099_v41 = vpop.f32.mrb[38].mxu1  ;;  %9156 = vmatprep.mubr.f32.mxu1 %v5228_v30  ;;  %v4752_v56 = vadd.f32 %v13518_v40, %v13534_v7 }
 0x6a6   : > { %v5215_v46 = vadd.f32 %v9099_v41, %v13545_v36  ;;  %v5028_v50 = vpop.f32.mrb[39].mxu1  ;;  %v4789_v22 = vmax.f32 %v4707_v27, 0.0  ;;  %9157 = vmatmul.mubr.f32.gmra.mrb[52].mxu1 %v5229_v4  ;;  %v5447_v27 = vld [vmem:[#allocation30 + $0x58] sm:$0xff] }
 0x6a7   : > { %v4817_v3 = vrot.slane %v4816_v42, 4  ;;  %v9066_v6 = vpop.f32.mrb[48].mxu0  ;;  %v5214_v53 = vadd.f32 %v13545_v36, %v5028_v50  ;;  %v4788_v60 = vmax.f32 %v4702_v34, 0.0  ;;  %v9108_v39 = vpop.f32.mrb[40].mxu1  ;;  %v4798_v8 = vmax.f32 %v4752_v56, 0.0  ;;  %10408 = vmatpush3.bf16.msra.mxu1 %v10407_v17 }
 0x6a8   : > { %v4717_v61 = vadd.f32 %v9066_v6, %v13518_v40  ;;  %v4711_v55 = vpop.f32.mrb[49].mxu0  ;;  %v5231_v62 = vmax.f32 %v5215_v46, 0.0  ;;  %v5217_v16 = vadd.f32 %v9108_v39, %v13545_v36  ;;  %v5163_v7 = vpop.f32.mrb[41].mxu1  ;;  %v10410_v6 = vpack.c.bf16 %v5445_v59, %v5444_v10  ;;  %10409 = vmatprep.subr.bf16.mxu1 %v11946_v11 }
 0x6a9   : > { %v4818_v19 = vmax.f32 %v4816_v42, %v4817_v3  ;;  %v4712_v12 = vadd.f32 %v13518_v40, %v4711_v55  ;;  %v5230_v45 = vmax.f32 %v5214_v53, 0.0  ;;  %v5216_v52 = vadd.f32 %v13545_v36, %v5163_v7  ;;  %v9111_v55 = vpop.f32.mrb[42].mxu1 }
 0x6aa   : > { %v4791_v31 = vmax.f32 %v4717_v61, 0.0  ;;  %v4799_v3 = vmax.f32 %v4757_v54, 0.0  ;;  %v5233_v58 = vmax.f32 %v5217_v16, 0.0 }
 0x6ab   : > { %v4819_v33 = vrot.slane %v4818_v19, 2  ;;  %v4790_v29 = vmax.f32 %v4712_v12, 0.0  ;;  %v9069_v37 = vpop.f32.mrb[50].mxu0  ;;  %9159 = vmatprep.mubr.f32.mxu1 %v5230_v45  ;;  %v5232_v61 = vmax.f32 %v5216_v52, 0.0  ;;  %v5219_v12 = vadd.f32 %v9111_v55, %v13545_v36  ;;  %10411 = vmatpush3.bf16.msra.mxu1 %v10410_v6  ;;  %v5450_v45 = vld [vmem:[#allocation30 + $0x70] sm:$0xff]  ;;  %v5454_v6 = vld [vmem:[#allocation30 + $0x88] sm:$0xff] }
 0x6ac   : > { %v4825_v43 = vmax.f32 %v4787_v24, %v4791_v31  ;;  %v4727_v44 = vadd.f32 %v9069_v37, %v13518_v40  ;;  %v4721_v48 = vpop.f32.mrb[51].mxu0  ;;  %9160 = vmatmul.mubr.f32.gmra.mrb[54].mxu1 %v5231_v62  ;;  %v5173_v24 = vpop.f32.mrb[43].mxu1  ;;  %10412 = vmatprep.subr.bf16.mxu1 %v11946_v11  ;;  %v5458_v55 = vld [vmem:[#allocation30 + $0xa8] sm:$0xff] }
 0x6ad   : > { %v4820_v51 = vmax.f32 %v4818_v19, %v4819_v33  ;;  %v4824_v13 = vmax.f32 %v4786_v23, %v4790_v29  ;;  %v4722_v25 = vadd.f32 %v13518_v40, %v4721_v48  ;;  %v5446_v23 = vld [vmem:[#allocation30 + $0x50] sm:$0xff]  ;;  %v5218_v17 = vadd.f32 %v13545_v36, %v5173_v24  ;;  %9162 = vmatprep.mubr.f32.mxu1 %v5232_v61  ;;  %v5462_v24 = vld [vmem:[#allocation30 + $0xc8] sm:$0xff] }
 0x6ae   : > { %v4793_v57 = vmax.f32 %v4727_v44, 0.0  ;;  %v10413_v4 = vpack.c.bf16 %v5447_v27, %v5446_v23  ;;  %v4801_v44 = vmax.f32 %v4767_v14, 0.0  ;;  %v5235_v48 = vmax.f32 %v5219_v12, 0.0  ;;  %v5455_v14 = vld [vmem:[#allocation30 + $0x90] sm:$0xff] }
 0x6af   : > { %v4821_v35 = vrot.slane %v4820_v51, 1  ;;  %v4792_v28 = vmax.f32 %v4722_v25, 0.0  ;;  %v9072_v32 = vpop.f32.mrb[52].mxu0  ;;  %v5234_v41 = vmax.f32 %v5218_v17, 0.0  ;;  %v5463_v27 = vld [vmem:[#allocation30 + $0xd0] sm:$0xff]  ;;  %v5466_v17 = vld [vmem:[#allocation30 + $0xe8] sm:$0xff] }
 0x6b0   : > { %v4827_v42 = vmax.f32 %v4789_v22, %v4793_v57  ;;  %v4737_v63 = vadd.f32 %v9072_v32, %v13518_v40  ;;  %v4731_v0 = vpop.f32.mrb[53].mxu0  ;;  %9163 = vmatmul.mubr.f32.gmra.mrb[56].mxu1 %v5233_v58  ;;  %v5451_v32 = vld [vmem:[#allocation30 + $0x78] sm:$0xff]  ;;  %v5459_v58 = vld [vmem:[#allocation30 + $0xb0] sm:$0xff] }
 0x6b1   : > { %v4822_v1 = vmax.f32 %v4820_v51, %v4821_v35  ;;  %v4826_v38 = vmax.f32 %v4788_v60, %v4792_v28  ;;  %v4732_v2 = vadd.f32 %v13518_v40, %v4731_v0  ;;  %v5449_v51 = vld [vmem:[#allocation30 + $0x68] sm:$0xff]  ;;  %9165 = vmatprep.mubr.f32.mxu1 %v5234_v41  ;;  %10414 = vmatpush3.bf16.msra.mxu1 %v10413_v4  ;;  %v7502_v4 = vld [vmem:[%s14004_s0] ss:$0 sm:$0xff] }
 0x6b2   : > { %v4795_v5 = vmax.f32 %v4737_v63, 0.0  ;;  %10415 = vmatprep.subr.bf16.mxu1 %v11946_v11  ;;  %v10419_v16 = vpack.c.bf16 %v5451_v32, %v5450_v45 }
 0x6b3   : > { %4823 = vst [vmem:[#allocation38] sm:$0x1] %v4822_v1  ;;  %v4794_v49 = vmax.f32 %v4732_v2, 0.0  ;;  %v9075_v15 = vpop.f32.mrb[54].mxu0 }
 0x6b4   : > { %v4829_v18 = vmax.f32 %v4825_v43, %v4795_v5  ;;  %v4747_v19 = vadd.f32 %v9075_v15, %v13518_v40  ;;  %v4741_v21 = vpop.f32.mrb[55].mxu0  ;;  %v9114_v43 = vpop.f32.mrb[44].mxu1  ;;  %9166 = vmatmul.mubr.f32.gmra.mrb[58].mxu1 %v5235_v48  ;;  %v5453_v5 = vld [vmem:[#allocation30 + $0x80] sm:$0xff] }
 0x6b5   : > { %v4828_v31 = vmax.f32 %v4824_v13, %v4794_v49  ;;  %v4742_v33 = vadd.f32 %v13518_v40, %v4741_v21  ;;  %v5221_v26 = vadd.f32 %v9114_v43, %v13545_v36  ;;  %v5183_v50 = vpop.f32.mrb[45].mxu1  ;;  %v5448_v40 = vld [vmem:[#allocation30 + $0x60] sm:$0xff]  ;;  %v4800_v13 = vmax.f32 %v4762_v20, 0.0  ;;  %v5456_v49 = vld [vmem:[#allocation30 + $0x98] sm:$0xff] }
 0x6b6   : > { %v4833_v34 = vmax.f32 %v4829_v18, %v4799_v3  ;;  %v4797_v29 = vmax.f32 %v4747_v19, 0.0  ;;  %v5220_v54 = vadd.f32 %v13545_v36, %v5183_v50  ;;  %v9117_v10 = vpop.f32.mrb[46].mxu1  ;;  %v10416_v59 = vpack.c.bf16 %v5449_v51, %v5448_v40  ;;  %v5457_v15 = vld [vmem:[#allocation30 + $0xa0] sm:$0xff]  ;;  %v5460_v19 = vld [vmem:[#allocation30 + $0xb8] sm:$0xff] }
 0x6b7   : > { %v4832_v30 = vmax.f32 %v4828_v31, %v4798_v8  ;;  %v4796_v37 = vmax.f32 %v4742_v33, 0.0  ;;  %v5237_v35 = vmax.f32 %v5221_v26, 0.0  ;;  %v5223_v60 = vadd.f32 %v9117_v10, %v13545_v36  ;;  %v5193_v28 = vpop.f32.mrb[47].mxu1  ;;  %v5461_v21 = vld [vmem:[#allocation30 + $0xc0] sm:$0xff]  ;;  %v5464_v20 = vld [vmem:[#allocation30 + $0xd8] sm:$0xff] }
 0x6b8   : > { %v4831_v46 = vmax.f32 %v4827_v42, %v4797_v29  ;;  %v5236_v57 = vmax.f32 %v5220_v54, 0.0  ;;  %v5222_v42 = vadd.f32 %v13545_v36, %v5193_v28  ;;  %10417 = vmatpush3.bf16.msra.mxu1 %v10416_v59  ;;  %v10374_v8 = vpack.c.bf16 %v5454_v6, %v5453_v5  ;;  %v5465_v33 = vld [vmem:[#allocation30 + $0xe0] sm:$0xff]  ;;  %v5467_v29 = vld [vmem:[#allocation30 + $0xf0] sm:$0xff] }
 0x6b9   : > { %v4836_v25 = vmax.f32 %v4832_v30, %v4833_v34  ;;  %v4830_v53 = vmax.f32 %v4826_v38, %v4796_v37  ;;  %v5239_v0 = vmax.f32 %v5223_v60, 0.0  ;;  %10418 = vmatprep.subr.bf16.mxu1 %v11946_v11  ;;  %v10377_v61 = vpack.c.bf16 %v5456_v49, %v5455_v14  ;;  %v5468_v30 = vld [vmem:[#allocation30 + $0xf8] sm:$0xff] }
 0x6ba   : > { %v4835_v56 = vmax.f32 %v4831_v46, %v4801_v44  ;;  %9168 = vmatprep.mubr.f32.mxu1 %v5236_v57  ;;  %v5238_v63 = vmax.f32 %v5222_v42, 0.0  ;;  %10375 = vmatpush3.bf16.msra.mxu0 %v10374_v8  ;;  %v10380_v18 = vpack.c.bf16 %v5458_v55, %v5457_v15  ;;  %v10383_v12 = vpack.c.bf16 %v5460_v19, %v5459_v58 }
 0x6bb   : > { %v4834_v22 = vmax.f32 %v4830_v53, %v4800_v13  ;;  %9169 = vmatmul.mubr.f32.gmra.mrb[60].mxu1 %v5237_v35  ;;  %10376 = vmatprep.subr.bf16.mxu0 %v11946_v11  ;;  %v10386_v23 = vpack.c.bf16 %v5462_v24, %v5461_v21  ;;  %v10389_v31 = vpack.c.bf16 %v5464_v20, %v5463_v27 }
 0x6bc   : > { %9171 = vmatprep.mubr.f32.mxu1 %v5238_v63  ;;  %10420 = vmatpush3.bf16.msra.mxu1 %v10419_v16  ;;  %v10392_v34 = vpack.c.bf16 %v5466_v17, %v5465_v33  ;;  %v10395_v37 = vpack.c.bf16 %v5468_v30, %v5467_v29 }
 0x6bd   : > { %v4837_v39 = vmax.f32 %v4834_v22, %v4835_v56  ;;  %10445 = vmatprep.subr.bf16.mxu1 %v11946_v11 }
 0x6be   : > { %10378 = vmatpush3.bf16.msra.mxu0 %v10377_v61 }
 0x6bf   : > { %v4838_v62 = vmax.f32 %v4836_v25, %v4837_v39  ;;  %9172 = vmatmul.mubr.f32.gmra.mrb[62].mxu1 %v5239_v0  ;;  %10379 = vmatprep.subr.bf16.mxu0 %v11946_v11 }
 0x6c0   : > { %9241 = vmatprep.mubr.msk.f32.mxu1 %vm11947_vm0, %v11948_v9 }
 0x6c1   : > { %v4839_v7 = vrot.slane %v4838_v62, 4 }
 0x6c2   : > { %10381 = vmatpush3.bf16.msra.mxu0 %v10380_v18 }
 0x6c3   : > { %v4840_v1 = vmax.f32 %v4838_v62, %v4839_v7  ;;  %10382 = vmatprep.subr.bf16.mxu0 %v11946_v11 }
 0x6c5   : > { %v4841_v36 = vrot.slane %v4840_v1, 2 }
 0x6c6   : > { %10384 = vmatpush3.bf16.msra.mxu0 %v10383_v12 }
 0x6c7   : > { %v4842_v38 = vmax.f32 %v4840_v1, %v4841_v36  ;;  %10385 = vmatprep.subr.bf16.mxu0 %v11946_v11 }
 0x6c9   : > { %v4843_v2 = vrot.slane %v4842_v38, 1 }
 0x6ca   : > { %10387 = vmatpush3.bf16.msra.mxu0 %v10386_v23 }
 0x6cb   : > { %v4844_v52 = vmax.f32 %v4842_v38, %v4843_v2  ;;  %10388 = vmatprep.subr.bf16.mxu0 %v11946_v11 }
 0x6cd   : > { %4845 = vst [vmem:[#allocation38 + $0x1] sm:$0x1] %v4844_v52 }
 0x6ce   : > { %10390 = vmatpush3.bf16.msra.mxu0 %v10389_v31 }
 0x6cf   : > { %10391 = vmatprep.subr.bf16.mxu0 %v11946_v11 }
 0x6d2   : > { %10393 = vmatpush3.bf16.msra.mxu0 %v10392_v34 }
 0x6d3   : > { %10394 = vmatprep.subr.bf16.mxu0 %v11946_v11 }
 0x6d4   : > { %v13599_v3 = vld [vmem:[#allocation38] sm:$0x3] }
 0x6d5   : > { %9242 = vmatmul.mubr.f32.vlgmr.msra.gmra.mrb[64].mxu1 %v13599_v3 }
 0x6d6   : > { %9311 = vmatprep.mubr.msk.f32.mxu1 %vm11947_vm0, %v11948_v9  ;;  %10396 = vmatpush3.bf16.msra.mxu0 %v10395_v37 }
 0x6d7   : > { %10421 = vmatprep.subr.bf16.mxu0 %v11946_v11 }
 0x767   : > { %v9152_v41 = vpop.f32.mrb[48].mxu1 }
 0x768   : > { %v5312_v43 = vpop.f32.mrb[49].mxu1  ;;  %v5318_v48 = vadd.f32 %v9152_v41, %v7502_v4 }
 0x769   : > { %v5313_v26 = vadd.f32 %v7502_v4, %v5312_v43 }
 0x76a   : > { %v5392_v25 = vmax.f32 %v5318_v48, 0.0 }
 0x76b   : > { %v5391_v56 = vmax.f32 %v5313_v26, 0.0 }
 0x772   : > { %v9155_v44 = vpop.f32.mrb[50].mxu1 }
 0x773   : > { %v5322_v46 = vpop.f32.mrb[51].mxu1  ;;  %v5328_v53 = vadd.f32 %v9155_v44, %v7502_v4 }
 0x774   : > { %v5323_v22 = vadd.f32 %v7502_v4, %v5322_v46 }
 0x775   : > { %v5394_v32 = vmax.f32 %v5328_v53, 0.0 }
 0x776   : > { %v5393_v42 = vmax.f32 %v5323_v22, 0.0 }
 0x779   : > { %v9158_v50 = vpop.f32.mrb[52].mxu1 }
 0x77a   : > { %v5338_v40 = vadd.f32 %v9158_v50, %v7502_v4  ;;  %v5332_v51 = vpop.f32.mrb[53].mxu1 }
 0x77b   : > { %v5333_v13 = vadd.f32 %v7502_v4, %v5332_v51 }
 0x77c   : > { %v5396_v54 = vmax.f32 %v5338_v40, 0.0 }
 0x77d   : > { %v5395_v57 = vmax.f32 %v5333_v13, 0.0 }
 0x77e   : > { %v5408_v59 = vmax.f32 %v5392_v25, %v5396_v54 }
 0x77f   : > { %v9161_v10 = vpop.f32.mrb[54].mxu1  ;;  %v5407_v28 = vmax.f32 %v5391_v56, %v5395_v57 }
 0x780   : > { %v5348_v35 = vadd.f32 %v9161_v10, %v7502_v4  ;;  %v5342_v60 = vpop.f32.mrb[55].mxu1  ;;  %v5610_v10 = vld [vmem:[#allocation30 + $0x100] sm:$0xff] }
 0x781   : > { %v5343_v45 = vadd.f32 %v7502_v4, %v5342_v60  ;;  %v5411_v62 = vmax.f32 %v5407_v28, %v5408_v59  ;;  %v5611_v59 = vld [vmem:[#allocation30 + $0x108] sm:$0xff]  ;;  %v5612_v60 = vld [vmem:[#allocation30 + $0x110] sm:$0xff]  ;;  %v5613_v28 = vld [vmem:[#allocation30 + $0x118] sm:$0xff] }
 0x782   : > { %v5398_v39 = vmax.f32 %v5348_v35, 0.0  ;;  %v10422_v35 = vpack.c.bf16 %v5611_v59, %v5610_v10  ;;  %v5714_v59 = vld [vmem:[#allocation32 + $0x40] sm:$0xff] }
 0x783   : > { %v5397_v63 = vmax.f32 %v5343_v45, 0.0  ;;  %v9164_v16 = vpop.f32.mrb[56].mxu1 }
 0x784   : > { %v5410_v0 = vmax.f32 %v5394_v32, %v5398_v39  ;;  %v5352_v7 = vpop.f32.mrb[57].mxu1  ;;  %v5358_v5 = vadd.f32 %v9164_v16, %v7502_v4  ;;  %v10425_v32 = vpack.c.bf16 %v5613_v28, %v5612_v60  ;;  %v5614_v39 = vld [vmem:[#allocation30 + $0x120] sm:$0xff]  ;;  %v5617_v16 = vld [vmem:[#allocation30 + $0x138] sm:$0xff]  ;;  %v5716_v28 = vld [vmem:[#allocation32 + $0x50] sm:$0xff] }
 0x785   : > { %v5409_v1 = vmax.f32 %v5393_v42, %v5397_v63  ;;  %v5353_v8 = vadd.f32 %v7502_v4, %v5352_v7  ;;  %v5615_v42 = vld [vmem:[#allocation30 + $0x128] sm:$0xff]  ;;  %v5616_v63 = vld [vmem:[#allocation30 + $0x130] sm:$0xff]  ;;  %v5618_v7 = vld [vmem:[#allocation30 + $0x140] sm:$0xff] }
 0x786   : > { %v5400_v18 = vmax.f32 %v5358_v5, 0.0  ;;  %v5622_v5 = vld [vmem:[#allocation30 + $0x160] sm:$0xff] }
 0x787   : > { %v5412_v36 = vmax.f32 %v5409_v1, %v5410_v0  ;;  %v9167_v38 = vpop.f32.mrb[58].mxu1  ;;  %v5399_v21 = vmax.f32 %v5353_v8, 0.0  ;;  %v10431_v0 = vpack.c.bf16 %v5617_v16, %v5616_v63  ;;  %v5619_v1 = vld [vmem:[#allocation30 + $0x148] sm:$0xff]  ;;  %v5720_v16 = vld [vmem:[#allocation32 + $0x70] sm:$0xff] }
 0x788   : > { %v5362_v2 = vpop.f32.mrb[59].mxu1  ;;  %v5368_v58 = vadd.f32 %v9167_v38, %v7502_v4  ;;  %v5620_v38 = vld [vmem:[#allocation30 + $0x150] sm:$0xff] }
 0x789   : > { %v5413_v52 = vmax.f32 %v5411_v62, %v5412_v36  ;;  %v5363_v24 = vadd.f32 %v7502_v4, %v5362_v2  ;;  %v10428_v62 = vpack.c.bf16 %v5615_v42, %v5614_v39  ;;  %v10434_v36 = vpack.c.bf16 %v5619_v1, %v5618_v7  ;;  %v5621_v2 = vld [vmem:[#allocation30 + $0x158] sm:$0xff]  ;;  %v5718_v42 = vld [vmem:[#allocation32 + $0x60] sm:$0xff] }
 0x78a   : > { %v5402_v30 = vmax.f32 %v5368_v58, 0.0  ;;  %v5802_v58 = vld [vmem:[#allocation33 + $0x10] sm:$0xff] }
 0x78b   : > { %v5414_v6 = vrot.slane %v5413_v52, 4  ;;  %v5401_v43 = vmax.f32 %v5363_v24, 0.0  ;;  %v5805_v24 = vld [vmem:[#allocation33 + $0x28] sm:$0xff] }
 0x78d   : > { %v5415_v15 = vmax.f32 %v5413_v52, %v5414_v6  ;;  %v10437_v52 = vpack.c.bf16 %v5621_v2, %v5620_v38  ;;  %v5623_v6 = vld [vmem:[#allocation30 + $0x168] sm:$0xff] }
 0x78e   : > { %v9170_v14 = vpop.f32.mrb[60].mxu1  ;;  %v10440_v8 = vpack.c.bf16 %v5623_v6, %v5622_v5 }
 0x78f   : > { %v5378_v49 = vadd.f32 %v9170_v14, %v7502_v4  ;;  %v5372_v61 = vpop.f32.mrb[61].mxu1  ;;  %v5416_v12 = vrot.slane %v5415_v15, 2  ;;  %v5624_v14 = vld [vmem:[#allocation30 + $0x170] sm:$0xff] }
 0x790   : > { %v5373_v55 = vadd.f32 %v7502_v4, %v5372_v61 }
 0x791   : > { %v5404_v19 = vmax.f32 %v5378_v49, 0.0  ;;  %v5417_v17 = vmax.f32 %v5415_v15, %v5416_v12  ;;  %v5625_v49 = vld [vmem:[#allocation30 + $0x178] sm:$0xff]  ;;  %v5800_v15 = vld [vmem:[#allocation33] sm:$0xff] }
 0x792   : > { %v5403_v23 = vmax.f32 %v5373_v55, 0.0  ;;  %v9173_v27 = vpop.f32.mrb[62].mxu1  ;;  %v10443_v61 = vpack.c.bf16 %v5625_v49, %v5624_v14  ;;  %v5801_v55 = vld [vmem:[#allocation33 + $0x8] sm:$0xff] }
 0x793   : > { %v5422_v20 = vmax.f32 %v5400_v18, %v5404_v19  ;;  %v5388_v31 = vadd.f32 %v9173_v27, %v7502_v4  ;;  %v5382_v33 = vpop.f32.mrb[63].mxu1  ;;  %v5418_v41 = vrot.slane %v5417_v17, 1  ;;  %v10470_v18 = vpack.c.bf16 %v5801_v55, %v5800_v15  ;;  %v5803_v19 = vld [vmem:[#allocation33 + $0x18] sm:$0xff]  ;;  %v5806_v27 = vld [vmem:[#allocation33 + $0x30] sm:$0xff]  ;;  %v5895_v14 = vld [vmem:[#allocation35 + $0x8] sm:$0xff] }
 0x794   : > { %v5421_v34 = vmax.f32 %v5399_v21, %v5403_v23  ;;  %v5383_v29 = vadd.f32 %v7502_v4, %v5382_v33  ;;  %v10473_v12 = vpack.c.bf16 %v5803_v19, %v5802_v58  ;;  %v5804_v21 = vld [vmem:[#allocation33 + $0x20] sm:$0xff]  ;;  %v5896_v55 = vld [vmem:[#allocation35 + $0x10] sm:$0xff]  ;;  %v5899_v19 = vld [vmem:[#allocation35 + $0x28] sm:$0xff] }
 0x795   : > { %v5406_v37 = vmax.f32 %v5388_v31, 0.0  ;;  %v5419_v26 = vmax.f32 %v5417_v17, %v5418_v41  ;;  %v10476_v23 = vpack.c.bf16 %v5805_v24, %v5804_v21  ;;  %v5808_v33 = vld [vmem:[#allocation33 + $0x40] sm:$0xff]  ;;  %v5809_v17 = vld [vmem:[#allocation33 + $0x48] sm:$0xff]  ;;  %v5900_v21 = vld [vmem:[#allocation35 + $0x30] sm:$0xff] }
 0x796   : > { %v5425_v44 = vmax.f32 %v5421_v34, %v5422_v20  ;;  %v5405_v46 = vmax.f32 %v5383_v29, 0.0  ;;  %v5807_v20 = vld [vmem:[#allocation33 + $0x38] sm:$0xff]  ;;  %v10482_v34 = vpack.c.bf16 %v5809_v17, %v5808_v33  ;;  %v5810_v29 = vld [vmem:[#allocation33 + $0x50] sm:$0xff]  ;;  %v5812_v41 = vld [vmem:[#allocation33 + $0x60] sm:$0xff] }
 0x797   : > { %v5424_v48 = vmax.f32 %v5402_v30, %v5406_v37  ;;  %5420 = vst [vmem:[#allocation39] sm:$0x1] %v5419_v26  ;;  %v10479_v31 = vpack.c.bf16 %v5807_v20, %v5806_v27  ;;  %v5811_v30 = vld [vmem:[#allocation33 + $0x58] sm:$0xff]  ;;  %v5902_v27 = vld [vmem:[#allocation35 + $0x40] sm:$0xff]  ;;  %v5903_v20 = vld [vmem:[#allocation35 + $0x48] sm:$0xff] }
 0x798   : > { %v5423_v50 = vmax.f32 %v5401_v43, %v5405_v46  ;;  %v10485_v37 = vpack.c.bf16 %v5811_v30, %v5810_v29  ;;  %v5813_v43 = vld [vmem:[#allocation33 + $0x68] sm:$0xff]  ;;  %v5814_v46 = vld [vmem:[#allocation33 + $0x70] sm:$0xff]  ;;  %v5901_v24 = vld [vmem:[#allocation35 + $0x38] sm:$0xff] }
 0x799   : > { %v5904_v33 = vld [vmem:[#allocation35 + $0x50] sm:$0xff]  ;;  %v5905_v17 = vld [vmem:[#allocation35 + $0x58] sm:$0xff]  ;;  %v5906_v29 = vld [vmem:[#allocation35 + $0x60] sm:$0xff] }
 0x79a   : > { %v5426_v40 = vmax.f32 %v5423_v50, %v5424_v48  ;;  %v5815_v48 = vld [vmem:[#allocation33 + $0x78] sm:$0xff]  ;;  %v5706_v50 = vld [vmem:[#allocation32] sm:$0xff]  ;;  %v5907_v30 = vld [vmem:[#allocation35 + $0x68] sm:$0xff] }
 0x79b   : > { %v10491_v26 = vpack.c.bf16 %v5815_v48, %v5814_v46 }
 0x79c   : > { %v5427_v51 = vmax.f32 %v5425_v44, %v5426_v40  ;;  %v10488_v44 = vpack.c.bf16 %v5813_v43, %v5812_v41  ;;  %v5707_v40 = vld [vmem:[#allocation32 + $0x8] sm:$0xff]  ;;  %v5908_v41 = vld [vmem:[#allocation35 + $0x70] sm:$0xff]  ;;  %v5909_v43 = vld [vmem:[#allocation35 + $0x78] sm:$0xff] }
 0x79d   : > { %v10515_v48 = vpack.c.bf16 %v5909_v43, %v5908_v41  ;;  %v6181_v41 = vld [vmem:[#allocation35 + $0x80] sm:$0xff]  ;;  %v6182_v43 = vld [vmem:[#allocation35 + $0x88] sm:$0xff] }
 0x79e   : > { %v5428_v13 = vrot.slane %v5427_v51, 4 }
 0x7a0   : > { %v5429_v25 = vmax.f32 %v5427_v51, %v5428_v13  ;;  %v5708_v51 = vld [vmem:[#allocation32 + $0x10] sm:$0xff]  ;;  %v10446_v13 = vpack.c.bf16 %v5707_v40, %v5706_v50  ;;  %v6085_v40 = vld [vmem:[#allocation33 + $0x80] sm:$0xff] }
 0x7a2   : > { %v5430_v53 = vrot.slane %v5429_v25, 2  ;;  %10447 = vmatpush3.bf16.msra.mxu1 %v10446_v13 }
 0x7a3   : > { %10448 = vmatprep.subr.bf16.mxu1 %v11946_v11 }
 0x7a4   : > { %v5431_v54 = vmax.f32 %v5429_v25, %v5430_v53  ;;  %v5709_v25 = vld [vmem:[#allocation32 + $0x18] sm:$0xff] }
 0x7a5   : > { %v10449_v53 = vpack.c.bf16 %v5709_v25, %v5708_v51  ;;  %v6086_v51 = vld [vmem:[#allocation33 + $0x88] sm:$0xff] }
 0x7a6   : > { %v5432_v22 = vrot.slane %v5431_v54, 1  ;;  %v10542_v25 = vpack.c.bf16 %v6086_v51, %v6085_v40  ;;  %v6183_v40 = vld [vmem:[#allocation35 + $0x90] sm:$0xff]  ;;  %v6184_v51 = vld [vmem:[#allocation35 + $0x98] sm:$0xff] }
 0x7a7   : > { %10450 = vmatpush3.bf16.msra.mxu1 %v10449_v53  ;;  %v6087_v53 = vld [vmem:[#allocation33 + $0x90] sm:$0xff] }
 0x7a8   : > { %v13613_v56 = vpop.f32.mrb[64].mxu1  ;;  %v5433_v57 = vmax.f32 %v5431_v54, %v5432_v22  ;;  %v5710_v54 = vld [vmem:[#allocation32 + $0x20] sm:$0xff]  ;;  %v5711_v22 = vld [vmem:[#allocation32 + $0x28] sm:$0xff]  ;;  %10451 = vmatprep.subr.bf16.mxu1 %v11946_v11 }
 0x7a9   : > { %v9243_v4 = vpop.f32.mrb[65].mxu1 }
 0x7aa   : > { %5434 = vst [vmem:[#allocation39 + $0x1] sm:$0x1] %v5433_v57  ;;  %v10452_v4 = vpack.c.bf16 %v5711_v22, %v5710_v54  ;;  %v5712_v57 = vld [vmem:[#allocation32 + $0x30] sm:$0xff]  ;;  %v6088_v54 = vld [vmem:[#allocation33 + $0x98] sm:$0xff] }
 0x7ab   : > { %v10545_v22 = vpack.c.bf16 %v6088_v54, %v6087_v53  ;;  %v6186_v53 = vld [vmem:[#allocation35 + $0xa8] sm:$0xff] }
 0x7ac   : > { %10453 = vmatpush3.bf16.msra.mxu1 %v10452_v4  ;;  %v6089_v4 = vld [vmem:[#allocation33 + $0xa0] sm:$0xff] }
 0x7ad   : > { %10454 = vmatprep.subr.bf16.mxu1 %v11946_v11 }
 0x7b1   : > { %v13615_v45 = vld [vmem:[#allocation39] sm:$0x3] }
 0x7b2   : > { %9207 = vmatmul.mubr.f32.vlgmr.msra.gmra.mrb[56].mxu0 %v13615_v45 }
 0x7b3   : > { %10423 = vmatpush3.bf16.msra.mxu0 %v10422_v35  ;;  %9276 = vmatprep.mubr.msk.f32.mxu0 %vm11947_vm0, %v11948_v9  ;;  %v5715_v35 = vld [vmem:[#allocation32 + $0x48] sm:$0xff] }
 0x7b4   : > { %10424 = vmatprep.subr.bf16.mxu0 %v11946_v11  ;;  %v10458_v60 = vpack.c.bf16 %v5715_v35, %v5714_v59  ;;  %v6092_v59 = vld [vmem:[#allocation33 + $0xb8] sm:$0xff] }
 0x7b7   : > { %10426 = vmatpush3.bf16.msra.mxu0 %v10425_v32  ;;  %v5717_v32 = vld [vmem:[#allocation32 + $0x58] sm:$0xff] }
 0x7b8   : > { %10427 = vmatprep.subr.bf16.mxu0 %v11946_v11  ;;  %v10461_v39 = vpack.c.bf16 %v5717_v32, %v5716_v28  ;;  %v6094_v28 = vld [vmem:[#allocation33 + $0xc8] sm:$0xff] }
 0x7bb   : > { %10429 = vmatpush3.bf16.msra.mxu0 %v10428_v62  ;;  %v5719_v62 = vld [vmem:[#allocation32 + $0x68] sm:$0xff] }
 0x7bc   : > { %10430 = vmatprep.subr.bf16.mxu0 %v11946_v11  ;;  %v10464_v63 = vpack.c.bf16 %v5719_v62, %v5718_v42  ;;  %v6096_v42 = vld [vmem:[#allocation33 + $0xd8] sm:$0xff] }
 0x7bf   : > { %10432 = vmatpush3.bf16.msra.mxu0 %v10431_v0  ;;  %v5721_v0 = vld [vmem:[#allocation32 + $0x78] sm:$0xff] }
 0x7c0   : > { %10433 = vmatprep.subr.bf16.mxu0 %v11946_v11  ;;  %v10467_v7 = vpack.c.bf16 %v5721_v0, %v5720_v16  ;;  %v6098_v16 = vld [vmem:[#allocation33 + $0xe8] sm:$0xff] }
 0x7c3   : > { %10435 = vmatpush3.bf16.msra.mxu0 %v10434_v36 }
 0x7c4   : > { %10436 = vmatprep.subr.bf16.mxu0 %v11946_v11 }
 0x7c7   : > { %10438 = vmatpush3.bf16.msra.mxu0 %v10437_v52  ;;  %v7503_v52 = vld [vmem:[%s14005_s18] ss:$0 sm:$0xff] }
 0x7c8   : > { %10439 = vmatprep.subr.bf16.mxu0 %v11946_v11 }
 0x7cb   : > { %10441 = vmatpush3.bf16.msra.mxu0 %v10440_v8  ;;  %v5894_v8 = vld [vmem:[#allocation35] sm:$0xff] }
 0x7cc   : > { %10442 = vmatprep.subr.bf16.mxu0 %v11946_v11 }
 0x7cf   : > { %10444 = vmatpush3.bf16.msra.mxu0 %v10443_v61  ;;  %v10494_v61 = vpack.c.bf16 %v5895_v14, %v5894_v8  ;;  %v5992_v14 = vld [vmem:[#allocation36 + $0x20] sm:$0xff] }
 0x7d0   : > { %10469 = vmatprep.subr.bf16.mxu0 %v11946_v11 }
 0x7d2   : > { %9277 = vmatmul.mubr.f32.vlgmr.msra.gmra.mrb[58].mxu0 %v13406_v47 }
 0x7d3   : > { %10471 = vmatpush3.bf16.msra.mxu0 %v10470_v18  ;;  %9346 = vmatprep.mubr.msk.f32.mxu0 %vm11947_vm0, %v11948_v9  ;;  %v5897_v18 = vld [vmem:[#allocation35 + $0x18] sm:$0xff] }
 0x7d4   : > { %10472 = vmatprep.subr.bf16.mxu0 %v11946_v11  ;;  %v10497_v58 = vpack.c.bf16 %v5897_v18, %v5896_v55  ;;  %v5996_v18 = vld [vmem:[#allocation36 + $0x40] sm:$0xff] }
 0x7d7   : > { %10474 = vmatpush3.bf16.msra.mxu0 %v10473_v12 }
 0x7d8   : > { %10475 = vmatprep.subr.bf16.mxu0 %v11946_v11 }
 0x7db   : > { %10477 = vmatpush3.bf16.msra.mxu0 %v10476_v23  ;;  %v10503_v23 = vpack.c.bf16 %v5901_v24, %v5900_v21  ;;  %v6000_v24 = vld [vmem:[#allocation36 + $0x60] sm:$0xff] }
 0x7dc   : > { %10478 = vmatprep.subr.bf16.mxu0 %v11946_v11 }
 0x7df   : > { %10480 = vmatpush3.bf16.msra.mxu0 %v10479_v31  ;;  %v10506_v31 = vpack.c.bf16 %v5903_v20, %v5902_v27  ;;  %v6002_v20 = vld [vmem:[#allocation36 + $0x70] sm:$0xff] }
 0x7e0   : > { %10481 = vmatprep.subr.bf16.mxu0 %v11946_v11 }
 0x7e3   : > { %10483 = vmatpush3.bf16.msra.mxu0 %v10482_v34  ;;  %v10509_v34 = vpack.c.bf16 %v5905_v17, %v5904_v33  ;;  %v7504_v17 = vld [vmem:[%s14007_s6] ss:$0 sm:$0xff] }
 0x7e4   : > { %10484 = vmatprep.subr.bf16.mxu0 %v11946_v11 }
 0x7e7   : > { %10486 = vmatpush3.bf16.msra.mxu0 %v10485_v37  ;;  %v10512_v37 = vpack.c.bf16 %v5907_v30, %v5906_v29 }
 0x7e8   : > { %10487 = vmatprep.subr.bf16.mxu0 %v11946_v11 }
 0x7eb   : > { %10489 = vmatpush3.bf16.msra.mxu0 %v10488_v44  ;;  %v7505_v44 = vld [vmem:[%s14006_s2] ss:$0 sm:$0xff] }
 0x7ec   : > { %10490 = vmatprep.subr.bf16.mxu0 %v11946_v11 }
 0x7ef   : > { %10492 = vmatpush3.bf16.msra.mxu0 %v10491_v26 }
 0x7f0   : > { %10517 = vmatprep.subr.bf16.mxu0 %v11946_v11 }
 0x7f2   : > { %9347 = vmatmul.mubr.f32.vlgmr.msra.gmra.mrb[60].mxu0 %v13406_v47  ;;  %v5713_v47 = vld [vmem:[#allocation32 + $0x38] sm:$0xff] }
 0x7f3   : > { %9416 = vmatprep.mubr.msk.f32.mxu0 %vm11947_vm0, %v11948_v9  ;;  %v10455_v10 = vpack.c.bf16 %v5713_v47, %v5712_v57  ;;  %v6090_v57 = vld [vmem:[#allocation33 + $0xa8] sm:$0xff] }
 0x7f4   : > { %v10548_v47 = vpack.c.bf16 %v6090_v57, %v6089_v4  ;;  %v6188_v4 = vld [vmem:[#allocation35 + $0xb8] sm:$0xff] }
 0x7f5   : > { %10456 = vmatpush3.bf16.msra.mxu1 %v10455_v10  ;;  %v6091_v10 = vld [vmem:[#allocation33 + $0xb0] sm:$0xff] }
 0x7f6   : > { %10457 = vmatprep.subr.bf16.mxu1 %v11946_v11  ;;  %v10551_v35 = vpack.c.bf16 %v6092_v59, %v6091_v10  ;;  %v6190_v10 = vld [vmem:[#allocation35 + $0xc8] sm:$0xff] }
 0x7f9   : > { %10459 = vmatpush3.bf16.msra.mxu1 %v10458_v60  ;;  %v6093_v60 = vld [vmem:[#allocation33 + $0xc0] sm:$0xff] }
 0x7fa   : > { %10460 = vmatprep.subr.bf16.mxu1 %v11946_v11  ;;  %v10554_v32 = vpack.c.bf16 %v6094_v28, %v6093_v60  ;;  %v6192_v60 = vld [vmem:[#allocation35 + $0xd8] sm:$0xff] }
 0x7fd   : > { %10462 = vmatpush3.bf16.msra.mxu1 %v10461_v39  ;;  %v6095_v39 = vld [vmem:[#allocation33 + $0xd0] sm:$0xff] }
 0x7fe   : > { %10463 = vmatprep.subr.bf16.mxu1 %v11946_v11  ;;  %v10557_v62 = vpack.c.bf16 %v6096_v42, %v6095_v39  ;;  %v6194_v39 = vld [vmem:[#allocation35 + $0xe8] sm:$0xff] }
 0x801   : > { %10465 = vmatpush3.bf16.msra.mxu1 %v10464_v63  ;;  %v6097_v63 = vld [vmem:[#allocation33 + $0xe0] sm:$0xff] }
 0x802   : > { %10466 = vmatprep.subr.bf16.mxu1 %v11946_v11  ;;  %v10560_v0 = vpack.c.bf16 %v6098_v16, %v6097_v63  ;;  %v6196_v63 = vld [vmem:[#allocation35 + $0xf8] sm:$0xff] }
 0x803   : > { %v7509_v16 = vld [vmem:[%s14006_s2 + $0x1] ss:$0 sm:$0xff] }
 0x805   : > { %10468 = vmatpush3.bf16.msra.mxu1 %v10467_v7  ;;  %v6099_v7 = vld [vmem:[#allocation33 + $0xf0] sm:$0xff] }
 0x806   : > { %10493 = vmatprep.subr.bf16.mxu1 %v11946_v11 }
 0x885   : > { %v5535_v1 = vpop.f32.mrb[56].mxu0 }
 0x886   : > { %v5606_v36 = vadd.f32 %v13613_v56, %v5535_v1  ;;  %v9208_v38 = vpop.f32.mrb[57].mxu0  ;;  %v5898_v56 = vld [vmem:[#allocation35 + $0x20] sm:$0xff]  ;;  %v6100_v1 = vld [vmem:[#allocation33 + $0xf8] sm:$0xff] }
 0x887   : > { %v10500_v12 = vpack.c.bf16 %v5899_v19, %v5898_v56  ;;  %v5988_v38 = vld [vmem:[#allocation36] sm:$0xff]  ;;  %v5998_v19 = vld [vmem:[#allocation36 + $0x50] sm:$0xff] }
 0x8a5   : > { %v5692_v2 = vpop.f32.mrb[58].mxu0 }
 0x8a6   : > { %v5696_v5 = vadd.f32 %v5692_v2, %v5606_v36  ;;  %v9278_v6 = vpop.f32.mrb[59].mxu0  ;;  %v10563_v36 = vpack.c.bf16 %v6100_v1, %v6099_v7  ;;  %v5989_v2 = vld [vmem:[#allocation36 + $0x8] sm:$0xff]  ;;  %v6378_v7 = vld [vmem:[#allocation33 + $0x100] sm:$0xff] }
 0x8a7   : > { %v5991_v6 = vld [vmem:[#allocation36 + $0x18] sm:$0xff]  ;;  %v6379_v1 = vld [vmem:[#allocation33 + $0x108] sm:$0xff] }
 0x8a8   : > { %v5704_v49 = vadd.f32 %v7503_v52, %v5696_v5  ;;  %v10518_v52 = vpack.c.bf16 %v5989_v2, %v5988_v38  ;;  %v5990_v5 = vld [vmem:[#allocation36 + $0x10] sm:$0xff] }
 0x8a9   : > { %v10521_v8 = vpack.c.bf16 %v5991_v6, %v5990_v5  ;;  %v6380_v6 = vld [vmem:[#allocation33 + $0x110] sm:$0xff] }
 0x8aa   : > { %v5705_v15 = vmax.f32 %v5704_v49, 0.0  ;;  %10519 = vmatpush3.bf16.msra.mxu0 %v10518_v52  ;;  %v5993_v49 = vld [vmem:[#allocation36 + $0x28] sm:$0xff]  ;;  %v10614_v52 = vpack.c.bf16 %v6379_v1, %v6378_v7 }
 0x8ab   : > { %10520 = vmatprep.subr.bf16.mxu0 %v11946_v11 }
 0x8ac   : > { %9312 = vmatmul.mubr.f32.vlgmr.msra.gmra.mrb[66].mxu1 %v5705_v15  ;;  %v5994_v15 = vld [vmem:[#allocation36 + $0x30] sm:$0xff] }
 0x8ad   : > { %10495 = vmatpush3.bf16.msra.mxu1 %v10494_v61  ;;  %9381 = vmatprep.mubr.msk.f32.mxu1 %vm11947_vm0, %v11948_v9  ;;  %v10524_v61 = vpack.c.bf16 %v5993_v49, %v5992_v14  ;;  %v6382_v49 = vld [vmem:[#allocation33 + $0x120] sm:$0xff] }
 0x8ae   : > { %10496 = vmatprep.subr.bf16.mxu1 %v11946_v11  ;;  %10522 = vmatpush3.bf16.msra.mxu0 %v10521_v8  ;;  %v6381_v8 = vld [vmem:[#allocation33 + $0x118] sm:$0xff] }
 0x8af   : > { %10523 = vmatprep.subr.bf16.mxu0 %v11946_v11  ;;  %v10617_v14 = vpack.c.bf16 %v6381_v8, %v6380_v6  ;;  %v6480_v8 = vld [vmem:[#allocation35 + $0x130] sm:$0xff] }
 0x8b1   : > { %10498 = vmatpush3.bf16.msra.mxu1 %v10497_v58  ;;  %v5997_v58 = vld [vmem:[#allocation36 + $0x48] sm:$0xff] }
 0x8b2   : > { %10499 = vmatprep.subr.bf16.mxu1 %v11946_v11  ;;  %10525 = vmatpush3.bf16.msra.mxu0 %v10524_v61  ;;  %v10530_v56 = vpack.c.bf16 %v5997_v58, %v5996_v18  ;;  %v6383_v61 = vld [vmem:[#allocation33 + $0x128] sm:$0xff]  ;;  %v6386_v58 = vld [vmem:[#allocation33 + $0x140] sm:$0xff] }
 0x8b3   : > { %10526 = vmatprep.subr.bf16.mxu0 %v11946_v11 }
 0x8b5   : > { %10501 = vmatpush3.bf16.msra.mxu1 %v10500_v12  ;;  %v5999_v12 = vld [vmem:[#allocation36 + $0x58] sm:$0xff] }
 0x8b6   : > { %10502 = vmatprep.subr.bf16.mxu1 %v11946_v11  ;;  %v10533_v21 = vpack.c.bf16 %v5999_v12, %v5998_v19  ;;  %v6388_v12 = vld [vmem:[#allocation33 + $0x150] sm:$0xff] }
 0x8b9   : > { %10504 = vmatpush3.bf16.msra.mxu1 %v10503_v23  ;;  %v6001_v23 = vld [vmem:[#allocation36 + $0x68] sm:$0xff] }
 0x8ba   : > { %10505 = vmatprep.subr.bf16.mxu1 %v11946_v11  ;;  %v10536_v27 = vpack.c.bf16 %v6001_v23, %v6000_v24  ;;  %v6390_v23 = vld [vmem:[#allocation33 + $0x160] sm:$0xff] }
 0x8bd   : > { %10507 = vmatpush3.bf16.msra.mxu1 %v10506_v31  ;;  %v6003_v31 = vld [vmem:[#allocation36 + $0x78] sm:$0xff] }
 0x8be   : > { %10508 = vmatprep.subr.bf16.mxu1 %v11946_v11  ;;  %v10539_v33 = vpack.c.bf16 %v6003_v31, %v6002_v20  ;;  %v6392_v31 = vld [vmem:[#allocation33 + $0x170] sm:$0xff] }
 0x8c1   : > { %10510 = vmatpush3.bf16.msra.mxu1 %v10509_v34 }
 0x8c2   : > { %10511 = vmatprep.subr.bf16.mxu1 %v11946_v11 }
 0x8c5   : > { %10513 = vmatpush3.bf16.msra.mxu1 %v10512_v37  ;;  %v5889_v46 = vpop.f32.mrb[60].mxu0  ;;  %v7506_v37 = vld [vmem:[%s14008_s1] ss:$0 sm:$0xff] }
 0x8c6   : > { %v5890_v26 = vadd.f32 %v7505_v44, %v5889_v46  ;;  %v9348_v50 = vpop.f32.mrb[61].mxu0  ;;  %10514 = vmatprep.subr.bf16.mxu1 %v11946_v11 }
 0x8c8   : > { %v5893_v13 = vmax.f32 %v5890_v26, 0.0  ;;  %v10566_v26 = vpack.c.bf16 %v6182_v43, %v6181_v41  ;;  %v6280_v41 = vld [vmem:[#allocation36 + $0x98] sm:$0xff] }
 0x8c9   : > { %10516 = vmatpush3.bf16.msra.mxu1 %v10515_v48 }
 0x8ca   : > { %6081 = vst [vmem:[#allocation45] sm:$0x3] %v5893_v13  ;;  %10541 = vmatprep.subr.bf16.mxu1 %v11946_v11 }
 0x8cc   : > { %9382 = vmatmul.mubr.f32.vlgmr.msra.gmra.mrb[68].mxu1 %v5893_v13  ;;  %v10569_v13 = vpack.c.bf16 %v6184_v51, %v6183_v40  ;;  %v6285_v40 = vld [vmem:[#allocation36 + $0xc0] sm:$0xff]  ;;  %v6286_v51 = vld [vmem:[#allocation36 + $0xc8] sm:$0xff] }
 0x8cd   : > { %10543 = vmatpush3.bf16.msra.mxu1 %v10542_v25  ;;  %9451 = vmatprep.mubr.msk.f32.mxu1 %vm11947_vm0, %v11948_v9  ;;  %v6185_v25 = vld [vmem:[#allocation35 + $0xa0] sm:$0xff] }
 0x8ce   : > { %10544 = vmatprep.subr.bf16.mxu1 %v11946_v11  ;;  %v10572_v54 = vpack.c.bf16 %v6186_v53, %v6185_v25  ;;  %v6287_v25 = vld [vmem:[#allocation36 + $0xd0] sm:$0xff]  ;;  %v6288_v53 = vld [vmem:[#allocation36 + $0xd8] sm:$0xff] }
 0x8d1   : > { %10546 = vmatpush3.bf16.msra.mxu1 %v10545_v22  ;;  %v6187_v22 = vld [vmem:[#allocation35 + $0xb0] sm:$0xff] }
 0x8d2   : > { %10547 = vmatprep.subr.bf16.mxu1 %v11946_v11  ;;  %v10575_v57 = vpack.c.bf16 %v6188_v4, %v6187_v22  ;;  %v6289_v22 = vld [vmem:[#allocation36 + $0xe0] sm:$0xff]  ;;  %v6290_v4 = vld [vmem:[#allocation36 + $0xe8] sm:$0xff] }
 0x8d5   : > { %10549 = vmatpush3.bf16.msra.mxu1 %v10548_v47  ;;  %v6189_v47 = vld [vmem:[#allocation35 + $0xc0] sm:$0xff] }
 0x8d6   : > { %10550 = vmatprep.subr.bf16.mxu1 %v11946_v11  ;;  %v10578_v59 = vpack.c.bf16 %v6190_v10, %v6189_v47  ;;  %v6291_v47 = vld [vmem:[#allocation36 + $0xf0] sm:$0xff]  ;;  %v6292_v10 = vld [vmem:[#allocation36 + $0xf8] sm:$0xff] }
 0x8d9   : > { %10552 = vmatpush3.bf16.msra.mxu1 %v10551_v35  ;;  %v6191_v35 = vld [vmem:[#allocation35 + $0xd0] sm:$0xff] }
 0x8da   : > { %10553 = vmatprep.subr.bf16.mxu1 %v11946_v11  ;;  %v10581_v28 = vpack.c.bf16 %v6192_v60, %v6191_v35  ;;  %v7507_v35 = vld [vmem:[%s14009_s12] ss:$0 sm:$0xff] }
 0x8dd   : > { %10555 = vmatpush3.bf16.msra.mxu1 %v10554_v32  ;;  %v6193_v32 = vld [vmem:[#allocation35 + $0xe0] sm:$0xff] }
 0x8de   : > { %10556 = vmatprep.subr.bf16.mxu1 %v11946_v11  ;;  %v10584_v42 = vpack.c.bf16 %v6194_v39, %v6193_v32  ;;  %v7511_v39 = vld [vmem:[%s14008_s1 + $0x1] ss:$0 sm:$0xff] }
 0x8e1   : > { %10558 = vmatpush3.bf16.msra.mxu1 %v10557_v62  ;;  %v6195_v62 = vld [vmem:[#allocation35 + $0xf0] sm:$0xff] }
 0x8e2   : > { %10559 = vmatprep.subr.bf16.mxu1 %v11946_v11 }
 0x8e5   : > { %10561 = vmatpush3.bf16.msra.mxu1 %v10560_v0  ;;  %v10587_v0 = vpack.c.bf16 %v6196_v63, %v6195_v62  ;;  %v6475_v62 = vld [vmem:[#allocation35 + $0x108] sm:$0xff] }
 0x8e6   : > { %10562 = vmatprep.subr.bf16.mxu1 %v11946_v11 }
 0x8e9   : > { %10564 = vmatpush3.bf16.msra.mxu1 %v10563_v36 }
 0x8ea   : > { %10589 = vmatprep.subr.bf16.mxu1 %v11946_v11 }
 0x8ec   : > { %9452 = vmatmul.mubr.f32.vlgmr.msra.gmra.mrb[70].mxu1 %v13599_v3  ;;  %v5995_v3 = vld [vmem:[#allocation36 + $0x38] sm:$0xff] }
 0x8ed   : > { %9521 = vmatprep.mubr.msk.f32.mxu1 %vm11947_vm0, %v11948_v9  ;;  %v10527_v55 = vpack.c.bf16 %v5995_v3, %v5994_v15  ;;  %v10620_v15 = vpack.c.bf16 %v6383_v61, %v6382_v49  ;;  %v6384_v3 = vld [vmem:[#allocation33 + $0x130] sm:$0xff]  ;;  %v6482_v61 = vld [vmem:[#allocation35 + $0x140] sm:$0xff] }
 0x8ef   : > { %10528 = vmatpush3.bf16.msra.mxu0 %v10527_v55  ;;  %v6385_v55 = vld [vmem:[#allocation33 + $0x138] sm:$0xff] }
 0x8f0   : > { %10529 = vmatprep.subr.bf16.mxu0 %v11946_v11  ;;  %v10623_v18 = vpack.c.bf16 %v6385_v55, %v6384_v3  ;;  %v6485_v55 = vld [vmem:[#allocation35 + $0x158] sm:$0xff] }
 0x8f3   : > { %10531 = vmatpush3.bf16.msra.mxu0 %v10530_v56  ;;  %v6387_v56 = vld [vmem:[#allocation33 + $0x148] sm:$0xff] }
 0x8f4   : > { %10532 = vmatprep.subr.bf16.mxu0 %v11946_v11  ;;  %v10626_v19 = vpack.c.bf16 %v6387_v56, %v6386_v58  ;;  %v6486_v58 = vld [vmem:[#allocation35 + $0x160] sm:$0xff]  ;;  %v6487_v56 = vld [vmem:[#allocation35 + $0x168] sm:$0xff] }
 0x8f7   : > { %10534 = vmatpush3.bf16.msra.mxu0 %v10533_v21  ;;  %v6389_v21 = vld [vmem:[#allocation33 + $0x158] sm:$0xff] }
 0x8f8   : > { %10535 = vmatprep.subr.bf16.mxu0 %v11946_v11  ;;  %v10629_v24 = vpack.c.bf16 %v6389_v21, %v6388_v12  ;;  %v6488_v12 = vld [vmem:[#allocation35 + $0x170] sm:$0xff]  ;;  %v6489_v21 = vld [vmem:[#allocation35 + $0x178] sm:$0xff] }
 0x8fb   : > { %10537 = vmatpush3.bf16.msra.mxu0 %v10536_v27  ;;  %v6391_v27 = vld [vmem:[#allocation33 + $0x168] sm:$0xff] }
 0x8fc   : > { %10538 = vmatprep.subr.bf16.mxu0 %v11946_v11  ;;  %v10632_v20 = vpack.c.bf16 %v6391_v27, %v6390_v23  ;;  %v10659_v23 = vpack.c.bf16 %v6489_v21, %v6488_v12 }
 0x8ff   : > { %10540 = vmatpush3.bf16.msra.mxu0 %v10539_v33  ;;  %v6393_v33 = vld [vmem:[#allocation33 + $0x178] sm:$0xff] }
 0x900   : > { %10565 = vmatprep.subr.bf16.mxu0 %v11946_v11 }
 0x97f   : > { %v5795_v34 = vpop.f32.mrb[66].mxu1 }
 0x980   : > { %v5796_v29 = vadd.f32 %v7504_v17, %v5795_v34  ;;  %v9313_v30 = vpop.f32.mrb[67].mxu1  ;;  %v10635_v17 = vpack.c.bf16 %v6393_v33, %v6392_v31  ;;  %v6277_v34 = vld [vmem:[#allocation36 + $0x80] sm:$0xff] }
 0x981   : > { %v6279_v30 = vld [vmem:[#allocation36 + $0x90] sm:$0xff] }
 0x982   : > { %5799 = vst [vmem:[#allocation42] sm:$0x3] %v5796_v29  ;;  %v6278_v29 = vld [vmem:[#allocation36 + $0x88] sm:$0xff]  ;;  %v10593_v43 = vpack.c.bf16 %v6280_v41, %v6279_v30 }
 0x99f   : > { %v5983_v44 = vpop.f32.mrb[68].mxu1 }
 0x9a0   : > { %v5984_v46 = vadd.f32 %v7506_v37, %v5983_v44  ;;  %v9383_v48 = vpop.f32.mrb[69].mxu1  ;;  %v10590_v37 = vpack.c.bf16 %v6278_v29, %v6277_v34  ;;  %v6281_v44 = vld [vmem:[#allocation36 + $0xa0] sm:$0xff]  ;;  %v6571_v34 = vld [vmem:[#allocation36 + $0x108] sm:$0xff]  ;;  %v6572_v29 = vld [vmem:[#allocation36 + $0x110] sm:$0xff] }
 0x9a2   : > { %v5987_v50 = vmax.f32 %v5984_v46, 0.0  ;;  %10591 = vmatpush3.bf16.msra.mxu1 %v10590_v37  ;;  %v6282_v46 = vld [vmem:[#allocation36 + $0xa8] sm:$0xff]  ;;  %v6573_v37 = vld [vmem:[#allocation36 + $0x118] sm:$0xff] }
 0x9a3   : > { %10592 = vmatprep.subr.bf16.mxu1 %v11946_v11  ;;  %v10596_v48 = vpack.c.bf16 %v6282_v46, %v6281_v44  ;;  %v10665_v41 = vpack.c.bf16 %v6573_v37, %v6572_v29  ;;  %v6575_v44 = vld [vmem:[#allocation36 + $0x128] sm:$0xff] }
 0x9a4   : > { %6082 = vst [vmem:[#allocation47] sm:$0x3] %v5987_v50  ;;  %9417 = vmatmul.mubr.f32.vlgmr.msra.gmra.mrb[62].mxu0 %v5987_v50 }
 0x9a5   : > { %10567 = vmatpush3.bf16.msra.mxu0 %v10566_v26  ;;  %9486 = vmatprep.mubr.msk.f32.mxu0 %vm11947_vm0, %v11948_v9  ;;  %v6283_v26 = vld [vmem:[#allocation36 + $0xb0] sm:$0xff] }
 0x9a6   : > { %10568 = vmatprep.subr.bf16.mxu0 %v11946_v11  ;;  %10594 = vmatpush3.bf16.msra.mxu1 %v10593_v43  ;;  %v6574_v43 = vld [vmem:[#allocation36 + $0x120] sm:$0xff] }
 0x9a7   : > { %10595 = vmatprep.subr.bf16.mxu1 %v11946_v11  ;;  %v10668_v46 = vpack.c.bf16 %v6575_v44, %v6574_v43 }
 0x9a9   : > { %10570 = vmatpush3.bf16.msra.mxu0 %v10569_v13  ;;  %v10602_v13 = vpack.c.bf16 %v6286_v51, %v6285_v40  ;;  %v6579_v40 = vld [vmem:[#allocation36 + $0x148] sm:$0xff] }
 0x9aa   : > { %10571 = vmatprep.subr.bf16.mxu0 %v11946_v11  ;;  %10597 = vmatpush3.bf16.msra.mxu1 %v10596_v48  ;;  %v6576_v48 = vld [vmem:[#allocation36 + $0x130] sm:$0xff] }
 0x9ab   : > { %10598 = vmatprep.subr.bf16.mxu1 %v11946_v11 }
 0x9ad   : > { %10573 = vmatpush3.bf16.msra.mxu0 %v10572_v54  ;;  %v10605_v54 = vpack.c.bf16 %v6288_v53, %v6287_v25  ;;  %v6581_v25 = vld [vmem:[#allocation36 + $0x158] sm:$0xff] }
 0x9ae   : > { %10574 = vmatprep.subr.bf16.mxu0 %v11946_v11 }
 0x9b1   : > { %10576 = vmatpush3.bf16.msra.mxu0 %v10575_v57  ;;  %v10608_v57 = vpack.c.bf16 %v6290_v4, %v6289_v22  ;;  %v6583_v22 = vld [vmem:[#allocation36 + $0x168] sm:$0xff] }
 0x9b2   : > { %10577 = vmatprep.subr.bf16.mxu0 %v11946_v11 }
 0x9b5   : > { %10579 = vmatpush3.bf16.msra.mxu0 %v10578_v59  ;;  %v10611_v59 = vpack.c.bf16 %v6292_v10, %v6291_v47  ;;  %v6585_v47 = vld [vmem:[#allocation36 + $0x178] sm:$0xff] }
 0x9b6   : > { %10580 = vmatprep.subr.bf16.mxu0 %v11946_v11 }
 0x9b9   : > { %10582 = vmatpush3.bf16.msra.mxu0 %v10581_v28 }
 0x9ba   : > { %10583 = vmatprep.subr.bf16.mxu0 %v11946_v11 }
 0x9bd   : > { %10585 = vmatpush3.bf16.msra.mxu0 %v10584_v42  ;;  %v6474_v42 = vld [vmem:[#allocation35 + $0x100] sm:$0xff] }
 0x9be   : > { %10586 = vmatprep.subr.bf16.mxu0 %v11946_v11  ;;  %v10638_v7 = vpack.c.bf16 %v6475_v62, %v6474_v42 }
 0x9bf   : > { %v6175_v36 = vpop.f32.mrb[70].mxu1 }
 0x9c0   : > { %v6176_v38 = vadd.f32 %v7509_v16, %v6175_v36  ;;  %v9453_v2 = vpop.f32.mrb[71].mxu1  ;;  %v6476_v36 = vld [vmem:[#allocation35 + $0x110] sm:$0xff] }
 0x9c1   : > { %10588 = vmatpush3.bf16.msra.mxu0 %v10587_v0 }
 0x9c2   : > { %v6179_v5 = vmax.f32 %v6176_v38, 0.0  ;;  %10613 = vmatprep.subr.bf16.mxu0 %v11946_v11  ;;  %v6477_v38 = vld [vmem:[#allocation35 + $0x118] sm:$0xff] }
 0x9c3   : > { %v10641_v2 = vpack.c.bf16 %v6477_v38, %v6476_v36 }
 0x9c4   : > { %6372 = vst [vmem:[#allocation45 + $0x2] sm:$0x3] %v6179_v5  ;;  %9487 = vmatmul.mubr.f32.vlgmr.msra.gmra.mrb[64].mxu0 %v6179_v5  ;;  %v6479_v5 = vld [vmem:[#allocation35 + $0x128] sm:$0xff] }
 0x9c5   : > { %10615 = vmatpush3.bf16.msra.mxu0 %v10614_v52  ;;  %9556 = vmatprep.mubr.msk.f32.mxu0 %vm11947_vm0, %v11948_v9  ;;  %v6478_v52 = vld [vmem:[#allocation35 + $0x120] sm:$0xff] }
 0x9c6   : > { %10616 = vmatprep.subr.bf16.mxu0 %v11946_v11  ;;  %v10644_v6 = vpack.c.bf16 %v6479_v5, %v6478_v52 }
 0x9c9   : > { %10618 = vmatpush3.bf16.msra.mxu0 %v10617_v14  ;;  %v6481_v14 = vld [vmem:[#allocation35 + $0x138] sm:$0xff] }
 0x9ca   : > { %10619 = vmatprep.subr.bf16.mxu0 %v11946_v11  ;;  %v10647_v49 = vpack.c.bf16 %v6481_v14, %v6480_v8 }
 0x9cd   : > { %10621 = vmatpush3.bf16.msra.mxu0 %v10620_v15  ;;  %v6483_v15 = vld [vmem:[#allocation35 + $0x148] sm:$0xff] }
 0x9ce   : > { %10622 = vmatprep.subr.bf16.mxu0 %v11946_v11  ;;  %v10650_v3 = vpack.c.bf16 %v6483_v15, %v6482_v61 }
 0x9d1   : > { %10624 = vmatpush3.bf16.msra.mxu0 %v10623_v18 }
 0x9d2   : > { %10625 = vmatprep.subr.bf16.mxu0 %v11946_v11 }
 0x9d5   : > { %10627 = vmatpush3.bf16.msra.mxu0 %v10626_v19  ;;  %v10656_v19 = vpack.c.bf16 %v6487_v56, %v6486_v58 }
 0x9d6   : > { %10628 = vmatprep.subr.bf16.mxu0 %v11946_v11 }
 0x9d9   : > { %10630 = vmatpush3.bf16.msra.mxu0 %v10629_v24  ;;  %v7515_v24 = vld [vmem:[%s14006_s2 + $0x2] ss:$0 sm:$0xff] }
 0x9da   : > { %10631 = vmatprep.subr.bf16.mxu0 %v11946_v11 }
 0x9dd   : > { %10633 = vmatpush3.bf16.msra.mxu0 %v10632_v20 }
 0x9de   : > { %10634 = vmatprep.subr.bf16.mxu0 %v11946_v11 }
 0x9e1   : > { %10636 = vmatpush3.bf16.msra.mxu0 %v10635_v17  ;;  %v6570_v17 = vld [vmem:[#allocation36 + $0x100] sm:$0xff] }
 0x9e2   : > { %10661 = vmatprep.subr.bf16.mxu0 %v11946_v11  ;;  %v10662_v30 = vpack.c.bf16 %v6571_v34, %v6570_v17 }
 0x9e4   : > { %9557 = vmatmul.mubr.f32.vlgmr.msra.gmra.mrb[66].mxu0 %v13615_v45  ;;  %v6284_v45 = vld [vmem:[#allocation36 + $0xb8] sm:$0xff] }
 0x9e5   : > { %9626 = vmatprep.mubr.msk.f32.mxu0 %vm11947_vm0, %v11948_v9  ;;  %v10599_v50 = vpack.c.bf16 %v6284_v45, %v6283_v26  ;;  %10663 = vmatpush3.bf16.msra.mxu0 %v10662_v30  ;;  %v6577_v26 = vld [vmem:[#allocation36 + $0x138] sm:$0xff] }
 0x9e6   : > { %10664 = vmatprep.subr.bf16.mxu0 %v11946_v11  ;;  %v10671_v45 = vpack.c.bf16 %v6577_v26, %v6576_v48 }
 0x9e7   : > { %10600 = vmatpush3.bf16.msra.mxu1 %v10599_v50  ;;  %v6578_v50 = vld [vmem:[#allocation36 + $0x140] sm:$0xff] }
 0x9e8   : > { %10601 = vmatprep.subr.bf16.mxu1 %v11946_v11  ;;  %v10674_v51 = vpack.c.bf16 %v6579_v40, %v6578_v50 }
 0x9e9   : > { %10666 = vmatpush3.bf16.msra.mxu0 %v10665_v41 }
 0x9ea   : > { %10667 = vmatprep.subr.bf16.mxu0 %v11946_v11 }
 0x9eb   : > { %10603 = vmatpush3.bf16.msra.mxu1 %v10602_v13  ;;  %v6580_v13 = vld [vmem:[#allocation36 + $0x150] sm:$0xff] }
 0x9ec   : > { %10604 = vmatprep.subr.bf16.mxu1 %v11946_v11  ;;  %v10677_v53 = vpack.c.bf16 %v6581_v25, %v6580_v13 }
 0x9ed   : > { %10669 = vmatpush3.bf16.msra.mxu0 %v10668_v46 }
 0x9ee   : > { %10670 = vmatprep.subr.bf16.mxu0 %v11946_v11 }
 0x9ef   : > { %10606 = vmatpush3.bf16.msra.mxu1 %v10605_v54  ;;  %v6582_v54 = vld [vmem:[#allocation36 + $0x160] sm:$0xff] }
 0x9f0   : > { %10607 = vmatprep.subr.bf16.mxu1 %v11946_v11  ;;  %v10680_v4 = vpack.c.bf16 %v6583_v22, %v6582_v54 }
 0x9f1   : > { %10672 = vmatpush3.bf16.msra.mxu0 %v10671_v45 }
 0x9f2   : > { %10673 = vmatprep.subr.bf16.mxu0 %v11946_v11 }
 0x9f3   : > { %10609 = vmatpush3.bf16.msra.mxu1 %v10608_v57  ;;  %v6584_v57 = vld [vmem:[#allocation36 + $0x170] sm:$0xff] }
 0x9f4   : > { %10610 = vmatprep.subr.bf16.mxu1 %v11946_v11  ;;  %v10683_v10 = vpack.c.bf16 %v6585_v47, %v6584_v57 }
 0x9f5   : > { %10675 = vmatpush3.bf16.msra.mxu0 %v10674_v51 }
 0x9f6   : > { %10676 = vmatprep.subr.bf16.mxu0 %v11946_v11 }
 0x9f7   : > { %10612 = vmatpush3.bf16.msra.mxu1 %v10611_v59  ;;  %v7513_v59 = vld [vmem:[%s14009_s12 + $0x1] ss:$0 sm:$0xff] }
 0x9f8   : > { %10637 = vmatprep.subr.bf16.mxu1 %v11946_v11 }
 0x9f9   : > { %10678 = vmatpush3.bf16.msra.mxu0 %v10677_v53 }
 0x9fa   : > { %10679 = vmatprep.subr.bf16.mxu0 %v11946_v11 }
 0x9fd   : > { %10681 = vmatpush3.bf16.msra.mxu0 %v10680_v4 }
 0x9fe   : > { %10682 = vmatprep.subr.bf16.mxu0 %v11946_v11 }
 0xa01   : > { %10684 = vmatpush3.bf16.msra.mxu0 %v10683_v10 }
 0xa77   : > { %v6077_v60 = vpop.f32.mrb[62].mxu0 }
 0xa78   : > { %v6078_v28 = vadd.f32 %v7507_v35, %v6077_v60  ;;  %v9418_v32 = vpop.f32.mrb[63].mxu0 }
 0xa79   : > { %v7517_v32 = vld [vmem:[%s14008_s1 + $0x2] ss:$0 sm:$0xff] }
 0xa7a   : > { %6083 = vst [vmem:[#allocation44] sm:$0x3] %v6078_v28 }
 0xa97   : > { %v6271_v63 = vpop.f32.mrb[64].mxu0 }
 0xa98   : > { %v6272_v16 = vadd.f32 %v7511_v39, %v6271_v63  ;;  %v9488_v0 = vpop.f32.mrb[65].mxu0 }
 0xa9a   : > { %v6275_v1 = vmax.f32 %v6272_v16, 0.0  ;;  %v7519_v16 = vld [vmem:[%s14009_s12 + $0x2] ss:$0 sm:$0xff] }
 0xa9c   : > { %6374 = vst [vmem:[#allocation47 + $0x2] sm:$0x3] %v6275_v1  ;;  %9522 = vmatmul.mubr.f32.vlgmr.msra.gmra.mrb[72].mxu1 %v6275_v1 }
 0xa9d   : > { %10639 = vmatpush3.bf16.msra.mxu1 %v10638_v7  ;;  %9591 = vmatprep.mubr.msk.f32.mxu1 %vm11947_vm0, %v11948_v9  ;;  %v6484_v9 = vld [vmem:[#allocation35 + $0x150] sm:$0xff] }
 0xa9e   : > { %10640 = vmatprep.subr.bf16.mxu1 %v11946_v11  ;;  %v10653_v18 = vpack.c.bf16 %v6485_v55, %v6484_v9 }
 0xaa1   : > { %10642 = vmatpush3.bf16.msra.mxu1 %v10641_v2 }
 0xaa2   : > { %10643 = vmatprep.subr.bf16.mxu1 %v11946_v11 }
 0xaa5   : > { %10645 = vmatpush3.bf16.msra.mxu1 %v10644_v6 }
 0xaa6   : > { %10646 = vmatprep.subr.bf16.mxu1 %v11946_v11 }
 0xaa9   : > { %10648 = vmatpush3.bf16.msra.mxu1 %v10647_v49 }
 0xaaa   : > { %10649 = vmatprep.subr.bf16.mxu1 %v11946_v11 }
 0xaad   : > { %10651 = vmatpush3.bf16.msra.mxu1 %v10650_v3 }
 0xaae   : > { %10652 = vmatprep.subr.bf16.mxu1 %v11946_v11 }
 0xab1   : > { %10654 = vmatpush3.bf16.msra.mxu1 %v10653_v18 }
 0xab2   : > { %10655 = vmatprep.subr.bf16.mxu1 %v11946_v11 }
 0xab5   : > { %10657 = vmatpush3.bf16.msra.mxu1 %v10656_v19 }
 0xab6   : > { %10658 = vmatprep.subr.bf16.mxu1 %v11946_v11 }
 0xab7   : > { %v6468_v27 = vpop.f32.mrb[66].mxu0 }
 0xab8   : > { %v6469_v20 = vadd.f32 %v7515_v24, %v6468_v27  ;;  %v9558_v31 = vpop.f32.mrb[67].mxu0 }
 0xab9   : > { %10660 = vmatpush3.bf16.msra.mxu1 %v10659_v23 }
 0xaba   : > { %v6472_v33 = vmax.f32 %v6469_v20, 0.0 }
 0xabc   : > { %6665 = vst [vmem:[#allocation45 + $0x4] sm:$0x3] %v6472_v33  ;;  %9592 = vmatmul.mubr.f32.vlgmr.msra.gmra.mrb[74].mxu1 %v6472_v33 }
 0xb6f   : > { %v6367_v35 = vpop.f32.mrb[72].mxu1 }
 0xb70   : > { %v6368_v60 = vadd.f32 %v7513_v59, %v6367_v35  ;;  %v9523_v28 = vpop.f32.mrb[73].mxu1 }
 0xb72   : > { %6376 = vst [vmem:[#allocation44 + $0x2] sm:$0x3] %v6368_v60 }
 0xb8f   : > { %v6564_v39 = vpop.f32.mrb[74].mxu1 }
 0xb90   : > { %v6565_v42 = vadd.f32 %v7517_v32, %v6564_v39  ;;  %v9593_v62 = vpop.f32.mrb[75].mxu1 }
 0xb92   : > { %v6568_v63 = vmax.f32 %v6565_v42, 0.0 }
 0xb94   : > { %6667 = vst [vmem:[#allocation47 + $0x4] sm:$0x3] %v6568_v63  ;;  %9627 = vmatmul.mubr.f32.vlgmr.msra.gmra.mrb[68].mxu0 %v6568_v63 }
 0xc67   : > { %v6660_v0 = vpop.f32.mrb[68].mxu0 }
 0xc68   : > { %v6661_v11 = vadd.f32 %v7519_v16, %v6660_v0  ;;  %v9628_v7 = vpop.f32.mrb[69].mxu0 }
 0xc6a   : > { %6669 = vst [vmem:[#allocation44 + $0x4] sm:$0x3] %v6661_v11 }
 0xc6b PF: > { %s14010_s3 = sld [smem:[#allocation99_spill]]  ;;  %s11949_s11 = smov [#allocation39]  }
 0xc6c   : > { %s6692_s4 = sshll.u32 %s11949_s11, 4  ;;  %s11950_s28 = smov [#allocation42]   ;;  %s6693_s4 = int_to_ptr.vmem [resolvable:$true] %s6692_s4 }
 0xc6d   : > { %s6718_s10 = sshll.u32 %s11950_s28, 4  ;;  %s11583_s0 = scalar_lea.vmem %s6693_s4, 32  ;;  %s6719_s10 = int_to_ptr.vmem [resolvable:$true] %s6718_s10 }
 0xc6e   : > { %p11584_p13 = scmp.ne.s32.totalorder %s6693_s4, %s11583_s0  ;;  %p11590_p3 = scmp.lt.s32.totalorder %s6693_s4, %s6693_s4 }
 0xc6f   : > { %p11591_p4 = scmp.lt.s32.totalorder %s11583_s0, %s11583_s0 }
 0xc71   : > { %p10837_p12 = scmp.eq.s32.totalorder %s14010_s3, 2  ;;  %p11592_p6 = por %p11591_p4, %p11590_p3 }
 0xc73   : > { %p11585_p0 = pnand %p11584_p13, %p10837_p12 }
 0xc75   : > { %p11586_p2 = pneg %p11585_p0 }
 0xc77   : > { %p11593_p7 = pnand %p11592_p6, %p11586_p2 }
 0xc79   : > { %11596 = shalt.err (!%p11593_p7)
}
 0xc7a   : > { %s14011_s18 = sld [smem:[#allocation92_spill]] }
 0xc80   : > { %s14012_s6 = smov %s14011_s18  ;;  %s11597_s1 = scalar_lea.hbm %s14011_s18, 32 }
 0xc81   : > { %p11598_p5 = scmp.ne.s32.totalorder %s14012_s6, %s11597_s1  ;;  %p11603_p10 = scmp.lt.u32.totalorder %s11597_s1, %s14012_s6 }
 0xc83   : > { %p11599_p8 = pnand %p11598_p5, %p10837_p12 }
 0xc85   : > { %p11600_p9 = pneg %p11599_p8 }
 0xc87   : > { %p11605_p11 = pnand %p11603_p10, %p11600_p9 }
 0xc89   : > { %11608 = shalt.err (!%p11605_p11)
}
 0xc8a   : > { %10766 = dma.vmem_to_hbm [thread:$0]  (%p10837_p12), %s6693_s4, 32, %s14012_s6, [#allocation40]  }
 0xc8b   : > { %s11609_s11 = scalar_lea.vmem %s6719_s10, 32  ;;  %p11616_p2 = scmp.lt.s32.totalorder %s6719_s10, %s6719_s10 }
 0xc8c   : > { %p11610_p1 = scmp.ne.s32.totalorder %s6719_s10, %s11609_s11  ;;  %p11617_p3 = scmp.lt.s32.totalorder %s11609_s11, %s11609_s11 }
 0xc8e   : > { %p11611_p13 = pnand %p11610_p1, %p10837_p12  ;;  %p11618_p4 = por %p11617_p3, %p11616_p2 }
 0xc90   : > { %p11612_p0 = pneg %p11611_p13 }
 0xc92   : > { %p11619_p6 = pnand %p11618_p4, %p11612_p0 }
 0xc94   : > { %11622 = shalt.err (!%p11619_p6)
}
 0xc95   : > { %s14013_s28 = sld [smem:[#allocation94_spill]] }
 0xc9b   : > { %s11623_s1 = scalar_lea.hbm %s14013_s28, 32 }
 0xc9c   : > { %p11624_p7 = scmp.ne.s32.totalorder %s14013_s28, %s11623_s1  ;;  %p11629_p9 = scmp.lt.u32.totalorder %s11623_s1, %s14013_s28 }
 0xc9e   : > { %p11625_p5 = pnand %p11624_p7, %p10837_p12 }
 0xca0   : > { %p11626_p8 = pneg %p11625_p5 }
 0xca2   : > { %p11631_p10 = pnand %p11629_p9, %p11626_p8 }
 0xca4   : > { %11634 = shalt.err (!%p11631_p10)
}
 0xca5   : > { %10770 = dma.vmem_to_hbm [thread:$0]  (%p10837_p12), %s6719_s10, 32, %s14013_s28, [#allocation43]  }
 0xca6   : > { %s11951_s4 = smov [#allocation45]  }
 0xca7   : > { %s6745_s0 = sshll.u32 %s11951_s4, 4  ;;  %s6746_s0 = int_to_ptr.vmem [resolvable:$true] %s6745_s0 }
 0xca8   : > { %s11635_s18 = scalar_lea.vmem %s6746_s0, 96  ;;  %p11642_p0 = scmp.lt.s32.totalorder %s6746_s0, %s6746_s0 }
 0xca9   : > { %p11636_p11 = scmp.ne.s32.totalorder %s6746_s0, %s11635_s18  ;;  %p11643_p2 = scmp.lt.s32.totalorder %s11635_s18, %s11635_s18 }
 0xcab   : > { %p11637_p1 = pnand %p11636_p11, %p10837_p12  ;;  %p11644_p3 = por %p11643_p2, %p11642_p0 }
 0xcad   : > { %p11638_p13 = pneg %p11637_p1 }
 0xcaf   : > { %p11645_p4 = pnand %p11644_p3, %p11638_p13 }
 0xcb1   : > { %11648 = shalt.err (!%p11645_p4)
}
 0xcb2   : > { %s14014_s11 = sld [smem:[#allocation96_spill]] }
 0xcb8   : > { %s11649_s1 = scalar_lea.hbm %s14014_s11, 96 }
 0xcb9   : > { %p11650_p6 = scmp.ne.s32.totalorder %s14014_s11, %s11649_s1  ;;  %p11655_p8 = scmp.lt.u32.totalorder %s11649_s1, %s14014_s11 }
 0xcbb   : > { %p11651_p7 = pnand %p11650_p6, %p10837_p12 }
 0xcbd   : > { %p11652_p5 = pneg %p11651_p7 }
 0xcbf   : > { %p11657_p9 = pnand %p11655_p8, %p11652_p5 }
 0xcc1   : > { %11660 = shalt.err (!%p11657_p9)
}
 0xcc2   : > { %s13905_s10 = smov 32   ;;  %s13907_s4 = smov 2  }
 0xcc3   : > { %10774 = dma.vmem_to_hbm [thread:$0]  (%p10837_p12), %s6746_s0, 96, %s14014_s11, [#allocation46], %s13905_s10, %s13905_s10, %s13907_s4  }
 0xcc4   : > { %s11954_s18 = smov [#allocation38]   ;;  %s11955_s5 = smov [#allocation41]  }
 0xcc5   : > { %s6679_s2 = sshll.u32 %s11954_s18, 4  ;;  %s6705_s6 = sshll.u32 %s11955_s5, 4  ;;  %s6680_s2 = int_to_ptr.vmem [resolvable:$true] %s6679_s2  ;;  %s6706_s6 = int_to_ptr.vmem [resolvable:$true] %s6705_s6 }
 0xcc6   : > { %s11661_s7 = scalar_lea.vmem %s6680_s2, 32  ;;  %p11668_p13 = scmp.lt.s32.totalorder %s6680_s2, %s6680_s2 }
 0xcc7   : > { %p11662_p10 = scmp.ne.s32.totalorder %s6680_s2, %s11661_s7  ;;  %p11669_p0 = scmp.lt.s32.totalorder %s11661_s7, %s11661_s7 }
 0xcc9   : > { %p11663_p11 = pnand %p11662_p10, %p10837_p12  ;;  %p11670_p2 = por %p11669_p0, %p11668_p13 }
 0xccb   : > { %p11664_p1 = pneg %p11663_p11 }
 0xccd   : > { %p11671_p3 = pnand %p11670_p2, %p11664_p1 }
 0xccf   : > { %11674 = shalt.err (!%p11671_p3)
}
 0xcd0   : > { %s14015_s1 = sld [smem:[#allocation91_spill]] }
 0xcd6   : > { %s11675_s0 = scalar_lea.hbm %s14015_s1, 32 }
 0xcd7   : > { %p11676_p4 = scmp.ne.s32.totalorder %s14015_s1, %s11675_s0  ;;  %p11681_p5 = scmp.lt.u32.totalorder %s11675_s0, %s14015_s1 }
 0xcd9   : > { %p11677_p6 = pnand %p11676_p4, %p10837_p12 }
 0xcdb   : > { %p11678_p7 = pneg %p11677_p6 }
 0xcdd   : > { %p11683_p8 = pnand %p11681_p5, %p11678_p7 }
 0xcdf   : > { %11686 = shalt.err (!%p11683_p8)
}
 0xce0   : > { %10764 = dma.vmem_to_hbm [thread:$0]  (%p10837_p12), %s6680_s2, 32, %s14015_s1, [#allocation5]  }
 0xce1   : > { %s11687_s5 = scalar_lea.vmem %s6706_s6, 32  ;;  %p11694_p1 = scmp.lt.s32.totalorder %s6706_s6, %s6706_s6 }
 0xce2   : > { %p11688_p9 = scmp.ne.s32.totalorder %s6706_s6, %s11687_s5  ;;  %p11695_p13 = scmp.lt.s32.totalorder %s11687_s5, %s11687_s5 }
 0xce4   : > { %p11689_p10 = pnand %p11688_p9, %p10837_p12  ;;  %p11696_p0 = por %p11695_p13, %p11694_p1 }
 0xce6   : > { %p11690_p11 = pneg %p11689_p10 }
 0xce8   : > { %p11697_p2 = pnand %p11696_p0, %p11690_p11 }
 0xcea   : > { %11700 = shalt.err (!%p11697_p2)
}
 0xceb   : > { %s14016_s7 = sld [smem:[#allocation93_spill]] }
 0xcf1   : > { %s11701_s18 = scalar_lea.hbm %s14016_s7, 32 }
 0xcf2   : > { %p11702_p3 = scmp.ne.s32.totalorder %s14016_s7, %s11701_s18  ;;  %p11707_p7 = scmp.lt.u32.totalorder %s11701_s18, %s14016_s7 }
 0xcf4   : > { %p11703_p4 = pnand %p11702_p3, %p10837_p12 }
 0xcf6   : > { %p11704_p6 = pneg %p11703_p4 }
 0xcf8   : > { %p11709_p5 = pnand %p11707_p7, %p11704_p6 }
 0xcfa   : > { %11712 = shalt.err (!%p11709_p5)
}
 0xcfb   : > { %10768 = dma.vmem_to_hbm [thread:$0]  (%p10837_p12), %s6706_s6, 32, %s14016_s7, [#allocation40]  }
 0xcfc   : > { %s11956_s2 = smov [#allocation44]   ;;  %s11957_s5 = smov [#allocation47]  }
 0xcfd   : > { %s6730_s0 = sshll.u32 %s11956_s2, 4  ;;  %s6760_s10 = sshll.u32 %s11957_s5, 4  ;;  %s6731_s0 = int_to_ptr.vmem [resolvable:$true] %s6730_s0  ;;  %s6761_s10 = int_to_ptr.vmem [resolvable:$true] %s6760_s10 }
 0xcfe   : > { %s11713_s4 = scalar_lea.vmem %s6731_s0, 96  ;;  %p11720_p11 = scmp.lt.s32.totalorder %s6731_s0, %s6731_s0 }
 0xcff   : > { %p11714_p8 = scmp.ne.s32.totalorder %s6731_s0, %s11713_s4  ;;  %p11721_p1 = scmp.lt.s32.totalorder %s11713_s4, %s11713_s4 }
 0xd01   : > { %p11715_p9 = pnand %p11714_p8, %p10837_p12  ;;  %p11722_p13 = por %p11721_p1, %p11720_p11 }
 0xd03   : > { %p11716_p10 = pneg %p11715_p9 }
 0xd05   : > { %p11723_p0 = pnand %p11722_p13, %p11716_p10 }
 0xd07   : > { %11726 = shalt.err (!%p11723_p0)
}
 0xd08   : > { %s14017_s18 = sld [smem:[#allocation95_spill]] }
 0xd0e   : > { %s14018_s1 = smov %s14017_s18  ;;  %s11727_s6 = scalar_lea.hbm %s14017_s18, 96 }
 0xd0f   : > { %p11728_p2 = scmp.ne.s32.totalorder %s14018_s1, %s11727_s6  ;;  %p11733_p6 = scmp.lt.u32.totalorder %s11727_s6, %s14018_s1 }
 0xd11   : > { %p11729_p3 = pnand %p11728_p2, %p10837_p12 }
 0xd13   : > { %p11730_p4 = pneg %p11729_p3 }
 0xd15   : > { %p11735_p7 = pnand %p11733_p6, %p11730_p4 }
 0xd17   : > { %11738 = shalt.err (!%p11735_p7)
}
 0xd18   : > { %s14019_s2 = smov 2   ;;  %s14020_s5 = smov 32  }
 0xd19   : > { %10772 = dma.vmem_to_hbm [thread:$0]  (%p10837_p12), %s6731_s0, 96, %s14018_s1, [#allocation43], %s14020_s5, %s14020_s5, %s14019_s2  }
 0xd1a   : > { %s11739_s4 = scalar_lea.vmem %s6761_s10, 96  ;;  %p11746_p10 = scmp.lt.s32.totalorder %s6761_s10, %s6761_s10 }
 0xd1b   : > { %p11740_p5 = scmp.ne.s32.totalorder %s6761_s10, %s11739_s4  ;;  %p11747_p11 = scmp.lt.s32.totalorder %s11739_s4, %s11739_s4 }
 0xd1d   : > { %p11741_p8 = pnand %p11740_p5, %p10837_p12  ;;  %p11748_p1 = por %p11747_p11, %p11746_p10 }
 0xd1f   : > { %p11742_p9 = pneg %p11741_p8 }
 0xd21   : > { %p11749_p13 = pnand %p11748_p1, %p11742_p9 }
 0xd23   : > { %11752 = shalt.err (!%p11749_p13)
}
 0xd24   : > { %s14021_s18 = sld [smem:[#allocation97_spill]] }
 0xd2a   : > { %s14022_s6 = smov %s14021_s18  ;;  %s11753_s7 = scalar_lea.hbm %s14021_s18, 96 }
 0xd2b   : > { %p11754_p0 = scmp.ne.s32.totalorder %s14022_s6, %s11753_s7  ;;  %p11759_p4 = scmp.lt.u32.totalorder %s11753_s7, %s14022_s6 }
 0xd2d   : > { %p11755_p2 = pnand %p11754_p0, %p10837_p12 }
 0xd2f   : > { %p11756_p3 = pneg %p11755_p2 }
 0xd31   : > { %p11761_p6 = pnand %p11759_p4, %p11756_p3 }
 0xd33   : > { %11764 = shalt.err (!%p11761_p6)
}
 0xd34   : > { %10776 = dma.vmem_to_hbm [thread:$0]  (%p10837_p12), %s6761_s10, 96, %s14022_s6, [#allocation46], %s14020_s5, %s14020_s5, %s14019_s2  }
 0xd35   : > { %11838 = dma.done.wait (%p10837_p12), [#allocation5], 32  }
 0xd36   : > { %11840 = vsyncadd (%p10837_p12), [#allocation5], 4294967264 }
 0xd37   : > { %11842 = dma.done.wait (%p10837_p12), [#allocation40], 64  }
 0xd38   : > { %11844 = vsyncadd (%p10837_p12), [#allocation40], 4294967232 }
 0xd39   : > { %11846 = dma.done.wait (%p10837_p12), [#allocation43], 128  }
 0xd3a   : > { %11848 = vsyncadd (%p10837_p12), [#allocation43], 4294967168 }
 0xd3b   : > { %11850 = dma.done.wait (%p10837_p12), [#allocation46], 192  }
 0xd3c   : > { %11852 = vsyncadd (%p10837_p12), [#allocation46], 4294967104 }
 0xd3d PF: > { %s126_s23 = sadd.s32 1, %s11875_s23   ;;  %s14023_s10 = sld [smem:[#allocation101_spill]] }
 0xd3e   : > { %p123_p7 = scmp.ge.s32.totalorder %s126_s23, 5   ;;  %s14024_s7 = sld [smem:[#allocation100_spill]] }
 0xd3f   : > { %s14025_s0 = smov %s11859_s15  ;;  %s14026_s15 = smov %s11863_s16 }
 0xd40   : > { %s14028_s18 = smov %s11871_s22  ;;  %125 = sbr.rel (!%p123_p7) target bundleno = 106 (0x6a), region = 525 }
 0xd43   : > { %s14027_s16 = smov %s14023_s10 }
 0xd44   : > { %s14029_s22 = smov %s14024_s7 }
 0xd47   :  { %6800 = vsyncpa [#allocation4], 1 }
 0xd48   :  { %6802 = vsyncpa [#allocation4 + $0x1], 1 }
 0xd49   :  { %6803 = vsyncpa [#allocation7], 1 }
 0xd4a   :  { %6805 = vsyncpa [#allocation7 + $0x1], 1 }
 0xd4b   :  { %6806 = vsyncpa [#allocation10], 1 }
 0xd4c   :  { %6808 = vsyncpa [#allocation10 + $0x1], 1 }
 0xd4d   :  { %6809 = vsyncpa [#allocation13], 1 }
 0xd4e   :  { %6811 = vsyncpa [#allocation13 + $0x1], 1 }
 0xd4f   :  { %6812 = vsyncpa [#allocation16], 1 }
 0xd50   :  { %6814 = vsyncpa [#allocation16 + $0x1], 1 }
 0xd51   :  { %6815 = vsyncpa [#allocation19], 1 }
 0xd52   :  { %6817 = vsyncpa [#allocation19 + $0x1], 1 }
 0xd53   :  { %6818 = vsyncpa [#allocation22], 1 }
 0xd54   :  { %6820 = vsyncpa [#allocation22 + $0x1], 1 }
 0xd55   :  { %6821 = vsyncpa [#allocation25], 1 }
 0xd56   :  { %6822 = vsyncpa [#allocation28], 1 }
 0xd57   :  { %6823 = vsyncpa [#allocation31], 1 }
 0xd58   :  { %6824 = vsyncpa [#allocation34], 1 }
 0xd59   :  { %6825 = vsyncpa [#allocation37], 1 }
 0xd5a   :  { %6826 = vsyncpa [#allocation5], 1 }
 0xd5b   :  { %6828 = vsyncpa [#allocation5 + $0x1], 1 }
 0xd5c   :  { %6829 = vsyncpa [#allocation40], 1 }
 0xd5d   :  { %6830 = vsyncpa [#allocation43], 1 }
 0xd5e   :  { %6831 = vsyncpa [#allocation46], 1 }

</bundles_post_ra>
